<compile_context>
chip_gen: v7x
topology: tpu7x:2x2x1
jax: 0.10.0
libtpu: 0.0.40
codegen_flags: <defaults>
</compile_context>

<pallas_src>
import functools

import numpy as np
import jax
import jax.numpy as jnp
from jax.experimental import pallas as pl
from jax.experimental.pallas import tpu as pltpu

EXPANSION = 4
EPS = 1e-5
ROW_TILE = 512                       # streaming-kernel row tile (measured sweet spot)
VMEM_LIMIT = 32 * 1024 * 1024        # explicit scoped-VMEM cap; safe on v5e/v6e/v7x


def _compiler_params():
    return pltpu.CompilerParams(
        dimension_semantics=("parallel",),
        vmem_limit_bytes=VMEM_LIMIT,
    )


def _pick_row_tile(m, target=ROW_TILE):
    """Largest row tile <= target that divides m and is a multiple of 8.
    Falls back to a single full-array block (always legal) if none exists."""
    if m <= target:
        return m
    for t in range((target // 8) * 8, 7, -8):
        if m % t == 0:
            return t
    return m


def _stats_rows(y):
    """Per-channel (sum, sum_sq) partials of an f32 (rows, C) tile -> (1, 2, C)."""
    ssum = jnp.sum(y, axis=0, keepdims=True)
    ssq = jnp.sum(y * y, axis=0, keepdims=True)
    return jnp.concatenate([ssum, ssq], axis=0)[None]


# --------------------------------------------------------------------------
# Kernel 1: row-tiled matmul (optionally preceded by BN affine + relu) with
# fused BN partial statistics of the f32 output; bf16 in / bf16 out in HBM.
# --------------------------------------------------------------------------
def _make_matmul_stats_kernel(has_affine, relu_in):
    def kernel(*refs):
        if has_affine:
            x_ref, w_ref, sc_ref, sh_ref, y_ref, st_ref = refs
            a = x_ref[...].astype(jnp.float32) * sc_ref[...] + sh_ref[...]
            if relu_in:
                a = jnp.maximum(a, 0.0)
            a = a.astype(jnp.bfloat16)
        else:
            x_ref, w_ref, y_ref, st_ref = refs
            a = x_ref[...]                                   # already bf16
        y = jnp.dot(a, w_ref[...], preferred_element_type=jnp.float32)
        st_ref[...] = _stats_rows(y)                         # stats on f32 accumulator
        y_ref[...] = y.astype(y_ref.dtype)                   # bf16 to HBM
    return kernel


def matmul_stats(x, w, scale=None, shift=None, relu=False):
    """y = act(x*scale+shift) @ w, row-tiled; also returns per-tile BN partials."""
    M, Cin = x.shape
    Cout = w.shape[1]
    tm = _pick_row_tile(M)
    grid = (M // tm,)
    has_affine = scale is not None

    in_specs = [pl.BlockSpec((tm, Cin), lambda i: (i, 0)),
                pl.BlockSpec((Cin, Cout), lambda i: (0, 0))]
    args = [x, w]
    if has_affine:
        in_specs += [pl.BlockSpec((1, Cin), lambda i: (0, 0)),
                     pl.BlockSpec((1, Cin), lambda i: (0, 0))]
        args += [scale, shift]

    y, stats = pl.pallas_call(
        _make_matmul_stats_kernel(has_affine, relu),
        grid=grid,
        in_specs=in_specs,
        out_specs=(pl.BlockSpec((tm, Cout), lambda i: (i, 0)),
                   pl.BlockSpec((1, 2, Cout), lambda i: (i, 0, 0))),
        out_shape=(jax.ShapeDtypeStruct((M, Cout), jnp.bfloat16),
                   jax.ShapeDtypeStruct((grid[0], 2, Cout), jnp.float32)),
        compiler_params=_compiler_params(),
    )(*args)
    return y, stats


# --------------------------------------------------------------------------
# Kernel 1b: fused conv1 (1x1) + projection-shortcut (1x1): one pass over x,
# two matmuls sharing the LHS, both outputs + both BN partials.
# --------------------------------------------------------------------------
def _fused_conv1_proj_kernel(x_ref, w1_ref, ws_ref, y1_ref, st1_ref, ysc_ref, stsc_ref):
    x = x_ref[...]                                           # bf16, read x ONCE
    y1 = jnp.dot(x, w1_ref[...], preferred_element_type=jnp.float32)
    st1_ref[...] = _stats_rows(y1)
    y1_ref[...] = y1.astype(y1_ref.dtype)
    ysc = jnp.dot(x, ws_ref[...], preferred_element_type=jnp.float32)
    stsc_ref[...] = _stats_rows(ysc)
    ysc_ref[...] = ysc.astype(ysc_ref.dtype)


def fused_conv1_proj(x, w1, ws):
    M, Cin = x.shape
    P = w1.shape[1]
    Cout = ws.shape[1]
    tm = _pick_row_tile(M)
    grid = (M // tm,)
    return pl.pallas_call(
        _fused_conv1_proj_kernel,
        grid=grid,
        in_specs=[pl.BlockSpec((tm, Cin), lambda i: (i, 0)),
                  pl.BlockSpec((Cin, P), lambda i: (0, 0)),
                  pl.BlockSpec((Cin, Cout), lambda i: (0, 0))],
        out_specs=(pl.BlockSpec((tm, P), lambda i: (i, 0)),
                   pl.BlockSpec((1, 2, P), lambda i: (i, 0, 0)),
                   pl.BlockSpec((tm, Cout), lambda i: (i, 0)),
                   pl.BlockSpec((1, 2, Cout), lambda i: (i, 0, 0))),
        out_shape=(jax.ShapeDtypeStruct((M, P), jnp.bfloat16),
                   jax.ShapeDtypeStruct((grid[0], 2, P), jnp.float32),
                   jax.ShapeDtypeStruct((M, Cout), jnp.bfloat16),
                   jax.ShapeDtypeStruct((grid[0], 2, Cout), jnp.float32)),
        compiler_params=_compiler_params(),
    )(x, w1, ws)


# --------------------------------------------------------------------------
# Kernel 2: 3x3 conv (pad=1) as accumulated tap matmuls (no 9P im2col slab),
# per-image grid, f32 VMEM accumulator, fused BN partials of the output.
# --------------------------------------------------------------------------
def _tap_matmul_accumulate(tap, w2_ref, acc_ref, group):
    """Accumulate the 3x3 conv as ngroups matmuls of depth K = group*P."""
    ngroups = 9 // group
    for g in range(ngroups):
        if group == 1:
            lhs = tap(g // 3, g % 3)                                  # K = P
        else:
            lhs = jnp.concatenate([tap(g, kw) for kw in range(3)], axis=-1)  # K = 3P
        contrib = jnp.dot(lhs, w2_ref[g], preferred_element_type=jnp.float32)
        if g == 0:
            acc_ref[...] = contrib
        else:
            acc_ref[...] += contrib


def _make_conv3x3_s1_kernel(H, W, P, group):
    def kernel(y1_ref, sc_ref, sh_ref, w2_ref, y2_ref, st_ref, pad_ref, acc_ref):
        # bn1 + relu applied on the fly (f32), cast once to bf16 for the MXU.
        a = jnp.maximum(y1_ref[...].astype(jnp.float32) * sc_ref[...] + sh_ref[...], 0.0)
        a3d = a.reshape(H, W, P)

        # Zero-halo padding assembled at value level; single aligned bf16 store.
        zc = jnp.zeros((H, 1, P), jnp.float32)
        zr = jnp.zeros((1, W + 2, P), jnp.float32)
        rows = jnp.concatenate([zc, a3d, zc], axis=1)                 # (H, W+2, P)
        pad_ref[...] = jnp.concatenate([zr, rows, zr], axis=0).astype(jnp.bfloat16)

        def tap(kh, kw):
            return pad_ref[kh:kh + H, kw:kw + W, :].reshape(H * W, P)

        _tap_matmul_accumulate(tap, w2_ref, acc_ref, group)
        acc = acc_ref[...]
        st_ref[...] = _stats_rows(acc)
        y2_ref[...] = acc.astype(y2_ref.dtype)

    return kernel


def _make_conv3x3_s2_kernel(Ho, Wo, P, group):
    def kernel(planes_ref, w2_ref, y2_ref, st_ref, acc_ref):
        # planes_ref holds 4 pre-padded parity planes of the (already bn+relu'd)
        # input image; every stride-2 tap is a contiguous slice of one plane.
        def tap(kh, kw):
            q = 2 * (kh % 2) + (kw % 2)
            oi, oj = kh // 2, kw // 2
            return planes_ref[q, oi:oi + Ho, oj:oj + Wo, :].reshape(Ho * Wo, P)

        _tap_matmul_accumulate(tap, w2_ref, acc_ref, group)
        acc = acc_ref[...]
        st_ref[...] = _stats_rows(acc)
        y2_ref[...] = acc.astype(y2_ref.dtype)

    return kernel


def conv3x3_stride1(y1, scale, shift, w2g, N, H, W, P, group):
    M = N * H * W
    ngroups, Kg, _ = w2g.shape
    return pl.pallas_call(
        _make_conv3x3_s1_kernel(H, W, P, group),
        grid=(N,),
        in_specs=[pl.BlockSpec((H * W, P), lambda n: (n, 0)),
                  pl.BlockSpec((1, P), lambda n: (0, 0)),
                  pl.BlockSpec((1, P), lambda n: (0, 0)),
                  pl.BlockSpec((ngroups, Kg, P), lambda n: (0, 0, 0))],
        out_specs=(pl.BlockSpec((H * W, P), lambda n: (n, 0)),
                   pl.BlockSpec((1, 2, P), lambda n: (n, 0, 0))),
        out_shape=(jax.ShapeDtypeStruct((M, P), jnp.bfloat16),
                   jax.ShapeDtypeStruct((N, 2, P), jnp.float32)),
        scratch_shapes=[pltpu.VMEM((H + 2, W + 2, P), jnp.bfloat16),
                        pltpu.VMEM((H * W, P), jnp.float32)],
        compiler_params=_compiler_params(),
    )(y1, scale, shift, w2g)


def conv3x3_stride2(planes, w2g, N, Ho, Wo, P, group):
    Mo = N * Ho * Wo
    Hp, Wp = Ho + 1, Wo + 1
    ngroups, Kg, _ = w2g.shape
    return pl.pallas_call(
        _make_conv3x3_s2_kernel(Ho, Wo, P, group),
        grid=(N,),
        in_specs=[pl.BlockSpec((4, Hp, Wp, P), lambda n: (n, 0, 0, 0)),
                  pl.BlockSpec((ngroups, Kg, P), lambda n: (0, 0, 0))],
        out_specs=(pl.BlockSpec((Ho * Wo, P), lambda n: (n, 0)),
                   pl.BlockSpec((1, 2, P), lambda n: (n, 0, 0))),
        out_shape=(jax.ShapeDtypeStruct((Mo, P), jnp.bfloat16),
                   jax.ShapeDtypeStruct((N, 2, P), jnp.float32)),
        scratch_shapes=[pltpu.VMEM((Ho * Wo, P), jnp.float32)],
        compiler_params=_compiler_params(),
    )(planes, w2g)


# --------------------------------------------------------------------------
# Kernel 3: residual epilogue  relu(bn3(conv3) + shortcut), row-tiled.
# --------------------------------------------------------------------------
def _residual_proj_kernel(y3_ref, a3_ref, b3_ref, ysc_ref, as_ref, bs_ref, out_ref):
    main = y3_ref[...].astype(jnp.float32) * a3_ref[...] + b3_ref[...]
    short = ysc_ref[...].astype(jnp.float32) * as_ref[...] + bs_ref[...]
    out_ref[...] = jnp.maximum(main + short, 0.0)


def _residual_identity_kernel(y3_ref, a3_ref, b3_ref, x_ref, out_ref):
    out_ref[...] = jnp.maximum(
        y3_ref[...].astype(jnp.float32) * a3_ref[...] + b3_ref[...]
        + x_ref[...].astype(jnp.float32), 0.0)


def residual_epilogue(y3, a3, b3, shortcut, sc_scale=None, sc_shift=None):
    Mo, C = y3.shape
    tm = _pick_row_tile(Mo)
    grid = (Mo // tm,)
    row = pl.BlockSpec((tm, C), lambda i: (i, 0))
    vec = pl.BlockSpec((1, C), lambda i: (0, 0))
    if sc_scale is not None:
        kernel = _residual_proj_kernel
        in_specs = [row, vec, vec, row, vec, vec]
        args = [y3, a3, b3, shortcut, sc_scale, sc_shift]
    else:
        kernel = _residual_identity_kernel
        in_specs = [row, vec, vec, row]
        args = [y3, a3, b3, shortcut]
    return pl.pallas_call(
        kernel,
        grid=grid,
        in_specs=in_specs,
        out_specs=row,
        out_shape=jax.ShapeDtypeStruct((Mo, C), jnp.float32),
        compiler_params=_compiler_params(),
    )(*args)


# --------------------------------------------------------------------------
# Wrapper: one Bottleneck block forward (NCHW in / NCHW out)
# --------------------------------------------------------------------------
def _bn_scale_shift(partial_stats, count, gamma, beta, eps=EPS):
    """Fold per-tile (sum, sum_sq) partials into BN scale/shift.  O(C) glue.
    (E[y^2]-mean^2 in f32; within the stated tolerance for these shapes.)"""
    s = jnp.sum(partial_stats, axis=0)                       # (2, C)
    mean = s[0] / count
    var = jnp.maximum(s[1] / count - mean * mean, 0.0)       # biased training-mode var
    scale = gamma.astype(jnp.float32) * jax.lax.rsqrt(var + eps)
    shift = beta.astype(jnp.float32) - mean * scale
    return scale.reshape(1, -1), shift.reshape(1, -1)


@functools.partial(jax.jit, static_argnames=("stride",))
def bottleneck_forward(x_nchw, params, stride=1):
    N, Cin, H, W = x_nchw.shape
    P = params["w1"].shape[0]
    Cout = EXPANSION * P
    has_proj = "ws" in params
    assert stride in (1, 2)
    assert has_proj or (stride == 1 and Cin == Cout)
    if stride == 2:
        assert H % 2 == 0 and W % 2 == 0
    Ho = (H - 1) // stride + 1
    Wo = (W - 1) // stride + 1
    M, Mo = N * H * W, N * Ho * Wo

    # Layout glue: NCHW -> (rows, C), channels on lanes; bf16 activations.
    x_nhwc = jnp.transpose(x_nchw, (0, 2, 3, 1))
    x2d = x_nhwc.reshape(M, Cin).astype(jnp.bfloat16)

    # Conv weights -> matmul layout; bf16 MXU operands (f32 accumulation in-kernel).
    w1 = params["w1"][:, :, 0, 0].T.astype(jnp.bfloat16)                 # (Cin, P)
    w3 = params["w3"][:, :, 0, 0].T.astype(jnp.bfloat16)                 # (P, 4P)
    group = 1 if P >= 128 else 3        # taps per MXU pass: keep K >= 128/256
    w2g = jnp.transpose(params["w2"], (2, 3, 1, 0)).reshape(9 // group, group * P, P)
    w2g = w2g.astype(jnp.bfloat16)

    # conv1 (1x1) (+ fused projection shortcut when stride == 1: one pass over x).
    if has_proj and stride == 1:
        ws = params["ws"][:, :, 0, 0].T.astype(jnp.bfloat16)             # (Cin, 4P)
        y1, s1, ysc, ssc = fused_conv1_proj(x2d, w1, ws)
    else:
        y1, s1 = matmul_stats(x2d, w1)
        if has_proj:
            # stride-2 projection: subsample BEFORE the matmul (no wasted FLOPs).
            # TODO(synk): fuse with conv1 via a per-image grid so x is read once.
            ws = params["ws"][:, :, 0, 0].T.astype(jnp.bfloat16)
            xs = x_nhwc[:, ::stride, ::stride, :].reshape(Mo, Cin).astype(jnp.bfloat16)
            ysc, ssc = matmul_stats(xs, ws)
    a1, b1 = _bn_scale_shift(s1, M, params["bn1_g"], params["bn1_b"])

    # conv2 (3x3, pad=1, stride), consuming relu(bn1(.)); fused BN partials.
    if stride == 1:
        y2, s2 = conv3x3_stride1(y1, a1, b1, w2g, N, H, W, P, group)
    else:
        # bn1+relu, zero-pad and parity de-interleave (space-to-depth) as XLA
        # glue so the kernel's tap reads are plain contiguous slices.
        # TODO(synk): fold this pass into the kernel.
        act = jnp.maximum(y1.astype(jnp.float32).reshape(N, H, W, P) * a1 + b1, 0.0)
        act = jnp.pad(act, ((0, 0), (1, 1), (1, 1), (0, 0))).astype(jnp.bfloat16)
        Hp, Wp = Ho + 1, Wo + 1
        planes = act.reshape(N, Hp, 2, Wp, 2, P).transpose(0, 2, 4, 1, 3, 5)
        planes = planes.reshape(N * 4, Hp, Wp, P)
        y2, s2 = conv3x3_stride2(planes, w2g, N, Ho, Wo, P, group)
    a2, b2 = _bn_scale_shift(s2, Mo, params["bn2_g"], params["bn2_b"])

    # conv3 (1x1), consuming relu(bn2(.)) in-kernel.
    y3, s3 = matmul_stats(y2, w3, scale=a2, shift=b2, relu=True)
    a3, b3 = _bn_scale_shift(s3, Mo, params["bn3_g"], params["bn3_b"])

    # Shortcut + bn3 apply + residual add + final relu.
    if has_proj:
        asc, bsc = _bn_scale_shift(ssc, Mo, params["bns_g"], params["bns_b"])
        out2d = residual_epilogue(y3, a3, b3, ysc, asc, bsc)
    else:
        out2d = residual_epilogue(y3, a3, b3, x2d)

    # Layout glue back to NCHW (network-boundary only; chained blocks should
    # stay in the rows-x-channels bf16 layout).
    return out2d.reshape(N, Ho, Wo, Cout).transpose(0, 3, 1, 2)


# TODO(synk): the surrounding pieces of Engstrom2019RobustnessNet (input
# (x-mu)/sigma normalization, 3x3 stem conv + bn, 4x4 avg-pool, final Linear)
# are outside this fused Bottleneck block; they would reuse matmul_stats /
# conv3x3_stride1 unchanged when composing the full network.


# --------------------------------------------------------------------------
# Pure-JAX reference (mirrors the PyTorch Bottleneck.forward, training-mode BN)
# --------------------------------------------------------------------------
def reference_bottleneck(x, params, stride, has_proj, eps=EPS):
    def bn(v, g, b):
        mean = jnp.mean(v, axis=(0, 2, 3), keepdims=True)
        var = jnp.mean((v - mean) ** 2, axis=(0, 2, 3), keepdims=True)
        return (v - mean) * jax.lax.rsqrt(var + eps) * g.reshape(1, -1, 1, 1) \
            + b.reshape(1, -1, 1, 1)

    def conv(v, w, s=1, p=0):
        return jax.lax.conv_general_dilated(
            v, w, (s, s), [(p, p), (p, p)],
            dimension_numbers=("NCHW", "OIHW", "NCHW"),
            precision=jax.lax.Precision.HIGHEST)

    out = jax.nn.relu(bn(conv(x, params["w1"]), params["bn1_g"], params["bn1_b"]))
    out = jax.nn.relu(bn(conv(out, params["w2"], s=stride, p=1),
                         params["bn2_g"], params["bn2_b"]))
    out = bn(conv(out, params["w3"]), params["bn3_g"], params["bn3_b"])
    if has_proj:
        sc = bn(conv(x, params["ws"], s=stride), params["bns_g"], params["bns_b"])
    else:
        sc = x
    return jax.nn.relu(out + sc)


def init_params(key, in_planes, planes, stride=1):
    has_proj = (stride != 1) or (in_planes != EXPANSION * planes)
    ks = jax.random.split(key, 12)

    def conv_w(k, cout, cin, kh, kw):
        fan_in = cin * kh * kw
        return jax.random.normal(k, (cout, cin, kh, kw), jnp.float32) / np.sqrt(fan_in)

    def bn_gb(kg, kb, c):
        g = 1.0 + 0.1 * jax.random.normal(kg, (c,), jnp.float32)
        b = 0.1 * jax.random.normal(kb, (c,), jnp.float32)
        return g, b

    p = {}
    p["w1"] = conv_w(ks[0], planes, in_planes, 1, 1)
    p["bn1_g"], p["bn1_b"] = bn_gb(ks[1], ks[2], planes)
    p["w2"] = conv_w(ks[3], planes, planes, 3, 3)
    p["bn2_g"], p["bn2_b"] = bn_gb(ks[4], ks[5], planes)
    p["w3"] = conv_w(ks[6], EXPANSION * planes, planes, 1, 1)
    p["bn3_g"], p["bn3_b"] = bn_gb(ks[7], ks[8], EXPANSION * planes)
    if has_proj:
        p["ws"] = conv_w(ks[9], EXPANSION * planes, in_planes, 1, 1)
        p["bns_g"], p["bns_b"] = bn_gb(ks[10], ks[11], EXPANSION * planes)
    return p, has_proj


if __name__ == "__main__":
    key = jax.random.PRNGKey(0)
    kx1, kp1, kx2, kp2, kx3, kp3 = jax.random.split(key, 6)

    # Tolerance sized for bf16 activations + bf16 MXU operands (f32 accumulation)
    # vs an all-f32 HIGHEST-precision reference.
    TOL = 4e-2

    # Case 1: projection shortcut, stride=1 (first block of layer1).
    x1 = jax.random.normal(kx1, (2, 64, 16, 16), jnp.float32)       # NCHW
    params1, proj1 = init_params(kp1, in_planes=64, planes=64, stride=1)
    out1 = jax.block_until_ready(bottleneck_forward(x1, params1, stride=1))
    ref1 = reference_bottleneck(x1, params1, 1, proj1)
    assert proj1 and out1.shape == ref1.shape == (2, 256, 16, 16)
    np.testing.assert_allclose(np.asarray(out1), np.asarray(ref1), rtol=TOL, atol=TOL)

    # Case 2: identity shortcut, stride=1 (repeated block of layer1).
    x2 = jax.random.normal(kx2, (2, 256, 16, 16), jnp.float32)      # NCHW
    params2, proj2 = init_params(kp2, in_planes=256, planes=64, stride=1)
    out2 = jax.block_until_ready(bottleneck_forward(x2, params2, stride=1))
    ref2 = reference_bottleneck(x2, params2, 1, proj2)
    assert (not proj2) and out2.shape == ref2.shape == (2, 256, 16, 16)
    np.testing.assert_allclose(np.asarray(out2), np.asarray(ref2), rtol=TOL, atol=TOL)

    # Case 3: projection shortcut, stride=2 (first block of layer2).
    x3 = jax.random.normal(kx3, (2, 256, 16, 16), jnp.float32)      # NCHW
    params3, proj3 = init_params(kp3, in_planes=256, planes=128, stride=2)
    out3 = jax.block_until_ready(bottleneck_forward(x3, params3, stride=2))
    ref3 = reference_bottleneck(x3, params3, 2, proj3)
    assert proj3 and out3.shape == ref3.shape == (2, 512, 8, 8)
    np.testing.assert_allclose(np.asarray(out3), np.asarray(ref3), rtol=TOL, atol=TOL)

    print("KERNEL_OK")
</pallas_src>

<mosaic_0001>
module attributes {stable_mosaic.version = 11 : i64} {
  func.func @_fused_conv1_proj_kernel(%arg0: i32, %arg1: memref<512x64xbf16, #tpu.memory_space<vmem>>, %arg2: memref<64x64xbf16, #tpu.memory_space<vmem>>, %arg3: memref<64x256xbf16, #tpu.memory_space<vmem>>, %arg4: memref<512x64xbf16, #tpu.memory_space<vmem>>, %arg5: memref<1x2x64xf32, #tpu.memory_space<vmem>>, %arg6: memref<512x256xbf16, #tpu.memory_space<vmem>>, %arg7: memref<1x2x256xf32, #tpu.memory_space<vmem>>) attributes {dimension_semantics = [#tpu.dimension_semantics<parallel>], iteration_bounds = array<i64: 1>, scalar_prefetch = 0 : i64, scratch_operands = 0 : i64, tpu.core_type = #tpu.core_type<tc>, window_params = [{transform_indices = @transform_0, window_bounds = array<i64: 512, 64>}, {pipeline_mode = #tpu.pipeline_mode<synchronous>, transform_indices = @transform_1, window_bounds = array<i64: 64, 64>}, {pipeline_mode = #tpu.pipeline_mode<synchronous>, transform_indices = @transform_2, window_bounds = array<i64: 64, 256>}, {transform_indices = @transform_3, window_bounds = array<i64: 512, 64>}, {transform_indices = @transform_4, window_bounds = array<i64: 1, 2, 64>}, {transform_indices = @transform_5, window_bounds = array<i64: 512, 256>}, {transform_indices = @transform_6, window_bounds = array<i64: 1, 2, 256>}]} {
    %c0 = arith.constant 0 : index
    %c0_0 = arith.constant 0 : index
    %0 = vector.load %arg1[%c0, %c0_0] : memref<512x64xbf16, #tpu.memory_space<vmem>>, vector<512x64xbf16>
    %c0_1 = arith.constant 0 : index
    %c0_2 = arith.constant 0 : index
    %1 = vector.load %arg2[%c0_1, %c0_2] : memref<64x64xbf16, #tpu.memory_space<vmem>>, vector<64x64xbf16>
    %cst = arith.constant dense<0.000000e+00> : vector<512x64xf32>
    %2 = tpu.matmul %0, %1, %cst {dimension_numbers = #tpu.dot_dimension_numbers<[1], [0], [0], [1], [0, 0, 1, 1], [], []>} : vector<512x64xbf16>, vector<64x64xbf16>, vector<512x64xf32> -> vector<512x64xf32>
    %cst_3 = arith.constant dense<0.000000e+00> : vector<64xf32>
    %3 = vector.multi_reduction <add>, %2, %cst_3 [0] : vector<512x64xf32> to vector<64xf32>
    %4 = vector.shape_cast %3 : vector<64xf32> to vector<1x64xf32>
    %5 = arith.mulf %2, %2 : vector<512x64xf32>
    %cst_4 = arith.constant dense<0.000000e+00> : vector<64xf32>
    %6 = vector.multi_reduction <add>, %5, %cst_4 [0] : vector<512x64xf32> to vector<64xf32>
    %7 = vector.shape_cast %6 : vector<64xf32> to vector<1x64xf32>
    %8 = tpu.concatenate %4, %7 in 0 : vector<1x64xf32>, vector<1x64xf32> -> vector<2x64xf32>
    %9 = vector.shape_cast %8 : vector<2x64xf32> to vector<1x2x64xf32>
    %c0_5 = arith.constant 0 : index
    %c0_6 = arith.constant 0 : index
    %c0_7 = arith.constant 0 : index
    %10 = vector.load %arg5[%c0_5, %c0_6, %c0_7] : memref<1x2x64xf32, #tpu.memory_space<vmem>>, vector<1x2x64xf32>
    tpu.vector_store %arg5[%c0_5, %c0_6, %c0_7], %9 {strides = array<i32>} : memref<1x2x64xf32, #tpu.memory_space<vmem>>, vector<1x2x64xf32>,
    %11 = arith.truncf %2 : vector<512x64xf32> to vector<512x64xbf16>
    %c0_8 = arith.constant 0 : index
    %c0_9 = arith.constant 0 : index
    %12 = vector.load %arg4[%c0_8, %c0_9] : memref<512x64xbf16, #tpu.memory_space<vmem>>, vector<512x64xbf16>
    tpu.vector_store %arg4[%c0_8, %c0_9], %11 {strides = array<i32>} : memref<512x64xbf16, #tpu.memory_space<vmem>>, vector<512x64xbf16>,
    %c0_10 = arith.constant 0 : index
    %c0_11 = arith.constant 0 : index
    %13 = vector.load %arg3[%c0_10, %c0_11] : memref<64x256xbf16, #tpu.memory_space<vmem>>, vector<64x256xbf16>
    %cst_12 = arith.constant dense<0.000000e+00> : vector<512x256xf32>
    %14 = tpu.matmul %0, %13, %cst_12 {dimension_numbers = #tpu.dot_dimension_numbers<[1], [0], [0], [1], [0, 0, 1, 1], [], []>} : vector<512x64xbf16>, vector<64x256xbf16>, vector<512x256xf32> -> vector<512x256xf32>
    %cst_13 = arith.constant dense<0.000000e+00> : vector<256xf32>
    %15 = vector.multi_reduction <add>, %14, %cst_13 [0] : vector<512x256xf32> to vector<256xf32>
    %16 = vector.shape_cast %15 : vector<256xf32> to vector<1x256xf32>
    %17 = arith.mulf %14, %14 : vector<512x256xf32>
    %cst_14 = arith.constant dense<0.000000e+00> : vector<256xf32>
    %18 = vector.multi_reduction <add>, %17, %cst_14 [0] : vector<512x256xf32> to vector<256xf32>
    %19 = vector.shape_cast %18 : vector<256xf32> to vector<1x256xf32>
    %20 = tpu.concatenate %16, %19 in 0 : vector<1x256xf32>, vector<1x256xf32> -> vector<2x256xf32>
    %21 = vector.shape_cast %20 : vector<2x256xf32> to vector<1x2x256xf32>
    %c0_15 = arith.constant 0 : index
    %c0_16 = arith.constant 0 : index
    %c0_17 = arith.constant 0 : index
    %22 = vector.load %arg7[%c0_15, %c0_16, %c0_17] : memref<1x2x256xf32, #tpu.memory_space<vmem>>, vector<1x2x256xf32>
    tpu.vector_store %arg7[%c0_15, %c0_16, %c0_17], %21 {strides = array<i32>} : memref<1x2x256xf32, #tpu.memory_space<vmem>>, vector<1x2x256xf32>,
    %23 = arith.truncf %14 : vector<512x256xf32> to vector<512x256xbf16>
    %c0_18 = arith.constant 0 : index
    %c0_19 = arith.constant 0 : index
    %24 = vector.load %arg6[%c0_18, %c0_19] : memref<512x256xbf16, #tpu.memory_space<vmem>>, vector<512x256xbf16>
    tpu.vector_store %arg6[%c0_18, %c0_19], %23 {strides = array<i32>} : memref<512x256xbf16, #tpu.memory_space<vmem>>, vector<512x256xbf16>,
    return
  }
  func.func @transform_0(%arg0: i32) -> (i32, i32) {
    %c0_i32 = arith.constant 0 : i32
    %c0_i32_0 = arith.constant 0 : i32
    return %arg0, %c0_i32 : i32, i32
  }
  func.func @transform_1(%arg0: i32) -> (i32, i32) {
    %c0_i32 = arith.constant 0 : i32
    %c0_i32_0 = arith.constant 0 : i32
    %c0_i32_1 = arith.constant 0 : i32
    return %c0_i32, %c0_i32_0 : i32, i32
  }
  func.func @transform_2(%arg0: i32) -> (i32, i32) {
    %c0_i32 = arith.constant 0 : i32
    %c0_i32_0 = arith.constant 0 : i32
    %c0_i32_1 = arith.constant 0 : i32
    return %c0_i32, %c0_i32_0 : i32, i32
  }
  func.func @transform_3(%arg0: i32) -> (i32, i32) {
    %c0_i32 = arith.constant 0 : i32
    %c0_i32_0 = arith.constant 0 : i32
    return %arg0, %c0_i32 : i32, i32
  }
  func.func @transform_4(%arg0: i32) -> (i32, i32, i32) {
    %c0_i32 = arith.constant 0 : i32
    %c0_i32_0 = arith.constant 0 : i32
    %c0_i32_1 = arith.constant 0 : i32
    return %arg0, %c0_i32, %c0_i32_0 : i32, i32, i32
  }
  func.func @transform_5(%arg0: i32) -> (i32, i32) {
    %c0_i32 = arith.constant 0 : i32
    %c0_i32_0 = arith.constant 0 : i32
    return %arg0, %c0_i32 : i32, i32
  }
  func.func @transform_6(%arg0: i32) -> (i32, i32, i32) {
    %c0_i32 = arith.constant 0 : i32
    %c0_i32_0 = arith.constant 0 : i32
    %c0_i32_1 = arith.constant 0 : i32
    return %arg0, %c0_i32, %c0_i32_0 : i32, i32, i32
  }
}

module attributes {stable_mosaic.version = 11 : i64} {
  func.func @kernel(%arg0: i32, %arg1: memref<256x64xbf16, #tpu.memory_space<vmem>>, %arg2: memref<1x64xf32, #tpu.memory_space<vmem>>, %arg3: memref<1x64xf32, #tpu.memory_space<vmem>>, %arg4: memref<3x192x64xbf16, #tpu.memory_space<vmem>>, %arg5: memref<256x64xbf16, #tpu.memory_space<vmem>>, %arg6: memref<1x2x64xf32, #tpu.memory_space<vmem>>, %arg7: memref<18x18x64xbf16, #tpu.memory_space<vmem>>, %arg8: memref<256x64xf32, #tpu.memory_space<vmem>>) attributes {dimension_semantics = [#tpu.dimension_semantics<parallel>], iteration_bounds = array<i64: 2>, scalar_prefetch = 0 : i64, scratch_operands = 2 : i64, tpu.core_type = #tpu.core_type<tc>, window_params = [{transform_indices = @transform_0, window_bounds = array<i64: 256, 64>}, {pipeline_mode = #tpu.pipeline_mode<synchronous>, transform_indices = @transform_1, window_bounds = array<i64: 1, 64>}, {pipeline_mode = #tpu.pipeline_mode<synchronous>, transform_indices = @transform_2, window_bounds = array<i64: 1, 64>}, {pipeline_mode = #tpu.pipeline_mode<synchronous>, transform_indices = @transform_3, window_bounds = array<i64: 3, 192, 64>}, {transform_indices = @transform_4, window_bounds = array<i64: 256, 64>}, {transform_indices = @transform_5, window_bounds = array<i64: 1, 2, 64>}]} {
    %c0 = arith.constant 0 : index
    %c0_0 = arith.constant 0 : index
    %0 = vector.load %arg1[%c0, %c0_0] : memref<256x64xbf16, #tpu.memory_space<vmem>>, vector<256x64xbf16>
    %1 = arith.extf %0 : vector<256x64xbf16> to vector<256x64xf32>
    %c0_1 = arith.constant 0 : index
    %c0_2 = arith.constant 0 : index
    %2 = vector.load %arg2[%c0_1, %c0_2] : memref<1x64xf32, #tpu.memory_space<vmem>>, vector<1x64xf32>
    %3 = vector.broadcast %2 : vector<1x64xf32> to vector<256x64xf32>
    %4 = arith.mulf %1, %3 : vector<256x64xf32>
    %c0_3 = arith.constant 0 : index
    %c0_4 = arith.constant 0 : index
    %5 = vector.load %arg3[%c0_3, %c0_4] : memref<1x64xf32, #tpu.memory_space<vmem>>, vector<1x64xf32>
    %6 = vector.broadcast %5 : vector<1x64xf32> to vector<256x64xf32>
    %7 = arith.addf %4, %6 : vector<256x64xf32>
    %cst = arith.constant 0.000000e+00 : f32
    %8 = vector.broadcast %cst : f32 to vector<256x64xf32>
    %9 = arith.maximumf %7, %8 : vector<256x64xf32>
    %10 = vector.shape_cast %9 : vector<256x64xf32> to vector<16x16x64xf32>
    %cst_5 = arith.constant 0.000000e+00 : f32
    %11 = vector.broadcast %cst_5 : f32 to vector<16x1x64xf32>
    %cst_6 = arith.constant 0.000000e+00 : f32
    %12 = vector.broadcast %cst_6 : f32 to vector<1x18x64xf32>
    %13 = tpu.concatenate %11, %10, %11 in 1 : vector<16x1x64xf32>, vector<16x16x64xf32>, vector<16x1x64xf32> -> vector<16x18x64xf32>
    %14 = tpu.concatenate %12, %13, %12 in 0 : vector<1x18x64xf32>, vector<16x18x64xf32>, vector<1x18x64xf32> -> vector<18x18x64xf32>
    %15 = arith.truncf %14 : vector<18x18x64xf32> to vector<18x18x64xbf16>
    %c0_7 = arith.constant 0 : index
    %c0_8 = arith.constant 0 : index
    %c0_9 = arith.constant 0 : index
    %16 = vector.load %arg7[%c0_7, %c0_8, %c0_9] : memref<18x18x64xbf16, #tpu.memory_space<vmem>>, vector<18x18x64xbf16>
    tpu.vector_store %arg7[%c0_7, %c0_8, %c0_9], %15 {strides = array<i32>} : memref<18x18x64xbf16, #tpu.memory_space<vmem>>, vector<18x18x64xbf16>,
    %c0_10 = arith.constant 0 : index
    %c0_11 = arith.constant 0 : index
    %c0_12 = arith.constant 0 : index
    %17 = vector.load %arg7[%c0_10, %c0_11, %c0_12] : memref<18x18x64xbf16, #tpu.memory_space<vmem>>, vector<16x16x64xbf16>
    %18 = vector.shape_cast %17 : vector<16x16x64xbf16> to vector<256x64xbf16>
    %c0_13 = arith.constant 0 : index
    %c1 = arith.constant 1 : index
    %c0_14 = arith.constant 0 : index
    %19 = vector.load %arg7[%c0_13, %c1, %c0_14] : memref<18x18x64xbf16, #tpu.memory_space<vmem>>, vector<16x16x64xbf16>
    %20 = vector.shape_cast %19 : vector<16x16x64xbf16> to vector<256x64xbf16>
    %c0_15 = arith.constant 0 : index
    %c2 = arith.constant 2 : index
    %c0_16 = arith.constant 0 : index
    %21 = vector.load %arg7[%c0_15, %c2, %c0_16] : memref<18x18x64xbf16, #tpu.memory_space<vmem>>, vector<16x16x64xbf16>
    %22 = vector.shape_cast %21 : vector<16x16x64xbf16> to vector<256x64xbf16>
    %23 = tpu.concatenate %18, %20, %22 in 1 : vector<256x64xbf16>, vector<256x64xbf16>, vector<256x64xbf16> -> vector<256x192xbf16>
    %c0_17 = arith.constant 0 : index
    %c0_18 = arith.constant 0 : index
    %c0_19 = arith.constant 0 : index
    %24 = vector.load %arg4[%c0_17, %c0_18, %c0_19] : memref<3x192x64xbf16, #tpu.memory_space<vmem>>, vector<1x192x64xbf16>
    %25 = vector.shape_cast %24 : vector<1x192x64xbf16> to vector<192x64xbf16>
    %cst_20 = arith.constant dense<0.000000e+00> : vector<256x64xf32>
    %26 = tpu.matmul %23, %25, %cst_20 {dimension_numbers = #tpu.dot_dimension_numbers<[1], [0], [0], [1], [0, 0, 1, 1], [], []>} : vector<256x192xbf16>, vector<192x64xbf16>, vector<256x64xf32> -> vector<256x64xf32>
    %c0_21 = arith.constant 0 : index
    %c0_22 = arith.constant 0 : index
    %27 = vector.load %arg8[%c0_21, %c0_22] : memref<256x64xf32, #tpu.memory_space<vmem>>, vector<256x64xf32>
    tpu.vector_store %arg8[%c0_21, %c0_22], %26 {strides = array<i32>} : memref<256x64xf32, #tpu.memory_space<vmem>>, vector<256x64xf32>,
    %c1_23 = arith.constant 1 : index
    %c0_24 = arith.constant 0 : index
    %c0_25 = arith.constant 0 : index
    %28 = vector.load %arg7[%c1_23, %c0_24, %c0_25] : memref<18x18x64xbf16, #tpu.memory_space<vmem>>, vector<16x16x64xbf16>
    %29 = vector.shape_cast %28 : vector<16x16x64xbf16> to vector<256x64xbf16>
    %c1_26 = arith.constant 1 : index
    %c1_27 = arith.constant 1 : index
    %c0_28 = arith.constant 0 : index
    %30 = vector.load %arg7[%c1_26, %c1_27, %c0_28] : memref<18x18x64xbf16, #tpu.memory_space<vmem>>, vector<16x16x64xbf16>
    %31 = vector.shape_cast %30 : vector<16x16x64xbf16> to vector<256x64xbf16>
    %c1_29 = arith.constant 1 : index
    %c2_30 = arith.constant 2 : index
    %c0_31 = arith.constant 0 : index
    %32 = vector.load %arg7[%c1_29, %c2_30, %c0_31] : memref<18x18x64xbf16, #tpu.memory_space<vmem>>, vector<16x16x64xbf16>
    %33 = vector.shape_cast %32 : vector<16x16x64xbf16> to vector<256x64xbf16>
    %34 = tpu.concatenate %29, %31, %33 in 1 : vector<256x64xbf16>, vector<256x64xbf16>, vector<256x64xbf16> -> vector<256x192xbf16>
    %c1_32 = arith.constant 1 : index
    %c0_33 = arith.constant 0 : index
    %c0_34 = arith.constant 0 : index
    %35 = vector.load %arg4[%c1_32, %c0_33, %c0_34] : memref<3x192x64xbf16, #tpu.memory_space<vmem>>, vector<1x192x64xbf16>
    %36 = vector.shape_cast %35 : vector<1x192x64xbf16> to vector<192x64xbf16>
    %cst_35 = arith.constant dense<0.000000e+00> : vector<256x64xf32>
    %37 = tpu.matmul %34, %36, %cst_35 {dimension_numbers = #tpu.dot_dimension_numbers<[1], [0], [0], [1], [0, 0, 1, 1], [], []>} : vector<256x192xbf16>, vector<192x64xbf16>, vector<256x64xf32> -> vector<256x64xf32>
    %c0_36 = arith.constant 0 : index
    %c0_37 = arith.constant 0 : index
    %38 = vector.load %arg8[%c0_36, %c0_37] : memref<256x64xf32, #tpu.memory_space<vmem>>, vector<256x64xf32>
    %39 = arith.addf %38, %37 : vector<256x64xf32>
    %c0_38 = arith.constant 0 : index
    %c0_39 = arith.constant 0 : index
    %40 = vector.load %arg8[%c0_38, %c0_39] : memref<256x64xf32, #tpu.memory_space<vmem>>, vector<256x64xf32>
    tpu.vector_store %arg8[%c0_38, %c0_39], %39 {strides = array<i32>} : memref<256x64xf32, #tpu.memory_space<vmem>>, vector<256x64xf32>,
    %c2_40 = arith.constant 2 : index
    %c0_41 = arith.constant 0 : index
    %c0_42 = arith.constant 0 : index
    %41 = vector.load %arg7[%c2_40, %c0_41, %c0_42] : memref<18x18x64xbf16, #tpu.memory_space<vmem>>, vector<16x16x64xbf16>
    %42 = vector.shape_cast %41 : vector<16x16x64xbf16> to vector<256x64xbf16>
    %c2_43 = arith.constant 2 : index
    %c1_44 = arith.constant 1 : index
    %c0_45 = arith.constant 0 : index
    %43 = vector.load %arg7[%c2_43, %c1_44, %c0_45] : memref<18x18x64xbf16, #tpu.memory_space<vmem>>, vector<16x16x64xbf16>
    %44 = vector.shape_cast %43 : vector<16x16x64xbf16> to vector<256x64xbf16>
    %c2_46 = arith.constant 2 : index
    %c2_47 = arith.constant 2 : index
    %c0_48 = arith.constant 0 : index
    %45 = vector.load %arg7[%c2_46, %c2_47, %c0_48] : memref<18x18x64xbf16, #tpu.memory_space<vmem>>, vector<16x16x64xbf16>
    %46 = vector.shape_cast %45 : vector<16x16x64xbf16> to vector<256x64xbf16>
    %47 = tpu.concatenate %42, %44, %46 in 1 : vector<256x64xbf16>, vector<256x64xbf16>, vector<256x64xbf16> -> vector<256x192xbf16>
    %c2_49 = arith.constant 2 : index
    %c0_50 = arith.constant 0 : index
    %c0_51 = arith.constant 0 : index
    %48 = vector.load %arg4[%c2_49, %c0_50, %c0_51] : memref<3x192x64xbf16, #tpu.memory_space<vmem>>, vector<1x192x64xbf16>
    %49 = vector.shape_cast %48 : vector<1x192x64xbf16> to vector<192x64xbf16>
    %cst_52 = arith.constant dense<0.000000e+00> : vector<256x64xf32>
    %50 = tpu.matmul %47, %49, %cst_52 {dimension_numbers = #tpu.dot_dimension_numbers<[1], [0], [0], [1], [0, 0, 1, 1], [], []>} : vector<256x192xbf16>, vector<192x64xbf16>, vector<256x64xf32> -> vector<256x64xf32>
    %c0_53 = arith.constant 0 : index
    %c0_54 = arith.constant 0 : index
    %51 = vector.load %arg8[%c0_53, %c0_54] : memref<256x64xf32, #tpu.memory_space<vmem>>, vector<256x64xf32>
    %52 = arith.addf %51, %50 : vector<256x64xf32>
    %c0_55 = arith.constant 0 : index
    %c0_56 = arith.constant 0 : index
    %53 = vector.load %arg8[%c0_55, %c0_56] : memref<256x64xf32, #tpu.memory_space<vmem>>, vector<256x64xf32>
    tpu.vector_store %arg8[%c0_55, %c0_56], %52 {strides = array<i32>} : memref<256x64xf32, #tpu.memory_space<vmem>>, vector<256x64xf32>,
    %c0_57 = arith.constant 0 : index
    %c0_58 = arith.constant 0 : index
    %54 = vector.load %arg8[%c0_57, %c0_58] : memref<256x64xf32, #tpu.memory_space<vmem>>, vector<256x64xf32>
    %cst_59 = arith.constant dense<0.000000e+00> : vector<64xf32>
    %55 = vector.multi_reduction <add>, %54, %cst_59 [0] : vector<256x64xf32> to vector<64xf32>
    %56 = vector.shape_cast %55 : vector<64xf32> to vector<1x64xf32>
    %57 = arith.mulf %54, %54 : vector<256x64xf32>
    %cst_60 = arith.constant dense<0.000000e+00> : vector<64xf32>
    %58 = vector.multi_reduction <add>, %57, %cst_60 [0] : vector<256x64xf32> to vector<64xf32>
    %59 = vector.shape_cast %58 : vector<64xf32> to vector<1x64xf32>
    %60 = tpu.concatenate %56, %59 in 0 : vector<1x64xf32>, vector<1x64xf32> -> vector<2x64xf32>
    %61 = vector.shape_cast %60 : vector<2x64xf32> to vector<1x2x64xf32>
    %c0_61 = arith.constant 0 : index
    %c0_62 = arith.constant 0 : index
    %c0_63 = arith.constant 0 : index
    %62 = vector.load %arg6[%c0_61, %c0_62, %c0_63] : memref<1x2x64xf32, #tpu.memory_space<vmem>>, vector<1x2x64xf32>
    tpu.vector_store %arg6[%c0_61, %c0_62, %c0_63], %61 {strides = array<i32>} : memref<1x2x64xf32, #tpu.memory_space<vmem>>, vector<1x2x64xf32>,
    %63 = arith.truncf %54 : vector<256x64xf32> to vector<256x64xbf16>
    %c0_64 = arith.constant 0 : index
    %c0_65 = arith.constant 0 : index
    %64 = vector.load %arg5[%c0_64, %c0_65] : memref<256x64xbf16, #tpu.memory_space<vmem>>, vector<256x64xbf16>
    tpu.vector_store %arg5[%c0_64, %c0_65], %63 {strides = array<i32>} : memref<256x64xbf16, #tpu.memory_space<vmem>>, vector<256x64xbf16>,
    return
  }
  func.func @transform_0(%arg0: i32) -> (i32, i32) {
    %c0_i32 = arith.constant 0 : i32
    %c0_i32_0 = arith.constant 0 : i32
    return %arg0, %c0_i32 : i32, i32
  }
  func.func @transform_1(%arg0: i32) -> (i32, i32) {
    %c0_i32 = arith.constant 0 : i32
    %c0_i32_0 = arith.constant 0 : i32
    %c0_i32_1 = arith.constant 0 : i32
    return %c0_i32, %c0_i32_0 : i32, i32
  }
  func.func @transform_2(%arg0: i32) -> (i32, i32) {
    %c0_i32 = arith.constant 0 : i32
    %c0_i32_0 = arith.constant 0 : i32
    %c0_i32_1 = arith.constant 0 : i32
    return %c0_i32, %c0_i32_0 : i32, i32
  }
  func.func @transform_3(%arg0: i32) -> (i32, i32, i32) {
    %c0_i32 = arith.constant 0 : i32
    %c0_i32_0 = arith.constant 0 : i32
    %c0_i32_1 = arith.constant 0 : i32
    %c0_i32_2 = arith.constant 0 : i32
    return %c0_i32, %c0_i32_0, %c0_i32_1 : i32, i32, i32
  }
  func.func @transform_4(%arg0: i32) -> (i32, i32) {
    %c0_i32 = arith.constant 0 : i32
    %c0_i32_0 = arith.constant 0 : i32
    return %arg0, %c0_i32 : i32, i32
  }
  func.func @transform_5(%arg0: i32) -> (i32, i32, i32) {
    %c0_i32 = arith.constant 0 : i32
    %c0_i32_0 = arith.constant 0 : i32
    %c0_i32_1 = arith.constant 0 : i32
    return %arg0, %c0_i32, %c0_i32_0 : i32, i32, i32
  }
}

module attributes {stable_mosaic.version = 11 : i64} {
  func.func @_residual_proj_kernel(%arg0: i32, %arg1: memref<512x256xbf16, #tpu.memory_space<vmem>>, %arg2: memref<1x256xf32, #tpu.memory_space<vmem>>, %arg3: memref<1x256xf32, #tpu.memory_space<vmem>>, %arg4: memref<512x256xbf16, #tpu.memory_space<vmem>>, %arg5: memref<1x256xf32, #tpu.memory_space<vmem>>, %arg6: memref<1x256xf32, #tpu.memory_space<vmem>>, %arg7: memref<512x256xf32, #tpu.memory_space<vmem>>) attributes {dimension_semantics = [#tpu.dimension_semantics<parallel>], iteration_bounds = array<i64: 1>, scalar_prefetch = 0 : i64, scratch_operands = 0 : i64, tpu.core_type = #tpu.core_type<tc>, window_params = [{transform_indices = @transform_0, window_bounds = array<i64: 512, 256>}, {pipeline_mode = #tpu.pipeline_mode<synchronous>, transform_indices = @transform_1, window_bounds = array<i64: 1, 256>}, {pipeline_mode = #tpu.pipeline_mode<synchronous>, transform_indices = @transform_2, window_bounds = array<i64: 1, 256>}, {transform_indices = @transform_3, window_bounds = array<i64: 512, 256>}, {pipeline_mode = #tpu.pipeline_mode<synchronous>, transform_indices = @transform_4, window_bounds = array<i64: 1, 256>}, {pipeline_mode = #tpu.pipeline_mode<synchronous>, transform_indices = @transform_5, window_bounds = array<i64: 1, 256>}, {transform_indices = @transform_6, window_bounds = array<i64: 512, 256>}]} {
    %c0 = arith.constant 0 : index
    %c0_0 = arith.constant 0 : index
    %0 = vector.load %arg1[%c0, %c0_0] : memref<512x256xbf16, #tpu.memory_space<vmem>>, vector<512x256xbf16>
    %1 = arith.extf %0 : vector<512x256xbf16> to vector<512x256xf32>
    %c0_1 = arith.constant 0 : index
    %c0_2 = arith.constant 0 : index
    %2 = vector.load %arg2[%c0_1, %c0_2] : memref<1x256xf32, #tpu.memory_space<vmem>>, vector<1x256xf32>
    %3 = vector.broadcast %2 : vector<1x256xf32> to vector<512x256xf32>
    %4 = arith.mulf %1, %3 : vector<512x256xf32>
    %c0_3 = arith.constant 0 : index
    %c0_4 = arith.constant 0 : index
    %5 = vector.load %arg3[%c0_3, %c0_4] : memref<1x256xf32, #tpu.memory_space<vmem>>, vector<1x256xf32>
    %6 = vector.broadcast %5 : vector<1x256xf32> to vector<512x256xf32>
    %7 = arith.addf %4, %6 : vector<512x256xf32>
    %c0_5 = arith.constant 0 : index
    %c0_6 = arith.constant 0 : index
    %8 = vector.load %arg4[%c0_5, %c0_6] : memref<512x256xbf16, #tpu.memory_space<vmem>>, vector<512x256xbf16>
    %9 = arith.extf %8 : vector<512x256xbf16> to vector<512x256xf32>
    %c0_7 = arith.constant 0 : index
    %c0_8 = arith.constant 0 : index
    %10 = vector.load %arg5[%c0_7, %c0_8] : memref<1x256xf32, #tpu.memory_space<vmem>>, vector<1x256xf32>
    %11 = vector.broadcast %10 : vector<1x256xf32> to vector<512x256xf32>
    %12 = arith.mulf %9, %11 : vector<512x256xf32>
    %c0_9 = arith.constant 0 : index
    %c0_10 = arith.constant 0 : index
    %13 = vector.load %arg6[%c0_9, %c0_10] : memref<1x256xf32, #tpu.memory_space<vmem>>, vector<1x256xf32>
    %14 = vector.broadcast %13 : vector<1x256xf32> to vector<512x256xf32>
    %15 = arith.addf %12, %14 : vector<512x256xf32>
    %16 = arith.addf %7, %15 : vector<512x256xf32>
    %cst = arith.constant 0.000000e+00 : f32
    %17 = vector.broadcast %cst : f32 to vector<512x256xf32>
    %18 = arith.maximumf %16, %17 : vector<512x256xf32>
    %c0_11 = arith.constant 0 : index
    %c0_12 = arith.constant 0 : index
    %19 = vector.load %arg7[%c0_11, %c0_12] : memref<512x256xf32, #tpu.memory_space<vmem>>, vector<512x256xf32>
    tpu.vector_store %arg7[%c0_11, %c0_12], %18 {strides = array<i32>} : memref<512x256xf32, #tpu.memory_space<vmem>>, vector<512x256xf32>,
    return
  }
  func.func @transform_0(%arg0: i32) -> (i32, i32) {
    %c0_i32 = arith.constant 0 : i32
    %c0_i32_0 = arith.constant 0 : i32
    return %arg0, %c0_i32 : i32, i32
  }
  func.func @transform_1(%arg0: i32) -> (i32, i32) {
    %c0_i32 = arith.constant 0 : i32
    %c0_i32_0 = arith.constant 0 : i32
    %c0_i32_1 = arith.constant 0 : i32
    return %c0_i32, %c0_i32_0 : i32, i32
  }
  func.func @transform_2(%arg0: i32) -> (i32, i32) {
    %c0_i32 = arith.constant 0 : i32
    %c0_i32_0 = arith.constant 0 : i32
    %c0_i32_1 = arith.constant 0 : i32
    return %c0_i32, %c0_i32_0 : i32, i32
  }
  func.func @transform_3(%arg0: i32) -> (i32, i32) {
    %c0_i32 = arith.constant 0 : i32
    %c0_i32_0 = arith.constant 0 : i32
    return %arg0, %c0_i32 : i32, i32
  }
  func.func @transform_4(%arg0: i32) -> (i32, i32) {
    %c0_i32 = arith.constant 0 : i32
    %c0_i32_0 = arith.constant 0 : i32
    %c0_i32_1 = arith.constant 0 : i32
    return %c0_i32, %c0_i32_0 : i32, i32
  }
  func.func @transform_5(%arg0: i32) -> (i32, i32) {
    %c0_i32 = arith.constant 0 : i32
    %c0_i32_0 = arith.constant 0 : i32
    %c0_i32_1 = arith.constant 0 : i32
    return %c0_i32, %c0_i32_0 : i32, i32
  }
  func.func @transform_6(%arg0: i32) -> (i32, i32) {
    %c0_i32 = arith.constant 0 : i32
    %c0_i32_0 = arith.constant 0 : i32
    return %arg0, %c0_i32 : i32, i32
  }
}

module attributes {stable_mosaic.version = 11 : i64} {
  func.func @kernel(%arg0: i32, %arg1: memref<512x64xbf16, #tpu.memory_space<vmem>>, %arg2: memref<64x256xbf16, #tpu.memory_space<vmem>>, %arg3: memref<1x64xf32, #tpu.memory_space<vmem>>, %arg4: memref<1x64xf32, #tpu.memory_space<vmem>>, %arg5: memref<512x256xbf16, #tpu.memory_space<vmem>>, %arg6: memref<1x2x256xf32, #tpu.memory_space<vmem>>) attributes {dimension_semantics = [#tpu.dimension_semantics<parallel>], iteration_bounds = array<i64: 1>, scalar_prefetch = 0 : i64, scratch_operands = 0 : i64, tpu.core_type = #tpu.core_type<tc>, window_params = [{transform_indices = @transform_0, window_bounds = array<i64: 512, 64>}, {pipeline_mode = #tpu.pipeline_mode<synchronous>, transform_indices = @transform_1, window_bounds = array<i64: 64, 256>}, {pipeline_mode = #tpu.pipeline_mode<synchronous>, transform_indices = @transform_2, window_bounds = array<i64: 1, 64>}, {pipeline_mode = #tpu.pipeline_mode<synchronous>, transform_indices = @transform_3, window_bounds = array<i64: 1, 64>}, {transform_indices = @transform_4, window_bounds = array<i64: 512, 256>}, {transform_indices = @transform_5, window_bounds = array<i64: 1, 2, 256>}]} {
    %c0 = arith.constant 0 : index
    %c0_0 = arith.constant 0 : index
    %0 = vector.load %arg1[%c0, %c0_0] : memref<512x64xbf16, #tpu.memory_space<vmem>>, vector<512x64xbf16>
    %1 = arith.extf %0 : vector<512x64xbf16> to vector<512x64xf32>
    %c0_1 = arith.constant 0 : index
    %c0_2 = arith.constant 0 : index
    %2 = vector.load %arg3[%c0_1, %c0_2] : memref<1x64xf32, #tpu.memory_space<vmem>>, vector<1x64xf32>
    %3 = vector.broadcast %2 : vector<1x64xf32> to vector<512x64xf32>
    %4 = arith.mulf %1, %3 : vector<512x64xf32>
    %c0_3 = arith.constant 0 : index
    %c0_4 = arith.constant 0 : index
    %5 = vector.load %arg4[%c0_3, %c0_4] : memref<1x64xf32, #tpu.memory_space<vmem>>, vector<1x64xf32>
    %6 = vector.broadcast %5 : vector<1x64xf32> to vector<512x64xf32>
    %7 = arith.addf %4, %6 : vector<512x64xf32>
    %cst = arith.constant 0.000000e+00 : f32
    %8 = vector.broadcast %cst : f32 to vector<512x64xf32>
    %9 = arith.maximumf %7, %8 : vector<512x64xf32>
    %10 = arith.truncf %9 : vector<512x64xf32> to vector<512x64xbf16>
    %c0_5 = arith.constant 0 : index
    %c0_6 = arith.constant 0 : index
    %11 = vector.load %arg2[%c0_5, %c0_6] : memref<64x256xbf16, #tpu.memory_space<vmem>>, vector<64x256xbf16>
    %cst_7 = arith.constant dense<0.000000e+00> : vector<512x256xf32>
    %12 = tpu.matmul %10, %11, %cst_7 {dimension_numbers = #tpu.dot_dimension_numbers<[1], [0], [0], [1], [0, 0, 1, 1], [], []>} : vector<512x64xbf16>, vector<64x256xbf16>, vector<512x256xf32> -> vector<512x256xf32>
    %cst_8 = arith.constant dense<0.000000e+00> : vector<256xf32>
    %13 = vector.multi_reduction <add>, %12, %cst_8 [0] : vector<512x256xf32> to vector<256xf32>
    %14 = vector.shape_cast %13 : vector<256xf32> to vector<1x256xf32>
    %15 = arith.mulf %12, %12 : vector<512x256xf32>
    %cst_9 = arith.constant dense<0.000000e+00> : vector<256xf32>
    %16 = vector.multi_reduction <add>, %15, %cst_9 [0] : vector<512x256xf32> to vector<256xf32>
    %17 = vector.shape_cast %16 : vector<256xf32> to vector<1x256xf32>
    %18 = tpu.concatenate %14, %17 in 0 : vector<1x256xf32>, vector<1x256xf32> -> vector<2x256xf32>
    %19 = vector.shape_cast %18 : vector<2x256xf32> to vector<1x2x256xf32>
    %c0_10 = arith.constant 0 : index
    %c0_11 = arith.constant 0 : index
    %c0_12 = arith.constant 0 : index
    %20 = vector.load %arg6[%c0_10, %c0_11, %c0_12] : memref<1x2x256xf32, #tpu.memory_space<vmem>>, vector<1x2x256xf32>
    tpu.vector_store %arg6[%c0_10, %c0_11, %c0_12], %19 {strides = array<i32>} : memref<1x2x256xf32, #tpu.memory_space<vmem>>, vector<1x2x256xf32>,
    %21 = arith.truncf %12 : vector<512x256xf32> to vector<512x256xbf16>
    %c0_13 = arith.constant 0 : index
    %c0_14 = arith.constant 0 : index
    %22 = vector.load %arg5[%c0_13, %c0_14] : memref<512x256xbf16, #tpu.memory_space<vmem>>, vector<512x256xbf16>
    tpu.vector_store %arg5[%c0_13, %c0_14], %21 {strides = array<i32>} : memref<512x256xbf16, #tpu.memory_space<vmem>>, vector<512x256xbf16>,
    return
  }
  func.func @transform_0(%arg0: i32) -> (i32, i32) {
    %c0_i32 = arith.constant 0 : i32
    %c0_i32_0 = arith.constant 0 : i32
    return %arg0, %c0_i32 : i32, i32
  }
  func.func @transform_1(%arg0: i32) -> (i32, i32) {
    %c0_i32 = arith.constant 0 : i32
    %c0_i32_0 = arith.constant 0 : i32
    %c0_i32_1 = arith.constant 0 : i32
    return %c0_i32, %c0_i32_0 : i32, i32
  }
  func.func @transform_2(%arg0: i32) -> (i32, i32) {
    %c0_i32 = arith.constant 0 : i32
    %c0_i32_0 = arith.constant 0 : i32
    %c0_i32_1 = arith.constant 0 : i32
    return %c0_i32, %c0_i32_0 : i32, i32
  }
  func.func @transform_3(%arg0: i32) -> (i32, i32) {
    %c0_i32 = arith.constant 0 : i32
    %c0_i32_0 = arith.constant 0 : i32
    %c0_i32_1 = arith.constant 0 : i32
    return %c0_i32, %c0_i32_0 : i32, i32
  }
  func.func @transform_4(%arg0: i32) -> (i32, i32) {
    %c0_i32 = arith.constant 0 : i32
    %c0_i32_0 = arith.constant 0 : i32
    return %arg0, %c0_i32 : i32, i32
  }
  func.func @transform_5(%arg0: i32) -> (i32, i32, i32) {
    %c0_i32 = arith.constant 0 : i32
    %c0_i32_0 = arith.constant 0 : i32
    %c0_i32_1 = arith.constant 0 : i32
    return %arg0, %c0_i32, %c0_i32_0 : i32, i32, i32
  }
}

</mosaic_0001>

<bundles_post_ra>
// kernel: bottleneck_forward.7
= control target key start
LH: loop header
LB: loop body
LE: loop exit
PB: predicated region body
PF: predicated region fallthrough
CT: control target
= control target key end

     0   :  { %v218_v1 = vlaneseq  ;;  %s2377_s0 = inlined_call_operand.vmem [shape: bf16[512,256], index: 0, kind: input, shape index: {}]   ;;  %s2378_s1 = inlined_call_operand.vmem [shape: f32[1,256], index: 1, kind: input, shape index: {}]   ;;  %s2379_s2 = inlined_call_operand.vmem [shape: f32[1,256], index: 2, kind: input, shape index: {}]   ;;  %s2380_s3 = inlined_call_operand.vmem [shape: bf16[512,256], index: 3, kind: input, shape index: {}]   ;;  %s2381_s4 = inlined_call_operand.vmem [shape: f32[1,256], index: 4, kind: input, shape index: {}]   ;;  %s2382_s5 = inlined_call_operand.vmem [shape: f32[1,256], index: 5, kind: input, shape index: {}]   ;;  %s2383_s6 = inlined_call_operand.hbm [shape: f32[512,256], index: 6, kind: output, shape index: {}]  }
   0x1   :  { %v24_v0 = vld [vmem:[%s2377_s0] sm:$0xff]  ;;  %v25_v12 = vld [vmem:[%s2377_s0 + $0x8] sm:$0xff]  ;;  %v26_v14 = vld [vmem:[%s2377_s0 + $0x10] sm:$0xff] }
   0x2   :  { %v88_v2 = vunpack.c.l.bf16 %v24_v0  ;;  %v216_v3 = vld [vmem:[%s2378_s1] sm:$0x3]  ;;  %v219_v8 = vshrl.u32 %v218_v1, 7  ;;  %v89_v10 = vunpack.c.h.bf16 %v24_v0  ;;  %v497_v13 = vld [vmem:[%s2380_s3 + $0x8] sm:$0xff]  ;;  %v90_v15 = vunpack.c.l.bf16 %v25_v12  ;;  %v498_v19 = vld [vmem:[%s2380_s3 + $0x10] sm:$0xff] }
   0x3   :  { %v356_v4 = vld [vmem:[%s2379_s2] sm:$0x3]  ;;  %v562_v16 = vunpack.c.l.bf16 %v497_v13  ;;  %v91_v17 = vunpack.c.h.bf16 %v25_v12  ;;  %v563_v18 = vunpack.c.h.bf16 %v497_v13  ;;  %v1466_v20 = vld [vmem:[%s2377_s0 + $0x18] sm:$0xff]  ;;  %v92_v24 = vunpack.c.l.bf16 %v26_v14 }
   0x4   :  { %v496_v5 = vld [vmem:[%s2380_s3] sm:$0xff]  ;;  %v1471_v21 = vld [vmem:[%s2380_s3 + $0x18] sm:$0xff]  ;;  %v220_v22 = vsub.s32 0, %v219_v8  ;;  %v224_v23 = vsub.s32 1, %v219_v8  ;;  %v564_v25 = vunpack.c.l.bf16 %v498_v19  ;;  %v93_v26 = vunpack.c.h.bf16 %v26_v14 }
   0x5   :  { %v688_v6 = vld [vmem:[%s2381_s4] sm:$0x3]  ;;  %v560_v9 = vunpack.c.l.bf16 %v496_v5  ;;  %v561_v11 = vunpack.c.h.bf16 %v496_v5  ;;  %v565_v27 = vunpack.c.h.bf16 %v498_v19  ;;  %v94_v28 = vunpack.c.l.bf16 %v1466_v20 }
   0x6   :  { %v828_v7 = vld [vmem:[%s2382_s5] sm:$0x3]  ;;  %v566_v29 = vunpack.c.l.bf16 %v1471_v21  ;;  %v1475_v30 = vrot.slane %v216_v3, %v220_v22  ;;  %v1477_v31 = vrot.slane %v356_v4, %v220_v22  ;;  %v1479_v32 = vrot.slane %v688_v6, %v220_v22 }
   0x7   :  { %v1481_v33 = vrot.slane %v828_v7, %v220_v22  ;;  %v1483_v34 = vrot.slane %v216_v3, %v224_v23  ;;  %v1485_v35 = vrot.slane %v356_v4, %v224_v23  ;;  %v1487_v36 = vrot.slane %v688_v6, %v224_v23  ;;  %v500_v3 = vld [vmem:[%s2380_s3 + $0x20] sm:$0xff]  ;;  %v29_v22 = vld [vmem:[%s2377_s0 + $0x28] sm:$0xff] }
   0x8   :  { %v1489_v37 = vrot.slane %v828_v7, %v224_v23  ;;  %v228_v38 = vmul.f32 %v1475_v30, %v88_v2  ;;  %v700_v39 = vmul.f32 %v1479_v32, %v560_v9  ;;  %v230_v40 = vmul.f32 %v1475_v30, %v90_v15  ;;  %v28_v2 = vld [vmem:[%s2377_s0 + $0x20] sm:$0xff] }
   0x9   :  { %v702_v41 = vmul.f32 %v1479_v32, %v562_v16  ;;  %v229_v42 = vmul.f32 %v1483_v34, %v89_v10  ;;  %v701_v43 = vmul.f32 %v1487_v36, %v561_v11  ;;  %v231_v44 = vmul.f32 %v1483_v34, %v91_v17 }
   0xa   :  { %v703_v45 = vmul.f32 %v1487_v36, %v563_v18  ;;  %v368_v46 = vadd.f32 %v1477_v31, %v228_v38  ;;  %v840_v47 = vadd.f32 %v1481_v33, %v700_v39  ;;  %v370_v48 = vadd.f32 %v1477_v31, %v230_v40 }
   0xb   :  { %v842_v49 = vadd.f32 %v1481_v33, %v702_v41  ;;  %v369_v50 = vadd.f32 %v1485_v35, %v229_v42  ;;  %v841_v51 = vadd.f32 %v1489_v37, %v701_v43  ;;  %v371_v52 = vadd.f32 %v1485_v35, %v231_v44 }
   0xc   :  { %v843_v53 = vadd.f32 %v1489_v37, %v703_v45  ;;  %v968_v54 = vadd.f32 %v840_v47, %v368_v46  ;;  %v232_v56 = vmul.f32 %v1475_v30, %v92_v24  ;;  %v704_v57 = vmul.f32 %v1479_v32, %v564_v25  ;;  %v501_v25 = vld [vmem:[%s2380_s3 + $0x28] sm:$0xff] }
   0xd   :  { %v970_v55 = vadd.f32 %v842_v49, %v370_v48  ;;  %v969_v58 = vadd.f32 %v841_v51, %v369_v50  ;;  %v233_v60 = vmul.f32 %v1483_v34, %v93_v26  ;;  %v705_v61 = vmul.f32 %v1487_v36, %v565_v27  ;;  %v30_v50 = vld [vmem:[%s2377_s0 + $0x30] sm:$0xff] }
   0xe   :  { %v971_v59 = vadd.f32 %v843_v53, %v371_v52  ;;  %v1096_v62 = vmax.f32 %v968_v54, 0.0  ;;  %v372_v0 = vadd.f32 %v1477_v31, %v232_v56  ;;  %v844_v1 = vadd.f32 %v1481_v33, %v704_v57 }
   0xf   :  { %v1098_v63 = vmax.f32 %v970_v55, 0.0  ;;  %v1097_v4 = vmax.f32 %v969_v58, 0.0  ;;  %v373_v6 = vadd.f32 %v1485_v35, %v233_v60  ;;  %v845_v7 = vadd.f32 %v1489_v37, %v705_v61  ;;  %v502_v55 = vld [vmem:[%s2380_s3 + $0x30] sm:$0xff] }
  0x10   :  { %v1099_v5 = vmax.f32 %v971_v59, 0.0  ;;  %1224 = vst [vmem:[#allocation2] sm:$0xff] %v1096_v62  ;;  %v972_v8 = vadd.f32 %v844_v1, %v372_v0  ;;  %v234_v9 = vmul.f32 %v1475_v30, %v94_v28  ;;  %v706_v10 = vmul.f32 %v1479_v32, %v566_v29  ;;  %v31_v0 = vld [vmem:[%s2377_s0 + $0x38] sm:$0xff] }
  0x11   :  { %1226 = vst [vmem:[#allocation2 + $0x10] sm:$0xff] %v1098_v63  ;;  %v95_v11 = vunpack.c.h.bf16 %v1466_v20  ;;  %1225 = vst [vmem:[#allocation2 + $0x8] sm:$0xff] %v1097_v4  ;;  %v973_v12 = vadd.f32 %v845_v7, %v373_v6  ;;  %v567_v13 = vunpack.c.h.bf16 %v1471_v21  ;;  %v96_v14 = vunpack.c.l.bf16 %v28_v2 }
  0x12   :  { %1227 = vst [vmem:[#allocation2 + $0x18] sm:$0xff] %v1099_v5  ;;  %v568_v15 = vunpack.c.l.bf16 %v500_v3  ;;  %v1100_v16 = vmax.f32 %v972_v8, 0.0  ;;  %v374_v17 = vadd.f32 %v1477_v31, %v234_v9  ;;  %v846_v18 = vadd.f32 %v1481_v33, %v706_v10  ;;  %v503_v5 = vld [vmem:[%s2380_s3 + $0x38] sm:$0xff] }
  0x13   :  { %v235_v19 = vmul.f32 %v1483_v34, %v95_v11  ;;  %v1101_v23 = vmax.f32 %v973_v12, 0.0  ;;  %v707_v20 = vmul.f32 %v1487_v36, %v567_v13  ;;  %v236_v24 = vmul.f32 %v1475_v30, %v96_v14 }
  0x14   :  { %v708_v21 = vmul.f32 %v1479_v32, %v568_v15  ;;  %1228 = vst [vmem:[#allocation2 + $0x20] sm:$0xff] %v1100_v16  ;;  %v974_v26 = vadd.f32 %v846_v18, %v374_v17  ;;  %v97_v28 = vunpack.c.h.bf16 %v28_v2  ;;  %v569_v29 = vunpack.c.h.bf16 %v500_v3 }
  0x15   :  { %v375_v27 = vadd.f32 %v1485_v35, %v235_v19  ;;  %1229 = vst [vmem:[#allocation2 + $0x28] sm:$0xff] %v1101_v23  ;;  %v847_v38 = vadd.f32 %v1489_v37, %v707_v20  ;;  %v376_v39 = vadd.f32 %v1477_v31, %v236_v24  ;;  %v98_v41 = vunpack.c.l.bf16 %v29_v22 }
  0x16   :  { %v848_v40 = vadd.f32 %v1481_v33, %v708_v21  ;;  %v1102_v42 = vmax.f32 %v974_v26, 0.0  ;;  %v237_v43 = vmul.f32 %v1483_v34, %v97_v28  ;;  %v709_v44 = vmul.f32 %v1487_v36, %v569_v29 }
  0x17   :  { %v570_v45 = vunpack.c.l.bf16 %v501_v25  ;;  %v975_v46 = vadd.f32 %v847_v38, %v375_v27  ;;  %v238_v48 = vmul.f32 %v1475_v30, %v98_v41  ;;  %v99_v49 = vunpack.c.h.bf16 %v29_v22 }
  0x18   :  { %v976_v47 = vadd.f32 %v848_v40, %v376_v39  ;;  %1230 = vst [vmem:[#allocation2 + $0x30] sm:$0xff] %v1102_v42  ;;  %v377_v51 = vadd.f32 %v1485_v35, %v237_v43  ;;  %v849_v52 = vadd.f32 %v1489_v37, %v709_v44  ;;  %v571_v54 = vunpack.c.h.bf16 %v501_v25 }
  0x19   :  { %v710_v53 = vmul.f32 %v1479_v32, %v570_v45  ;;  %v1103_v56 = vmax.f32 %v975_v46, 0.0  ;;  %v378_v58 = vadd.f32 %v1477_v31, %v238_v48  ;;  %v239_v59 = vmul.f32 %v1483_v34, %v99_v49 }
  0x1a   :  { %v1104_v57 = vmax.f32 %v976_v47, 0.0  ;;  %v977_v60 = vadd.f32 %v849_v52, %v377_v51  ;;  %v711_v62 = vmul.f32 %v1487_v36, %v571_v54  ;;  %v100_v63 = vunpack.c.l.bf16 %v30_v50 }
  0x1b   :  { %v850_v61 = vadd.f32 %v1481_v33, %v710_v53  ;;  %1231 = vst [vmem:[#allocation2 + $0x38] sm:$0xff] %v1103_v56  ;;  %v379_v1 = vadd.f32 %v1485_v35, %v239_v59  ;;  %v572_v2 = vunpack.c.l.bf16 %v502_v55  ;;  %v101_v3 = vunpack.c.h.bf16 %v30_v50 }
  0x1c   :  { %1232 = vst [vmem:[#allocation2 + $0x40] sm:$0xff] %v1104_v57  ;;  %v573_v4 = vunpack.c.h.bf16 %v502_v55 }
  0x1d   :  { %11 = vsyncpa [#allocation3], 0  ;;  %v1105_v6 = vmax.f32 %v977_v60, 0.0  ;;  %v978_v7 = vadd.f32 %v850_v61, %v378_v58  ;;  %v851_v8 = vadd.f32 %v1489_v37, %v711_v62  ;;  %v240_v9 = vmul.f32 %v1475_v30, %v100_v63  ;;  %v32_v18 = vld [vmem:[%s2377_s0 + $0x40] sm:$0xff]  ;;  %v33_v44 = vld [vmem:[%s2377_s0 + $0x48] sm:$0xff] }
  0x1e   :  { %v712_v10 = vmul.f32 %v1479_v32, %v572_v2  ;;  %v241_v11 = vmul.f32 %v1483_v34, %v101_v3  ;;  %v713_v12 = vmul.f32 %v1487_v36, %v573_v4  ;;  %v102_v13 = vunpack.c.l.bf16 %v31_v0  ;;  %v504_v24 = vld [vmem:[%s2380_s3 + $0x40] sm:$0xff]  ;;  %v505_v49 = vld [vmem:[%s2380_s3 + $0x48] sm:$0xff]  ;;  %v34_v62 = vld [vmem:[%s2377_s0 + $0x50] sm:$0xff] }
  0x1f   :  { %1233 = vst [vmem:[#allocation2 + $0x48] sm:$0xff] %v1105_v6  ;;  %v1106_v14 = vmax.f32 %v978_v7, 0.0  ;;  %v979_v15 = vadd.f32 %v851_v8, %v379_v1  ;;  %v380_v16 = vadd.f32 %v1477_v31, %v240_v9  ;;  %v574_v17 = vunpack.c.l.bf16 %v503_v5  ;;  %v506_v3 = vld [vmem:[%s2380_s3 + $0x50] sm:$0xff] }
  0x20   :  { %v852_v19 = vadd.f32 %v1481_v33, %v712_v10  ;;  %v381_v22 = vadd.f32 %v1485_v35, %v241_v11  ;;  %v853_v23 = vadd.f32 %v1489_v37, %v713_v12  ;;  %v242_v20 = vmul.f32 %v1475_v30, %v102_v13 }
  0x21   :  { %1234 = vst [vmem:[#allocation2 + $0x50] sm:$0xff] %v1106_v14  ;;  %v1107_v21 = vmax.f32 %v979_v15, 0.0  ;;  %v714_v25 = vmul.f32 %v1479_v32, %v574_v17  ;;  %v103_v26 = vunpack.c.h.bf16 %v31_v0  ;;  %v575_v27 = vunpack.c.h.bf16 %v503_v5 }
  0x22   :  { %v980_v28 = vadd.f32 %v852_v19, %v380_v16  ;;  %v981_v29 = vadd.f32 %v853_v23, %v381_v22  ;;  %v382_v38 = vadd.f32 %v1477_v31, %v242_v20  ;;  %v104_v39 = vunpack.c.l.bf16 %v32_v18  ;;  %v35_v16 = vld [vmem:[%s2377_s0 + $0x58] sm:$0xff] }
  0x23   :  { %1235 = vst [vmem:[#allocation2 + $0x58] sm:$0xff] %v1107_v21  ;;  %v854_v40 = vadd.f32 %v1481_v33, %v714_v25  ;;  %v243_v41 = vmul.f32 %v1483_v34, %v103_v26  ;;  %v715_v42 = vmul.f32 %v1487_v36, %v575_v27  ;;  %v576_v43 = vunpack.c.l.bf16 %v504_v24  ;;  %v507_v25 = vld [vmem:[%s2380_s3 + $0x58] sm:$0xff] }
  0x24   :  { %v1108_v45 = vmax.f32 %v980_v28, 0.0  ;;  %v1109_v46 = vmax.f32 %v981_v29, 0.0  ;;  %v244_v47 = vmul.f32 %v1475_v30, %v104_v39  ;;  %v105_v48 = vunpack.c.h.bf16 %v32_v18 }
  0x25   :  { %v982_v50 = vadd.f32 %v854_v40, %v382_v38  ;;  %v383_v51 = vadd.f32 %v1485_v35, %v243_v41  ;;  %v855_v52 = vadd.f32 %v1489_v37, %v715_v42  ;;  %v716_v53 = vmul.f32 %v1479_v32, %v576_v43  ;;  %v36_v42 = vld [vmem:[%s2377_s0 + $0x60] sm:$0xff] }
  0x26   :  { %1236 = vst [vmem:[#allocation2 + $0x60] sm:$0xff] %v1108_v45  ;;  %1237 = vst [vmem:[#allocation2 + $0x68] sm:$0xff] %v1109_v46  ;;  %v384_v54 = vadd.f32 %v1477_v31, %v244_v47  ;;  %v245_v55 = vmul.f32 %v1483_v34, %v105_v48  ;;  %v577_v56 = vunpack.c.h.bf16 %v504_v24  ;;  %v106_v57 = vunpack.c.l.bf16 %v33_v44  ;;  %v508_v47 = vld [vmem:[%s2380_s3 + $0x60] sm:$0xff] }
  0x27   :  { %v1110_v58 = vmax.f32 %v982_v50, 0.0  ;;  %v983_v59 = vadd.f32 %v855_v52, %v383_v51  ;;  %v856_v60 = vadd.f32 %v1481_v33, %v716_v53  ;;  %v578_v61 = vunpack.c.l.bf16 %v505_v49 }
  0x28   :  { %v385_v63 = vadd.f32 %v1485_v35, %v245_v55  ;;  %v717_v0 = vmul.f32 %v1487_v36, %v577_v56  ;;  %v246_v1 = vmul.f32 %v1475_v30, %v106_v57  ;;  %v107_v2 = vunpack.c.h.bf16 %v33_v44 }
  0x29   :  { %1238 = vst [vmem:[#allocation2 + $0x70] sm:$0xff] %v1110_v58  ;;  %v1111_v4 = vmax.f32 %v983_v59, 0.0  ;;  %v984_v5 = vadd.f32 %v856_v60, %v384_v54  ;;  %v718_v6 = vmul.f32 %v1479_v32, %v578_v61  ;;  %v579_v7 = vunpack.c.h.bf16 %v505_v49  ;;  %v37_v60 = vld [vmem:[%s2377_s0 + $0x68] sm:$0xff] }
  0x2a   :  { %v857_v8 = vadd.f32 %v1489_v37, %v717_v0  ;;  %v386_v9 = vadd.f32 %v1477_v31, %v246_v1  ;;  %v247_v10 = vmul.f32 %v1483_v34, %v107_v2  ;;  %v108_v11 = vunpack.c.l.bf16 %v34_v62  ;;  %v509_v1 = vld [vmem:[%s2380_s3 + $0x68] sm:$0xff] }
  0x2b   :  { %1239 = vst [vmem:[#allocation2 + $0x78] sm:$0xff] %v1111_v4  ;;  %v1112_v12 = vmax.f32 %v984_v5, 0.0  ;;  %v858_v13 = vadd.f32 %v1481_v33, %v718_v6  ;;  %v719_v14 = vmul.f32 %v1487_v36, %v579_v7  ;;  %v580_v15 = vunpack.c.l.bf16 %v506_v3 }
  0x2c   :  { %v985_v17 = vadd.f32 %v857_v8, %v385_v63  ;;  %v387_v18 = vadd.f32 %v1485_v35, %v247_v10  ;;  %v248_v19 = vmul.f32 %v1475_v30, %v108_v11  ;;  %v109_v22 = vunpack.c.h.bf16 %v34_v62 }
  0x2d   :  { %1240 = vst [vmem:[#allocation2 + $0x80] sm:$0xff] %v1112_v12  ;;  %v986_v23 = vadd.f32 %v858_v13, %v386_v9  ;;  %v859_v20 = vadd.f32 %v1489_v37, %v719_v14  ;;  %v720_v24 = vmul.f32 %v1479_v32, %v580_v15  ;;  %v581_v21 = vunpack.c.h.bf16 %v506_v3  ;;  %v38_v14 = vld [vmem:[%s2377_s0 + $0x70] sm:$0xff] }
  0x2e   :  { %v1113_v26 = vmax.f32 %v985_v17, 0.0  ;;  %v388_v27 = vadd.f32 %v1477_v31, %v248_v19  ;;  %v249_v28 = vmul.f32 %v1483_v34, %v109_v22  ;;  %v110_v29 = vunpack.c.l.bf16 %v35_v16  ;;  %v510_v19 = vld [vmem:[%s2380_s3 + $0x70] sm:$0xff] }
  0x2f   :  { %v1114_v38 = vmax.f32 %v986_v23, 0.0  ;;  %v987_v39 = vadd.f32 %v859_v20, %v387_v18  ;;  %v860_v40 = vadd.f32 %v1481_v33, %v720_v24  ;;  %v721_v41 = vmul.f32 %v1487_v36, %v581_v21 }
  0x30   :  { %1241 = vst [vmem:[#allocation2 + $0x88] sm:$0xff] %v1113_v26  ;;  %v389_v43 = vadd.f32 %v1485_v35, %v249_v28  ;;  %v250_v44 = vmul.f32 %v1475_v30, %v110_v29  ;;  %v582_v45 = vunpack.c.l.bf16 %v507_v25  ;;  %v111_v46 = vunpack.c.h.bf16 %v35_v16 }
  0x31   :  { %1242 = vst [vmem:[#allocation2 + $0x90] sm:$0xff] %v1114_v38  ;;  %v1115_v48 = vmax.f32 %v987_v39, 0.0  ;;  %v988_v49 = vadd.f32 %v860_v40, %v388_v27  ;;  %v861_v50 = vadd.f32 %v1489_v37, %v721_v41  ;;  %v583_v51 = vunpack.c.h.bf16 %v507_v25  ;;  %v39_v40 = vld [vmem:[%s2377_s0 + $0x78] sm:$0xff] }
  0x32   :  { %v390_v52 = vadd.f32 %v1477_v31, %v250_v44  ;;  %v722_v53 = vmul.f32 %v1479_v32, %v582_v45  ;;  %v251_v54 = vmul.f32 %v1483_v34, %v111_v46  ;;  %v112_v55 = vunpack.c.l.bf16 %v36_v42  ;;  %v511_v45 = vld [vmem:[%s2380_s3 + $0x78] sm:$0xff] }
  0x33   :  { %1243 = vst [vmem:[#allocation2 + $0x98] sm:$0xff] %v1115_v48  ;;  %v1116_v56 = vmax.f32 %v988_v49, 0.0  ;;  %v989_v57 = vadd.f32 %v861_v50, %v389_v43  ;;  %v723_v58 = vmul.f32 %v1487_v36, %v583_v51  ;;  %v584_v59 = vunpack.c.l.bf16 %v508_v47 }
  0x34   :  { %v862_v61 = vadd.f32 %v1481_v33, %v722_v53  ;;  %v391_v62 = vadd.f32 %v1485_v35, %v251_v54  ;;  %v252_v63 = vmul.f32 %v1475_v30, %v112_v55  ;;  %v113_v0 = vunpack.c.h.bf16 %v36_v42 }
  0x35   :  { %1244 = vst [vmem:[#allocation2 + $0xa0] sm:$0xff] %v1116_v56  ;;  %v1117_v2 = vmax.f32 %v989_v57, 0.0  ;;  %v863_v3 = vadd.f32 %v1489_v37, %v723_v58  ;;  %v724_v4 = vmul.f32 %v1479_v32, %v584_v59  ;;  %v585_v5 = vunpack.c.h.bf16 %v508_v47  ;;  %v40_v58 = vld [vmem:[%s2377_s0 + $0x80] sm:$0xff] }
  0x36   :  { %v990_v6 = vadd.f32 %v862_v61, %v390_v52  ;;  %v392_v7 = vadd.f32 %v1477_v31, %v252_v63  ;;  %v253_v8 = vmul.f32 %v1483_v34, %v113_v0  ;;  %v114_v9 = vunpack.c.l.bf16 %v37_v60 }
  0x37   :  { %1245 = vst [vmem:[#allocation2 + $0xa8] sm:$0xff] %v1117_v2  ;;  %v991_v10 = vadd.f32 %v863_v3, %v391_v62  ;;  %v864_v11 = vadd.f32 %v1481_v33, %v724_v4  ;;  %v725_v12 = vmul.f32 %v1487_v36, %v585_v5  ;;  %v586_v13 = vunpack.c.l.bf16 %v509_v1  ;;  %v512_v3 = vld [vmem:[%s2380_s3 + $0x80] sm:$0xff] }
  0x38   :  { %v1118_v15 = vmax.f32 %v990_v6, 0.0  ;;  %v393_v16 = vadd.f32 %v1485_v35, %v253_v8  ;;  %v254_v17 = vmul.f32 %v1475_v30, %v114_v9  ;;  %v115_v18 = vunpack.c.h.bf16 %v37_v60 }
  0x39   :  { %v1119_v22 = vmax.f32 %v991_v10, 0.0  ;;  %v992_v23 = vadd.f32 %v864_v11, %v392_v7  ;;  %v865_v20 = vadd.f32 %v1489_v37, %v725_v12  ;;  %v726_v24 = vmul.f32 %v1479_v32, %v586_v13  ;;  %v41_v12 = vld [vmem:[%s2377_s0 + $0x88] sm:$0xff] }
  0x3a   :  { %1246 = vst [vmem:[#allocation2 + $0xb0] sm:$0xff] %v1118_v15  ;;  %v394_v21 = vadd.f32 %v1477_v31, %v254_v17  ;;  %v255_v25 = vmul.f32 %v1483_v34, %v115_v18  ;;  %v587_v26 = vunpack.c.h.bf16 %v509_v1  ;;  %v116_v27 = vunpack.c.l.bf16 %v38_v14  ;;  %v513_v17 = vld [vmem:[%s2380_s3 + $0x88] sm:$0xff] }
  0x3b   :  { %1247 = vst [vmem:[#allocation2 + $0xb8] sm:$0xff] %v1119_v22  ;;  %v1120_v28 = vmax.f32 %v992_v23, 0.0  ;;  %v993_v29 = vadd.f32 %v865_v20, %v393_v16  ;;  %v866_v38 = vadd.f32 %v1481_v33, %v726_v24  ;;  %v588_v39 = vunpack.c.l.bf16 %v510_v19 }
  0x3c   :  { %v395_v41 = vadd.f32 %v1485_v35, %v255_v25  ;;  %v727_v42 = vmul.f32 %v1487_v36, %v587_v26  ;;  %v256_v43 = vmul.f32 %v1475_v30, %v116_v27  ;;  %v117_v44 = vunpack.c.h.bf16 %v38_v14 }
  0x3d   :  { %1248 = vst [vmem:[#allocation2 + $0xc0] sm:$0xff] %v1120_v28  ;;  %v1121_v46 = vmax.f32 %v993_v29, 0.0  ;;  %v994_v47 = vadd.f32 %v866_v38, %v394_v21  ;;  %v728_v48 = vmul.f32 %v1479_v32, %v588_v39  ;;  %v589_v49 = vunpack.c.h.bf16 %v510_v19  ;;  %v42_v38 = vld [vmem:[%s2377_s0 + $0x90] sm:$0xff] }
  0x3e   :  { %v867_v50 = vadd.f32 %v1489_v37, %v727_v42  ;;  %v396_v51 = vadd.f32 %v1477_v31, %v256_v43  ;;  %v257_v52 = vmul.f32 %v1483_v34, %v117_v44  ;;  %v118_v53 = vunpack.c.l.bf16 %v39_v40  ;;  %v514_v43 = vld [vmem:[%s2380_s3 + $0x90] sm:$0xff] }
  0x3f   :  { %1249 = vst [vmem:[#allocation2 + $0xc8] sm:$0xff] %v1121_v46  ;;  %v1122_v54 = vmax.f32 %v994_v47, 0.0  ;;  %v868_v55 = vadd.f32 %v1481_v33, %v728_v48  ;;  %v729_v56 = vmul.f32 %v1487_v36, %v589_v49  ;;  %v590_v57 = vunpack.c.l.bf16 %v511_v45 }
  0x40   :  { %v995_v59 = vadd.f32 %v867_v50, %v395_v41  ;;  %v397_v60 = vadd.f32 %v1485_v35, %v257_v52  ;;  %v258_v61 = vmul.f32 %v1475_v30, %v118_v53  ;;  %v119_v62 = vunpack.c.h.bf16 %v39_v40 }
  0x41   :  { %1250 = vst [vmem:[#allocation2 + $0xd0] sm:$0xff] %v1122_v54  ;;  %v996_v63 = vadd.f32 %v868_v55, %v396_v51  ;;  %v869_v0 = vadd.f32 %v1489_v37, %v729_v56  ;;  %v730_v1 = vmul.f32 %v1479_v32, %v590_v57  ;;  %v591_v2 = vunpack.c.h.bf16 %v511_v45  ;;  %v43_v56 = vld [vmem:[%s2377_s0 + $0x98] sm:$0xff] }
  0x42   :  { %v1123_v4 = vmax.f32 %v995_v59, 0.0  ;;  %v398_v5 = vadd.f32 %v1477_v31, %v258_v61  ;;  %v259_v6 = vmul.f32 %v1483_v34, %v119_v62  ;;  %v120_v7 = vunpack.c.l.bf16 %v40_v58  ;;  %v515_v61 = vld [vmem:[%s2380_s3 + $0x98] sm:$0xff] }
  0x43   :  { %v1124_v8 = vmax.f32 %v996_v63, 0.0  ;;  %v997_v9 = vadd.f32 %v869_v0, %v397_v60  ;;  %v870_v10 = vadd.f32 %v1481_v33, %v730_v1  ;;  %v731_v11 = vmul.f32 %v1487_v36, %v591_v2 }
  0x44   :  { %1251 = vst [vmem:[#allocation2 + $0xd8] sm:$0xff] %v1123_v4  ;;  %v399_v13 = vadd.f32 %v1485_v35, %v259_v6  ;;  %v260_v14 = vmul.f32 %v1475_v30, %v120_v7  ;;  %v592_v15 = vunpack.c.l.bf16 %v512_v3  ;;  %v121_v16 = vunpack.c.h.bf16 %v40_v58 }
  0x45   :  { %1252 = vst [vmem:[#allocation2 + $0xe0] sm:$0xff] %v1124_v8  ;;  %v1125_v18 = vmax.f32 %v997_v9, 0.0  ;;  %v998_v19 = vadd.f32 %v870_v10, %v398_v5  ;;  %v871_v22 = vadd.f32 %v1489_v37, %v731_v11  ;;  %v593_v23 = vunpack.c.h.bf16 %v512_v3  ;;  %v44_v10 = vld [vmem:[%s2377_s0 + $0xa0] sm:$0xff] }
  0x46   :  { %v400_v20 = vadd.f32 %v1477_v31, %v260_v14  ;;  %v732_v24 = vmul.f32 %v1479_v32, %v592_v15  ;;  %v261_v21 = vmul.f32 %v1483_v34, %v121_v16  ;;  %v122_v25 = vunpack.c.l.bf16 %v41_v12  ;;  %v516_v15 = vld [vmem:[%s2380_s3 + $0xa0] sm:$0xff] }
  0x47   :  { %1253 = vst [vmem:[#allocation2 + $0xe8] sm:$0xff] %v1125_v18  ;;  %v1126_v26 = vmax.f32 %v998_v19, 0.0  ;;  %v999_v27 = vadd.f32 %v871_v22, %v399_v13  ;;  %v733_v28 = vmul.f32 %v1487_v36, %v593_v23  ;;  %v594_v29 = vunpack.c.l.bf16 %v513_v17 }
  0x48   :  { %v872_v39 = vadd.f32 %v1481_v33, %v732_v24  ;;  %v401_v40 = vadd.f32 %v1485_v35, %v261_v21  ;;  %v262_v41 = vmul.f32 %v1475_v30, %v122_v25  ;;  %v123_v42 = vunpack.c.h.bf16 %v41_v12 }
  0x49   :  { %1254 = vst [vmem:[#allocation2 + $0xf0] sm:$0xff] %v1126_v26  ;;  %v1127_v44 = vmax.f32 %v999_v27, 0.0  ;;  %v873_v45 = vadd.f32 %v1489_v37, %v733_v28  ;;  %v734_v46 = vmul.f32 %v1479_v32, %v594_v29  ;;  %v595_v47 = vunpack.c.h.bf16 %v513_v17  ;;  %v45_v28 = vld [vmem:[%s2377_s0 + $0xa8] sm:$0xff] }
  0x4a   :  { %v1000_v48 = vadd.f32 %v872_v39, %v400_v20  ;;  %v402_v49 = vadd.f32 %v1477_v31, %v262_v41  ;;  %v263_v50 = vmul.f32 %v1483_v34, %v123_v42  ;;  %v124_v51 = vunpack.c.l.bf16 %v42_v38 }
  0x4b   :  { %1255 = vst [vmem:[#allocation2 + $0xf8] sm:$0xff] %v1127_v44  ;;  %v1001_v52 = vadd.f32 %v873_v45, %v401_v40  ;;  %v874_v53 = vadd.f32 %v1481_v33, %v734_v46  ;;  %v735_v54 = vmul.f32 %v1487_v36, %v595_v47  ;;  %v596_v55 = vunpack.c.l.bf16 %v514_v43  ;;  %v517_v45 = vld [vmem:[%s2380_s3 + $0xa8] sm:$0xff] }
  0x4c   :  { %v1128_v57 = vmax.f32 %v1000_v48, 0.0  ;;  %v403_v58 = vadd.f32 %v1485_v35, %v263_v50  ;;  %v264_v59 = vmul.f32 %v1475_v30, %v124_v51  ;;  %v125_v60 = vunpack.c.h.bf16 %v42_v38 }
  0x4d   :  { %v1129_v62 = vmax.f32 %v1001_v52, 0.0  ;;  %v1002_v63 = vadd.f32 %v874_v53, %v402_v49  ;;  %v875_v0 = vadd.f32 %v1489_v37, %v735_v54  ;;  %v736_v1 = vmul.f32 %v1479_v32, %v596_v55  ;;  %v46_v54 = vld [vmem:[%s2377_s0 + $0xb0] sm:$0xff] }
  0x4e   :  { %1256 = vst [vmem:[#allocation2 + $0x100] sm:$0xff] %v1128_v57  ;;  %v404_v2 = vadd.f32 %v1477_v31, %v264_v59  ;;  %v265_v3 = vmul.f32 %v1483_v34, %v125_v60  ;;  %v597_v4 = vunpack.c.h.bf16 %v514_v43  ;;  %v126_v5 = vunpack.c.l.bf16 %v43_v56  ;;  %v518_v59 = vld [vmem:[%s2380_s3 + $0xb0] sm:$0xff] }
  0x4f   :  { %1257 = vst [vmem:[#allocation2 + $0x108] sm:$0xff] %v1129_v62  ;;  %v1130_v6 = vmax.f32 %v1002_v63, 0.0  ;;  %v1003_v7 = vadd.f32 %v875_v0, %v403_v58  ;;  %v876_v8 = vadd.f32 %v1481_v33, %v736_v1  ;;  %v598_v9 = vunpack.c.l.bf16 %v515_v61 }
  0x50   :  { %v405_v11 = vadd.f32 %v1485_v35, %v265_v3  ;;  %v737_v12 = vmul.f32 %v1487_v36, %v597_v4  ;;  %v266_v13 = vmul.f32 %v1475_v30, %v126_v5  ;;  %v127_v14 = vunpack.c.h.bf16 %v43_v56 }
  0x51   :  { %1258 = vst [vmem:[#allocation2 + $0x110] sm:$0xff] %v1130_v6  ;;  %v1131_v16 = vmax.f32 %v1003_v7, 0.0  ;;  %v1004_v17 = vadd.f32 %v876_v8, %v404_v2  ;;  %v738_v18 = vmul.f32 %v1479_v32, %v598_v9  ;;  %v599_v19 = vunpack.c.h.bf16 %v515_v61  ;;  %v47_v8 = vld [vmem:[%s2377_s0 + $0xb8] sm:$0xff] }
  0x52   :  { %v877_v22 = vadd.f32 %v1489_v37, %v737_v12  ;;  %v406_v23 = vadd.f32 %v1477_v31, %v266_v13  ;;  %v267_v20 = vmul.f32 %v1483_v34, %v127_v14  ;;  %v128_v24 = vunpack.c.l.bf16 %v44_v10  ;;  %v519_v13 = vld [vmem:[%s2380_s3 + $0xb8] sm:$0xff] }
  0x53   :  { %1259 = vst [vmem:[#allocation2 + $0x118] sm:$0xff] %v1131_v16  ;;  %v1132_v21 = vmax.f32 %v1004_v17, 0.0  ;;  %v878_v25 = vadd.f32 %v1481_v33, %v738_v18  ;;  %v739_v26 = vmul.f32 %v1487_v36, %v599_v19  ;;  %v600_v27 = vunpack.c.l.bf16 %v516_v15 }
  0x54   :  { %v1005_v29 = vadd.f32 %v877_v22, %v405_v11  ;;  %v407_v38 = vadd.f32 %v1485_v35, %v267_v20  ;;  %v268_v39 = vmul.f32 %v1475_v30, %v128_v24  ;;  %v129_v40 = vunpack.c.h.bf16 %v44_v10 }
  0x55   :  { %1260 = vst [vmem:[#allocation2 + $0x120] sm:$0xff] %v1132_v21  ;;  %v1006_v41 = vadd.f32 %v878_v25, %v406_v23  ;;  %v879_v42 = vadd.f32 %v1489_v37, %v739_v26  ;;  %v740_v43 = vmul.f32 %v1479_v32, %v600_v27  ;;  %v601_v44 = vunpack.c.h.bf16 %v516_v15  ;;  %v48_v26 = vld [vmem:[%s2377_s0 + $0xc0] sm:$0xff] }
  0x56   :  { %v1133_v46 = vmax.f32 %v1005_v29, 0.0  ;;  %v408_v47 = vadd.f32 %v1477_v31, %v268_v39  ;;  %v269_v48 = vmul.f32 %v1483_v34, %v129_v40  ;;  %v130_v49 = vunpack.c.l.bf16 %v45_v28  ;;  %v520_v39 = vld [vmem:[%s2380_s3 + $0xc0] sm:$0xff] }
  0x57   :  { %v1134_v50 = vmax.f32 %v1006_v41, 0.0  ;;  %v1007_v51 = vadd.f32 %v879_v42, %v407_v38  ;;  %v880_v52 = vadd.f32 %v1481_v33, %v740_v43  ;;  %v741_v53 = vmul.f32 %v1487_v36, %v601_v44 }
  0x58   :  { %1261 = vst [vmem:[#allocation2 + $0x128] sm:$0xff] %v1133_v46  ;;  %v409_v55 = vadd.f32 %v1485_v35, %v269_v48  ;;  %v270_v56 = vmul.f32 %v1475_v30, %v130_v49  ;;  %v602_v57 = vunpack.c.l.bf16 %v517_v45  ;;  %v131_v58 = vunpack.c.h.bf16 %v45_v28 }
  0x59   :  { %1262 = vst [vmem:[#allocation2 + $0x130] sm:$0xff] %v1134_v50  ;;  %v1135_v60 = vmax.f32 %v1007_v51, 0.0  ;;  %v1008_v61 = vadd.f32 %v880_v52, %v408_v47  ;;  %v881_v62 = vadd.f32 %v1489_v37, %v741_v53  ;;  %v603_v63 = vunpack.c.h.bf16 %v517_v45  ;;  %v49_v52 = vld [vmem:[%s2377_s0 + $0xc8] sm:$0xff] }
  0x5a   :  { %v410_v0 = vadd.f32 %v1477_v31, %v270_v56  ;;  %v742_v1 = vmul.f32 %v1479_v32, %v602_v57  ;;  %v271_v2 = vmul.f32 %v1483_v34, %v131_v58  ;;  %v132_v3 = vunpack.c.l.bf16 %v46_v54  ;;  %v521_v57 = vld [vmem:[%s2380_s3 + $0xc8] sm:$0xff] }
  0x5b   :  { %1263 = vst [vmem:[#allocation2 + $0x138] sm:$0xff] %v1135_v60  ;;  %v1136_v4 = vmax.f32 %v1008_v61, 0.0  ;;  %v1009_v5 = vadd.f32 %v881_v62, %v409_v55  ;;  %v743_v6 = vmul.f32 %v1487_v36, %v603_v63  ;;  %v604_v7 = vunpack.c.l.bf16 %v518_v59 }
  0x5c   :  { %v882_v9 = vadd.f32 %v1481_v33, %v742_v1  ;;  %v411_v10 = vadd.f32 %v1485_v35, %v271_v2  ;;  %v272_v11 = vmul.f32 %v1475_v30, %v132_v3  ;;  %v133_v12 = vunpack.c.h.bf16 %v46_v54 }
  0x5d   :  { %1264 = vst [vmem:[#allocation2 + $0x140] sm:$0xff] %v1136_v4  ;;  %v1137_v14 = vmax.f32 %v1009_v5, 0.0  ;;  %v883_v15 = vadd.f32 %v1489_v37, %v743_v6  ;;  %v744_v16 = vmul.f32 %v1479_v32, %v604_v7  ;;  %v605_v17 = vunpack.c.h.bf16 %v518_v59  ;;  %v50_v6 = vld [vmem:[%s2377_s0 + $0xd0] sm:$0xff] }
  0x5e   :  { %v1010_v18 = vadd.f32 %v882_v9, %v410_v0  ;;  %v412_v19 = vadd.f32 %v1477_v31, %v272_v11  ;;  %v273_v22 = vmul.f32 %v1483_v34, %v133_v12  ;;  %v134_v23 = vunpack.c.l.bf16 %v47_v8 }
  0x5f   :  { %1265 = vst [vmem:[#allocation2 + $0x148] sm:$0xff] %v1137_v14  ;;  %v1011_v20 = vadd.f32 %v883_v15, %v411_v10  ;;  %v884_v24 = vadd.f32 %v1481_v33, %v744_v16  ;;  %v745_v21 = vmul.f32 %v1487_v36, %v605_v17  ;;  %v606_v25 = vunpack.c.l.bf16 %v519_v13  ;;  %v522_v15 = vld [vmem:[%s2380_s3 + $0xd0] sm:$0xff] }
  0x60   :  { %v1138_v27 = vmax.f32 %v1010_v18, 0.0  ;;  %v413_v28 = vadd.f32 %v1485_v35, %v273_v22  ;;  %v274_v29 = vmul.f32 %v1475_v30, %v134_v23  ;;  %v135_v38 = vunpack.c.h.bf16 %v47_v8 }
  0x61   :  { %v1139_v40 = vmax.f32 %v1011_v20, 0.0  ;;  %v1012_v41 = vadd.f32 %v884_v24, %v412_v19  ;;  %v885_v42 = vadd.f32 %v1489_v37, %v745_v21  ;;  %v746_v43 = vmul.f32 %v1479_v32, %v606_v25  ;;  %v51_v21 = vld [vmem:[%s2377_s0 + $0xd8] sm:$0xff] }
  0x62   :  { %1266 = vst [vmem:[#allocation2 + $0x150] sm:$0xff] %v1138_v27  ;;  %v414_v44 = vadd.f32 %v1477_v31, %v274_v29  ;;  %v275_v45 = vmul.f32 %v1483_v34, %v135_v38  ;;  %v607_v46 = vunpack.c.h.bf16 %v519_v13  ;;  %v136_v47 = vunpack.c.l.bf16 %v48_v26  ;;  %v523_v29 = vld [vmem:[%s2380_s3 + $0xd8] sm:$0xff] }
  0x63   :  { %1267 = vst [vmem:[#allocation2 + $0x158] sm:$0xff] %v1139_v40  ;;  %v1140_v48 = vmax.f32 %v1012_v41, 0.0  ;;  %v1013_v49 = vadd.f32 %v885_v42, %v413_v28  ;;  %v886_v50 = vadd.f32 %v1481_v33, %v746_v43  ;;  %v608_v51 = vunpack.c.l.bf16 %v520_v39 }
  0x64   :  { %v415_v53 = vadd.f32 %v1485_v35, %v275_v45  ;;  %v747_v54 = vmul.f32 %v1487_v36, %v607_v46  ;;  %v276_v55 = vmul.f32 %v1475_v30, %v136_v47  ;;  %v137_v56 = vunpack.c.h.bf16 %v48_v26 }
  0x65   :  { %1268 = vst [vmem:[#allocation2 + $0x160] sm:$0xff] %v1140_v48  ;;  %v1141_v58 = vmax.f32 %v1013_v49, 0.0  ;;  %v1014_v59 = vadd.f32 %v886_v50, %v414_v44  ;;  %v748_v60 = vmul.f32 %v1479_v32, %v608_v51  ;;  %v609_v61 = vunpack.c.h.bf16 %v520_v39  ;;  %v52_v50 = vld [vmem:[%s2377_s0 + $0xe0] sm:$0xff] }
  0x66   :  { %v887_v62 = vadd.f32 %v1489_v37, %v747_v54  ;;  %v416_v63 = vadd.f32 %v1477_v31, %v276_v55  ;;  %v277_v0 = vmul.f32 %v1483_v34, %v137_v56  ;;  %v138_v1 = vunpack.c.l.bf16 %v49_v52  ;;  %v524_v55 = vld [vmem:[%s2380_s3 + $0xe0] sm:$0xff] }
  0x67   :  { %1269 = vst [vmem:[#allocation2 + $0x168] sm:$0xff] %v1141_v58  ;;  %v1142_v2 = vmax.f32 %v1014_v59, 0.0  ;;  %v888_v3 = vadd.f32 %v1481_v33, %v748_v60  ;;  %v749_v4 = vmul.f32 %v1487_v36, %v609_v61  ;;  %v610_v5 = vunpack.c.l.bf16 %v521_v57 }
  0x68   :  { %v1015_v7 = vadd.f32 %v887_v62, %v415_v53  ;;  %v417_v8 = vadd.f32 %v1485_v35, %v277_v0  ;;  %v278_v9 = vmul.f32 %v1475_v30, %v138_v1  ;;  %v139_v10 = vunpack.c.h.bf16 %v49_v52 }
  0x69   :  { %1270 = vst [vmem:[#allocation2 + $0x170] sm:$0xff] %v1142_v2  ;;  %v1016_v11 = vadd.f32 %v888_v3, %v416_v63  ;;  %v889_v12 = vadd.f32 %v1489_v37, %v749_v4  ;;  %v750_v13 = vmul.f32 %v1479_v32, %v610_v5  ;;  %v611_v14 = vunpack.c.h.bf16 %v521_v57  ;;  %v53_v4 = vld [vmem:[%s2377_s0 + $0xe8] sm:$0xff] }
  0x6a   :  { %v1143_v16 = vmax.f32 %v1015_v7, 0.0  ;;  %v418_v17 = vadd.f32 %v1477_v31, %v278_v9  ;;  %v279_v18 = vmul.f32 %v1483_v34, %v139_v10  ;;  %v140_v19 = vunpack.c.l.bf16 %v50_v6  ;;  %v525_v9 = vld [vmem:[%s2380_s3 + $0xe8] sm:$0xff] }
  0x6b   :  { %v1144_v22 = vmax.f32 %v1016_v11, 0.0  ;;  %v1017_v23 = vadd.f32 %v889_v12, %v417_v8  ;;  %v890_v20 = vadd.f32 %v1481_v33, %v750_v13  ;;  %v751_v24 = vmul.f32 %v1487_v36, %v611_v14 }
  0x6c   :  { %1271 = vst [vmem:[#allocation2 + $0x178] sm:$0xff] %v1143_v16  ;;  %v419_v25 = vadd.f32 %v1485_v35, %v279_v18  ;;  %v280_v26 = vmul.f32 %v1475_v30, %v140_v19  ;;  %v612_v27 = vunpack.c.l.bf16 %v522_v15  ;;  %v141_v28 = vunpack.c.h.bf16 %v50_v6 }
  0x6d   :  { %1272 = vst [vmem:[#allocation2 + $0x180] sm:$0xff] %v1144_v22  ;;  %v1145_v38 = vmax.f32 %v1017_v23, 0.0  ;;  %v1018_v39 = vadd.f32 %v890_v20, %v418_v17  ;;  %v891_v40 = vadd.f32 %v1489_v37, %v751_v24  ;;  %v613_v41 = vunpack.c.h.bf16 %v522_v15  ;;  %v54_v20 = vld [vmem:[%s2377_s0 + $0xf0] sm:$0xff] }
  0x6e   :  { %v420_v42 = vadd.f32 %v1477_v31, %v280_v26  ;;  %v752_v43 = vmul.f32 %v1479_v32, %v612_v27  ;;  %v281_v44 = vmul.f32 %v1483_v34, %v141_v28  ;;  %v142_v45 = vunpack.c.l.bf16 %v51_v21  ;;  %v526_v27 = vld [vmem:[%s2380_s3 + $0xf0] sm:$0xff] }
  0x6f   :  { %1273 = vst [vmem:[#allocation2 + $0x188] sm:$0xff] %v1145_v38  ;;  %v1146_v46 = vmax.f32 %v1018_v39, 0.0  ;;  %v1019_v47 = vadd.f32 %v891_v40, %v419_v25  ;;  %v753_v48 = vmul.f32 %v1487_v36, %v613_v41  ;;  %v614_v49 = vunpack.c.l.bf16 %v523_v29 }
  0x70   :  { %v892_v51 = vadd.f32 %v1481_v33, %v752_v43  ;;  %v421_v52 = vadd.f32 %v1485_v35, %v281_v44  ;;  %v282_v53 = vmul.f32 %v1475_v30, %v142_v45  ;;  %v143_v54 = vunpack.c.h.bf16 %v51_v21 }
  0x71   :  { %1274 = vst [vmem:[#allocation2 + $0x190] sm:$0xff] %v1146_v46  ;;  %v1147_v56 = vmax.f32 %v1019_v47, 0.0  ;;  %v893_v57 = vadd.f32 %v1489_v37, %v753_v48  ;;  %v754_v58 = vmul.f32 %v1479_v32, %v614_v49  ;;  %v615_v59 = vunpack.c.h.bf16 %v523_v29  ;;  %v55_v48 = vld [vmem:[%s2377_s0 + $0xf8] sm:$0xff] }
  0x72   :  { %v1020_v60 = vadd.f32 %v892_v51, %v420_v42  ;;  %v422_v61 = vadd.f32 %v1477_v31, %v282_v53  ;;  %v283_v62 = vmul.f32 %v1483_v34, %v143_v54  ;;  %v144_v63 = vunpack.c.l.bf16 %v52_v50 }
  0x73   :  { %1275 = vst [vmem:[#allocation2 + $0x198] sm:$0xff] %v1147_v56  ;;  %v1021_v0 = vadd.f32 %v893_v57, %v421_v52  ;;  %v894_v1 = vadd.f32 %v1481_v33, %v754_v58  ;;  %v755_v2 = vmul.f32 %v1487_v36, %v615_v59  ;;  %v616_v3 = vunpack.c.l.bf16 %v524_v55  ;;  %v527_v57 = vld [vmem:[%s2380_s3 + $0xf8] sm:$0xff] }
  0x74   :  { %v1148_v5 = vmax.f32 %v1020_v60, 0.0  ;;  %v423_v6 = vadd.f32 %v1485_v35, %v283_v62  ;;  %v284_v7 = vmul.f32 %v1475_v30, %v144_v63  ;;  %v145_v8 = vunpack.c.h.bf16 %v52_v50 }
  0x75   :  { %v1149_v10 = vmax.f32 %v1021_v0, 0.0  ;;  %v1022_v11 = vadd.f32 %v894_v1, %v422_v61  ;;  %v895_v12 = vadd.f32 %v1489_v37, %v755_v2  ;;  %v756_v13 = vmul.f32 %v1479_v32, %v616_v3  ;;  %v56_v2 = vld [vmem:[%s2377_s0 + $0x100] sm:$0xff] }
  0x76   :  { %1276 = vst [vmem:[#allocation2 + $0x1a0] sm:$0xff] %v1148_v5  ;;  %v424_v14 = vadd.f32 %v1477_v31, %v284_v7  ;;  %v285_v15 = vmul.f32 %v1483_v34, %v145_v8  ;;  %v617_v16 = vunpack.c.h.bf16 %v524_v55  ;;  %v146_v17 = vunpack.c.l.bf16 %v53_v4  ;;  %v528_v7 = vld [vmem:[%s2380_s3 + $0x100] sm:$0xff] }
  0x77   :  { %1277 = vst [vmem:[#allocation2 + $0x1a8] sm:$0xff] %v1149_v10  ;;  %v1150_v18 = vmax.f32 %v1022_v11, 0.0  ;;  %v1023_v19 = vadd.f32 %v895_v12, %v423_v6  ;;  %v896_v22 = vadd.f32 %v1481_v33, %v756_v13  ;;  %v618_v23 = vunpack.c.l.bf16 %v525_v9 }
  0x78   :  { %v425_v24 = vadd.f32 %v1485_v35, %v285_v15  ;;  %v757_v21 = vmul.f32 %v1487_v36, %v617_v16  ;;  %v286_v25 = vmul.f32 %v1475_v30, %v146_v17  ;;  %v147_v26 = vunpack.c.h.bf16 %v53_v4 }
  0x79   :  { %1278 = vst [vmem:[#allocation2 + $0x1b0] sm:$0xff] %v1150_v18  ;;  %v1151_v28 = vmax.f32 %v1023_v19, 0.0  ;;  %v1024_v29 = vadd.f32 %v896_v22, %v424_v14  ;;  %v758_v38 = vmul.f32 %v1479_v32, %v618_v23  ;;  %v619_v39 = vunpack.c.h.bf16 %v525_v9  ;;  %v57_v22 = vld [vmem:[%s2377_s0 + $0x108] sm:$0xff] }
  0x7a   :  { %v897_v40 = vadd.f32 %v1489_v37, %v757_v21  ;;  %v426_v41 = vadd.f32 %v1477_v31, %v286_v25  ;;  %v287_v42 = vmul.f32 %v1483_v34, %v147_v26  ;;  %v148_v43 = vunpack.c.l.bf16 %v54_v20  ;;  %v529_v25 = vld [vmem:[%s2380_s3 + $0x108] sm:$0xff] }
  0x7b   :  { %1279 = vst [vmem:[#allocation2 + $0x1b8] sm:$0xff] %v1151_v28  ;;  %v1152_v44 = vmax.f32 %v1024_v29, 0.0  ;;  %v898_v45 = vadd.f32 %v1481_v33, %v758_v38  ;;  %v759_v46 = vmul.f32 %v1487_v36, %v619_v39  ;;  %v620_v47 = vunpack.c.l.bf16 %v526_v27 }
  0x7c   :  { %v1025_v49 = vadd.f32 %v897_v40, %v425_v24  ;;  %v427_v50 = vadd.f32 %v1485_v35, %v287_v42  ;;  %v288_v51 = vmul.f32 %v1475_v30, %v148_v43  ;;  %v149_v52 = vunpack.c.h.bf16 %v54_v20 }
  0x7d   :  { %1280 = vst [vmem:[#allocation2 + $0x1c0] sm:$0xff] %v1152_v44  ;;  %v1026_v53 = vadd.f32 %v898_v45, %v426_v41  ;;  %v899_v54 = vadd.f32 %v1489_v37, %v759_v46  ;;  %v760_v55 = vmul.f32 %v1479_v32, %v620_v47  ;;  %v621_v56 = vunpack.c.h.bf16 %v526_v27  ;;  %v58_v46 = vld [vmem:[%s2377_s0 + $0x110] sm:$0xff] }
  0x7e   :  { %v1153_v58 = vmax.f32 %v1025_v49, 0.0  ;;  %v428_v59 = vadd.f32 %v1477_v31, %v288_v51  ;;  %v289_v60 = vmul.f32 %v1483_v34, %v149_v52  ;;  %v150_v61 = vunpack.c.l.bf16 %v55_v48  ;;  %v530_v51 = vld [vmem:[%s2380_s3 + $0x110] sm:$0xff] }
  0x7f   :  { %v1154_v62 = vmax.f32 %v1026_v53, 0.0  ;;  %v1027_v63 = vadd.f32 %v899_v54, %v427_v50  ;;  %v900_v0 = vadd.f32 %v1481_v33, %v760_v55  ;;  %v761_v1 = vmul.f32 %v1487_v36, %v621_v56 }
  0x80   :  { %1281 = vst [vmem:[#allocation2 + $0x1c8] sm:$0xff] %v1153_v58  ;;  %v429_v3 = vadd.f32 %v1485_v35, %v289_v60  ;;  %v290_v4 = vmul.f32 %v1475_v30, %v150_v61  ;;  %v622_v5 = vunpack.c.l.bf16 %v527_v57  ;;  %v151_v6 = vunpack.c.h.bf16 %v55_v48 }
  0x81   :  { %1282 = vst [vmem:[#allocation2 + $0x1d0] sm:$0xff] %v1154_v62  ;;  %v1155_v8 = vmax.f32 %v1027_v63, 0.0  ;;  %v1028_v9 = vadd.f32 %v900_v0, %v428_v59  ;;  %v901_v10 = vadd.f32 %v1489_v37, %v761_v1  ;;  %v623_v11 = vunpack.c.h.bf16 %v527_v57  ;;  %v59_v0 = vld [vmem:[%s2377_s0 + $0x118] sm:$0xff] }
  0x82   :  { %v430_v12 = vadd.f32 %v1477_v31, %v290_v4  ;;  %v762_v13 = vmul.f32 %v1479_v32, %v622_v5  ;;  %v291_v14 = vmul.f32 %v1483_v34, %v151_v6  ;;  %v152_v15 = vunpack.c.l.bf16 %v56_v2  ;;  %v531_v5 = vld [vmem:[%s2380_s3 + $0x118] sm:$0xff] }
  0x83   :  { %1283 = vst [vmem:[#allocation2 + $0x1d8] sm:$0xff] %v1155_v8  ;;  %v1156_v16 = vmax.f32 %v1028_v9, 0.0  ;;  %v1029_v17 = vadd.f32 %v901_v10, %v429_v3  ;;  %v763_v18 = vmul.f32 %v1487_v36, %v623_v11  ;;  %v624_v19 = vunpack.c.l.bf16 %v528_v7 }
  0x84   :  { %v902_v23 = vadd.f32 %v1481_v33, %v762_v13  ;;  %v431_v20 = vadd.f32 %v1485_v35, %v291_v14  ;;  %v292_v24 = vmul.f32 %v1475_v30, %v152_v15  ;;  %v153_v21 = vunpack.c.h.bf16 %v56_v2 }
  0x85   :  { %1284 = vst [vmem:[#allocation2 + $0x1e0] sm:$0xff] %v1156_v16  ;;  %v1157_v26 = vmax.f32 %v1029_v17, 0.0  ;;  %v903_v27 = vadd.f32 %v1489_v37, %v763_v18  ;;  %v764_v28 = vmul.f32 %v1479_v32, %v624_v19  ;;  %v625_v29 = vunpack.c.h.bf16 %v528_v7  ;;  %v60_v18 = vld [vmem:[%s2377_s0 + $0x120] sm:$0xff] }
  0x86   :  { %v1030_v38 = vadd.f32 %v902_v23, %v430_v12  ;;  %v432_v39 = vadd.f32 %v1477_v31, %v292_v24  ;;  %v293_v40 = vmul.f32 %v1483_v34, %v153_v21  ;;  %v154_v41 = vunpack.c.l.bf16 %v57_v22 }
  0x87   :  { %1285 = vst [vmem:[#allocation2 + $0x1e8] sm:$0xff] %v1157_v26  ;;  %v1031_v42 = vadd.f32 %v903_v27, %v431_v20  ;;  %v904_v43 = vadd.f32 %v1481_v33, %v764_v28  ;;  %v765_v44 = vmul.f32 %v1487_v36, %v625_v29  ;;  %v626_v45 = vunpack.c.l.bf16 %v529_v25  ;;  %v532_v27 = vld [vmem:[%s2380_s3 + $0x120] sm:$0xff] }
  0x88   :  { %v1158_v47 = vmax.f32 %v1030_v38, 0.0  ;;  %v433_v48 = vadd.f32 %v1485_v35, %v293_v40  ;;  %v294_v49 = vmul.f32 %v1475_v30, %v154_v41  ;;  %v155_v50 = vunpack.c.h.bf16 %v57_v22 }
  0x89   :  { %v1159_v52 = vmax.f32 %v1031_v42, 0.0  ;;  %v1032_v53 = vadd.f32 %v904_v43, %v432_v39  ;;  %v905_v54 = vadd.f32 %v1489_v37, %v765_v44  ;;  %v766_v55 = vmul.f32 %v1479_v32, %v626_v45  ;;  %v61_v44 = vld [vmem:[%s2377_s0 + $0x128] sm:$0xff] }
  0x8a   :  { %1286 = vst [vmem:[#allocation2 + $0x1f0] sm:$0xff] %v1158_v47  ;;  %v434_v56 = vadd.f32 %v1477_v31, %v294_v49  ;;  %v295_v57 = vmul.f32 %v1483_v34, %v155_v50  ;;  %v627_v58 = vunpack.c.h.bf16 %v529_v25  ;;  %v156_v59 = vunpack.c.l.bf16 %v58_v46  ;;  %v533_v49 = vld [vmem:[%s2380_s3 + $0x128] sm:$0xff] }
  0x8b   :  { %1287 = vst [vmem:[#allocation2 + $0x1f8] sm:$0xff] %v1159_v52  ;;  %v1160_v60 = vmax.f32 %v1032_v53, 0.0  ;;  %v1033_v61 = vadd.f32 %v905_v54, %v433_v48  ;;  %v906_v62 = vadd.f32 %v1481_v33, %v766_v55  ;;  %v628_v63 = vunpack.c.l.bf16 %v530_v51 }
  0x8c   :  { %v435_v1 = vadd.f32 %v1485_v35, %v295_v57  ;;  %v767_v2 = vmul.f32 %v1487_v36, %v627_v58  ;;  %v296_v3 = vmul.f32 %v1475_v30, %v156_v59  ;;  %v157_v4 = vunpack.c.h.bf16 %v58_v46 }
  0x8d   :  { %1288 = vst [vmem:[#allocation2 + $0x200] sm:$0xff] %v1160_v60  ;;  %v1161_v6 = vmax.f32 %v1033_v61, 0.0  ;;  %v1034_v7 = vadd.f32 %v906_v62, %v434_v56  ;;  %v768_v8 = vmul.f32 %v1479_v32, %v628_v63  ;;  %v629_v9 = vunpack.c.h.bf16 %v530_v51  ;;  %v62_v62 = vld [vmem:[%s2377_s0 + $0x130] sm:$0xff] }
  0x8e   :  { %v907_v10 = vadd.f32 %v1489_v37, %v767_v2  ;;  %v436_v11 = vadd.f32 %v1477_v31, %v296_v3  ;;  %v297_v12 = vmul.f32 %v1483_v34, %v157_v4  ;;  %v158_v13 = vunpack.c.l.bf16 %v59_v0  ;;  %v534_v3 = vld [vmem:[%s2380_s3 + $0x130] sm:$0xff] }
  0x8f   :  { %1289 = vst [vmem:[#allocation2 + $0x208] sm:$0xff] %v1161_v6  ;;  %v1162_v14 = vmax.f32 %v1034_v7, 0.0  ;;  %v908_v15 = vadd.f32 %v1481_v33, %v768_v8  ;;  %v769_v16 = vmul.f32 %v1487_v36, %v629_v9  ;;  %v630_v17 = vunpack.c.l.bf16 %v531_v5 }
  0x90   :  { %v1035_v19 = vadd.f32 %v907_v10, %v435_v1  ;;  %v437_v22 = vadd.f32 %v1485_v35, %v297_v12  ;;  %v298_v23 = vmul.f32 %v1475_v30, %v158_v13  ;;  %v159_v20 = vunpack.c.h.bf16 %v59_v0 }
  0x91   :  { %1290 = vst [vmem:[#allocation2 + $0x210] sm:$0xff] %v1162_v14  ;;  %v1036_v24 = vadd.f32 %v908_v15, %v436_v11  ;;  %v909_v21 = vadd.f32 %v1489_v37, %v769_v16  ;;  %v770_v25 = vmul.f32 %v1479_v32, %v630_v17  ;;  %v631_v26 = vunpack.c.h.bf16 %v531_v5  ;;  %v63_v16 = vld [vmem:[%s2377_s0 + $0x138] sm:$0xff] }
  0x92   :  { %v1163_v28 = vmax.f32 %v1035_v19, 0.0  ;;  %v438_v29 = vadd.f32 %v1477_v31, %v298_v23  ;;  %v299_v38 = vmul.f32 %v1483_v34, %v159_v20  ;;  %v160_v39 = vunpack.c.l.bf16 %v60_v18  ;;  %v535_v23 = vld [vmem:[%s2380_s3 + $0x138] sm:$0xff] }
  0x93   :  { %v1164_v40 = vmax.f32 %v1036_v24, 0.0  ;;  %v1037_v41 = vadd.f32 %v909_v21, %v437_v22  ;;  %v910_v42 = vadd.f32 %v1481_v33, %v770_v25  ;;  %v771_v43 = vmul.f32 %v1487_v36, %v631_v26 }
  0x94   :  { %1291 = vst [vmem:[#allocation2 + $0x218] sm:$0xff] %v1163_v28  ;;  %v439_v45 = vadd.f32 %v1485_v35, %v299_v38  ;;  %v300_v46 = vmul.f32 %v1475_v30, %v160_v39  ;;  %v632_v47 = vunpack.c.l.bf16 %v532_v27  ;;  %v161_v48 = vunpack.c.h.bf16 %v60_v18 }
  0x95   :  { %1292 = vst [vmem:[#allocation2 + $0x220] sm:$0xff] %v1164_v40  ;;  %v1165_v50 = vmax.f32 %v1037_v41, 0.0  ;;  %v1038_v51 = vadd.f32 %v910_v42, %v438_v29  ;;  %v911_v52 = vadd.f32 %v1489_v37, %v771_v43  ;;  %v633_v53 = vunpack.c.h.bf16 %v532_v27  ;;  %v64_v42 = vld [vmem:[%s2377_s0 + $0x140] sm:$0xff] }
  0x96   :  { %v440_v54 = vadd.f32 %v1477_v31, %v300_v46  ;;  %v772_v55 = vmul.f32 %v1479_v32, %v632_v47  ;;  %v301_v56 = vmul.f32 %v1483_v34, %v161_v48  ;;  %v162_v57 = vunpack.c.l.bf16 %v61_v44  ;;  %v536_v47 = vld [vmem:[%s2380_s3 + $0x140] sm:$0xff] }
  0x97   :  { %1293 = vst [vmem:[#allocation2 + $0x228] sm:$0xff] %v1165_v50  ;;  %v1166_v58 = vmax.f32 %v1038_v51, 0.0  ;;  %v1039_v59 = vadd.f32 %v911_v52, %v439_v45  ;;  %v773_v60 = vmul.f32 %v1487_v36, %v633_v53  ;;  %v634_v61 = vunpack.c.l.bf16 %v533_v49 }
  0x98   :  { %v912_v63 = vadd.f32 %v1481_v33, %v772_v55  ;;  %v441_v0 = vadd.f32 %v1485_v35, %v301_v56  ;;  %v302_v1 = vmul.f32 %v1475_v30, %v162_v57  ;;  %v163_v2 = vunpack.c.h.bf16 %v61_v44 }
  0x99   :  { %1294 = vst [vmem:[#allocation2 + $0x230] sm:$0xff] %v1166_v58  ;;  %v1167_v4 = vmax.f32 %v1039_v59, 0.0  ;;  %v913_v5 = vadd.f32 %v1489_v37, %v773_v60  ;;  %v774_v6 = vmul.f32 %v1479_v32, %v634_v61  ;;  %v635_v7 = vunpack.c.h.bf16 %v533_v49  ;;  %v65_v60 = vld [vmem:[%s2377_s0 + $0x148] sm:$0xff] }
  0x9a   :  { %v1040_v8 = vadd.f32 %v912_v63, %v440_v54  ;;  %v442_v9 = vadd.f32 %v1477_v31, %v302_v1  ;;  %v303_v10 = vmul.f32 %v1483_v34, %v163_v2  ;;  %v164_v11 = vunpack.c.l.bf16 %v62_v62 }
  0x9b   :  { %1295 = vst [vmem:[#allocation2 + $0x238] sm:$0xff] %v1167_v4  ;;  %v1041_v12 = vadd.f32 %v913_v5, %v441_v0  ;;  %v914_v13 = vadd.f32 %v1481_v33, %v774_v6  ;;  %v775_v14 = vmul.f32 %v1487_v36, %v635_v7  ;;  %v636_v15 = vunpack.c.l.bf16 %v534_v3  ;;  %v537_v5 = vld [vmem:[%s2380_s3 + $0x148] sm:$0xff] }
  0x9c   :  { %v1168_v17 = vmax.f32 %v1040_v8, 0.0  ;;  %v443_v18 = vadd.f32 %v1485_v35, %v303_v10  ;;  %v304_v19 = vmul.f32 %v1475_v30, %v164_v11  ;;  %v165_v22 = vunpack.c.h.bf16 %v62_v62 }
  0x9d   :  { %v1169_v20 = vmax.f32 %v1041_v12, 0.0  ;;  %v1042_v24 = vadd.f32 %v914_v13, %v442_v9  ;;  %v915_v21 = vadd.f32 %v1489_v37, %v775_v14  ;;  %v776_v25 = vmul.f32 %v1479_v32, %v636_v15  ;;  %v66_v14 = vld [vmem:[%s2377_s0 + $0x150] sm:$0xff] }
  0x9e   :  { %1296 = vst [vmem:[#allocation2 + $0x240] sm:$0xff] %v1168_v17  ;;  %v444_v26 = vadd.f32 %v1477_v31, %v304_v19  ;;  %v305_v27 = vmul.f32 %v1483_v34, %v165_v22  ;;  %v637_v28 = vunpack.c.h.bf16 %v534_v3  ;;  %v166_v29 = vunpack.c.l.bf16 %v63_v16  ;;  %v538_v19 = vld [vmem:[%s2380_s3 + $0x150] sm:$0xff] }
  0x9f   :  { %1297 = vst [vmem:[#allocation2 + $0x248] sm:$0xff] %v1169_v20  ;;  %v1170_v38 = vmax.f32 %v1042_v24, 0.0  ;;  %v1043_v39 = vadd.f32 %v915_v21, %v443_v18  ;;  %v916_v40 = vadd.f32 %v1481_v33, %v776_v25  ;;  %v638_v41 = vunpack.c.l.bf16 %v535_v23 }
  0xa0   :  { %v445_v43 = vadd.f32 %v1485_v35, %v305_v27  ;;  %v777_v44 = vmul.f32 %v1487_v36, %v637_v28  ;;  %v306_v45 = vmul.f32 %v1475_v30, %v166_v29  ;;  %v167_v46 = vunpack.c.h.bf16 %v63_v16 }
  0xa1   :  { %1298 = vst [vmem:[#allocation2 + $0x250] sm:$0xff] %v1170_v38  ;;  %v1171_v48 = vmax.f32 %v1043_v39, 0.0  ;;  %v1044_v49 = vadd.f32 %v916_v40, %v444_v26  ;;  %v778_v50 = vmul.f32 %v1479_v32, %v638_v41  ;;  %v639_v51 = vunpack.c.h.bf16 %v535_v23  ;;  %v67_v40 = vld [vmem:[%s2377_s0 + $0x158] sm:$0xff] }
  0xa2   :  { %v917_v52 = vadd.f32 %v1489_v37, %v777_v44  ;;  %v446_v53 = vadd.f32 %v1477_v31, %v306_v45  ;;  %v307_v54 = vmul.f32 %v1483_v34, %v167_v46  ;;  %v168_v55 = vunpack.c.l.bf16 %v64_v42  ;;  %v539_v45 = vld [vmem:[%s2380_s3 + $0x158] sm:$0xff] }
  0xa3   :  { %1299 = vst [vmem:[#allocation2 + $0x258] sm:$0xff] %v1171_v48  ;;  %v1172_v56 = vmax.f32 %v1044_v49, 0.0  ;;  %v918_v57 = vadd.f32 %v1481_v33, %v778_v50  ;;  %v779_v58 = vmul.f32 %v1487_v36, %v639_v51  ;;  %v640_v59 = vunpack.c.l.bf16 %v536_v47 }
  0xa4   :  { %v1045_v61 = vadd.f32 %v917_v52, %v445_v43  ;;  %v447_v62 = vadd.f32 %v1485_v35, %v307_v54  ;;  %v308_v63 = vmul.f32 %v1475_v30, %v168_v55  ;;  %v169_v0 = vunpack.c.h.bf16 %v64_v42 }
  0xa5   :  { %1300 = vst [vmem:[#allocation2 + $0x260] sm:$0xff] %v1172_v56  ;;  %v1046_v1 = vadd.f32 %v918_v57, %v446_v53  ;;  %v919_v2 = vadd.f32 %v1489_v37, %v779_v58  ;;  %v780_v3 = vmul.f32 %v1479_v32, %v640_v59  ;;  %v641_v4 = vunpack.c.h.bf16 %v536_v47  ;;  %v68_v58 = vld [vmem:[%s2377_s0 + $0x160] sm:$0xff] }
  0xa6   :  { %v1173_v6 = vmax.f32 %v1045_v61, 0.0  ;;  %v448_v7 = vadd.f32 %v1477_v31, %v308_v63  ;;  %v309_v8 = vmul.f32 %v1483_v34, %v169_v0  ;;  %v170_v9 = vunpack.c.l.bf16 %v65_v60  ;;  %v540_v63 = vld [vmem:[%s2380_s3 + $0x160] sm:$0xff] }
  0xa7   :  { %v1174_v10 = vmax.f32 %v1046_v1, 0.0  ;;  %v1047_v11 = vadd.f32 %v919_v2, %v447_v62  ;;  %v920_v12 = vadd.f32 %v1481_v33, %v780_v3  ;;  %v781_v13 = vmul.f32 %v1487_v36, %v641_v4 }
  0xa8   :  { %1301 = vst [vmem:[#allocation2 + $0x268] sm:$0xff] %v1173_v6  ;;  %v449_v15 = vadd.f32 %v1485_v35, %v309_v8  ;;  %v310_v16 = vmul.f32 %v1475_v30, %v170_v9  ;;  %v642_v17 = vunpack.c.l.bf16 %v537_v5  ;;  %v171_v18 = vunpack.c.h.bf16 %v65_v60 }
  0xa9   :  { %1302 = vst [vmem:[#allocation2 + $0x270] sm:$0xff] %v1174_v10  ;;  %v1175_v22 = vmax.f32 %v1047_v11, 0.0  ;;  %v1048_v23 = vadd.f32 %v920_v12, %v448_v7  ;;  %v921_v20 = vadd.f32 %v1489_v37, %v781_v13  ;;  %v643_v24 = vunpack.c.h.bf16 %v537_v5  ;;  %v69_v12 = vld [vmem:[%s2377_s0 + $0x168] sm:$0xff] }
  0xaa   :  { %v450_v21 = vadd.f32 %v1477_v31, %v310_v16  ;;  %v782_v25 = vmul.f32 %v1479_v32, %v642_v17  ;;  %v311_v26 = vmul.f32 %v1483_v34, %v171_v18  ;;  %v172_v27 = vunpack.c.l.bf16 %v66_v14  ;;  %v541_v17 = vld [vmem:[%s2380_s3 + $0x168] sm:$0xff] }
  0xab   :  { %1303 = vst [vmem:[#allocation2 + $0x278] sm:$0xff] %v1175_v22  ;;  %v1176_v28 = vmax.f32 %v1048_v23, 0.0  ;;  %v1049_v29 = vadd.f32 %v921_v20, %v449_v15  ;;  %v783_v38 = vmul.f32 %v1487_v36, %v643_v24  ;;  %v644_v39 = vunpack.c.l.bf16 %v538_v19 }
  0xac   :  { %v922_v41 = vadd.f32 %v1481_v33, %v782_v25  ;;  %v451_v42 = vadd.f32 %v1485_v35, %v311_v26  ;;  %v312_v43 = vmul.f32 %v1475_v30, %v172_v27  ;;  %v173_v44 = vunpack.c.h.bf16 %v66_v14 }
  0xad   :  { %1304 = vst [vmem:[#allocation2 + $0x280] sm:$0xff] %v1176_v28  ;;  %v1177_v46 = vmax.f32 %v1049_v29, 0.0  ;;  %v923_v47 = vadd.f32 %v1489_v37, %v783_v38  ;;  %v784_v48 = vmul.f32 %v1479_v32, %v644_v39  ;;  %v645_v49 = vunpack.c.h.bf16 %v538_v19  ;;  %v70_v38 = vld [vmem:[%s2377_s0 + $0x170] sm:$0xff] }
  0xae   :  { %v1050_v50 = vadd.f32 %v922_v41, %v450_v21  ;;  %v452_v51 = vadd.f32 %v1477_v31, %v312_v43  ;;  %v313_v52 = vmul.f32 %v1483_v34, %v173_v44  ;;  %v174_v53 = vunpack.c.l.bf16 %v67_v40 }
  0xaf   :  { %1305 = vst [vmem:[#allocation2 + $0x288] sm:$0xff] %v1177_v46  ;;  %v1051_v54 = vadd.f32 %v923_v47, %v451_v42  ;;  %v924_v55 = vadd.f32 %v1481_v33, %v784_v48  ;;  %v785_v56 = vmul.f32 %v1487_v36, %v645_v49  ;;  %v646_v57 = vunpack.c.l.bf16 %v539_v45  ;;  %v542_v47 = vld [vmem:[%s2380_s3 + $0x170] sm:$0xff] }
  0xb0   :  { %v1178_v59 = vmax.f32 %v1050_v50, 0.0  ;;  %v453_v60 = vadd.f32 %v1485_v35, %v313_v52  ;;  %v314_v61 = vmul.f32 %v1475_v30, %v174_v53  ;;  %v175_v62 = vunpack.c.h.bf16 %v67_v40 }
  0xb1   :  { %v1179_v0 = vmax.f32 %v1051_v54, 0.0  ;;  %v1052_v1 = vadd.f32 %v924_v55, %v452_v51  ;;  %v925_v2 = vadd.f32 %v1489_v37, %v785_v56  ;;  %v786_v3 = vmul.f32 %v1479_v32, %v646_v57  ;;  %v71_v56 = vld [vmem:[%s2377_s0 + $0x178] sm:$0xff] }
  0xb2   :  { %1306 = vst [vmem:[#allocation2 + $0x290] sm:$0xff] %v1178_v59  ;;  %v454_v4 = vadd.f32 %v1477_v31, %v314_v61  ;;  %v315_v5 = vmul.f32 %v1483_v34, %v175_v62  ;;  %v647_v6 = vunpack.c.h.bf16 %v539_v45  ;;  %v176_v7 = vunpack.c.l.bf16 %v68_v58  ;;  %v543_v61 = vld [vmem:[%s2380_s3 + $0x178] sm:$0xff] }
  0xb3   :  { %1307 = vst [vmem:[#allocation2 + $0x298] sm:$0xff] %v1179_v0  ;;  %v1180_v8 = vmax.f32 %v1052_v1, 0.0  ;;  %v1053_v9 = vadd.f32 %v925_v2, %v453_v60  ;;  %v926_v10 = vadd.f32 %v1481_v33, %v786_v3  ;;  %v648_v11 = vunpack.c.l.bf16 %v540_v63 }
  0xb4   :  { %v455_v13 = vadd.f32 %v1485_v35, %v315_v5  ;;  %v787_v14 = vmul.f32 %v1487_v36, %v647_v6  ;;  %v316_v15 = vmul.f32 %v1475_v30, %v176_v7  ;;  %v177_v16 = vunpack.c.h.bf16 %v68_v58 }
  0xb5   :  { %1308 = vst [vmem:[#allocation2 + $0x2a0] sm:$0xff] %v1180_v8  ;;  %v1181_v18 = vmax.f32 %v1053_v9, 0.0  ;;  %v1054_v19 = vadd.f32 %v926_v10, %v454_v4  ;;  %v788_v22 = vmul.f32 %v1479_v32, %v648_v11  ;;  %v649_v23 = vunpack.c.h.bf16 %v540_v63  ;;  %v72_v10 = vld [vmem:[%s2377_s0 + $0x180] sm:$0xff] }
  0xb6   :  { %v927_v20 = vadd.f32 %v1489_v37, %v787_v14  ;;  %v456_v24 = vadd.f32 %v1477_v31, %v316_v15  ;;  %v317_v21 = vmul.f32 %v1483_v34, %v177_v16  ;;  %v178_v25 = vunpack.c.l.bf16 %v69_v12  ;;  %v544_v15 = vld [vmem:[%s2380_s3 + $0x180] sm:$0xff] }
  0xb7   :  { %1309 = vst [vmem:[#allocation2 + $0x2a8] sm:$0xff] %v1181_v18  ;;  %v1182_v26 = vmax.f32 %v1054_v19, 0.0  ;;  %v928_v27 = vadd.f32 %v1481_v33, %v788_v22  ;;  %v789_v28 = vmul.f32 %v1487_v36, %v649_v23  ;;  %v650_v29 = vunpack.c.l.bf16 %v541_v17 }
  0xb8   :  { %v1055_v39 = vadd.f32 %v927_v20, %v455_v13  ;;  %v457_v40 = vadd.f32 %v1485_v35, %v317_v21  ;;  %v318_v41 = vmul.f32 %v1475_v30, %v178_v25  ;;  %v179_v42 = vunpack.c.h.bf16 %v69_v12 }
  0xb9   :  { %1310 = vst [vmem:[#allocation2 + $0x2b0] sm:$0xff] %v1182_v26  ;;  %v1056_v43 = vadd.f32 %v928_v27, %v456_v24  ;;  %v929_v44 = vadd.f32 %v1489_v37, %v789_v28  ;;  %v790_v45 = vmul.f32 %v1479_v32, %v650_v29  ;;  %v651_v46 = vunpack.c.h.bf16 %v541_v17  ;;  %v73_v28 = vld [vmem:[%s2377_s0 + $0x188] sm:$0xff] }
  0xba   :  { %v1183_v48 = vmax.f32 %v1055_v39, 0.0  ;;  %v458_v49 = vadd.f32 %v1477_v31, %v318_v41  ;;  %v319_v50 = vmul.f32 %v1483_v34, %v179_v42  ;;  %v180_v51 = vunpack.c.l.bf16 %v70_v38  ;;  %v545_v41 = vld [vmem:[%s2380_s3 + $0x188] sm:$0xff] }
  0xbb   :  { %v1184_v52 = vmax.f32 %v1056_v43, 0.0  ;;  %v1057_v53 = vadd.f32 %v929_v44, %v457_v40  ;;  %v930_v54 = vadd.f32 %v1481_v33, %v790_v45  ;;  %v791_v55 = vmul.f32 %v1487_v36, %v651_v46 }
  0xbc   :  { %1311 = vst [vmem:[#allocation2 + $0x2b8] sm:$0xff] %v1183_v48  ;;  %v459_v57 = vadd.f32 %v1485_v35, %v319_v50  ;;  %v320_v58 = vmul.f32 %v1475_v30, %v180_v51  ;;  %v652_v59 = vunpack.c.l.bf16 %v542_v47  ;;  %v181_v60 = vunpack.c.h.bf16 %v70_v38 }
  0xbd   :  { %1312 = vst [vmem:[#allocation2 + $0x2c0] sm:$0xff] %v1184_v52  ;;  %v1185_v62 = vmax.f32 %v1057_v53, 0.0  ;;  %v1058_v63 = vadd.f32 %v930_v54, %v458_v49  ;;  %v931_v0 = vadd.f32 %v1489_v37, %v791_v55  ;;  %v653_v1 = vunpack.c.h.bf16 %v542_v47  ;;  %v74_v54 = vld [vmem:[%s2377_s0 + $0x190] sm:$0xff] }
  0xbe   :  { %v460_v2 = vadd.f32 %v1477_v31, %v320_v58  ;;  %v792_v3 = vmul.f32 %v1479_v32, %v652_v59  ;;  %v321_v4 = vmul.f32 %v1483_v34, %v181_v60  ;;  %v182_v5 = vunpack.c.l.bf16 %v71_v56  ;;  %v546_v59 = vld [vmem:[%s2380_s3 + $0x190] sm:$0xff] }
  0xbf   :  { %1313 = vst [vmem:[#allocation2 + $0x2c8] sm:$0xff] %v1185_v62  ;;  %v1186_v6 = vmax.f32 %v1058_v63, 0.0  ;;  %v1059_v7 = vadd.f32 %v931_v0, %v459_v57  ;;  %v793_v8 = vmul.f32 %v1487_v36, %v653_v1  ;;  %v654_v9 = vunpack.c.l.bf16 %v543_v61 }
  0xc0   :  { %v932_v11 = vadd.f32 %v1481_v33, %v792_v3  ;;  %v461_v12 = vadd.f32 %v1485_v35, %v321_v4  ;;  %v322_v13 = vmul.f32 %v1475_v30, %v182_v5  ;;  %v183_v14 = vunpack.c.h.bf16 %v71_v56 }
  0xc1   :  { %1314 = vst [vmem:[#allocation2 + $0x2d0] sm:$0xff] %v1186_v6  ;;  %v1187_v16 = vmax.f32 %v1059_v7, 0.0  ;;  %v933_v17 = vadd.f32 %v1489_v37, %v793_v8  ;;  %v794_v18 = vmul.f32 %v1479_v32, %v654_v9  ;;  %v655_v19 = vunpack.c.h.bf16 %v543_v61  ;;  %v75_v8 = vld [vmem:[%s2377_s0 + $0x198] sm:$0xff] }
  0xc2   :  { %v1060_v22 = vadd.f32 %v932_v11, %v460_v2  ;;  %v462_v23 = vadd.f32 %v1477_v31, %v322_v13  ;;  %v323_v20 = vmul.f32 %v1483_v34, %v183_v14  ;;  %v184_v24 = vunpack.c.l.bf16 %v72_v10 }
  0xc3   :  { %1315 = vst [vmem:[#allocation2 + $0x2d8] sm:$0xff] %v1187_v16  ;;  %v1061_v21 = vadd.f32 %v933_v17, %v461_v12  ;;  %v934_v25 = vadd.f32 %v1481_v33, %v794_v18  ;;  %v795_v26 = vmul.f32 %v1487_v36, %v655_v19  ;;  %v656_v27 = vunpack.c.l.bf16 %v544_v15  ;;  %v547_v17 = vld [vmem:[%s2380_s3 + $0x198] sm:$0xff] }
  0xc4   :  { %v1188_v29 = vmax.f32 %v1060_v22, 0.0  ;;  %v463_v38 = vadd.f32 %v1485_v35, %v323_v20  ;;  %v324_v39 = vmul.f32 %v1475_v30, %v184_v24  ;;  %v185_v40 = vunpack.c.h.bf16 %v72_v10 }
  0xc5   :  { %v1189_v42 = vmax.f32 %v1061_v21, 0.0  ;;  %v1062_v43 = vadd.f32 %v934_v25, %v462_v23  ;;  %v935_v44 = vadd.f32 %v1489_v37, %v795_v26  ;;  %v796_v45 = vmul.f32 %v1479_v32, %v656_v27  ;;  %v76_v26 = vld [vmem:[%s2377_s0 + $0x1a0] sm:$0xff] }
  0xc6   :  { %1316 = vst [vmem:[#allocation2 + $0x2e0] sm:$0xff] %v1188_v29  ;;  %v464_v46 = vadd.f32 %v1477_v31, %v324_v39  ;;  %v325_v47 = vmul.f32 %v1483_v34, %v185_v40  ;;  %v657_v48 = vunpack.c.h.bf16 %v544_v15  ;;  %v186_v49 = vunpack.c.l.bf16 %v73_v28  ;;  %v548_v39 = vld [vmem:[%s2380_s3 + $0x1a0] sm:$0xff] }
  0xc7   :  { %1317 = vst [vmem:[#allocation2 + $0x2e8] sm:$0xff] %v1189_v42  ;;  %v1190_v50 = vmax.f32 %v1062_v43, 0.0  ;;  %v1063_v51 = vadd.f32 %v935_v44, %v463_v38  ;;  %v936_v52 = vadd.f32 %v1481_v33, %v796_v45  ;;  %v658_v53 = vunpack.c.l.bf16 %v545_v41 }
  0xc8   :  { %v465_v55 = vadd.f32 %v1485_v35, %v325_v47  ;;  %v797_v56 = vmul.f32 %v1487_v36, %v657_v48  ;;  %v326_v57 = vmul.f32 %v1475_v30, %v186_v49  ;;  %v187_v58 = vunpack.c.h.bf16 %v73_v28 }
  0xc9   :  { %1318 = vst [vmem:[#allocation2 + $0x2f0] sm:$0xff] %v1190_v50  ;;  %v1191_v60 = vmax.f32 %v1063_v51, 0.0  ;;  %v1064_v61 = vadd.f32 %v936_v52, %v464_v46  ;;  %v798_v62 = vmul.f32 %v1479_v32, %v658_v53  ;;  %v659_v63 = vunpack.c.h.bf16 %v545_v41  ;;  %v77_v52 = vld [vmem:[%s2377_s0 + $0x1a8] sm:$0xff] }
  0xca   :  { %v937_v0 = vadd.f32 %v1489_v37, %v797_v56  ;;  %v466_v1 = vadd.f32 %v1477_v31, %v326_v57  ;;  %v327_v2 = vmul.f32 %v1483_v34, %v187_v58  ;;  %v188_v3 = vunpack.c.l.bf16 %v74_v54  ;;  %v549_v57 = vld [vmem:[%s2380_s3 + $0x1a8] sm:$0xff] }
  0xcb   :  { %1319 = vst [vmem:[#allocation2 + $0x2f8] sm:$0xff] %v1191_v60  ;;  %v1192_v4 = vmax.f32 %v1064_v61, 0.0  ;;  %v938_v5 = vadd.f32 %v1481_v33, %v798_v62  ;;  %v799_v6 = vmul.f32 %v1487_v36, %v659_v63  ;;  %v660_v7 = vunpack.c.l.bf16 %v546_v59 }
  0xcc   :  { %v1065_v9 = vadd.f32 %v937_v0, %v465_v55  ;;  %v467_v10 = vadd.f32 %v1485_v35, %v327_v2  ;;  %v328_v11 = vmul.f32 %v1475_v30, %v188_v3  ;;  %v189_v12 = vunpack.c.h.bf16 %v74_v54 }
  0xcd   :  { %1320 = vst [vmem:[#allocation2 + $0x300] sm:$0xff] %v1192_v4  ;;  %v1066_v13 = vadd.f32 %v938_v5, %v466_v1  ;;  %v939_v14 = vadd.f32 %v1489_v37, %v799_v6  ;;  %v800_v15 = vmul.f32 %v1479_v32, %v660_v7  ;;  %v661_v16 = vunpack.c.h.bf16 %v546_v59  ;;  %v78_v6 = vld [vmem:[%s2377_s0 + $0x1b0] sm:$0xff] }
  0xce   :  { %v1193_v18 = vmax.f32 %v1065_v9, 0.0  ;;  %v468_v19 = vadd.f32 %v1477_v31, %v328_v11  ;;  %v329_v22 = vmul.f32 %v1483_v34, %v189_v12  ;;  %v190_v23 = vunpack.c.l.bf16 %v75_v8  ;;  %v550_v11 = vld [vmem:[%s2380_s3 + $0x1b0] sm:$0xff] }
  0xcf   :  { %v1194_v20 = vmax.f32 %v1066_v13, 0.0  ;;  %v1067_v24 = vadd.f32 %v939_v14, %v467_v10  ;;  %v940_v21 = vadd.f32 %v1481_v33, %v800_v15  ;;  %v801_v25 = vmul.f32 %v1487_v36, %v661_v16 }
  0xd0   :  { %1321 = vst [vmem:[#allocation2 + $0x308] sm:$0xff] %v1193_v18  ;;  %v469_v27 = vadd.f32 %v1485_v35, %v329_v22  ;;  %v330_v28 = vmul.f32 %v1475_v30, %v190_v23  ;;  %v662_v29 = vunpack.c.l.bf16 %v547_v17  ;;  %v191_v38 = vunpack.c.h.bf16 %v75_v8 }
  0xd1   :  { %1322 = vst [vmem:[#allocation2 + $0x310] sm:$0xff] %v1194_v20  ;;  %v1195_v40 = vmax.f32 %v1067_v24, 0.0  ;;  %v1068_v41 = vadd.f32 %v940_v21, %v468_v19  ;;  %v941_v42 = vadd.f32 %v1489_v37, %v801_v25  ;;  %v663_v43 = vunpack.c.h.bf16 %v547_v17  ;;  %v79_v21 = vld [vmem:[%s2377_s0 + $0x1b8] sm:$0xff] }
  0xd2   :  { %v470_v44 = vadd.f32 %v1477_v31, %v330_v28  ;;  %v802_v45 = vmul.f32 %v1479_v32, %v662_v29  ;;  %v331_v46 = vmul.f32 %v1483_v34, %v191_v38  ;;  %v192_v47 = vunpack.c.l.bf16 %v76_v26  ;;  %v551_v29 = vld [vmem:[%s2380_s3 + $0x1b8] sm:$0xff] }
  0xd3   :  { %1323 = vst [vmem:[#allocation2 + $0x318] sm:$0xff] %v1195_v40  ;;  %v1196_v48 = vmax.f32 %v1068_v41, 0.0  ;;  %v1069_v49 = vadd.f32 %v941_v42, %v469_v27  ;;  %v803_v50 = vmul.f32 %v1487_v36, %v663_v43  ;;  %v664_v51 = vunpack.c.l.bf16 %v548_v39 }
  0xd4   :  { %v942_v53 = vadd.f32 %v1481_v33, %v802_v45  ;;  %v471_v54 = vadd.f32 %v1485_v35, %v331_v46  ;;  %v332_v55 = vmul.f32 %v1475_v30, %v192_v47  ;;  %v193_v56 = vunpack.c.h.bf16 %v76_v26 }
  0xd5   :  { %1324 = vst [vmem:[#allocation2 + $0x320] sm:$0xff] %v1196_v48  ;;  %v1197_v58 = vmax.f32 %v1069_v49, 0.0  ;;  %v943_v59 = vadd.f32 %v1489_v37, %v803_v50  ;;  %v804_v60 = vmul.f32 %v1479_v32, %v664_v51  ;;  %v665_v61 = vunpack.c.h.bf16 %v548_v39  ;;  %v80_v50 = vld [vmem:[%s2377_s0 + $0x1c0] sm:$0xff] }
  0xd6   :  { %v1070_v62 = vadd.f32 %v942_v53, %v470_v44  ;;  %v472_v63 = vadd.f32 %v1477_v31, %v332_v55  ;;  %v333_v0 = vmul.f32 %v1483_v34, %v193_v56  ;;  %v194_v1 = vunpack.c.l.bf16 %v77_v52 }
  0xd7   :  { %1325 = vst [vmem:[#allocation2 + $0x328] sm:$0xff] %v1197_v58  ;;  %v1071_v2 = vadd.f32 %v943_v59, %v471_v54  ;;  %v944_v3 = vadd.f32 %v1481_v33, %v804_v60  ;;  %v805_v4 = vmul.f32 %v1487_v36, %v665_v61  ;;  %v666_v5 = vunpack.c.l.bf16 %v549_v57  ;;  %v552_v59 = vld [vmem:[%s2380_s3 + $0x1c0] sm:$0xff] }
  0xd8   :  { %v1198_v7 = vmax.f32 %v1070_v62, 0.0  ;;  %v473_v8 = vadd.f32 %v1485_v35, %v333_v0  ;;  %v334_v9 = vmul.f32 %v1475_v30, %v194_v1  ;;  %v195_v10 = vunpack.c.h.bf16 %v77_v52 }
  0xd9   :  { %v1199_v12 = vmax.f32 %v1071_v2, 0.0  ;;  %v1072_v13 = vadd.f32 %v944_v3, %v472_v63  ;;  %v945_v14 = vadd.f32 %v1489_v37, %v805_v4  ;;  %v806_v15 = vmul.f32 %v1479_v32, %v666_v5  ;;  %v81_v4 = vld [vmem:[%s2377_s0 + $0x1c8] sm:$0xff] }
  0xda   :  { %1326 = vst [vmem:[#allocation2 + $0x330] sm:$0xff] %v1198_v7  ;;  %v474_v16 = vadd.f32 %v1477_v31, %v334_v9  ;;  %v335_v17 = vmul.f32 %v1483_v34, %v195_v10  ;;  %v667_v18 = vunpack.c.h.bf16 %v549_v57  ;;  %v196_v19 = vunpack.c.l.bf16 %v78_v6  ;;  %v553_v9 = vld [vmem:[%s2380_s3 + $0x1c8] sm:$0xff] }
  0xdb   :  { %1327 = vst [vmem:[#allocation2 + $0x338] sm:$0xff] %v1199_v12  ;;  %v1200_v22 = vmax.f32 %v1072_v13, 0.0  ;;  %v1073_v23 = vadd.f32 %v945_v14, %v473_v8  ;;  %v946_v20 = vadd.f32 %v1481_v33, %v806_v15  ;;  %v668_v24 = vunpack.c.l.bf16 %v550_v11 }
  0xdc   :  { %v475_v25 = vadd.f32 %v1485_v35, %v335_v17  ;;  %v807_v26 = vmul.f32 %v1487_v36, %v667_v18  ;;  %v336_v27 = vmul.f32 %v1475_v30, %v196_v19  ;;  %v197_v28 = vunpack.c.h.bf16 %v78_v6 }
  0xdd   :  { %1328 = vst [vmem:[#allocation2 + $0x340] sm:$0xff] %v1200_v22  ;;  %v1201_v38 = vmax.f32 %v1073_v23, 0.0  ;;  %v1074_v39 = vadd.f32 %v946_v20, %v474_v16  ;;  %v808_v40 = vmul.f32 %v1479_v32, %v668_v24  ;;  %v669_v41 = vunpack.c.h.bf16 %v550_v11  ;;  %v82_v20 = vld [vmem:[%s2377_s0 + $0x1d0] sm:$0xff] }
  0xde   :  { %v947_v42 = vadd.f32 %v1489_v37, %v807_v26  ;;  %v476_v43 = vadd.f32 %v1477_v31, %v336_v27  ;;  %v337_v44 = vmul.f32 %v1483_v34, %v197_v28  ;;  %v198_v45 = vunpack.c.l.bf16 %v79_v21  ;;  %v554_v27 = vld [vmem:[%s2380_s3 + $0x1d0] sm:$0xff] }
  0xdf   :  { %1329 = vst [vmem:[#allocation2 + $0x348] sm:$0xff] %v1201_v38  ;;  %v1202_v46 = vmax.f32 %v1074_v39, 0.0  ;;  %v948_v47 = vadd.f32 %v1481_v33, %v808_v40  ;;  %v809_v48 = vmul.f32 %v1487_v36, %v669_v41  ;;  %v670_v49 = vunpack.c.l.bf16 %v551_v29 }
  0xe0   :  { %v1075_v51 = vadd.f32 %v947_v42, %v475_v25  ;;  %v477_v52 = vadd.f32 %v1485_v35, %v337_v44  ;;  %v338_v53 = vmul.f32 %v1475_v30, %v198_v45  ;;  %v199_v54 = vunpack.c.h.bf16 %v79_v21 }
  0xe1   :  { %1330 = vst [vmem:[#allocation2 + $0x350] sm:$0xff] %v1202_v46  ;;  %v1076_v55 = vadd.f32 %v948_v47, %v476_v43  ;;  %v949_v56 = vadd.f32 %v1489_v37, %v809_v48  ;;  %v810_v57 = vmul.f32 %v1479_v32, %v670_v49  ;;  %v671_v58 = vunpack.c.h.bf16 %v551_v29  ;;  %v83_v48 = vld [vmem:[%s2377_s0 + $0x1d8] sm:$0xff] }
  0xe2   :  { %v1203_v60 = vmax.f32 %v1075_v51, 0.0  ;;  %v478_v61 = vadd.f32 %v1477_v31, %v338_v53  ;;  %v339_v62 = vmul.f32 %v1483_v34, %v199_v54  ;;  %v200_v63 = vunpack.c.l.bf16 %v80_v50  ;;  %v555_v53 = vld [vmem:[%s2380_s3 + $0x1d8] sm:$0xff] }
  0xe3   :  { %v1204_v0 = vmax.f32 %v1076_v55, 0.0  ;;  %v1077_v1 = vadd.f32 %v949_v56, %v477_v52  ;;  %v950_v2 = vadd.f32 %v1481_v33, %v810_v57  ;;  %v811_v3 = vmul.f32 %v1487_v36, %v671_v58 }
  0xe4   :  { %1331 = vst [vmem:[#allocation2 + $0x358] sm:$0xff] %v1203_v60  ;;  %v479_v5 = vadd.f32 %v1485_v35, %v339_v62  ;;  %v340_v6 = vmul.f32 %v1475_v30, %v200_v63  ;;  %v672_v7 = vunpack.c.l.bf16 %v552_v59  ;;  %v201_v8 = vunpack.c.h.bf16 %v80_v50 }
  0xe5   :  { %1332 = vst [vmem:[#allocation2 + $0x360] sm:$0xff] %v1204_v0  ;;  %v1205_v10 = vmax.f32 %v1077_v1, 0.0  ;;  %v1078_v11 = vadd.f32 %v950_v2, %v478_v61  ;;  %v951_v12 = vadd.f32 %v1489_v37, %v811_v3  ;;  %v673_v13 = vunpack.c.h.bf16 %v552_v59  ;;  %v84_v2 = vld [vmem:[%s2377_s0 + $0x1e0] sm:$0xff] }
  0xe6   :  { %v480_v14 = vadd.f32 %v1477_v31, %v340_v6  ;;  %v812_v15 = vmul.f32 %v1479_v32, %v672_v7  ;;  %v341_v16 = vmul.f32 %v1483_v34, %v201_v8  ;;  %v202_v17 = vunpack.c.l.bf16 %v81_v4  ;;  %v556_v7 = vld [vmem:[%s2380_s3 + $0x1e0] sm:$0xff] }
  0xe7   :  { %1333 = vst [vmem:[#allocation2 + $0x368] sm:$0xff] %v1205_v10  ;;  %v1206_v18 = vmax.f32 %v1078_v11, 0.0  ;;  %v1079_v19 = vadd.f32 %v951_v12, %v479_v5  ;;  %v813_v22 = vmul.f32 %v1487_v36, %v673_v13  ;;  %v674_v23 = vunpack.c.l.bf16 %v553_v9 }
  0xe8   :  { %v952_v24 = vadd.f32 %v1481_v33, %v812_v15  ;;  %v481_v21 = vadd.f32 %v1485_v35, %v341_v16  ;;  %v342_v25 = vmul.f32 %v1475_v30, %v202_v17  ;;  %v203_v26 = vunpack.c.h.bf16 %v81_v4 }
  0xe9   :  { %1334 = vst [vmem:[#allocation2 + $0x370] sm:$0xff] %v1206_v18  ;;  %v1207_v28 = vmax.f32 %v1079_v19, 0.0  ;;  %v953_v29 = vadd.f32 %v1489_v37, %v813_v22  ;;  %v814_v38 = vmul.f32 %v1479_v32, %v674_v23  ;;  %v675_v39 = vunpack.c.h.bf16 %v553_v9  ;;  %v85_v22 = vld [vmem:[%s2377_s0 + $0x1e8] sm:$0xff] }
  0xea   :  { %v1080_v40 = vadd.f32 %v952_v24, %v480_v14  ;;  %v482_v41 = vadd.f32 %v1477_v31, %v342_v25  ;;  %v343_v42 = vmul.f32 %v1483_v34, %v203_v26  ;;  %v204_v43 = vunpack.c.l.bf16 %v82_v20 }
  0xeb   :  { %1335 = vst [vmem:[#allocation2 + $0x378] sm:$0xff] %v1207_v28  ;;  %v1081_v44 = vadd.f32 %v953_v29, %v481_v21  ;;  %v954_v45 = vadd.f32 %v1481_v33, %v814_v38  ;;  %v815_v46 = vmul.f32 %v1487_v36, %v675_v39  ;;  %v676_v47 = vunpack.c.l.bf16 %v554_v27  ;;  %v557_v29 = vld [vmem:[%s2380_s3 + $0x1e8] sm:$0xff] }
  0xec   :  { %v1208_v49 = vmax.f32 %v1080_v40, 0.0  ;;  %v483_v50 = vadd.f32 %v1485_v35, %v343_v42  ;;  %v344_v51 = vmul.f32 %v1475_v30, %v204_v43  ;;  %v205_v52 = vunpack.c.h.bf16 %v82_v20 }
  0xed   :  { %v1209_v54 = vmax.f32 %v1081_v44, 0.0  ;;  %v1082_v55 = vadd.f32 %v954_v45, %v482_v41  ;;  %v955_v56 = vadd.f32 %v1489_v37, %v815_v46  ;;  %v816_v57 = vmul.f32 %v1479_v32, %v676_v47  ;;  %v86_v46 = vld [vmem:[%s2377_s0 + $0x1f0] sm:$0xff] }
  0xee   :  { %1336 = vst [vmem:[#allocation2 + $0x380] sm:$0xff] %v1208_v49  ;;  %v484_v58 = vadd.f32 %v1477_v31, %v344_v51  ;;  %v345_v59 = vmul.f32 %v1483_v34, %v205_v52  ;;  %v677_v60 = vunpack.c.h.bf16 %v554_v27  ;;  %v206_v61 = vunpack.c.l.bf16 %v83_v48  ;;  %v558_v51 = vld [vmem:[%s2380_s3 + $0x1f0] sm:$0xff] }
  0xef   :  { %1337 = vst [vmem:[#allocation2 + $0x388] sm:$0xff] %v1209_v54  ;;  %v1210_v62 = vmax.f32 %v1082_v55, 0.0  ;;  %v1083_v63 = vadd.f32 %v955_v56, %v483_v50  ;;  %v956_v0 = vadd.f32 %v1481_v33, %v816_v57  ;;  %v678_v1 = vunpack.c.l.bf16 %v555_v53 }
  0xf0   :  { %v485_v3 = vadd.f32 %v1485_v35, %v345_v59  ;;  %v817_v4 = vmul.f32 %v1487_v36, %v677_v60  ;;  %v346_v5 = vmul.f32 %v1475_v30, %v206_v61  ;;  %v207_v6 = vunpack.c.h.bf16 %v83_v48 }
  0xf1   :  { %1338 = vst [vmem:[#allocation2 + $0x390] sm:$0xff] %v1210_v62  ;;  %v1211_v8 = vmax.f32 %v1083_v63, 0.0  ;;  %v1084_v9 = vadd.f32 %v956_v0, %v484_v58  ;;  %v818_v10 = vmul.f32 %v1479_v32, %v678_v1  ;;  %v679_v11 = vunpack.c.h.bf16 %v555_v53  ;;  %v87_v0 = vld [vmem:[%s2377_s0 + $0x1f8] sm:$0xff]  ;;  %s1395_s0 = smov [#allocation2]  }
  0xf2   :  { %v957_v12 = vadd.f32 %v1489_v37, %v817_v4  ;;  %v486_v13 = vadd.f32 %v1477_v31, %v346_v5  ;;  %v347_v14 = vmul.f32 %v1483_v34, %v207_v6  ;;  %v208_v15 = vunpack.c.l.bf16 %v84_v2  ;;  %v559_v5 = vld [vmem:[%s2380_s3 + $0x1f8] sm:$0xff]  ;;  %s1357_s3 = sshll.u32 %s1395_s0, 4  ;;  %s1358_s3 = int_to_ptr.vmem [resolvable:$true] %s1357_s3 }
  0xf3   :  { %1339 = vst [vmem:[#allocation2 + $0x398] sm:$0xff] %v1211_v8  ;;  %v1212_v16 = vmax.f32 %v1084_v9, 0.0  ;;  %v958_v17 = vadd.f32 %v1481_v33, %v818_v10  ;;  %v819_v18 = vmul.f32 %v1487_v36, %v679_v11  ;;  %v680_v19 = vunpack.c.l.bf16 %v556_v7  ;;  %s1371_s1 = scalar_lea.vmem %s1358_s3, 16384  ;;  %p1376_p1 = scmp.lt.s32.totalorder %s1358_s3, %s1358_s3 }
  0xf4   :  { %v1085_v23 = vadd.f32 %v957_v12, %v485_v3  ;;  %v487_v20 = vadd.f32 %v1485_v35, %v347_v14  ;;  %v348_v24 = vmul.f32 %v1475_v30, %v208_v15  ;;  %v209_v21 = vunpack.c.h.bf16 %v84_v2  ;;  %p1372_p0 = scmp.ne.s32.totalorder %s1358_s3, %s1371_s1  ;;  %p1377_p2 = scmp.lt.s32.totalorder %s1371_s1, %s1371_s1 }
  0xf5   :  { %1340 = vst [vmem:[#allocation2 + $0x3a0] sm:$0xff] %v1212_v16  ;;  %v1086_v25 = vadd.f32 %v958_v17, %v486_v13  ;;  %v959_v26 = vadd.f32 %v1489_v37, %v819_v18  ;;  %v820_v27 = vmul.f32 %v1479_v32, %v680_v19  ;;  %v681_v28 = vunpack.c.h.bf16 %v556_v7 }
  0xf6   :  { %v1213_v38 = vmax.f32 %v1085_v23, 0.0  ;;  %v488_v39 = vadd.f32 %v1477_v31, %v348_v24  ;;  %v349_v40 = vmul.f32 %v1483_v34, %v209_v21  ;;  %v210_v41 = vunpack.c.l.bf16 %v85_v22  ;;  %p1378_p3 = por %p1377_p2, %p1376_p1 }
  0xf7   :  { %v1214_v42 = vmax.f32 %v1086_v25, 0.0  ;;  %v1087_v43 = vadd.f32 %v959_v26, %v487_v20  ;;  %v960_v44 = vadd.f32 %v1481_v33, %v820_v27  ;;  %v821_v45 = vmul.f32 %v1487_v36, %v681_v28 }
  0xf8   :  { %1341 = vst [vmem:[#allocation2 + $0x3a8] sm:$0xff] %v1213_v38  ;;  %v489_v47 = vadd.f32 %v1485_v35, %v349_v40  ;;  %v350_v48 = vmul.f32 %v1475_v30, %v210_v41  ;;  %v682_v49 = vunpack.c.l.bf16 %v557_v29  ;;  %v211_v50 = vunpack.c.h.bf16 %v85_v22  ;;  %p1379_p4 = pnand %p1378_p3, %p1372_p0 }
  0xf9   :  { %1342 = vst [vmem:[#allocation2 + $0x3b0] sm:$0xff] %v1214_v42  ;;  %v1215_v52 = vmax.f32 %v1087_v43, 0.0  ;;  %v1088_v53 = vadd.f32 %v960_v44, %v488_v39  ;;  %v961_v54 = vadd.f32 %v1489_v37, %v821_v45  ;;  %v683_v55 = vunpack.c.h.bf16 %v557_v29 }
  0xfa   :  { %v490_v56 = vadd.f32 %v1477_v31, %v350_v48  ;;  %v822_v57 = vmul.f32 %v1479_v32, %v682_v49  ;;  %v351_v58 = vmul.f32 %v1483_v34, %v211_v50  ;;  %v212_v59 = vunpack.c.l.bf16 %v86_v46 }
  0xfb   :  { %1343 = vst [vmem:[#allocation2 + $0x3b8] sm:$0xff] %v1215_v52  ;;  %v1216_v60 = vmax.f32 %v1088_v53, 0.0  ;;  %v1089_v61 = vadd.f32 %v961_v54, %v489_v47  ;;  %v823_v62 = vmul.f32 %v1487_v36, %v683_v55  ;;  %v684_v63 = vunpack.c.l.bf16 %v558_v51 }
  0xfc   :  { %v962_v1 = vadd.f32 %v1481_v33, %v822_v57  ;;  %v491_v2 = vadd.f32 %v1485_v35, %v351_v58  ;;  %v352_v3 = vmul.f32 %v1475_v30, %v212_v59  ;;  %v213_v4 = vunpack.c.h.bf16 %v86_v46 }
  0xfd   :  { %1344 = vst [vmem:[#allocation2 + $0x3c0] sm:$0xff] %v1216_v60  ;;  %v1217_v6 = vmax.f32 %v1089_v61, 0.0  ;;  %v963_v7 = vadd.f32 %v1489_v37, %v823_v62  ;;  %v824_v8 = vmul.f32 %v1479_v32, %v684_v63  ;;  %v685_v9 = vunpack.c.h.bf16 %v558_v51 }
  0xfe   :  { %v1090_v10 = vadd.f32 %v962_v1, %v490_v56  ;;  %v492_v11 = vadd.f32 %v1477_v31, %v352_v3  ;;  %v353_v12 = vmul.f32 %v1483_v34, %v213_v4  ;;  %v214_v13 = vunpack.c.l.bf16 %v87_v0 }
  0xff   :  { %1345 = vst [vmem:[#allocation2 + $0x3c8] sm:$0xff] %v1217_v6  ;;  %v1091_v14 = vadd.f32 %v963_v7, %v491_v2  ;;  %v964_v15 = vadd.f32 %v1481_v33, %v824_v8  ;;  %v825_v16 = vmul.f32 %v1487_v36, %v685_v9  ;;  %v686_v17 = vunpack.c.l.bf16 %v559_v5 }
 0x100   :  { %v1218_v18 = vmax.f32 %v1090_v10, 0.0  ;;  %v493_v19 = vadd.f32 %v1485_v35, %v353_v12  ;;  %v354_v22 = vmul.f32 %v1475_v30, %v214_v13  ;;  %v215_v23 = vunpack.c.h.bf16 %v87_v0 }
 0x101   :  { %v1219_v20 = vmax.f32 %v1091_v14, 0.0  ;;  %v1092_v24 = vadd.f32 %v964_v15, %v492_v11  ;;  %v965_v21 = vadd.f32 %v1489_v37, %v825_v16  ;;  %v826_v25 = vmul.f32 %v1479_v32, %v686_v17 }
 0x102   :  { %1346 = vst [vmem:[#allocation2 + $0x3d0] sm:$0xff] %v1218_v18  ;;  %v494_v26 = vadd.f32 %v1477_v31, %v354_v22  ;;  %v355_v27 = vmul.f32 %v1483_v34, %v215_v23  ;;  %v687_v28 = vunpack.c.h.bf16 %v559_v5 }
 0x103   :  { %1347 = vst [vmem:[#allocation2 + $0x3d8] sm:$0xff] %v1219_v20  ;;  %v1220_v29 = vmax.f32 %v1092_v24, 0.0  ;;  %v1093_v38 = vadd.f32 %v965_v21, %v493_v19  ;;  %v966_v39 = vadd.f32 %v1481_v33, %v826_v25 }
 0x104   :  { %v495_v30 = vadd.f32 %v1485_v35, %v355_v27  ;;  %v827_v40 = vmul.f32 %v1487_v36, %v687_v28 }
 0x105   :  { %1348 = vst [vmem:[#allocation2 + $0x3e0] sm:$0xff] %v1220_v29  ;;  %v1221_v41 = vmax.f32 %v1093_v38, 0.0  ;;  %v1094_v42 = vadd.f32 %v966_v39, %v494_v26 }
 0x106   :  { %v967_v32 = vadd.f32 %v1489_v37, %v827_v40 }
 0x107   :  { %1349 = vst [vmem:[#allocation2 + $0x3e8] sm:$0xff] %v1221_v41  ;;  %v1222_v31 = vmax.f32 %v1094_v42, 0.0 }
 0x108   :  { %v1095_v34 = vadd.f32 %v967_v32, %v495_v30 }
 0x109   :  { %1350 = vst [vmem:[#allocation2 + $0x3f0] sm:$0xff] %v1222_v31 }
 0x10a   :  { %v1223_v43 = vmax.f32 %v1095_v34, 0.0 }
 0x10c   :  { %1351 = vst [vmem:[#allocation2 + $0x3f8] sm:$0xff] %v1223_v43 }
 0x10d   :  { %1382 = shalt.err (!%p1379_p4)
}
 0x10e   :  { %s1383_s10 = scalar_lea.hbm %s2383_s6, 16384 }
 0x10f   :  { %p1384_p5 = scmp.ne.s32.totalorder %s2383_s6, %s1383_s10  ;;  %p1387_p6 = scmp.lt.u32.totalorder %s1383_s10, %s2383_s6 }
 0x111   :  { %p1389_p7 = pnand %p1387_p6, %p1384_p5 }
 0x113   :  { %1392 = shalt.err (!%p1389_p7)
}
 0x114   :  { %s1396_s13 = smov 256   ;;  %s1397_s14 = smov 16  }
 0x115   :  { %1363 = dma.vmem_to_hbm [thread:$0]  %s1358_s3, 16384, %s2383_s6, [#allocation3], %s1396_s13, %s1396_s13, %s1397_s14  }
 0x116   :  { %1393 = dma.done.wait [#allocation3], 16384  }
 0x117   :  { %1394 = vsyncadd [#allocation3], 4294950912 }
 0x118   :  { %1367 = vsyncpa [#allocation3], 1 }

// kernel: bottleneck_forward.6
= control target key start
LH: loop header
LB: loop body
LE: loop exit
PB: predicated region body
PF: predicated region fallthrough
CT: control target
= control target key end

     0   :  { %v2110_v1 = vmov 0   ;;  %vm434_vm0 = vcmask 523264   ;;  %vm1288_vm1 = vcmask 1040384   ;;  %s3042_s1 = inlined_call_operand.vmem [shape: bf16[64,256], index: 1, kind: input, shape index: {}]   ;;  %s3043_s0 = inlined_call_operand.vmem [shape: bf16[512,64], index: 0, kind: input, shape index: {}]   ;;  %s3044_s2 = inlined_call_operand.vmem [shape: f32[1,64], index: 2, kind: input, shape index: {}]   ;;  %s3045_s3 = inlined_call_operand.vmem [shape: f32[1,64], index: 3, kind: input, shape index: {}]   ;;  %s3046_s4 = inlined_call_operand.vmem [shape: bf16[512,256], index: 4, kind: output, shape index: {0}]   ;;  %s3047_s5 = inlined_call_operand.vmem [shape: f32[1,2,256], index: 5, kind: output, shape index: {1}]  }
   0x1   :  { %v2098_v0 = vld [vmem:[%s3042_s1 + $0x4] ss:$8 sps:$4 sm:$0xff]   ;;  %563 = vmatprep.mubr.bf16.mxu0 %v2110_v1  ;;  %723 = vmatprep.mubr.bf16.mxu1 %v2110_v1  ;;  %v2100_v2 = vld [vmem:[%s3042_s1] ss:$8 sps:$4 sm:$0xff]   ;;  %v2101_v3 = vld [vmem:[%s3042_s1 + $0x14] ss:$8 sps:$4 sm:$0xff]  }
   0x2   :  { %531 = vmatprep.subr.bf16.mxu0 %v2098_v0  ;;  %2089 = vmatprep.subr.bf16.mxu1 %v2098_v0  ;;  %v2103_v4 = vld [vmem:[%s3042_s1 + $0x10] ss:$8 sps:$4 sm:$0xff]   ;;  %v2104_v5 = vld [vmem:[%s3042_s1 + $0x24] ss:$8 sps:$4 sm:$0xff]   ;;  %v2164_v7 = vld [vmem:[%s3044_s2] ss:$0 sm:$0xff] }
   0x3   :  { %532 = vmatpush1.bf16.msra.mxu0 %v2100_v2  ;;  %2093 = vmatpush1.bf16.msra.mxu1 %v2100_v2  ;;  %v1931_v6 = vld [vmem:[%s3043_s0] sm:$0xff]   ;;  %v2058_v10 = vld [vmem:[%s3043_s0 + $0x8] sm:$0xff]   ;;  %v2107_v15 = vld [vmem:[%s3042_s1 + $0x34] ss:$8 sps:$4 sm:$0xff]  }
   0x4   :  { %533 = vmatprep.subr.bf16.mxu0 %v2101_v3  ;;  %2090 = vmatprep.subr.bf16.mxu1 %v2101_v3  ;;  %v1932_v8 = vunpack.c.l.bf16 %v1931_v6  ;;  %v1933_v9 = vunpack.c.h.bf16 %v1931_v6  ;;  %v2106_v11 = vld [vmem:[%s3042_s1 + $0x20] ss:$8 sps:$4 sm:$0xff]   ;;  %v1936_v13 = vunpack.c.l.bf16 %v2058_v10  ;;  %v1937_v14 = vunpack.c.h.bf16 %v2058_v10  ;;  %v2059_v22 = vld [vmem:[%s3043_s0 + $0x10] sm:$0xff]   ;;  %v2060_v31 = vld [vmem:[%s3043_s0 + $0x18] sm:$0xff]  }
   0x5   :  { %v2175_v12 = vld [vmem:[%s3045_s3] ss:$0 sm:$0xff]  ;;  %v2109_v23 = vld [vmem:[%s3042_s1 + $0x30] ss:$8 sps:$4 sm:$0xff]   ;;  %v1940_v26 = vunpack.c.l.bf16 %v2059_v22  ;;  %v1941_v30 = vunpack.c.h.bf16 %v2059_v22  ;;  %v1944_v37 = vunpack.c.l.bf16 %v2060_v31  ;;  %v1945_v38 = vunpack.c.h.bf16 %v2060_v31  ;;  %v2074_v43 = vld [vmem:[%s3043_s0 + $0x88] sm:$0xff]  }
   0x6   :  { %v155_v16 = vmul.f32 %v1932_v8, %v2164_v7  ;;  %v156_v17 = vmul.f32 %v1933_v9, %v2164_v7  ;;  %v157_v20 = vmul.f32 %v1936_v13, %v2164_v7  ;;  %v158_v21 = vmul.f32 %v1937_v14, %v2164_v7  ;;  %v2073_v36 = vld [vmem:[%s3043_s0 + $0x80] sm:$0xff]   ;;  %v2075_v57 = vld [vmem:[%s3043_s0 + $0x90] sm:$0xff]   ;;  %v2062_v13 = vld [vmem:[%s3043_s0 + $0x28] sm:$0xff]  }
   0x7   :  { %534 = vmatpush1.bf16.msra.mxu0 %v2103_v4  ;;  %2094 = vmatpush1.bf16.msra.mxu1 %v2103_v4  ;;  %v159_v34 = vmul.f32 %v1940_v26, %v2164_v7  ;;  %v160_v35 = vmul.f32 %v1941_v30, %v2164_v7  ;;  %v1996_v42 = vunpack.c.l.bf16 %v2073_v36  ;;  %v1997_v44 = vunpack.c.h.bf16 %v2073_v36  ;;  %v2061_v52 = vld [vmem:[%s3043_s0 + $0x20] sm:$0xff]   ;;  %v2063_v30 = vld [vmem:[%s3043_s0 + $0x30] sm:$0xff]  }
   0x8   :  { %535 = vmatprep.subr.bf16.mxu0 %v2104_v5  ;;  %2091 = vmatprep.subr.bf16.mxu1 %v2104_v5  ;;  %v226_v18 = vadd.f32 %v2175_v12, %v155_v16  ;;  %v227_v19 = vadd.f32 %v2175_v12, %v156_v17  ;;  %v228_v28 = vadd.f32 %v2175_v12, %v157_v20  ;;  %v2000_v49 = vunpack.c.l.bf16 %v2074_v43 }
   0x9   :  { %v229_v29 = vadd.f32 %v2175_v12, %v158_v21  ;;  %v230_v40 = vadd.f32 %v2175_v12, %v159_v34  ;;  %v231_v41 = vadd.f32 %v2175_v12, %v160_v35  ;;  %v161_v45 = vmul.f32 %v1944_v37, %v2164_v7  ;;  %v2077_v35 = vld [vmem:[%s3043_s0 + $0xa0] sm:$0xff]  }
   0xa   :  { %v290_v24 = vmax.f32 %v226_v18, 0.0  ;;  %v291_v25 = vmax.f32 %v227_v19, 0.0  ;;  %v292_v32 = vmax.f32 %v228_v28, 0.0  ;;  %v187_v46 = vmul.f32 %v1996_v42, %v2164_v7  ;;  %v2076_v19 = vld [vmem:[%s3043_s0 + $0x98] sm:$0xff]  }
   0xb   :  { %536 = vmatpush1.bf16.msra.mxu0 %v2106_v11  ;;  %2095 = vmatpush1.bf16.msra.mxu1 %v2106_v11  ;;  %v293_v33 = vmax.f32 %v229_v29, 0.0  ;;  %v162_v47 = vmul.f32 %v1945_v38, %v2164_v7  ;;  %v188_v48 = vmul.f32 %v1997_v44, %v2164_v7  ;;  %v294_v50 = vmax.f32 %v230_v40, 0.0 }
   0xc   :  { %537 = vmatprep.subr.bf16.mxu0 %v2107_v15  ;;  %2092 = vmatprep.subr.bf16.mxu1 %v2107_v15  ;;  %v354_v27 = vpack.c.bf16 %v291_v25, %v290_v24  ;;  %v295_v51 = vmax.f32 %v231_v41, 0.0  ;;  %v258_v53 = vadd.f32 %v2175_v12, %v187_v46  ;;  %v2001_v54 = vunpack.c.h.bf16 %v2074_v43 }
   0xd   :  { %v355_v39 = vpack.c.bf16 %v293_v33, %v292_v32  ;;  %v259_v55 = vadd.f32 %v2175_v12, %v188_v48  ;;  %v189_v56 = vmul.f32 %v2000_v49, %v2164_v7  ;;  %v232_v58 = vadd.f32 %v2175_v12, %v161_v45 }
   0xe   :  { %v322_v59 = vmax.f32 %v258_v53, 0.0  ;;  %v190_v60 = vmul.f32 %v2001_v54, %v2164_v7  ;;  %v233_v61 = vadd.f32 %v2175_v12, %v162_v47  ;;  %v1948_v62 = vunpack.c.l.bf16 %v2061_v52 }
   0xf   :  { %538 = vmatpush1.bf16.msra.mxu0 %v2109_v23  ;;  %2096 = vmatpush1.bf16.msra.mxu1 %v2109_v23  ;;  %v323_v63 = vmax.f32 %v259_v55, 0.0  ;;  %v260_v0 = vadd.f32 %v2175_v12, %v189_v56  ;;  %v356_v2 = vpack.c.bf16 %v295_v51, %v294_v50  ;;  %v1949_v3 = vunpack.c.h.bf16 %v2061_v52  ;;  %v2064_v50 = vld [vmem:[%s3043_s0 + $0x38] sm:$0xff]   ;;  %v2078_v55 = vld [vmem:[%s3043_s0 + $0xa8] sm:$0xff]  }
  0x10   :  { %v261_v4 = vadd.f32 %v2175_v12, %v190_v60  ;;  %v2004_v5 = vunpack.c.l.bf16 %v2075_v57  ;;  %v2005_v10 = vunpack.c.h.bf16 %v2075_v57  ;;  %v296_v11 = vmax.f32 %v232_v58, 0.0 }
  0x11   :  { %v370_v6 = vpack.c.bf16 %v323_v63, %v322_v59  ;;  %v324_v8 = vmax.f32 %v260_v0, 0.0  ;;  %v297_v15 = vmax.f32 %v233_v61, 0.0  ;;  %v163_v16 = vmul.f32 %v1948_v62, %v2164_v7 }
  0x12   :  { %1769 = vmatmul.mubr.msk.bf16.vlgmr.msra.gmra.mrb[0].mxu0 %vm434_vm0, %v354_v27  ;;  %v325_v9 = vmax.f32 %v261_v4, 0.0  ;;  %v191_v14 = vmul.f32 %v2004_v5, %v2164_v7  ;;  %v164_v17 = vmul.f32 %v1949_v3, %v2164_v7  ;;  %v192_v18 = vmul.f32 %v2005_v10, %v2164_v7 }
  0x13   :  { %573 = vmatprep.mubr.bf16.mxu0 %v2110_v1  ;;  %1785 = vmatmul.mubr.msk.bf16.vlgmr.msra.gmra.mrb[0].mxu1 %vm434_vm0, %v370_v6  ;;  %v1952_v20 = vunpack.c.l.bf16 %v2062_v13  ;;  %v2008_v24 = vunpack.c.l.bf16 %v2076_v19  ;;  %v2009_v25 = vunpack.c.h.bf16 %v2076_v19  ;;  %v357_v26 = vpack.c.bf16 %v297_v15, %v296_v11 }
  0x14   :  { %733 = vmatprep.mubr.bf16.mxu1 %v2110_v1  ;;  %v371_v21 = vpack.c.bf16 %v325_v9, %v324_v8  ;;  %v262_v22 = vadd.f32 %v2175_v12, %v191_v14  ;;  %v263_v23 = vadd.f32 %v2175_v12, %v192_v18  ;;  %v234_v27 = vadd.f32 %v2175_v12, %v163_v16  ;;  %v2065_v18 = vld [vmem:[%s3043_s0 + $0x40] sm:$0xff]  }
  0x15   :  { %v235_v28 = vadd.f32 %v2175_v12, %v164_v17  ;;  %v1953_v29 = vunpack.c.h.bf16 %v2062_v13  ;;  %v193_v33 = vmul.f32 %v2008_v24, %v2164_v7  ;;  %v194_v34 = vmul.f32 %v2009_v25, %v2164_v7  ;;  %v2079_v17 = vld [vmem:[%s3043_s0 + $0xb0] sm:$0xff]  }
  0x16   :  { %v326_v31 = vmax.f32 %v262_v22, 0.0  ;;  %v327_v32 = vmax.f32 %v263_v23, 0.0  ;;  %v298_v36 = vmax.f32 %v234_v27, 0.0  ;;  %v165_v38 = vmul.f32 %v1952_v20, %v2164_v7 }
  0x17   :  { %v299_v37 = vmax.f32 %v235_v28, 0.0  ;;  %v1956_v40 = vunpack.c.l.bf16 %v2063_v30  ;;  %v2012_v41 = vunpack.c.l.bf16 %v2077_v35  ;;  %v264_v43 = vadd.f32 %v2175_v12, %v193_v33 }
  0x18   :  { %v372_v42 = vpack.c.bf16 %v327_v32, %v326_v31  ;;  %v265_v44 = vadd.f32 %v2175_v12, %v194_v34  ;;  %v2013_v45 = vunpack.c.h.bf16 %v2077_v35  ;;  %v236_v47 = vadd.f32 %v2175_v12, %v165_v38  ;;  %v2080_v34 = vld [vmem:[%s3043_s0 + $0xb8] sm:$0xff]  }
  0x19   :  { %v358_v46 = vpack.c.bf16 %v299_v37, %v298_v36  ;;  %v1957_v49 = vunpack.c.h.bf16 %v2063_v30  ;;  %v328_v51 = vmax.f32 %v264_v43, 0.0  ;;  %v195_v53 = vmul.f32 %v2012_v41, %v2164_v7 }
  0x1a   :  { %1770 = vmatmul.mubr.msk.bf16.gmra.mrb[4].mxu0 %vm434_vm0, %v355_v39  ;;  %v166_v39 = vmul.f32 %v1953_v29, %v2164_v7  ;;  %v329_v52 = vmax.f32 %v265_v44, 0.0  ;;  %v196_v54 = vmul.f32 %v2013_v45, %v2164_v7  ;;  %v300_v56 = vmax.f32 %v236_v47, 0.0  ;;  %v2066_v29 = vld [vmem:[%s3043_s0 + $0x48] sm:$0xff]  }
  0x1b   :  { %583 = vmatprep.mubr.bf16.mxu0 %v2110_v1  ;;  %1786 = vmatmul.mubr.msk.bf16.gmra.mrb[4].mxu1 %vm434_vm0, %v371_v21  ;;  %v167_v58 = vmul.f32 %v1956_v40, %v2164_v7  ;;  %v168_v59 = vmul.f32 %v1957_v49, %v2164_v7  ;;  %v1960_v60 = vunpack.c.l.bf16 %v2064_v50  ;;  %v2016_v61 = vunpack.c.l.bf16 %v2078_v55 }
  0x1c   :  { %743 = vmatprep.mubr.bf16.mxu1 %v2110_v1  ;;  %v237_v48 = vadd.f32 %v2175_v12, %v166_v39  ;;  %v373_v62 = vpack.c.bf16 %v329_v52, %v328_v51  ;;  %v266_v63 = vadd.f32 %v2175_v12, %v195_v53  ;;  %v267_v0 = vadd.f32 %v2175_v12, %v196_v54 }
  0x1d   :  { %v238_v4 = vadd.f32 %v2175_v12, %v167_v58  ;;  %v239_v5 = vadd.f32 %v2175_v12, %v168_v59  ;;  %v1961_v6 = vunpack.c.h.bf16 %v2064_v50  ;;  %v169_v8 = vmul.f32 %v1960_v60, %v2164_v7  ;;  %v2067_v58 = vld [vmem:[%s3043_s0 + $0x50] sm:$0xff]  }
  0x1e   :  { %v301_v57 = vmax.f32 %v237_v48, 0.0  ;;  %v197_v9 = vmul.f32 %v2016_v61, %v2164_v7  ;;  %v330_v10 = vmax.f32 %v266_v63, 0.0  ;;  %v331_v11 = vmax.f32 %v267_v0, 0.0 }
  0x1f   :  { %v302_v14 = vmax.f32 %v238_v4, 0.0  ;;  %v303_v15 = vmax.f32 %v239_v5, 0.0  ;;  %v170_v16 = vmul.f32 %v1961_v6, %v2164_v7  ;;  %v240_v19 = vadd.f32 %v2175_v12, %v169_v8  ;;  %v2068_v6 = vld [vmem:[%s3043_s0 + $0x58] sm:$0xff]  }
  0x20   :  { %v359_v3 = vpack.c.bf16 %v301_v57, %v300_v56  ;;  %v268_v20 = vadd.f32 %v2175_v12, %v197_v9  ;;  %v374_v21 = vpack.c.bf16 %v331_v11, %v330_v10  ;;  %v2020_v23 = vunpack.c.l.bf16 %v2079_v17  ;;  %v2081_v57 = vld [vmem:[%s3043_s0 + $0xc0] sm:$0xff]  }
  0x21   :  { %v2021_v24 = vunpack.c.h.bf16 %v2079_v17  ;;  %v360_v25 = vpack.c.bf16 %v303_v15, %v302_v14  ;;  %v1964_v27 = vunpack.c.l.bf16 %v2065_v18  ;;  %v1965_v28 = vunpack.c.h.bf16 %v2065_v18 }
  0x22   :  { %1771 = vmatmul.mubr.msk.bf16.gmra.mrb[8].mxu0 %vm434_vm0, %v356_v2  ;;  %v2017_v2 = vunpack.c.h.bf16 %v2078_v55  ;;  %v332_v30 = vmax.f32 %v268_v20, 0.0  ;;  %v199_v32 = vmul.f32 %v2020_v23, %v2164_v7  ;;  %v304_v35 = vmax.f32 %v240_v19, 0.0 }
  0x23   :  { %593 = vmatprep.mubr.bf16.mxu0 %v2110_v1  ;;  %1787 = vmatmul.mubr.msk.bf16.gmra.mrb[8].mxu1 %vm434_vm0, %v372_v42  ;;  %v200_v33 = vmul.f32 %v2021_v24, %v2164_v7  ;;  %v171_v37 = vmul.f32 %v1964_v27, %v2164_v7  ;;  %v172_v38 = vmul.f32 %v1965_v28, %v2164_v7  ;;  %v1968_v39 = vunpack.c.l.bf16 %v2066_v29 }
  0x24   :  { %753 = vmatprep.mubr.bf16.mxu1 %v2110_v1  ;;  %v198_v13 = vmul.f32 %v2017_v2, %v2164_v7  ;;  %v2024_v40 = vunpack.c.l.bf16 %v2080_v34  ;;  %v270_v42 = vadd.f32 %v2175_v12, %v199_v32  ;;  %v2025_v44 = vunpack.c.h.bf16 %v2080_v34 }
  0x25   :  { %v271_v43 = vadd.f32 %v2175_v12, %v200_v33  ;;  %v243_v47 = vadd.f32 %v2175_v12, %v172_v38  ;;  %v1969_v48 = vunpack.c.h.bf16 %v2066_v29  ;;  %v173_v49 = vmul.f32 %v1968_v39, %v2164_v7  ;;  %v2083_v33 = vld [vmem:[%s3043_s0 + $0xd0] sm:$0xff]  }
  0x26   :  { %v269_v22 = vadd.f32 %v2175_v12, %v198_v13  ;;  %v201_v50 = vmul.f32 %v2024_v40, %v2164_v7  ;;  %v334_v51 = vmax.f32 %v270_v42, 0.0  ;;  %v202_v53 = vmul.f32 %v2025_v44, %v2164_v7  ;;  %v2082_v13 = vld [vmem:[%s3043_s0 + $0xc8] sm:$0xff]  }
  0x27   :  { %v335_v52 = vmax.f32 %v271_v43, 0.0  ;;  %v307_v55 = vmax.f32 %v243_v47, 0.0  ;;  %v174_v56 = vmul.f32 %v1969_v48, %v2164_v7  ;;  %v244_v59 = vadd.f32 %v2175_v12, %v173_v49  ;;  %v2070_v48 = vld [vmem:[%s3043_s0 + $0x68] sm:$0xff]  }
  0x28   :  { %v333_v31 = vmax.f32 %v269_v22, 0.0  ;;  %v272_v60 = vadd.f32 %v2175_v12, %v201_v50  ;;  %v2028_v63 = vunpack.c.l.bf16 %v2081_v57  ;;  %v2029_v0 = vunpack.c.h.bf16 %v2081_v57 }
  0x29   :  { %v376_v61 = vpack.c.bf16 %v335_v52, %v334_v51  ;;  %v1972_v4 = vunpack.c.l.bf16 %v2067_v58  ;;  %v1973_v5 = vunpack.c.h.bf16 %v2067_v58  ;;  %v308_v14 = vmax.f32 %v244_v59, 0.0 }
  0x2a   :  { %1772 = vmatmul.mubr.msk.bf16.gmra.mrb[12].mxu0 %vm434_vm0, %v357_v26  ;;  %v241_v26 = vadd.f32 %v2175_v12, %v170_v16  ;;  %v375_v41 = vpack.c.bf16 %v333_v31, %v332_v30  ;;  %v336_v8 = vmax.f32 %v272_v60, 0.0  ;;  %v203_v10 = vmul.f32 %v2028_v63, %v2164_v7 }
  0x2b   :  { %603 = vmatprep.mubr.bf16.mxu0 %v2110_v1  ;;  %1788 = vmatmul.mubr.msk.bf16.gmra.mrb[12].mxu1 %vm434_vm0, %v373_v62  ;;  %v273_v62 = vadd.f32 %v2175_v12, %v202_v53  ;;  %v204_v11 = vmul.f32 %v2029_v0, %v2164_v7  ;;  %v175_v16 = vmul.f32 %v1972_v4, %v2164_v7  ;;  %v1976_v18 = vunpack.c.l.bf16 %v2068_v6  ;;  %v2084_v53 = vld [vmem:[%s3043_s0 + $0xd8] sm:$0xff]  }
  0x2c   :  { %763 = vmatprep.mubr.bf16.mxu1 %v2110_v1  ;;  %v305_v36 = vmax.f32 %v241_v26, 0.0  ;;  %v176_v17 = vmul.f32 %v1973_v5, %v2164_v7  ;;  %v2032_v19 = vunpack.c.l.bf16 %v2082_v13  ;;  %v2033_v23 = vunpack.c.h.bf16 %v2082_v13  ;;  %v2071_v5 = vld [vmem:[%s3043_s0 + $0x70] sm:$0xff]  }
  0x2d   :  { %v337_v9 = vmax.f32 %v273_v62, 0.0  ;;  %v275_v22 = vadd.f32 %v2175_v12, %v204_v11  ;;  %v1977_v27 = vunpack.c.h.bf16 %v2068_v6  ;;  %v177_v28 = vmul.f32 %v1976_v18, %v2164_v7  ;;  %v2085_v11 = vld [vmem:[%s3043_s0 + $0xe0] sm:$0xff]  }
  0x2e   :  { %v361_v45 = vpack.c.bf16 %v305_v36, %v304_v35  ;;  %v247_v26 = vadd.f32 %v2175_v12, %v176_v17  ;;  %v205_v31 = vmul.f32 %v2032_v19, %v2164_v7  ;;  %v206_v32 = vmul.f32 %v2033_v23, %v2164_v7 }
  0x2f   :  { %v377_v20 = vpack.c.bf16 %v337_v9, %v336_v8  ;;  %v339_v30 = vmax.f32 %v275_v22, 0.0  ;;  %v178_v36 = vmul.f32 %v1977_v27, %v2164_v7  ;;  %v248_v38 = vadd.f32 %v2175_v12, %v177_v28 }
  0x30   :  { %v311_v35 = vmax.f32 %v247_v26, 0.0  ;;  %v2036_v39 = vunpack.c.l.bf16 %v2083_v33  ;;  %v277_v42 = vadd.f32 %v2175_v12, %v206_v32  ;;  %v2037_v43 = vunpack.c.h.bf16 %v2083_v33  ;;  %v2086_v32 = vld [vmem:[%s3043_s0 + $0xe8] sm:$0xff]  }
  0x31   :  { %v1984_v58 = vunpack.c.l.bf16 %v2070_v48  ;;  %v2040_v59 = vunpack.c.l.bf16 %v2084_v53  ;;  %v2041_v63 = vunpack.c.h.bf16 %v2084_v53  ;;  %v1985_v4 = vunpack.c.h.bf16 %v2070_v48 }
  0x32   :  { %1773 = vmatmul.mubr.msk.bf16.gmra.mrb[16].mxu0 %vm434_vm0, %v358_v46  ;;  %v242_v46 = vadd.f32 %v2175_v12, %v171_v37  ;;  %v2069_v37 = vld [vmem:[%s3043_s0 + $0x60] sm:$0xff]   ;;  %v341_v50 = vmax.f32 %v277_v42, 0.0  ;;  %v207_v51 = vmul.f32 %v2036_v39, %v2164_v7  ;;  %v208_v52 = vmul.f32 %v2037_v43, %v2164_v7 }
  0x33   :  { %613 = vmatprep.mubr.bf16.mxu0 %v2110_v1  ;;  %1789 = vmatmul.mubr.msk.bf16.gmra.mrb[16].mxu1 %vm434_vm0, %v374_v21  ;;  %v274_v21 = vadd.f32 %v2175_v12, %v203_v10  ;;  %v1981_v47 = vunpack.c.h.bf16 %v2069_v37  ;;  %v209_v9 = vmul.f32 %v2040_v59, %v2164_v7  ;;  %v210_v10 = vmul.f32 %v2041_v63, %v2164_v7 }
  0x34   :  { %773 = vmatprep.mubr.bf16.mxu1 %v2110_v1  ;;  %v306_v54 = vmax.f32 %v242_v46, 0.0  ;;  %v1980_v46 = vunpack.c.l.bf16 %v2069_v37  ;;  %v279_v62 = vadd.f32 %v2175_v12, %v208_v52  ;;  %v1988_v17 = vunpack.c.l.bf16 %v2071_v5 }
  0x35   :  { %v338_v29 = vmax.f32 %v274_v21, 0.0  ;;  %v180_v57 = vmul.f32 %v1981_v47, %v2164_v7  ;;  %v2044_v18 = vunpack.c.l.bf16 %v2085_v11  ;;  %v281_v21 = vadd.f32 %v2175_v12, %v210_v10 }
  0x36   :  { %v362_v2 = vpack.c.bf16 %v307_v55, %v306_v54  ;;  %v312_v54 = vmax.f32 %v248_v38, 0.0  ;;  %v343_v8 = vmax.f32 %v279_v62, 0.0  ;;  %v2045_v22 = vunpack.c.h.bf16 %v2085_v11 }
  0x37   :  { %v378_v40 = vpack.c.bf16 %v339_v30, %v338_v29  ;;  %v1989_v26 = vunpack.c.h.bf16 %v2071_v5  ;;  %v183_v27 = vmul.f32 %v1988_v17, %v2164_v7  ;;  %v345_v29 = vmax.f32 %v281_v21, 0.0  ;;  %v2088_v5 = vld [vmem:[%s3043_s0 + $0xf8] sm:$0xff]  }
  0x38   :  { %v211_v30 = vmul.f32 %v2044_v18, %v2164_v7  ;;  %v2048_v38 = vunpack.c.l.bf16 %v2086_v32  ;;  %v2049_v42 = vunpack.c.h.bf16 %v2086_v32 }
  0x39   :  { %v254_v37 = vadd.f32 %v2175_v12, %v183_v27 }
  0x3a   :  { %1774 = vmatmul.mubr.msk.bf16.gmra.mrb[20].mxu0 %vm434_vm0, %v359_v3  ;;  %v245_v3 = vadd.f32 %v2175_v12, %v174_v56  ;;  %v179_v56 = vmul.f32 %v1980_v46, %v2164_v7 }
  0x3b   :  { %623 = vmatprep.mubr.bf16.mxu0 %v2110_v1  ;;  %1790 = vmatmul.mubr.msk.bf16.gmra.mrb[20].mxu1 %vm434_vm0, %v375_v41  ;;  %v276_v41 = vadd.f32 %v2175_v12, %v205_v31  ;;  %v212_v31 = vmul.f32 %v2045_v22, %v2164_v7  ;;  %v318_v52 = vmax.f32 %v254_v37, 0.0 }
  0x3c   :  { %783 = vmatprep.mubr.bf16.mxu1 %v2110_v1  ;;  %v309_v15 = vmax.f32 %v245_v3, 0.0  ;;  %v251_v3 = vadd.f32 %v2175_v12, %v180_v57 }
  0x3d   :  { %v340_v49 = vmax.f32 %v276_v41, 0.0  ;;  %v283_v41 = vadd.f32 %v2175_v12, %v212_v31 }
  0x3e   :  { %v363_v24 = vpack.c.bf16 %v309_v15, %v308_v14  ;;  %v315_v14 = vmax.f32 %v251_v3, 0.0  ;;  %v181_v15 = vmul.f32 %v1984_v58, %v2164_v7 }
  0x3f   :  { %v379_v60 = vpack.c.bf16 %v341_v50, %v340_v49  ;;  %v347_v48 = vmax.f32 %v283_v41, 0.0  ;;  %v213_v49 = vmul.f32 %v2048_v38, %v2164_v7  ;;  %v214_v50 = vmul.f32 %v2049_v42, %v2164_v7 }
  0x41   :  { %v284_v58 = vadd.f32 %v2175_v12, %v213_v49  ;;  %v285_v59 = vadd.f32 %v2175_v12, %v214_v50 }
  0x42   :  { %1775 = vmatmul.mubr.msk.bf16.gmra.mrb[24].mxu0 %vm434_vm0, %v360_v25  ;;  %v246_v25 = vadd.f32 %v2175_v12, %v175_v16  ;;  %v182_v16 = vmul.f32 %v1985_v4, %v2164_v7 }
  0x43   :  { %633 = vmatprep.mubr.bf16.mxu0 %v2110_v1  ;;  %1791 = vmatmul.mubr.msk.bf16.gmra.mrb[24].mxu1 %vm434_vm0, %v376_v61  ;;  %v278_v61 = vadd.f32 %v2175_v12, %v207_v51  ;;  %v2087_v51 = vld [vmem:[%s3043_s0 + $0xf0] sm:$0xff]  }
  0x44   :  { %793 = vmatprep.mubr.bf16.mxu1 %v2110_v1  ;;  %v310_v34 = vmax.f32 %v246_v25, 0.0  ;;  %v253_v25 = vadd.f32 %v2175_v12, %v182_v16 }
  0x45   :  { %v342_v6 = vmax.f32 %v278_v61, 0.0 }
  0x46   :  { %v364_v44 = vpack.c.bf16 %v311_v35, %v310_v34  ;;  %v317_v34 = vmax.f32 %v253_v25, 0.0  ;;  %v184_v35 = vmul.f32 %v1989_v26, %v2164_v7 }
  0x47   :  { %v380_v19 = vpack.c.bf16 %v343_v8, %v342_v6 }
  0x4a   :  { %1776 = vmatmul.mubr.msk.bf16.gmra.mrb[28].mxu0 %vm434_vm0, %v361_v45  ;;  %v249_v45 = vadd.f32 %v2175_v12, %v178_v36  ;;  %v2072_v36 = vld [vmem:[%s3043_s0 + $0x78] sm:$0xff]  }
  0x4b   :  { %643 = vmatprep.mubr.bf16.mxu0 %v2110_v1  ;;  %1792 = vmatmul.mubr.msk.bf16.gmra.mrb[28].mxu1 %vm434_vm0, %v377_v20  ;;  %v280_v20 = vadd.f32 %v2175_v12, %v209_v9  ;;  %v1993_v46 = vunpack.c.h.bf16 %v2072_v36  ;;  %v2056_v9 = vunpack.c.l.bf16 %v2088_v5 }
  0x4c   :  { %803 = vmatprep.mubr.bf16.mxu1 %v2110_v1  ;;  %v313_v55 = vmax.f32 %v249_v45, 0.0  ;;  %v1992_v45 = vunpack.c.l.bf16 %v2072_v36 }
  0x4d   :  { %v344_v28 = vmax.f32 %v280_v20, 0.0  ;;  %v217_v18 = vmul.f32 %v2056_v9, %v2164_v7 }
  0x4e   :  { %v365_v0 = vpack.c.bf16 %v313_v55, %v312_v54  ;;  %v185_v54 = vmul.f32 %v1992_v45, %v2164_v7  ;;  %v186_v55 = vmul.f32 %v1993_v46, %v2164_v7 }
  0x4f   :  { %v381_v39 = vpack.c.bf16 %v345_v29, %v344_v28  ;;  %v288_v21 = vadd.f32 %v2175_v12, %v217_v18 }
  0x50   :  { %v256_v62 = vadd.f32 %v2175_v12, %v185_v54  ;;  %v257_v63 = vadd.f32 %v2175_v12, %v186_v55 }
  0x52   :  { %1777 = vmatmul.mubr.msk.bf16.gmra.mrb[32].mxu0 %vm434_vm0, %v362_v2  ;;  %v250_v2 = vadd.f32 %v2175_v12, %v179_v56  ;;  %v2052_v56 = vunpack.c.l.bf16 %v2087_v51  ;;  %v320_v6 = vmax.f32 %v256_v62, 0.0  ;;  %v321_v8 = vmax.f32 %v257_v63, 0.0 }
  0x53   :  { %653 = vmatprep.mubr.bf16.mxu0 %v2110_v1  ;;  %1793 = vmatmul.mubr.msk.bf16.gmra.mrb[32].mxu1 %vm434_vm0, %v378_v40  ;;  %v282_v40 = vadd.f32 %v2175_v12, %v211_v30 }
  0x54   :  { %813 = vmatprep.mubr.bf16.mxu1 %v2110_v1  ;;  %v314_v13 = vmax.f32 %v250_v2, 0.0  ;;  %v349_v2 = vmax.f32 %v285_v59, 0.0  ;;  %v215_v3 = vmul.f32 %v2052_v56, %v2164_v7 }
  0x55   :  { %v346_v47 = vmax.f32 %v282_v40, 0.0 }
  0x56   :  { %v366_v23 = vpack.c.bf16 %v315_v14, %v314_v13  ;;  %v286_v11 = vadd.f32 %v2175_v12, %v215_v3  ;;  %v2057_v14 = vunpack.c.h.bf16 %v2088_v5 }
  0x57   :  { %v382_v57 = vpack.c.bf16 %v347_v48, %v346_v47 }
  0x58   :  { %v350_v16 = vmax.f32 %v286_v11, 0.0 }
  0x5a   :  { %1778 = vmatmul.mubr.msk.bf16.gmra.mrb[36].mxu0 %vm434_vm0, %v363_v24  ;;  %v252_v24 = vadd.f32 %v2175_v12, %v181_v15  ;;  %v369_v15 = vpack.c.bf16 %v321_v8, %v320_v6 }
  0x5b   :  { %663 = vmatprep.mubr.bf16.mxu0 %v2110_v1  ;;  %1794 = vmatmul.mubr.msk.bf16.gmra.mrb[36].mxu1 %vm434_vm0, %v379_v60  ;;  %v2053_v60 = vunpack.c.h.bf16 %v2087_v51 }
  0x5c   :  { %823 = vmatprep.mubr.bf16.mxu1 %v2110_v1  ;;  %v316_v33 = vmax.f32 %v252_v24, 0.0 }
  0x5d   :  { %v216_v4 = vmul.f32 %v2053_v60, %v2164_v7 }
  0x5e   :  { %v367_v43 = vpack.c.bf16 %v317_v34, %v316_v33 }
  0x5f   :  { %v287_v13 = vadd.f32 %v2175_v12, %v216_v4 }
  0x61   :  { %v351_v17 = vmax.f32 %v287_v13, 0.0 }
  0x62   :  { %1779 = vmatmul.mubr.msk.bf16.gmra.mrb[40].mxu0 %vm434_vm0, %v364_v44  ;;  %v255_v44 = vadd.f32 %v2175_v12, %v184_v35 }
  0x63   :  { %673 = vmatprep.mubr.bf16.mxu0 %v2110_v1  ;;  %1795 = vmatmul.mubr.msk.bf16.gmra.mrb[40].mxu1 %vm434_vm0, %v380_v19  ;;  %v218_v19 = vmul.f32 %v2057_v14, %v2164_v7  ;;  %v384_v20 = vpack.c.bf16 %v351_v17, %v350_v16 }
  0x64   :  { %833 = vmatprep.mubr.bf16.mxu1 %v2110_v1  ;;  %v319_v53 = vmax.f32 %v255_v44, 0.0 }
  0x65   :  { %v289_v22 = vadd.f32 %v2175_v12, %v218_v19 }
  0x66   :  { %v368_v61 = vpack.c.bf16 %v319_v53, %v318_v52 }
  0x67   :  { %v353_v24 = vmax.f32 %v289_v22, 0.0 }
  0x6a   :  { %1780 = vmatmul.mubr.msk.bf16.gmra.mrb[44].mxu0 %vm434_vm0, %v365_v0  ;;  %v348_v0 = vmax.f32 %v284_v58, 0.0 }
  0x6b   :  { %683 = vmatprep.mubr.bf16.mxu0 %v2110_v1  ;;  %1796 = vmatmul.mubr.msk.bf16.gmra.mrb[44].mxu1 %vm434_vm0, %v381_v39 }
  0x6c   :  { %843 = vmatprep.mubr.bf16.mxu1 %v2110_v1  ;;  %v383_v10 = vpack.c.bf16 %v349_v2, %v348_v0 }
  0x72   :  { %1781 = vmatmul.mubr.msk.bf16.gmra.mrb[48].mxu0 %vm434_vm0, %v366_v23  ;;  %v352_v23 = vmax.f32 %v288_v21, 0.0 }
  0x73   :  { %693 = vmatprep.mubr.bf16.mxu0 %v2110_v1  ;;  %1797 = vmatmul.mubr.msk.bf16.gmra.mrb[48].mxu1 %vm434_vm0, %v382_v57 }
  0x74   :  { %853 = vmatprep.mubr.bf16.mxu1 %v2110_v1  ;;  %v385_v25 = vpack.c.bf16 %v353_v24, %v352_v23 }
  0x7a   :  { %1782 = vmatmul.mubr.msk.bf16.gmra.mrb[52].mxu0 %vm434_vm0, %v367_v43 }
  0x7b   :  { %703 = vmatprep.mubr.bf16.mxu0 %v2110_v1  ;;  %1798 = vmatmul.mubr.msk.bf16.gmra.mrb[52].mxu1 %vm434_vm0, %v383_v10 }
  0x7c   :  { %863 = vmatprep.mubr.bf16.mxu1 %v2110_v1 }
  0x82   :  { %1783 = vmatmul.mubr.msk.bf16.gmra.mrb[56].mxu0 %vm434_vm0, %v368_v61 }
  0x83   :  { %713 = vmatprep.mubr.bf16.mxu0 %v2110_v1  ;;  %1799 = vmatmul.mubr.msk.bf16.gmra.mrb[56].mxu1 %vm434_vm0, %v384_v20 }
  0x84   :  { %873 = vmatprep.mubr.bf16.mxu1 %v2110_v1 }
  0x8a   :  { %1784 = vmatmul.mubr.msk.bf16.gmra.mrb[60].mxu0 %vm434_vm0, %v369_v15 }
  0x8b   :  { %1800 = vmatmul.mubr.msk.bf16.gmra.mrb[60].mxu1 %vm434_vm0, %v385_v25 }
  0xe5   :  { %v565_v26 = vpop.f32.mrb[0].mxu0 }
  0xe6   :  { %v567_v7 = vpop.f32.mrb[1].mxu0  ;;  %v1022_v29 = vmul.f32 %v565_v26, %v565_v26  ;;  %v2475_v55 = vpop.f32.mrb[0].mxu1 }
  0xe7   :  { %v1866_v27 = vpack.c.bf16 %v567_v7, %v565_v26  ;;  %v569_v28 = vpop.f32.mrb[2].mxu0  ;;  %v1023_v33 = vmul.f32 %v567_v7, %v567_v7  ;;  %v2477_v57 = vpop.f32.mrb[1].mxu1 }
  0xe8   :  { %v884_v30 = vadd.f32 %v569_v28, %v565_v26  ;;  %v1024_v31 = vmul.f32 %v569_v28, %v569_v28  ;;  %v571_v32 = vpop.f32.mrb[3].mxu0  ;;  %v1898_v61 = vpack.c.bf16 %v2477_v57, %v2475_v55  ;;  %v2481_v62 = vpop.f32.mrb[2].mxu1 }
  0xe9   :  { %1687 = vst [vmem:[%s3046_s4] sm:$0xff] %v1866_v27  ;;  %v953_v12 = vadd.f32 %v571_v32, %v567_v7  ;;  %v1025_v34 = vmul.f32 %v571_v32, %v571_v32  ;;  %v1867_v35 = vpack.c.bf16 %v571_v32, %v569_v28  ;;  %v2483_v4 = vpop.f32.mrb[3].mxu1 }
  0xea   :  { %v1150_v1 = vadd.f32 %v1024_v31, %v1022_v29  ;;  %1719 = vst [vmem:[%s3046_s4 + $0x100] sm:$0xff] %v1898_v61  ;;  %v1899_v16 = vpack.c.bf16 %v2483_v4, %v2481_v62 }
  0xeb   :  { %v1219_v36 = vadd.f32 %v1025_v34, %v1023_v33  ;;  %1688 = vst [vmem:[%s3046_s4 + $0x8] sm:$0xff] %v1867_v35 }
  0xec   :  { %1720 = vst [vmem:[%s3046_s4 + $0x108] sm:$0xff] %v1899_v16 }
  0xed   :  { %v575_v37 = vpop.f32.mrb[4].mxu0 }
  0xee   :  { %v885_v38 = vadd.f32 %v884_v30, %v575_v37  ;;  %v1026_v39 = vmul.f32 %v575_v37, %v575_v37  ;;  %v577_v40 = vpop.f32.mrb[5].mxu0  ;;  %v2499_v18 = vpop.f32.mrb[4].mxu1 }
  0xef   :  { %v954_v41 = vadd.f32 %v953_v12, %v577_v40  ;;  %v1027_v42 = vmul.f32 %v577_v40, %v577_v40  ;;  %v1868_v43 = vpack.c.bf16 %v577_v40, %v575_v37  ;;  %v579_v44 = vpop.f32.mrb[6].mxu0  ;;  %v2501_v20 = vpop.f32.mrb[5].mxu1 }
  0xf0   :  { %v1151_v45 = vadd.f32 %v1150_v1, %v1026_v39  ;;  %v886_v46 = vadd.f32 %v885_v38, %v579_v44  ;;  %v1028_v47 = vmul.f32 %v579_v44, %v579_v44  ;;  %v581_v48 = vpop.f32.mrb[7].mxu0  ;;  %v1900_v24 = vpack.c.bf16 %v2501_v20, %v2499_v18  ;;  %v2505_v25 = vpop.f32.mrb[6].mxu1 }
  0xf1   :  { %v1220_v49 = vadd.f32 %v1219_v36, %v1027_v42  ;;  %1689 = vst [vmem:[%s3046_s4 + $0x10] sm:$0xff] %v1868_v43  ;;  %v955_v50 = vadd.f32 %v954_v41, %v581_v48  ;;  %v1029_v51 = vmul.f32 %v581_v48, %v581_v48  ;;  %v1869_v52 = vpack.c.bf16 %v581_v48, %v579_v44  ;;  %v2507_v29 = vpop.f32.mrb[7].mxu1 }
  0xf2   :  { %v1152_v53 = vadd.f32 %v1151_v45, %v1028_v47  ;;  %1721 = vst [vmem:[%s3046_s4 + $0x110] sm:$0xff] %v1900_v24  ;;  %v1901_v37 = vpack.c.bf16 %v2507_v29, %v2505_v25 }
  0xf3   :  { %v1221_v54 = vadd.f32 %v1220_v49, %v1029_v51  ;;  %1690 = vst [vmem:[%s3046_s4 + $0x18] sm:$0xff] %v1869_v52 }
  0xf4   :  { %1722 = vst [vmem:[%s3046_s4 + $0x118] sm:$0xff] %v1901_v37 }
  0xf5   :  { %v585_v56 = vpop.f32.mrb[8].mxu0 }
  0xf6   :  { %v887_v58 = vadd.f32 %v886_v46, %v585_v56  ;;  %v1030_v59 = vmul.f32 %v585_v56, %v585_v56  ;;  %v587_v60 = vpop.f32.mrb[9].mxu0  ;;  %v2523_v39 = vpop.f32.mrb[8].mxu1 }
  0xf7   :  { %v956_v63 = vadd.f32 %v955_v50, %v587_v60  ;;  %v1031_v0 = vmul.f32 %v587_v60, %v587_v60  ;;  %v1870_v2 = vpack.c.bf16 %v587_v60, %v585_v56  ;;  %v589_v3 = vpop.f32.mrb[10].mxu0  ;;  %v2525_v41 = vpop.f32.mrb[9].mxu1 }
  0xf8   :  { %v1153_v5 = vadd.f32 %v1152_v53, %v1030_v59  ;;  %v888_v6 = vadd.f32 %v887_v58, %v589_v3  ;;  %v1032_v8 = vmul.f32 %v589_v3, %v589_v3  ;;  %v591_v9 = vpop.f32.mrb[11].mxu0  ;;  %v1902_v45 = vpack.c.bf16 %v2525_v41, %v2523_v39  ;;  %v2529_v46 = vpop.f32.mrb[10].mxu1 }
  0xf9   :  { %v1222_v10 = vadd.f32 %v1221_v54, %v1031_v0  ;;  %1691 = vst [vmem:[%s3046_s4 + $0x20] sm:$0xff] %v1870_v2  ;;  %v957_v11 = vadd.f32 %v956_v63, %v591_v9  ;;  %v1033_v13 = vmul.f32 %v591_v9, %v591_v9  ;;  %v1871_v14 = vpack.c.bf16 %v591_v9, %v589_v3  ;;  %v2531_v51 = vpop.f32.mrb[11].mxu1 }
  0xfa   :  { %v1154_v15 = vadd.f32 %v1153_v5, %v1032_v8  ;;  %1723 = vst [vmem:[%s3046_s4 + $0x120] sm:$0xff] %v1902_v45  ;;  %v1903_v0 = vpack.c.bf16 %v2531_v51, %v2529_v46 }
  0xfb   :  { %v1223_v17 = vadd.f32 %v1222_v10, %v1033_v13  ;;  %1692 = vst [vmem:[%s3046_s4 + $0x28] sm:$0xff] %v1871_v14 }
  0xfc   :  { %1724 = vst [vmem:[%s3046_s4 + $0x128] sm:$0xff] %v1903_v0 }
  0xfd   :  { %v595_v19 = vpop.f32.mrb[12].mxu0 }
  0xfe   :  { %v889_v21 = vadd.f32 %v888_v6, %v595_v19  ;;  %v1034_v22 = vmul.f32 %v595_v19, %v595_v19  ;;  %v597_v23 = vpop.f32.mrb[13].mxu0  ;;  %v2547_v3 = vpop.f32.mrb[12].mxu1 }
  0xff   :  { %v958_v26 = vadd.f32 %v957_v11, %v597_v23  ;;  %v1035_v7 = vmul.f32 %v597_v23, %v597_v23  ;;  %v1872_v27 = vpack.c.bf16 %v597_v23, %v595_v19  ;;  %v599_v28 = vpop.f32.mrb[14].mxu0  ;;  %v2549_v6 = vpop.f32.mrb[13].mxu1 }
 0x100   :  { %v1155_v30 = vadd.f32 %v1154_v15, %v1034_v22  ;;  %v890_v31 = vadd.f32 %v889_v21, %v599_v28  ;;  %v1036_v32 = vmul.f32 %v599_v28, %v599_v28  ;;  %v601_v33 = vpop.f32.mrb[15].mxu0  ;;  %v1904_v11 = vpack.c.bf16 %v2549_v6, %v2547_v3  ;;  %v2553_v13 = vpop.f32.mrb[14].mxu1 }
 0x101   :  { %v1224_v12 = vadd.f32 %v1223_v17, %v1035_v7  ;;  %1693 = vst [vmem:[%s3046_s4 + $0x30] sm:$0xff] %v1872_v27  ;;  %v959_v34 = vadd.f32 %v958_v26, %v601_v33  ;;  %v1037_v35 = vmul.f32 %v601_v33, %v601_v33  ;;  %v1873_v1 = vpack.c.bf16 %v601_v33, %v599_v28  ;;  %v2555_v19 = vpop.f32.mrb[15].mxu1 }
 0x102   :  { %v1156_v36 = vadd.f32 %v1155_v30, %v1036_v32  ;;  %1725 = vst [vmem:[%s3046_s4 + $0x130] sm:$0xff] %v1904_v11 }
 0x103   :  { %v1225_v38 = vadd.f32 %v1224_v12, %v1037_v35  ;;  %1694 = vst [vmem:[%s3046_s4 + $0x38] sm:$0xff] %v1873_v1 }
 0x105   :  { %v605_v40 = vpop.f32.mrb[16].mxu0 }
 0x106   :  { %v891_v42 = vadd.f32 %v890_v31, %v605_v40  ;;  %v1038_v43 = vmul.f32 %v605_v40, %v605_v40  ;;  %v607_v44 = vpop.f32.mrb[17].mxu0  ;;  %v1905_v31 = vpack.c.bf16 %v2555_v19, %v2553_v13  ;;  %v2571_v33 = vpop.f32.mrb[16].mxu1 }
 0x107   :  { %v960_v47 = vadd.f32 %v959_v34, %v607_v44  ;;  %v1039_v48 = vmul.f32 %v607_v44, %v607_v44  ;;  %v1874_v49 = vpack.c.bf16 %v607_v44, %v605_v40  ;;  %v609_v50 = vpop.f32.mrb[18].mxu0  ;;  %v2573_v34 = vpop.f32.mrb[17].mxu1 }
 0x108   :  { %v1157_v52 = vadd.f32 %v1156_v36, %v1038_v43  ;;  %v892_v53 = vadd.f32 %v891_v42, %v609_v50  ;;  %v1040_v54 = vmul.f32 %v609_v50, %v609_v50  ;;  %v611_v56 = vpop.f32.mrb[19].mxu0  ;;  %1726 = vst [vmem:[%s3046_s4 + $0x138] sm:$0xff] %v1905_v31  ;;  %v1906_v37 = vpack.c.bf16 %v2573_v34, %v2571_v33 }
 0x109   :  { %v1226_v58 = vadd.f32 %v1225_v38, %v1039_v48  ;;  %1695 = vst [vmem:[%s3046_s4 + $0x40] sm:$0xff] %v1874_v49  ;;  %v961_v59 = vadd.f32 %v960_v47, %v611_v56  ;;  %v1041_v60 = vmul.f32 %v611_v56, %v611_v56  ;;  %v1875_v61 = vpack.c.bf16 %v611_v56, %v609_v50  ;;  %v2577_v38 = vpop.f32.mrb[18].mxu1 }
 0x10a   :  { %v1158_v63 = vadd.f32 %v1157_v52, %v1040_v54  ;;  %v2579_v45 = vpop.f32.mrb[19].mxu1  ;;  %1727 = vst [vmem:[%s3046_s4 + $0x140] sm:$0xff] %v1906_v37 }
 0x10b   :  { %v1227_v2 = vadd.f32 %v1226_v58, %v1041_v60  ;;  %1696 = vst [vmem:[%s3046_s4 + $0x48] sm:$0xff] %v1875_v61 }
 0x10d   :  { %v615_v5 = vpop.f32.mrb[20].mxu0 }
 0x10e   :  { %v893_v8 = vadd.f32 %v892_v53, %v615_v5  ;;  %v1042_v9 = vmul.f32 %v615_v5, %v615_v5  ;;  %v617_v10 = vpop.f32.mrb[21].mxu0  ;;  %v2595_v61 = vpop.f32.mrb[20].mxu1 }
 0x10f   :  { %v962_v14 = vadd.f32 %v961_v59, %v617_v10  ;;  %v1043_v15 = vmul.f32 %v617_v10, %v617_v10  ;;  %v1876_v16 = vpack.c.bf16 %v617_v10, %v615_v5  ;;  %v619_v17 = vpop.f32.mrb[22].mxu0  ;;  %v1907_v59 = vpack.c.bf16 %v2579_v45, %v2577_v38  ;;  %v2597_v0 = vpop.f32.mrb[21].mxu1 }
 0x110   :  { %v1159_v21 = vadd.f32 %v1158_v63, %v1042_v9  ;;  %v894_v22 = vadd.f32 %v893_v8, %v619_v17  ;;  %v1044_v23 = vmul.f32 %v619_v17, %v619_v17  ;;  %v621_v24 = vpop.f32.mrb[23].mxu0  ;;  %v1908_v9 = vpack.c.bf16 %v2597_v0, %v2595_v61  ;;  %v2601_v10 = vpop.f32.mrb[22].mxu1 }
 0x111   :  { %v1228_v26 = vadd.f32 %v1227_v2, %v1043_v15  ;;  %1697 = vst [vmem:[%s3046_s4 + $0x50] sm:$0xff] %v1876_v16  ;;  %v963_v7 = vadd.f32 %v962_v14, %v621_v24  ;;  %v1045_v27 = vmul.f32 %v621_v24, %v621_v24  ;;  %v1877_v28 = vpack.c.bf16 %v621_v24, %v619_v17  ;;  %v2603_v17 = vpop.f32.mrb[23].mxu1 }
 0x112   :  { %v1160_v30 = vadd.f32 %v1159_v21, %v1044_v23  ;;  %1728 = vst [vmem:[%s3046_s4 + $0x148] sm:$0xff] %v1907_v59  ;;  %1729 = vst [vmem:[%s3046_s4 + $0x150] sm:$0xff] %v1908_v9  ;;  %v1909_v31 = vpack.c.bf16 %v2603_v17, %v2601_v10 }
 0x113   :  { %v1229_v32 = vadd.f32 %v1228_v26, %v1045_v27  ;;  %1698 = vst [vmem:[%s3046_s4 + $0x58] sm:$0xff] %v1877_v28 }
 0x114   :  { %1730 = vst [vmem:[%s3046_s4 + $0x158] sm:$0xff] %v1909_v31 }
 0x115   :  { %v625_v12 = vpop.f32.mrb[24].mxu0 }
 0x116   :  { %v895_v35 = vadd.f32 %v894_v22, %v625_v12  ;;  %v1046_v1 = vmul.f32 %v625_v12, %v625_v12  ;;  %v627_v36 = vpop.f32.mrb[25].mxu0 }
 0x117   :  { %v964_v40 = vadd.f32 %v963_v7, %v627_v36  ;;  %v1047_v42 = vmul.f32 %v627_v36, %v627_v36  ;;  %v1878_v43 = vpack.c.bf16 %v627_v36, %v625_v12  ;;  %v629_v44 = vpop.f32.mrb[26].mxu0  ;;  %v2619_v12 = vpop.f32.mrb[24].mxu1 }
 0x118   :  { %v1161_v47 = vadd.f32 %v1160_v30, %v1046_v1  ;;  %v896_v48 = vadd.f32 %v895_v35, %v629_v44  ;;  %v1048_v49 = vmul.f32 %v629_v44, %v629_v44  ;;  %v631_v50 = vpop.f32.mrb[27].mxu0  ;;  %v2621_v1 = vpop.f32.mrb[25].mxu1 }
 0x119   :  { %v1230_v52 = vadd.f32 %v1229_v32, %v1047_v42  ;;  %1699 = vst [vmem:[%s3046_s4 + $0x60] sm:$0xff] %v1878_v43  ;;  %v965_v53 = vadd.f32 %v964_v40, %v631_v50  ;;  %v1049_v54 = vmul.f32 %v631_v50, %v631_v50  ;;  %v1879_v56 = vpack.c.bf16 %v631_v50, %v629_v44  ;;  %v2625_v43 = vpop.f32.mrb[26].mxu1 }
 0x11a   :  { %v1162_v58 = vadd.f32 %v1161_v47, %v1048_v49  ;;  %v1910_v42 = vpack.c.bf16 %v2621_v1, %v2619_v12  ;;  %v2627_v50 = vpop.f32.mrb[27].mxu1 }
 0x11b   :  { %v1231_v60 = vadd.f32 %v1230_v52, %v1049_v54  ;;  %1700 = vst [vmem:[%s3046_s4 + $0x68] sm:$0xff] %v1879_v56 }
 0x11c   :  { %1731 = vst [vmem:[%s3046_s4 + $0x160] sm:$0xff] %v1910_v42 }
 0x11d   :  { %v635_v63 = vpop.f32.mrb[28].mxu0 }
 0x11e   :  { %v897_v2 = vadd.f32 %v896_v48, %v635_v63  ;;  %v1050_v5 = vmul.f32 %v635_v63, %v635_v63  ;;  %v637_v8 = vpop.f32.mrb[29].mxu0  ;;  %v2643_v9 = vpop.f32.mrb[28].mxu1 }
 0x11f   :  { %v966_v11 = vadd.f32 %v965_v53, %v637_v8  ;;  %v1051_v14 = vmul.f32 %v637_v8, %v637_v8  ;;  %v1880_v15 = vpack.c.bf16 %v637_v8, %v635_v63  ;;  %v639_v16 = vpop.f32.mrb[30].mxu0 }
 0x120   :  { %v1163_v21 = vadd.f32 %v1162_v58, %v1050_v5  ;;  %v898_v22 = vadd.f32 %v897_v2, %v639_v16  ;;  %v1052_v23 = vmul.f32 %v639_v16, %v639_v16  ;;  %v641_v24 = vpop.f32.mrb[31].mxu0  ;;  %v1911_v5 = vpack.c.bf16 %v2627_v50, %v2625_v43 }
 0x121   :  { %v1232_v26 = vadd.f32 %v1231_v60, %v1051_v14  ;;  %1701 = vst [vmem:[%s3046_s4 + $0x70] sm:$0xff] %v1880_v15  ;;  %v967_v7 = vadd.f32 %v966_v11, %v641_v24  ;;  %v1053_v27 = vmul.f32 %v641_v24, %v641_v24  ;;  %v1881_v28 = vpack.c.bf16 %v641_v24, %v639_v16  ;;  %v2645_v14 = vpop.f32.mrb[29].mxu1 }
 0x122   :  { %v1164_v30 = vadd.f32 %v1163_v21, %v1052_v23  ;;  %1732 = vst [vmem:[%s3046_s4 + $0x168] sm:$0xff] %v1911_v5  ;;  %v2649_v23 = vpop.f32.mrb[30].mxu1 }
 0x123   :  { %v1233_v32 = vadd.f32 %v1232_v26, %v1053_v27  ;;  %1702 = vst [vmem:[%s3046_s4 + $0x78] sm:$0xff] %v1881_v28  ;;  %v2651_v28 = vpop.f32.mrb[31].mxu1 }
 0x125   :  { %v645_v35 = vpop.f32.mrb[32].mxu0 }
 0x126   :  { %v899_v36 = vadd.f32 %v898_v22, %v645_v35  ;;  %v1054_v37 = vmul.f32 %v645_v35, %v645_v35  ;;  %v647_v40 = vpop.f32.mrb[33].mxu0  ;;  %v1912_v22 = vpack.c.bf16 %v2645_v14, %v2643_v9 }
 0x127   :  { %v968_v44 = vadd.f32 %v967_v7, %v647_v40  ;;  %v1055_v47 = vmul.f32 %v647_v40, %v647_v40  ;;  %v1882_v48 = vpack.c.bf16 %v647_v40, %v645_v35  ;;  %v649_v49 = vpop.f32.mrb[34].mxu0 }
 0x128   :  { %v1165_v52 = vadd.f32 %v1164_v30, %v1054_v37  ;;  %v900_v53 = vadd.f32 %v899_v36, %v649_v49  ;;  %v1056_v54 = vmul.f32 %v649_v49, %v649_v49  ;;  %v651_v56 = vpop.f32.mrb[35].mxu0  ;;  %1733 = vst [vmem:[%s3046_s4 + $0x170] sm:$0xff] %v1912_v22 }
 0x129   :  { %v1234_v58 = vadd.f32 %v1233_v32, %v1055_v47  ;;  %1703 = vst [vmem:[%s3046_s4 + $0x80] sm:$0xff] %v1882_v48  ;;  %v969_v59 = vadd.f32 %v968_v44, %v651_v56  ;;  %v1057_v60 = vmul.f32 %v651_v56, %v651_v56  ;;  %v1883_v63 = vpack.c.bf16 %v651_v56, %v649_v49  ;;  %v2667_v49 = vpop.f32.mrb[32].mxu1 }
 0x12a   :  { %v1166_v2 = vadd.f32 %v1165_v52, %v1056_v54  ;;  %v1913_v47 = vpack.c.bf16 %v2651_v28, %v2649_v23 }
 0x12b   :  { %v1235_v8 = vadd.f32 %v1234_v58, %v1057_v60  ;;  %1704 = vst [vmem:[%s3046_s4 + $0x88] sm:$0xff] %v1883_v63 }
 0x12c   :  { %1734 = vst [vmem:[%s3046_s4 + $0x178] sm:$0xff] %v1913_v47 }
 0x12d   :  { %v655_v11 = vpop.f32.mrb[36].mxu0 }
 0x12e   :  { %v901_v15 = vadd.f32 %v900_v53, %v655_v11  ;;  %v1058_v16 = vmul.f32 %v655_v11, %v655_v11  ;;  %v657_v21 = vpop.f32.mrb[37].mxu0  ;;  %v2669_v53 = vpop.f32.mrb[33].mxu1 }
 0x12f   :  { %v970_v24 = vadd.f32 %v969_v59, %v657_v21  ;;  %v1059_v26 = vmul.f32 %v657_v21, %v657_v21  ;;  %v1884_v7 = vpack.c.bf16 %v657_v21, %v655_v11  ;;  %v659_v27 = vpop.f32.mrb[38].mxu0  ;;  %v1914_v59 = vpack.c.bf16 %v2669_v53, %v2667_v49  ;;  %v2673_v60 = vpop.f32.mrb[34].mxu1 }
 0x130   :  { %v1167_v30 = vadd.f32 %v1166_v2, %v1058_v16  ;;  %v902_v31 = vadd.f32 %v901_v15, %v659_v27  ;;  %v1060_v32 = vmul.f32 %v659_v27, %v659_v27  ;;  %v661_v35 = vpop.f32.mrb[39].mxu0  ;;  %v2675_v11 = vpop.f32.mrb[35].mxu1 }
 0x131   :  { %v1236_v36 = vadd.f32 %v1235_v8, %v1059_v26  ;;  %1705 = vst [vmem:[%s3046_s4 + $0x90] sm:$0xff] %v1884_v7  ;;  %v971_v37 = vadd.f32 %v970_v24, %v661_v35  ;;  %v1061_v40 = vmul.f32 %v661_v35, %v661_v35  ;;  %v1885_v42 = vpack.c.bf16 %v661_v35, %v659_v27  ;;  %v2691_v35 = vpop.f32.mrb[36].mxu1 }
 0x132   :  { %v1168_v44 = vadd.f32 %v1167_v30, %v1060_v32  ;;  %1735 = vst [vmem:[%s3046_s4 + $0x180] sm:$0xff] %v1914_v59 }
 0x133   :  { %v1237_v48 = vadd.f32 %v1236_v36, %v1061_v40  ;;  %1706 = vst [vmem:[%s3046_s4 + $0x98] sm:$0xff] %v1885_v42 }
 0x135   :  { %v665_v52 = vpop.f32.mrb[40].mxu0 }
 0x136   :  { %v903_v54 = vadd.f32 %v902_v31, %v665_v52  ;;  %v1062_v56 = vmul.f32 %v665_v52, %v665_v52  ;;  %v667_v58 = vpop.f32.mrb[41].mxu0  ;;  %v1915_v31 = vpack.c.bf16 %v2675_v11, %v2673_v60 }
 0x137   :  { %v972_v63 = vadd.f32 %v971_v37, %v667_v58  ;;  %v1063_v2 = vmul.f32 %v667_v58, %v667_v58  ;;  %v1886_v5 = vpack.c.bf16 %v667_v58, %v665_v52  ;;  %v669_v8 = vpop.f32.mrb[42].mxu0  ;;  %v2693_v37 = vpop.f32.mrb[37].mxu1 }
 0x138   :  { %v1169_v15 = vadd.f32 %v1168_v44, %v1062_v56  ;;  %v904_v16 = vadd.f32 %v903_v54, %v669_v8  ;;  %v1064_v21 = vmul.f32 %v669_v8, %v669_v8  ;;  %v671_v22 = vpop.f32.mrb[43].mxu0  ;;  %1736 = vst [vmem:[%s3046_s4 + $0x188] sm:$0xff] %v1915_v31  ;;  %v1916_v47 = vpack.c.bf16 %v2693_v37, %v2691_v35 }
 0x139   :  { %v1238_v24 = vadd.f32 %v1237_v48, %v1063_v2  ;;  %1707 = vst [vmem:[%s3046_s4 + $0xa0] sm:$0xff] %v1886_v5  ;;  %v973_v26 = vadd.f32 %v972_v63, %v671_v22  ;;  %v1065_v7 = vmul.f32 %v671_v22, %v671_v22  ;;  %v1887_v27 = vpack.c.bf16 %v671_v22, %v669_v8  ;;  %v2697_v48 = vpop.f32.mrb[38].mxu1 }
 0x13a   :  { %v1170_v30 = vadd.f32 %v1169_v15, %v1064_v21  ;;  %v2699_v59 = vpop.f32.mrb[39].mxu1  ;;  %1737 = vst [vmem:[%s3046_s4 + $0x190] sm:$0xff] %v1916_v47 }
 0x13b   :  { %v1239_v32 = vadd.f32 %v1238_v24, %v1065_v7  ;;  %1708 = vst [vmem:[%s3046_s4 + $0xa8] sm:$0xff] %v1887_v27  ;;  %v2715_v27 = vpop.f32.mrb[40].mxu1 }
 0x13c   :  { %v2717_v31 = vpop.f32.mrb[41].mxu1 }
 0x13d   :  { %v675_v36 = vpop.f32.mrb[44].mxu0 }
 0x13e   :  { %v905_v40 = vadd.f32 %v904_v16, %v675_v36  ;;  %v1066_v42 = vmul.f32 %v675_v36, %v675_v36  ;;  %v677_v44 = vpop.f32.mrb[45].mxu0 }
 0x13f   :  { %v974_v52 = vadd.f32 %v973_v26, %v677_v44  ;;  %v1067_v54 = vmul.f32 %v677_v44, %v677_v44  ;;  %v1888_v56 = vpack.c.bf16 %v677_v44, %v675_v36  ;;  %v679_v58 = vpop.f32.mrb[46].mxu0  ;;  %v1917_v26 = vpack.c.bf16 %v2699_v59, %v2697_v48  ;;  %v2721_v44 = vpop.f32.mrb[42].mxu1 }
 0x140   :  { %v1171_v63 = vadd.f32 %v1170_v30, %v1066_v42  ;;  %v906_v2 = vadd.f32 %v905_v40, %v679_v58  ;;  %v1068_v5 = vmul.f32 %v679_v58, %v679_v58  ;;  %v681_v8 = vpop.f32.mrb[47].mxu0  ;;  %v1918_v42 = vpack.c.bf16 %v2717_v31, %v2715_v27 }
 0x141   :  { %v1240_v15 = vadd.f32 %v1239_v32, %v1067_v54  ;;  %1709 = vst [vmem:[%s3046_s4 + $0xb0] sm:$0xff] %v1888_v56  ;;  %v975_v16 = vadd.f32 %v974_v52, %v681_v8  ;;  %v1069_v21 = vmul.f32 %v681_v8, %v681_v8  ;;  %v1889_v22 = vpack.c.bf16 %v681_v8, %v679_v58  ;;  %v2723_v58 = vpop.f32.mrb[43].mxu1 }
 0x142   :  { %v1172_v24 = vadd.f32 %v1171_v63, %v1068_v5  ;;  %1738 = vst [vmem:[%s3046_s4 + $0x198] sm:$0xff] %v1917_v26  ;;  %3070 = vst [vmem:[#allocation2_spill] sm:$0xff] %v2723_v58 }
 0x143   :  { %v1241_v7 = vadd.f32 %v1240_v15, %v1069_v21  ;;  %1710 = vst [vmem:[%s3046_s4 + $0xb8] sm:$0xff] %v1889_v22  ;;  %1739 = vst [vmem:[%s3046_s4 + $0x1a0] sm:$0xff] %v1918_v42 }
 0x145   :  { %v685_v30 = vpop.f32.mrb[48].mxu0 }
 0x146   :  { %v907_v32 = vadd.f32 %v906_v2, %v685_v30  ;;  %v1070_v36 = vmul.f32 %v685_v30, %v685_v30  ;;  %v687_v40 = vpop.f32.mrb[49].mxu0 }
 0x147   :  { %v976_v47 = vadd.f32 %v975_v16, %v687_v40  ;;  %v1071_v52 = vmul.f32 %v687_v40, %v687_v40  ;;  %v1890_v54 = vpack.c.bf16 %v687_v40, %v685_v30  ;;  %v689_v56 = vpop.f32.mrb[50].mxu0  ;;  %v1919_v30 = vpack.c.bf16 %v2723_v58, %v2721_v44 }
 0x148   :  { %v1173_v63 = vadd.f32 %v1172_v24, %v1070_v36  ;;  %v908_v5 = vadd.f32 %v907_v32, %v689_v56  ;;  %v1072_v8 = vmul.f32 %v689_v56, %v689_v56  ;;  %v691_v15 = vpop.f32.mrb[51].mxu0 }
 0x149   :  { %v1242_v2 = vadd.f32 %v1241_v7, %v1071_v52  ;;  %1711 = vst [vmem:[%s3046_s4 + $0xc0] sm:$0xff] %v1890_v54  ;;  %v977_v21 = vadd.f32 %v976_v47, %v691_v15  ;;  %v1073_v16 = vmul.f32 %v691_v15, %v691_v15  ;;  %v1891_v22 = vpack.c.bf16 %v691_v15, %v689_v56  ;;  %v2739_v7 = vpop.f32.mrb[44].mxu1 }
 0x14a   :  { %v1174_v26 = vadd.f32 %v1173_v63, %v1072_v8  ;;  %1740 = vst [vmem:[%s3046_s4 + $0x1a8] sm:$0xff] %v1919_v30  ;;  %3071 = vst [vmem:[#allocation3_spill] sm:$0xff] %v2739_v7  ;;  %v2741_v36 = vpop.f32.mrb[45].mxu1 }
 0x14b   :  { %v1243_v24 = vadd.f32 %v1242_v2, %v1073_v16  ;;  %1712 = vst [vmem:[%s3046_s4 + $0xc8] sm:$0xff] %v1891_v22  ;;  %3072 = vst [vmem:[#allocation4_spill] sm:$0xff] %v2741_v36  ;;  %v1920_v52 = vpack.c.bf16 %v2741_v36, %v2739_v7  ;;  %v2745_v54 = vpop.f32.mrb[46].mxu1 }
 0x14c   :  { %3073 = vst [vmem:[#allocation5_spill] sm:$0xff] %v2745_v54  ;;  %v2747_v2 = vpop.f32.mrb[47].mxu1 }
 0x14d   :  { %v695_v32 = vpop.f32.mrb[52].mxu0  ;;  %3074 = vst [vmem:[#allocation6_spill] sm:$0xff] %v2747_v2  ;;  %1741 = vst [vmem:[%s3046_s4 + $0x1b0] sm:$0xff] %v1920_v52 }
 0x14e   :  { %v909_v40 = vadd.f32 %v908_v5, %v695_v32  ;;  %v1074_v42 = vmul.f32 %v695_v32, %v695_v32  ;;  %v697_v47 = vpop.f32.mrb[53].mxu0 }
 0x14f   :  { %v978_v56 = vadd.f32 %v977_v21, %v697_v47  ;;  %v1075_v63 = vmul.f32 %v697_v47, %v697_v47  ;;  %v1892_v8 = vpack.c.bf16 %v697_v47, %v695_v32  ;;  %v699_v15 = vpop.f32.mrb[54].mxu0  ;;  %v1921_v47 = vpack.c.bf16 %v2747_v2, %v2745_v54 }
 0x150   :  { %v1175_v16 = vadd.f32 %v1174_v26, %v1074_v42  ;;  %v910_v22 = vadd.f32 %v909_v40, %v699_v15  ;;  %v1076_v30 = vmul.f32 %v699_v15, %v699_v15  ;;  %v701_v58 = vpop.f32.mrb[55].mxu0 }
 0x151   :  { %v1244_v5 = vadd.f32 %v1243_v24, %v1075_v63  ;;  %1713 = vst [vmem:[%s3046_s4 + $0xd0] sm:$0xff] %v1892_v8  ;;  %v979_v36 = vadd.f32 %v978_v56, %v701_v58  ;;  %v1077_v21 = vmul.f32 %v701_v58, %v701_v58  ;;  %v1893_v7 = vpack.c.bf16 %v701_v58, %v699_v15  ;;  %v2763_v24 = vpop.f32.mrb[48].mxu1 }
 0x152   :  { %v1176_v32 = vadd.f32 %v1175_v16, %v1076_v30  ;;  %1742 = vst [vmem:[%s3046_s4 + $0x1b8] sm:$0xff] %v1921_v47  ;;  %3075 = vst [vmem:[#allocation7_spill] sm:$0xff] %v2763_v24  ;;  %v2765_v42 = vpop.f32.mrb[49].mxu1 }
 0x153   :  { %v1245_v26 = vadd.f32 %v1244_v5, %v1077_v21  ;;  %1714 = vst [vmem:[%s3046_s4 + $0xd8] sm:$0xff] %v1893_v7  ;;  %3076 = vst [vmem:[#allocation8_spill] sm:$0xff] %v2765_v42  ;;  %v1922_v63 = vpack.c.bf16 %v2765_v42, %v2763_v24  ;;  %v2769_v8 = vpop.f32.mrb[50].mxu1 }
 0x154   :  { %3077 = vst [vmem:[#allocation9_spill] sm:$0xff] %v2769_v8  ;;  %v2771_v5 = vpop.f32.mrb[51].mxu1 }
 0x155   :  { %v705_v40 = vpop.f32.mrb[56].mxu0  ;;  %3078 = vst [vmem:[#allocation10_spill] sm:$0xff] %v2771_v5  ;;  %1743 = vst [vmem:[%s3046_s4 + $0x1c0] sm:$0xff] %v1922_v63 }
 0x156   :  { %v911_v52 = vadd.f32 %v910_v22, %v705_v40  ;;  %v1078_v58 = vmul.f32 %v705_v40, %v705_v40  ;;  %v707_v56 = vpop.f32.mrb[57].mxu0 }
 0x157   :  { %v980_v15 = vadd.f32 %v979_v36, %v707_v56  ;;  %v1079_v16 = vmul.f32 %v707_v56, %v707_v56  ;;  %v1894_v7 = vpack.c.bf16 %v707_v56, %v705_v40  ;;  %v709_v30 = vpop.f32.mrb[58].mxu0  ;;  %v1923_v56 = vpack.c.bf16 %v2771_v5, %v2769_v8 }
 0x158   :  { %v1177_v21 = vadd.f32 %v1176_v32, %v1078_v58  ;;  %v912_v47 = vadd.f32 %v911_v52, %v709_v30  ;;  %v1080_v2 = vmul.f32 %v709_v30, %v709_v30  ;;  %v711_v54 = vpop.f32.mrb[59].mxu0 }
 0x159   :  { %v1246_v22 = vadd.f32 %v1245_v26, %v1079_v16  ;;  %1715 = vst [vmem:[%s3046_s4 + $0xe0] sm:$0xff] %v1894_v7  ;;  %v981_v42 = vadd.f32 %v980_v15, %v711_v54  ;;  %v1081_v36 = vmul.f32 %v711_v54, %v711_v54  ;;  %v1895_v24 = vpack.c.bf16 %v711_v54, %v709_v30  ;;  %v2787_v26 = vpop.f32.mrb[52].mxu1 }
 0x15a   :  { %v1178_v40 = vadd.f32 %v1177_v21, %v1080_v2  ;;  %1744 = vst [vmem:[%s3046_s4 + $0x1c8] sm:$0xff] %v1923_v56  ;;  %3079 = vst [vmem:[#allocation11_spill] sm:$0xff] %v2787_v26  ;;  %v2789_v58 = vpop.f32.mrb[53].mxu1 }
 0x15b   :  { %v1247_v32 = vadd.f32 %v1246_v22, %v1081_v36  ;;  %1716 = vst [vmem:[%s3046_s4 + $0xe8] sm:$0xff] %v1895_v24  ;;  %3080 = vst [vmem:[#allocation12_spill] sm:$0xff] %v2789_v58  ;;  %v1924_v15 = vpack.c.bf16 %v2789_v58, %v2787_v26  ;;  %v2793_v16 = vpop.f32.mrb[54].mxu1 }
 0x15c   :  { %v2795_v22 = vpop.f32.mrb[55].mxu1 }
 0x15d   :  { %v715_v52 = vpop.f32.mrb[60].mxu0  ;;  %1745 = vst [vmem:[%s3046_s4 + $0x1d0] sm:$0xff] %v1924_v15 }
 0x15e   :  { %v913_v63 = vadd.f32 %v912_v47, %v715_v52  ;;  %v1082_v54 = vmul.f32 %v715_v52, %v715_v52  ;;  %v717_v2 = vpop.f32.mrb[61].mxu0 }
 0x15f   :  { %v982_v7 = vadd.f32 %v981_v42, %v717_v2  ;;  %v1083_v30 = vmul.f32 %v717_v2, %v717_v2  ;;  %v1896_v24 = vpack.c.bf16 %v717_v2, %v715_v52  ;;  %v719_v21 = vpop.f32.mrb[62].mxu0  ;;  %v1086_v52 = vmul.f32 %v2475_v55, %v2475_v55 }
 0x160   :  { %v1179_v36 = vadd.f32 %v1178_v40, %v1082_v54  ;;  %v914_v56 = vadd.f32 %v913_v63, %v719_v21  ;;  %v1084_v5 = vmul.f32 %v719_v21, %v719_v21  ;;  %v721_v8 = vpop.f32.mrb[63].mxu0  ;;  %v1925_v54 = vpack.c.bf16 %v2795_v22, %v2793_v16 }
 0x161   :  { %v1248_v47 = vadd.f32 %v1247_v32, %v1083_v30  ;;  %1717 = vst [vmem:[%s3046_s4 + $0xf0] sm:$0xff] %v1896_v24  ;;  %v983_v58 = vadd.f32 %v982_v7, %v721_v8  ;;  %v1085_v42 = vmul.f32 %v721_v8, %v721_v8  ;;  %v1897_v26 = vpack.c.bf16 %v721_v8, %v719_v21 }
 0x162   :  { %v915_v40 = vadd.f32 %v914_v56, %v2475_v55  ;;  %v1180_v63 = vadd.f32 %v1179_v36, %v1084_v5  ;;  %v1087_v2 = vmul.f32 %v2477_v57, %v2477_v57  ;;  %v1088_v8 = vmul.f32 %v2481_v62, %v2481_v62  ;;  %1746 = vst [vmem:[%s3046_s4 + $0x1d8] sm:$0xff] %v1925_v54  ;;  %v2820_v5 = vpop.f32.mrb[56].mxu1 }
 0x163   :  { %v984_v32 = vadd.f32 %v983_v58, %v2477_v57  ;;  %v1249_v15 = vadd.f32 %v1248_v47, %v1085_v42  ;;  %1718 = vst [vmem:[%s3046_s4 + $0xf8] sm:$0xff] %v1897_v26  ;;  %v1089_v57 = vmul.f32 %v2483_v4, %v2483_v4  ;;  %v2825_v24 = vpop.f32.mrb[57].mxu1  ;;  %v1090_v26 = vmul.f32 %v2499_v18, %v2499_v18 }
 0x164   :  { %v916_v7 = vadd.f32 %v915_v40, %v2481_v62  ;;  %v1181_v55 = vadd.f32 %v1180_v63, %v1086_v52  ;;  %v1926_v36 = vpack.c.bf16 %v2825_v24, %v2820_v5  ;;  %v2832_v56 = vpop.f32.mrb[58].mxu1  ;;  %v1091_v47 = vmul.f32 %v2501_v20, %v2501_v20 }
 0x165   :  { %v985_v58 = vadd.f32 %v984_v32, %v2483_v4  ;;  %v1250_v30 = vadd.f32 %v1249_v15, %v1087_v2  ;;  %v2837_v52 = vpop.f32.mrb[59].mxu1  ;;  %v1092_v40 = vmul.f32 %v2505_v25, %v2505_v25  ;;  %v1093_v2 = vmul.f32 %v2507_v29, %v2507_v29 }
 0x166   :  { %v917_v62 = vadd.f32 %v916_v7, %v2499_v18  ;;  %v1182_v21 = vadd.f32 %v1181_v55, %v1088_v8  ;;  %1747 = vst [vmem:[%s3046_s4 + $0x1e0] sm:$0xff] %v1926_v36  ;;  %v1927_v54 = vpack.c.bf16 %v2837_v52, %v2832_v56  ;;  %v1094_v15 = vmul.f32 %v2523_v39, %v2523_v39 }
 0x167   :  { %v986_v42 = vadd.f32 %v985_v58, %v2501_v20  ;;  %v1251_v4 = vadd.f32 %v1250_v30, %v1089_v57  ;;  %v1095_v7 = vmul.f32 %v2525_v41, %v2525_v41 }
 0x168   :  { %v918_v63 = vadd.f32 %v917_v62, %v2505_v25  ;;  %v1183_v18 = vadd.f32 %v1182_v21, %v1090_v26  ;;  %1748 = vst [vmem:[%s3046_s4 + $0x1e8] sm:$0xff] %v1927_v54  ;;  %v2862_v26 = vpop.f32.mrb[60].mxu1  ;;  %v1100_v54 = vmul.f32 %v2553_v13, %v2553_v13 }
 0x169   :  { %v987_v20 = vadd.f32 %v986_v42, %v2507_v29  ;;  %v1252_v32 = vadd.f32 %v1251_v4, %v1091_v47  ;;  %v1096_v29 = vmul.f32 %v2529_v46, %v2529_v46  ;;  %v2867_v36 = vpop.f32.mrb[61].mxu1 }
 0x16a   :  { %v919_v8 = vadd.f32 %v918_v63, %v2523_v39  ;;  %v1184_v25 = vadd.f32 %v1183_v18, %v1092_v40  ;;  %v1097_v39 = vmul.f32 %v2531_v51, %v2531_v51  ;;  %v2874_v4 = vpop.f32.mrb[62].mxu1  ;;  %v1099_v40 = vmul.f32 %v2549_v6, %v2549_v6 }
 0x16b   :  { %v988_v55 = vadd.f32 %v987_v20, %v2525_v41  ;;  %v1253_v57 = vadd.f32 %v1252_v32, %v1093_v2  ;;  %v1098_v41 = vmul.f32 %v2547_v3, %v2547_v3  ;;  %v2879_v18 = vpop.f32.mrb[63].mxu1  ;;  %v1101_v32 = vmul.f32 %v2555_v19, %v2555_v19 }
 0x16c   :  { %v920_v58 = vadd.f32 %v919_v8, %v2529_v46  ;;  %v1185_v30 = vadd.f32 %v1184_v25, %v1094_v15  ;;  %v1928_v46 = vpack.c.bf16 %v2867_v36, %v2862_v26  ;;  %v1929_v20 = vpack.c.bf16 %v2879_v18, %v2874_v4 }
 0x16d   :  { %v989_v62 = vadd.f32 %v988_v55, %v2531_v51  ;;  %v1254_v21 = vadd.f32 %v1253_v57, %v1095_v7  ;;  %v1102_v8 = vmul.f32 %v2571_v33, %v2571_v33  ;;  %v1103_v7 = vmul.f32 %v2573_v34, %v2573_v34 }
 0x16e   :  { %v921_v47 = vadd.f32 %v920_v58, %v2547_v3  ;;  %v1186_v42 = vadd.f32 %v1185_v30, %v1096_v29  ;;  %1749 = vst [vmem:[%s3046_s4 + $0x1f0] sm:$0xff] %v1928_v46  ;;  %1750 = vst [vmem:[%s3046_s4 + $0x1f8] sm:$0xff] %v1929_v20  ;;  %v1105_v30 = vmul.f32 %v2579_v45, %v2579_v45 }
 0x16f   :  { %v990_v63 = vadd.f32 %v989_v62, %v2549_v6  ;;  %v1255_v51 = vadd.f32 %v1254_v21, %v1097_v39  ;;  %v1106_v62 = vmul.f32 %v2595_v61, %v2595_v61 }
 0x170   :  { %v922_v2 = vadd.f32 %v921_v47, %v2553_v13  ;;  %v1187_v3 = vadd.f32 %v1186_v42, %v1098_v41 }
 0x171   :  { %v991_v6 = vadd.f32 %v990_v63, %v2555_v19  ;;  %v1256_v15 = vadd.f32 %v1255_v51, %v1099_v40  ;;  %v1104_v19 = vmul.f32 %v2577_v38, %v2577_v38 }
 0x172   :  { %v1188_v25 = vadd.f32 %v1187_v3, %v1100_v54  ;;  %v923_v13 = vadd.f32 %v922_v2, %v2571_v33 }
 0x173   :  { %v1257_v55 = vadd.f32 %v1256_v15, %v1101_v32  ;;  %v992_v57 = vadd.f32 %v991_v6, %v2573_v34  ;;  %v1107_v34 = vmul.f32 %v2597_v0, %v2597_v0 }
 0x174   :  { %v924_v29 = vadd.f32 %v923_v13, %v2577_v38  ;;  %v1189_v58 = vadd.f32 %v1188_v25, %v1102_v8  ;;  %v1108_v38 = vmul.f32 %v2601_v10, %v2601_v10 }
 0x175   :  { %v993_v33 = vadd.f32 %v992_v57, %v2579_v45  ;;  %v1258_v39 = vadd.f32 %v1257_v55, %v1103_v7  ;;  %v1109_v45 = vmul.f32 %v2603_v17, %v2603_v17 }
 0x176   :  { %v925_v21 = vadd.f32 %v924_v29, %v2595_v61  ;;  %v1190_v41 = vadd.f32 %v1189_v58, %v1104_v19  ;;  %v1110_v61 = vmul.f32 %v2619_v12, %v2619_v12 }
 0x177   :  { %v994_v47 = vadd.f32 %v993_v33, %v2597_v0  ;;  %v1259_v42 = vadd.f32 %v1258_v39, %v1105_v30  ;;  %v1111_v0 = vmul.f32 %v2621_v1, %v2621_v1  ;;  %v1118_v30 = vmul.f32 %v2667_v49, %v2667_v49 }
 0x178   :  { %v926_v46 = vadd.f32 %v925_v21, %v2601_v10  ;;  %v1191_v40 = vadd.f32 %v1190_v41, %v1106_v62  ;;  %v1112_v10 = vmul.f32 %v2625_v43, %v2625_v43  ;;  %v1119_v39 = vmul.f32 %v2669_v53, %v2669_v53 }
 0x179   :  { %v995_v63 = vadd.f32 %v994_v47, %v2603_v17  ;;  %v1260_v51 = vadd.f32 %v1259_v42, %v1107_v34  ;;  %v1113_v17 = vmul.f32 %v2627_v50, %v2627_v50  ;;  %v1120_v41 = vmul.f32 %v2673_v60, %v2673_v60 }
 0x17a   :  { %v927_v54 = vadd.f32 %v926_v46, %v2619_v12  ;;  %v1192_v2 = vadd.f32 %v1191_v40, %v1108_v38  ;;  %v1114_v12 = vmul.f32 %v2643_v9, %v2643_v9  ;;  %v1121_v47 = vmul.f32 %v2675_v11, %v2675_v11 }
 0x17b   :  { %v996_v3 = vadd.f32 %v995_v63, %v2621_v1  ;;  %v1261_v20 = vadd.f32 %v1260_v51, %v1109_v45  ;;  %v1115_v1 = vmul.f32 %v2645_v14, %v2645_v14  ;;  %v1122_v38 = vmul.f32 %v2691_v35, %v2691_v35 }
 0x17c   :  { %v928_v32 = vadd.f32 %v927_v54, %v2625_v43  ;;  %v1193_v6 = vadd.f32 %v1192_v2, %v1110_v61  ;;  %v1116_v43 = vmul.f32 %v2649_v23, %v2649_v23  ;;  %v1123_v40 = vmul.f32 %v2693_v37, %v2693_v37 }
 0x17d   :  { %v997_v15 = vadd.f32 %v996_v3, %v2627_v50  ;;  %v1262_v8 = vadd.f32 %v1261_v20, %v1111_v0  ;;  %v1117_v50 = vmul.f32 %v2651_v28, %v2651_v28  ;;  %v1124_v63 = vmul.f32 %v2697_v48, %v2697_v48 }
 0x17e   :  { %v929_v25 = vadd.f32 %v928_v32, %v2643_v9  ;;  %v1194_v13 = vadd.f32 %v1193_v6, %v1112_v10  ;;  %v1125_v61 = vmul.f32 %v2699_v59, %v2699_v59  ;;  %v1126_v2 = vmul.f32 %v2715_v27, %v2715_v27 }
 0x17f   :  { %v998_v7 = vadd.f32 %v997_v15, %v2645_v14  ;;  %v1263_v55 = vadd.f32 %v1262_v8, %v1113_v17  ;;  %v1127_v3 = vmul.f32 %v2717_v31, %v2717_v31  ;;  %v1128_v10 = vmul.f32 %v2721_v44, %v2721_v44 }
 0x180   :  { %v930_v57 = vadd.f32 %v929_v25, %v2649_v23  ;;  %v1195_v19 = vadd.f32 %v1194_v13, %v1114_v12 }
 0x181   :  { %v999_v29 = vadd.f32 %v998_v7, %v2651_v28  ;;  %v1264_v58 = vadd.f32 %v1263_v55, %v1115_v1 }
 0x182   :  { %v931_v9 = vadd.f32 %v930_v57, %v2667_v49  ;;  %v1196_v33 = vadd.f32 %v1195_v19, %v1116_v43  ;;  %v3085_v19 = vld [vmem:[#allocation6_spill] sm:$0xff] }
 0x183   :  { %v1000_v14 = vadd.f32 %v999_v29, %v2669_v53  ;;  %v1265_v62 = vadd.f32 %v1264_v58, %v1117_v50  ;;  %v1133_v29 = vmul.f32 %v3085_v19, %v3085_v19 }
 0x184   :  { %v1197_v23 = vadd.f32 %v1196_v33, %v1118_v30  ;;  %v932_v21 = vadd.f32 %v931_v9, %v2673_v60  ;;  %v3086_v9 = vld [vmem:[#allocation7_spill] sm:$0xff] }
 0x185   :  { %v1266_v28 = vadd.f32 %v1265_v62, %v1119_v39  ;;  %v1001_v34 = vadd.f32 %v1000_v14, %v2675_v11  ;;  %v1134_v33 = vmul.f32 %v3086_v9, %v3086_v9  ;;  %v3087_v39 = vld [vmem:[#allocation8_spill] sm:$0xff] }
 0x186   :  { %v1198_v49 = vadd.f32 %v1197_v23, %v1120_v41  ;;  %v933_v42 = vadd.f32 %v932_v21, %v2691_v35  ;;  %v1135_v23 = vmul.f32 %v3087_v39, %v3087_v39  ;;  %v3088_v41 = vld [vmem:[#allocation9_spill] sm:$0xff] }
 0x187   :  { %v1267_v53 = vadd.f32 %v1266_v28, %v1121_v47  ;;  %v1002_v46 = vadd.f32 %v1001_v34, %v2693_v37  ;;  %v1136_v34 = vmul.f32 %v3088_v41, %v3088_v41 }
 0x188   :  { %v1199_v45 = vadd.f32 %v1198_v49, %v1122_v38  ;;  %v934_v60 = vadd.f32 %v933_v42, %v2697_v48  ;;  %v3089_v49 = vld [vmem:[#allocation10_spill] sm:$0xff] }
 0x189   :  { %v1268_v51 = vadd.f32 %v1267_v53, %v1123_v40  ;;  %v1003_v11 = vadd.f32 %v1002_v46, %v2699_v59  ;;  %v3081_v59 = vld [vmem:[#allocation2_spill] sm:$0xff]  ;;  %v1137_v38 = vmul.f32 %v3089_v49, %v3089_v49  ;;  %v3090_v46 = vld [vmem:[#allocation11_spill] sm:$0xff] }
 0x18a   :  { %v1200_v54 = vadd.f32 %v1199_v45, %v1124_v63  ;;  %v935_v35 = vadd.f32 %v934_v60, %v2715_v27  ;;  %v1129_v17 = vmul.f32 %v3081_v59, %v3081_v59  ;;  %v3082_v27 = vld [vmem:[#allocation3_spill] sm:$0xff]  ;;  %v1138_v45 = vmul.f32 %v3090_v46, %v3090_v46  ;;  %v3091_v63 = vld [vmem:[#allocation12_spill] sm:$0xff] }
 0x18b   :  { %v1269_v0 = vadd.f32 %v1268_v51, %v1125_v61  ;;  %v1004_v37 = vadd.f32 %v1003_v11, %v2717_v31  ;;  %v1130_v12 = vmul.f32 %v3082_v27, %v3082_v27  ;;  %v3083_v31 = vld [vmem:[#allocation4_spill] sm:$0xff]  ;;  %v1139_v11 = vmul.f32 %v3091_v63, %v3091_v63 }
 0x18c   :  { %v1201_v20 = vadd.f32 %v1200_v54, %v1126_v2  ;;  %v936_v48 = vadd.f32 %v935_v35, %v2721_v44  ;;  %v1131_v1 = vmul.f32 %v3083_v31, %v3083_v31  ;;  %v3084_v44 = vld [vmem:[#allocation5_spill] sm:$0xff]  ;;  %v1140_v35 = vmul.f32 %v2793_v16, %v2793_v16 }
 0x18d   :  { %v1270_v32 = vadd.f32 %v1269_v0, %v1127_v3  ;;  %v1005_v6 = vadd.f32 %v1004_v37, %v3081_v59  ;;  %v1132_v43 = vmul.f32 %v3084_v44, %v3084_v44  ;;  %v1141_v37 = vmul.f32 %v2795_v22, %v2795_v22 }
 0x18e   :  { %v1202_v15 = vadd.f32 %v1201_v20, %v1128_v10  ;;  %v937_v8 = vadd.f32 %v936_v48, %v3082_v27  ;;  %v1142_v48 = vmul.f32 %v2820_v5, %v2820_v5  ;;  %v1143_v59 = vmul.f32 %v2825_v24, %v2825_v24 }
 0x18f   :  { %v1271_v25 = vadd.f32 %v1270_v32, %v1129_v17  ;;  %v1006_v13 = vadd.f32 %v1005_v6, %v3083_v31  ;;  %v1144_v17 = vmul.f32 %v2832_v56, %v2832_v56 }
 0x190   :  { %v1203_v7 = vadd.f32 %v1202_v15, %v1130_v12  ;;  %v938_v55 = vadd.f32 %v937_v8, %v3084_v44  ;;  %v1147_v8 = vmul.f32 %v2867_v36, %v2867_v36 }
 0x191   :  { %v1272_v57 = vadd.f32 %v1271_v25, %v1131_v1  ;;  %v1007_v50 = vadd.f32 %v1006_v13, %v3085_v19  ;;  %v1148_v1 = vmul.f32 %v2874_v4, %v2874_v4 }
 0x192   :  { %v1204_v58 = vadd.f32 %v1203_v7, %v1132_v43  ;;  %v939_v30 = vadd.f32 %v938_v55, %v3086_v9 }
 0x193   :  { %v1273_v14 = vadd.f32 %v1272_v57, %v1133_v29  ;;  %v1008_v62 = vadd.f32 %v1007_v50, %v3087_v39 }
 0x194   :  { %v1205_v21 = vadd.f32 %v1204_v58, %v1134_v33  ;;  %v940_v28 = vadd.f32 %v939_v30, %v3088_v41 }
 0x195   :  { %v1274_v47 = vadd.f32 %v1273_v14, %v1135_v23  ;;  %v1009_v42 = vadd.f32 %v1008_v62, %v3089_v49 }
 0x196   :  { %v1206_v53 = vadd.f32 %v1205_v21, %v1136_v34  ;;  %v941_v40 = vadd.f32 %v940_v28, %v3090_v46 }
 0x197   :  { %v1275_v60 = vadd.f32 %v1274_v47, %v1137_v38  ;;  %v1010_v51 = vadd.f32 %v1009_v42, %v3091_v63 }
 0x198   :  { %v1207_v61 = vadd.f32 %v1206_v53, %v1138_v45  ;;  %v942_v54 = vadd.f32 %v941_v40, %v2793_v16 }
 0x199   :  { %v1276_v2 = vadd.f32 %v1275_v60, %v1139_v11  ;;  %v1011_v0 = vadd.f32 %v1010_v51, %v2795_v22  ;;  %v1146_v22 = vmul.f32 %v2862_v26, %v2862_v26 }
 0x19a   :  { %v1208_v3 = vadd.f32 %v1207_v61, %v1140_v35  ;;  %v943_v20 = vadd.f32 %v942_v54, %v2820_v5  ;;  %v1145_v5 = vmul.f32 %v2837_v52, %v2837_v52 }
 0x19b   :  { %v1277_v10 = vadd.f32 %v1276_v2, %v1141_v37  ;;  %v1012_v32 = vadd.f32 %v1011_v0, %v2825_v24 }
 0x19c   :  { %v1209_v6 = vadd.f32 %v1208_v3, %v1142_v48  ;;  %v944_v16 = vadd.f32 %v943_v20, %v2832_v56 }
 0x19d   :  { %v1278_v15 = vadd.f32 %v1277_v10, %v1143_v59  ;;  %v1013_v27 = vadd.f32 %v1012_v32, %v2837_v52  ;;  %v1149_v52 = vmul.f32 %v2879_v18, %v2879_v18 }
 0x19e   :  { %v1210_v12 = vadd.f32 %v1209_v6, %v1144_v17  ;;  %v945_v24 = vadd.f32 %v944_v16, %v2862_v26 }
 0x19f   :  { %v1279_v25 = vadd.f32 %v1278_v15, %v1145_v5  ;;  %v1014_v31 = vadd.f32 %v1013_v27, %v2867_v36 }
 0x1a0   :  { %v1211_v13 = vadd.f32 %v1210_v12, %v1146_v22  ;;  %v946_v56 = vadd.f32 %v945_v24, %v2874_v4 }
 0x1a1   :  { %v1280_v7 = vadd.f32 %v1279_v25, %v1147_v8  ;;  %v1015_v44 = vadd.f32 %v1014_v31, %v2879_v18 }
 0x1a2   :  { %v947_v55 = vrot.slane %v946_v56, 4  ;;  %v1212_v43 = vadd.f32 %v1211_v13, %v1148_v1 }
 0x1a3   :  { %v1016_v57 = vrot.slane %v1015_v44, 4  ;;  %v1281_v19 = vadd.f32 %v1280_v7, %v1149_v52 }
 0x1a4   :  { %v948_v26 = vadd.f32 %v947_v55, %v946_v56  ;;  %v1213_v50 = vrot.slane %v1212_v43, 4 }
 0x1a5   :  { %v1017_v29 = vadd.f32 %v1016_v57, %v1015_v44  ;;  %v1282_v36 = vrot.slane %v1281_v19, 4 }
 0x1a6   :  { %v949_v58 = vrot.slane %v948_v26, 2  ;;  %v1214_v9 = vadd.f32 %v1213_v50, %v1212_v43 }
 0x1a7   :  { %v1018_v30 = vrot.slane %v1017_v29, 2  ;;  %v1283_v33 = vadd.f32 %v1282_v36, %v1281_v19 }
 0x1a8   :  { %v950_v14 = vadd.f32 %v949_v58, %v948_v26  ;;  %v1215_v4 = vrot.slane %v1214_v9, 2 }
 0x1a9   :  { %v1019_v39 = vadd.f32 %v1018_v30, %v1017_v29  ;;  %v1284_v62 = vrot.slane %v1283_v33, 2 }
 0x1aa   :  { %v951_v23 = vrot.slane %v950_v14, 1  ;;  %v1216_v21 = vadd.f32 %v1215_v4, %v1214_v9 }
 0x1ab   :  { %v1020_v41 = vrot.slane %v1019_v39, 1  ;;  %v1285_v18 = vadd.f32 %v1284_v62, %v1283_v33 }
 0x1ac   :  { %v1217_v28 = vrot.slane %v1216_v21, 1  ;;  %v952_v47 = vadd.f32 %v951_v23, %v950_v14 }
 0x1ad   :  { %v1286_v34 = vrot.slane %v1285_v18, 1  ;;  %v1021_v42 = vadd.f32 %v1020_v41, %v1019_v39 }
 0x1ae   :  { %v1218_v49 = vadd.f32 %v1217_v28, %v1216_v21 }
 0x1af   :  { %v1287_v38 = vadd.f32 %v1286_v34, %v1285_v18 }
 0x1b0   :  { %v1289_v53 = vsel %vm1288_vm1, %v952_v47, %v1218_v49 }
 0x1b1   :  { %v1290_v46 = vsel %vm1288_vm1, %v1021_v42, %v1287_v38 }
 0x1b2   :  { %v1293_v40 = vcombine.low %v1289_v53, %v1290_v46 }
 0x1b4   :  { %1801 = vst.sshfl [vmem:[%s3047_s5] sm:$0x33 pattern:$0x76325410] %v1293_v40 }

// kernel: bottleneck_forward.4
= control target key start
LH: loop header
LB: loop body
LE: loop exit
PB: predicated region body
PF: predicated region fallthrough
CT: control target
= control target key end

     0   :  { %v3129_v1 = vmov 0   ;;  %vm275_vm0 = vcmask 523264   ;;  %vm1251_vm1 = vcmask 519168   ;;  %vm991_vm2 = vcmask 1040384   ;;  %s4586_s1 = inlined_call_operand.vmem [shape: bf16[64,64], index: 1, kind: input, shape index: {}]   ;;  %s4587_s0 = inlined_call_operand.vmem [shape: bf16[512,64], index: 0, kind: input, shape index: {}]   ;;  %s4588_s2 = inlined_call_operand.vmem [shape: bf16[64,256], index: 2, kind: input, shape index: {}]   ;;  %s4589_s3 = inlined_call_operand.vmem [shape: bf16[512,64], index: 3, kind: output, shape index: {0}]   ;;  %s4590_s5 = inlined_call_operand.vmem [shape: bf16[512,256], index: 5, kind: output, shape index: {2}]   ;;  %s4591_s4 = inlined_call_operand.vmem [shape: f32[1,2,64], index: 4, kind: output, shape index: {1}]   ;;  %s4592_s6 = inlined_call_operand.vmem [shape: f32[1,2,256], index: 6, kind: output, shape index: {3}]  }
   0x1   :  { %v3081_v0 = vld [vmem:[%s4586_s1] sm:$0xff]   ;;  %1476 = vmatprep.mubr.bf16.mxu1 %v3129_v1  ;;  %v3082_v2 = vld [vmem:[%s4586_s1 + $0x8] sm:$0xff]   ;;  %v3083_v3 = vld [vmem:[%s4586_s1 + $0x10] sm:$0xff]   ;;  %vm993_vm3 = vcmask 517120  }
   0x2   :  { %3000 = vmatprep.subr.bf16.mxu0 %v3081_v0  ;;  %v3178_v4 = vld [vmem:[%s4587_s0] sm:$0xff]   ;;  %v3084_v7 = vld [vmem:[%s4586_s1 + $0x18] sm:$0xff]   ;;  %v3194_v8 = vld [vmem:[%s4587_s0 + $0x8] sm:$0xff]  }
   0x3   :  { %3001 = vmatpush3.bf16.msra.mxu0 %v3081_v0  ;;  %3008 = vmatprep.mubr.msk.bf16.mxu0 %vm275_vm0, %v3178_v4  ;;  %v3087_v5 = vld [vmem:[%s4588_s2] ss:$8 sps:$4 sm:$0xff]   ;;  %v3089_v6 = vld [vmem:[%s4588_s2 + $0x4] ss:$8 sps:$4 sm:$0xff]   ;;  %v3199_v9 = vld [vmem:[%s4587_s0 + $0x10] sm:$0xff]  }
   0x4   :  { %3002 = vmatprep.subr.bf16.mxu0 %v3082_v2  ;;  %3072 = vmatprep.subr.bf16.mxu1 %v3089_v6  ;;  %v3098_v10 = vld [vmem:[%s4588_s2 + $0x10] ss:$8 sps:$4 sm:$0xff]   ;;  %v3100_v11 = vld [vmem:[%s4588_s2 + $0x14] ss:$8 sps:$4 sm:$0xff]   ;;  %v3219_v13 = vld [vmem:[%s4587_s0 + $0x20] sm:$0xff]  }
   0x5   :  { %3076 = vmatpush1.bf16.msra.mxu1 %v3087_v5  ;;  %v3214_v12 = vld [vmem:[%s4587_s0 + $0x18] sm:$0xff]   ;;  %v3109_v14 = vld [vmem:[%s4588_s2 + $0x20] ss:$8 sps:$4 sm:$0xff]   ;;  %v3111_v15 = vld [vmem:[%s4588_s2 + $0x24] ss:$8 sps:$4 sm:$0xff]  }
   0x6   :  { %3073 = vmatprep.subr.bf16.mxu1 %v3100_v11  ;;  %v3234_v16 = vld [vmem:[%s4587_s0 + $0x28] sm:$0xff]   ;;  %v3239_v17 = vld [vmem:[%s4587_s0 + $0x30] sm:$0xff]   ;;  %v3096_v20 = vld [vmem:[%s4587_s0 + $0x40] sm:$0xff]  }
   0x7   :  { %3003 = vmatpush3.bf16.msra.mxu0 %v3082_v2  ;;  %v3118_v18 = vld [vmem:[%s4588_s2 + $0x34] ss:$8 sps:$4 sm:$0xff]   ;;  %v3120_v19 = vld [vmem:[%s4588_s2 + $0x30] ss:$8 sps:$4 sm:$0xff]   ;;  %v3097_v22 = vld [vmem:[%s4587_s0 + $0x48] sm:$0xff]  }
   0x8   :  { %3004 = vmatprep.subr.bf16.mxu0 %v3083_v3  ;;  %v3257_v21 = vld [vmem:[%s4587_s0 + $0x38] sm:$0xff]   ;;  %v3101_v23 = vld [vmem:[%s4587_s0 + $0x50] sm:$0xff]   ;;  %v3103_v25 = vld [vmem:[%s4587_s0 + $0x60] sm:$0xff]  }
   0x9   :  { %3077 = vmatpush1.bf16.msra.mxu1 %v3098_v10  ;;  %v3102_v24 = vld [vmem:[%s4587_s0 + $0x58] sm:$0xff]   ;;  %v3104_v26 = vld [vmem:[%s4587_s0 + $0x68] sm:$0xff]   ;;  %v3105_v27 = vld [vmem:[%s4587_s0 + $0x70] sm:$0xff]  }
   0xa   :  { %3074 = vmatprep.subr.bf16.mxu1 %v3111_v15  ;;  %v3106_v28 = vld [vmem:[%s4587_s0 + $0x78] sm:$0xff]   ;;  %v3107_v29 = vld [vmem:[%s4587_s0 + $0x80] sm:$0xff]   ;;  %v3108_v30 = vld [vmem:[%s4587_s0 + $0x88] sm:$0xff]  }
   0xb   :  { %3005 = vmatpush3.bf16.msra.mxu0 %v3083_v3  ;;  %v3112_v31 = vld [vmem:[%s4587_s0 + $0x90] sm:$0xff]   ;;  %v3113_v32 = vld [vmem:[%s4587_s0 + $0x98] sm:$0xff]   ;;  %v3114_v33 = vld [vmem:[%s4587_s0 + $0xa0] sm:$0xff]  }
   0xc   :  { %3006 = vmatprep.subr.bf16.mxu0 %v3084_v7  ;;  %v3115_v34 = vld [vmem:[%s4587_s0 + $0xa8] sm:$0xff]   ;;  %v3116_v35 = vld [vmem:[%s4587_s0 + $0xb0] sm:$0xff]   ;;  %v3117_v36 = vld [vmem:[%s4587_s0 + $0xb8] sm:$0xff]  }
   0xd   :  { %3078 = vmatpush1.bf16.msra.mxu1 %v3109_v14  ;;  %v3121_v37 = vld [vmem:[%s4587_s0 + $0xc0] sm:$0xff]   ;;  %v3122_v38 = vld [vmem:[%s4587_s0 + $0xc8] sm:$0xff]   ;;  %v3123_v39 = vld [vmem:[%s4587_s0 + $0xd0] sm:$0xff]  }
   0xe   :  { %3075 = vmatprep.subr.bf16.mxu1 %v3118_v18  ;;  %v3124_v40 = vld [vmem:[%s4587_s0 + $0xd8] sm:$0xff]   ;;  %v3125_v41 = vld [vmem:[%s4587_s0 + $0xe0] sm:$0xff]   ;;  %v3126_v42 = vld [vmem:[%s4587_s0 + $0xe8] sm:$0xff]  }
   0xf   :  { %3007 = vmatpush3.bf16.msra.mxu0 %v3084_v7  ;;  %v3127_v43 = vld [vmem:[%s4587_s0 + $0xf0] sm:$0xff]   ;;  %v3128_v44 = vld [vmem:[%s4587_s0 + $0xf8] sm:$0xff]  }
  0x10   :  { %1364 = vmatprep.subr.bf16.mxu0 %v3089_v6 }
  0x11   :  { %3079 = vmatpush1.bf16.msra.mxu1 %v3120_v19 }
  0x12   :  { %3009 = vmatmul.mubr.msk.bf16.vlgmr.msra.gmra.mrb[0].mxu0 %vm275_vm0, %v3194_v8 }
  0x13   :  { %1365 = vmatpush1.bf16.msra.mxu0 %v3087_v5  ;;  %3012 = vmatprep.mubr.msk.bf16.mxu0 %vm275_vm0, %v3199_v9 }
  0x14   :  { %1366 = vmatprep.subr.bf16.mxu0 %v3100_v11  ;;  %2747 = vmatmul.mubr.msk.bf16.vlgmr.msra.gmra.mrb[0].mxu1 %vm275_vm0, %v3096_v20 }
  0x15   :  { %1486 = vmatprep.mubr.bf16.mxu1 %v3129_v1 }
  0x17   :  { %1367 = vmatpush1.bf16.msra.mxu0 %v3098_v10 }
  0x18   :  { %1368 = vmatprep.subr.bf16.mxu0 %v3111_v15 }
  0x1a   :  { %3013 = vmatmul.mubr.msk.bf16.gmra.mrb[4].mxu0 %vm275_vm0, %v3214_v12 }
  0x1b   :  { %3016 = vmatprep.mubr.msk.bf16.mxu0 %vm275_vm0, %v3219_v13  ;;  %1369 = vmatpush1.bf16.msra.mxu0 %v3109_v14 }
  0x1c   :  { %1370 = vmatprep.subr.bf16.mxu0 %v3118_v18  ;;  %2748 = vmatmul.mubr.msk.bf16.gmra.mrb[4].mxu1 %vm275_vm0, %v3097_v22 }
  0x1d   :  { %1496 = vmatprep.mubr.bf16.mxu1 %v3129_v1 }
  0x1f   :  { %1371 = vmatpush1.bf16.msra.mxu0 %v3120_v19 }
  0x22   :  { %3017 = vmatmul.mubr.msk.bf16.gmra.mrb[8].mxu0 %vm275_vm0, %v3234_v16 }
  0x23   :  { %3020 = vmatprep.mubr.msk.bf16.mxu0 %vm275_vm0, %v3239_v17 }
  0x24   :  { %2749 = vmatmul.mubr.msk.bf16.gmra.mrb[8].mxu1 %vm275_vm0, %v3101_v23 }
  0x25   :  { %1506 = vmatprep.mubr.bf16.mxu1 %v3129_v1 }
  0x2a   :  { %3021 = vmatmul.mubr.msk.bf16.gmra.mrb[12].mxu0 %vm275_vm0, %v3257_v21 }
  0x2b   :  { %3024 = vmatprep.mubr.msk.bf16.mxu0 %vm275_vm0, %v3096_v20 }
  0x2c   :  { %2750 = vmatmul.mubr.msk.bf16.gmra.mrb[12].mxu1 %vm275_vm0, %v3102_v24 }
  0x2d   :  { %1516 = vmatprep.mubr.bf16.mxu1 %v3129_v1 }
  0x32   :  { %3025 = vmatmul.mubr.msk.bf16.gmra.mrb[16].mxu0 %vm275_vm0, %v3097_v22 }
  0x33   :  { %3028 = vmatprep.mubr.msk.bf16.mxu0 %vm275_vm0, %v3101_v23 }
  0x34   :  { %2751 = vmatmul.mubr.msk.bf16.gmra.mrb[16].mxu1 %vm275_vm0, %v3103_v25 }
  0x35   :  { %1526 = vmatprep.mubr.bf16.mxu1 %v3129_v1 }
  0x3a   :  { %3029 = vmatmul.mubr.msk.bf16.gmra.mrb[20].mxu0 %vm275_vm0, %v3102_v24 }
  0x3b   :  { %3032 = vmatprep.mubr.msk.bf16.mxu0 %vm275_vm0, %v3103_v25 }
  0x3c   :  { %2752 = vmatmul.mubr.msk.bf16.gmra.mrb[20].mxu1 %vm275_vm0, %v3104_v26 }
  0x3d   :  { %1536 = vmatprep.mubr.bf16.mxu1 %v3129_v1 }
  0x42   :  { %3033 = vmatmul.mubr.msk.bf16.gmra.mrb[24].mxu0 %vm275_vm0, %v3104_v26 }
  0x43   :  { %3036 = vmatprep.mubr.msk.bf16.mxu0 %vm275_vm0, %v3105_v27 }
  0x44   :  { %2753 = vmatmul.mubr.msk.bf16.gmra.mrb[24].mxu1 %vm275_vm0, %v3105_v27 }
  0x45   :  { %1546 = vmatprep.mubr.bf16.mxu1 %v3129_v1 }
  0x4a   :  { %3037 = vmatmul.mubr.msk.bf16.gmra.mrb[28].mxu0 %vm275_vm0, %v3106_v28 }
  0x4b   :  { %3040 = vmatprep.mubr.msk.bf16.mxu0 %vm275_vm0, %v3107_v29 }
  0x4c   :  { %2754 = vmatmul.mubr.msk.bf16.gmra.mrb[28].mxu1 %vm275_vm0, %v3106_v28 }
  0x4d   :  { %1556 = vmatprep.mubr.bf16.mxu1 %v3129_v1 }
  0x52   :  { %3041 = vmatmul.mubr.msk.bf16.gmra.mrb[32].mxu0 %vm275_vm0, %v3108_v30 }
  0x53   :  { %3044 = vmatprep.mubr.msk.bf16.mxu0 %vm275_vm0, %v3112_v31 }
  0x54   :  { %2755 = vmatmul.mubr.msk.bf16.gmra.mrb[32].mxu1 %vm275_vm0, %v3107_v29 }
  0x55   :  { %1566 = vmatprep.mubr.bf16.mxu1 %v3129_v1 }
  0x5a   :  { %3045 = vmatmul.mubr.msk.bf16.gmra.mrb[36].mxu0 %vm275_vm0, %v3113_v32 }
  0x5b   :  { %3048 = vmatprep.mubr.msk.bf16.mxu0 %vm275_vm0, %v3114_v33 }
  0x5c   :  { %2756 = vmatmul.mubr.msk.bf16.gmra.mrb[36].mxu1 %vm275_vm0, %v3108_v30 }
  0x5d   :  { %1576 = vmatprep.mubr.bf16.mxu1 %v3129_v1 }
  0x62   :  { %3049 = vmatmul.mubr.msk.bf16.gmra.mrb[40].mxu0 %vm275_vm0, %v3115_v34 }
  0x63   :  { %3052 = vmatprep.mubr.msk.bf16.mxu0 %vm275_vm0, %v3116_v35 }
  0x64   :  { %2757 = vmatmul.mubr.msk.bf16.gmra.mrb[40].mxu1 %vm275_vm0, %v3112_v31 }
  0x65   :  { %1586 = vmatprep.mubr.bf16.mxu1 %v3129_v1 }
  0x6a   :  { %3053 = vmatmul.mubr.msk.bf16.gmra.mrb[44].mxu0 %vm275_vm0, %v3117_v36 }
  0x6b   :  { %3056 = vmatprep.mubr.msk.bf16.mxu0 %vm275_vm0, %v3121_v37 }
  0x6c   :  { %2758 = vmatmul.mubr.msk.bf16.gmra.mrb[44].mxu1 %vm275_vm0, %v3113_v32 }
  0x6d   :  { %1596 = vmatprep.mubr.bf16.mxu1 %v3129_v1 }
  0x72   :  { %3057 = vmatmul.mubr.msk.bf16.gmra.mrb[48].mxu0 %vm275_vm0, %v3122_v38 }
  0x73   :  { %3060 = vmatprep.mubr.msk.bf16.mxu0 %vm275_vm0, %v3123_v39 }
  0x74   :  { %2759 = vmatmul.mubr.msk.bf16.gmra.mrb[48].mxu1 %vm275_vm0, %v3114_v33 }
  0x75   :  { %1606 = vmatprep.mubr.bf16.mxu1 %v3129_v1 }
  0x7a   :  { %3061 = vmatmul.mubr.msk.bf16.gmra.mrb[52].mxu0 %vm275_vm0, %v3124_v40 }
  0x7b   :  { %3064 = vmatprep.mubr.msk.bf16.mxu0 %vm275_vm0, %v3125_v41 }
  0x7c   :  { %2760 = vmatmul.mubr.msk.bf16.gmra.mrb[52].mxu1 %vm275_vm0, %v3115_v34 }
  0x7d   :  { %1616 = vmatprep.mubr.bf16.mxu1 %v3129_v1 }
  0x82   :  { %3065 = vmatmul.mubr.msk.bf16.gmra.mrb[56].mxu0 %vm275_vm0, %v3126_v42 }
  0x83   :  { %3068 = vmatprep.mubr.msk.bf16.mxu0 %vm275_vm0, %v3127_v43 }
  0x84   :  { %2761 = vmatmul.mubr.msk.bf16.gmra.mrb[56].mxu1 %vm275_vm0, %v3116_v35 }
  0x85   :  { %1626 = vmatprep.mubr.bf16.mxu1 %v3129_v1 }
  0x8a   :  { %3069 = vmatmul.mubr.msk.bf16.gmra.mrb[60].mxu0 %vm275_vm0, %v3128_v44 }
  0x8b   :  { %1396 = vmatprep.mubr.bf16.mxu0 %v3129_v1 }
  0x8c   :  { %2762 = vmatmul.mubr.msk.bf16.gmra.mrb[60].mxu1 %vm275_vm0, %v3117_v36 }
  0x8d   :  { %1636 = vmatprep.mubr.bf16.mxu1 %v3129_v1 }
  0x92   :  { %2739 = vmatmul.mubr.msk.bf16.vlgmr.msra.gmra.mrb[64].mxu0 %vm275_vm0, %v3178_v4 }
  0x93   :  { %1406 = vmatprep.mubr.bf16.mxu0 %v3129_v1 }
  0x94   :  { %2763 = vmatmul.mubr.msk.bf16.gmra.mrb[64].mxu1 %vm275_vm0, %v3121_v37 }
  0x95   :  { %1646 = vmatprep.mubr.bf16.mxu1 %v3129_v1 }
  0x9a   :  { %2740 = vmatmul.mubr.msk.bf16.gmra.mrb[68].mxu0 %vm275_vm0, %v3194_v8 }
  0x9b   :  { %1416 = vmatprep.mubr.bf16.mxu0 %v3129_v1 }
  0x9c   :  { %2764 = vmatmul.mubr.msk.bf16.gmra.mrb[68].mxu1 %vm275_vm0, %v3122_v38 }
  0x9d   :  { %1656 = vmatprep.mubr.bf16.mxu1 %v3129_v1 }
  0xa2   :  { %2741 = vmatmul.mubr.msk.bf16.gmra.mrb[72].mxu0 %vm275_vm0, %v3199_v9 }
  0xa3   :  { %1426 = vmatprep.mubr.bf16.mxu0 %v3129_v1 }
  0xa4   :  { %2765 = vmatmul.mubr.msk.bf16.gmra.mrb[72].mxu1 %vm275_vm0, %v3123_v39 }
  0xa5   :  { %1666 = vmatprep.mubr.bf16.mxu1 %v3129_v1 }
  0xaa   :  { %2742 = vmatmul.mubr.msk.bf16.gmra.mrb[76].mxu0 %vm275_vm0, %v3214_v12 }
  0xab   :  { %1436 = vmatprep.mubr.bf16.mxu0 %v3129_v1 }
  0xac   :  { %2766 = vmatmul.mubr.msk.bf16.gmra.mrb[76].mxu1 %vm275_vm0, %v3124_v40 }
  0xad   :  { %1676 = vmatprep.mubr.bf16.mxu1 %v3129_v1 }
  0xb2   :  { %2743 = vmatmul.mubr.msk.bf16.gmra.mrb[80].mxu0 %vm275_vm0, %v3219_v13 }
  0xb3   :  { %1446 = vmatprep.mubr.bf16.mxu0 %v3129_v1 }
  0xb4   :  { %2767 = vmatmul.mubr.msk.bf16.gmra.mrb[80].mxu1 %vm275_vm0, %v3125_v41 }
  0xb5   :  { %1686 = vmatprep.mubr.bf16.mxu1 %v3129_v1 }
  0xba   :  { %2744 = vmatmul.mubr.msk.bf16.gmra.mrb[84].mxu0 %vm275_vm0, %v3234_v16 }
  0xbb   :  { %1456 = vmatprep.mubr.bf16.mxu0 %v3129_v1 }
  0xbc   :  { %2768 = vmatmul.mubr.msk.bf16.gmra.mrb[84].mxu1 %vm275_vm0, %v3126_v42 }
  0xbd   :  { %1696 = vmatprep.mubr.bf16.mxu1 %v3129_v1 }
  0xc2   :  { %2745 = vmatmul.mubr.msk.bf16.gmra.mrb[88].mxu0 %vm275_vm0, %v3239_v17 }
  0xc3   :  { %1466 = vmatprep.mubr.bf16.mxu0 %v3129_v1 }
  0xc4   :  { %2769 = vmatmul.mubr.msk.bf16.gmra.mrb[88].mxu1 %vm275_vm0, %v3127_v43 }
  0xc5   :  { %1706 = vmatprep.mubr.bf16.mxu1 %v3129_v1 }
  0xca   :  { %2746 = vmatmul.mubr.msk.bf16.gmra.mrb[92].mxu0 %vm275_vm0, %v3257_v21 }
  0xcc   :  { %2770 = vmatmul.mubr.msk.bf16.gmra.mrb[92].mxu1 %vm275_vm0, %v3128_v44 }
  0xe5   :  { %v3010_v45 = vpop.f32.mrb[0].mxu0 }
  0xe6   :  { %v2838_v46 = vpack.c.bf16 %v3010_v45, %v3010_v45  ;;  %v406_v47 = vpop.f32.mrb[1].mxu0  ;;  %v796_v51 = vmul.f32 %v3010_v45, %v3010_v45  ;;  %v664_v60 = vsel %vm275_vm0, %v3010_v45, 0.0 }
  0xe7   :  { %v794_v48 = vmul.f32 %v406_v47, %v406_v47  ;;  %v2836_v49 = vpack.c.bf16 %v406_v47, %v406_v47  ;;  %v3011_v50 = vpop.f32.mrb[2].mxu0  ;;  %v661_v54 = vsel %vm275_vm0, %v406_v47, 0.0 }
  0xe8   :  { %1254 = vst.msk [vmem:[%s4589_s3 + $0x8] sm:$0xf] %vm1251_vm1, %v2838_v46  ;;  %v2839_v52 = vpack.c.bf16 %v3011_v50, %v3011_v50  ;;  %v409_v53 = vpop.f32.mrb[3].mxu0  ;;  %v797_v58 = vmul.f32 %v3011_v50, %v3011_v50  ;;  %v861_v1 = vsel %vm275_vm0, %v796_v51, 0.0  ;;  %v666_v3 = vsel %vm275_vm0, %v3011_v50, 0.0  ;;  %v3479_v46 = vpop.f32.mrb[0].mxu1 }
  0xe9   :  { %1252 = vst.msk [vmem:[%s4589_s3] sm:$0xf] %vm1251_vm1, %v2836_v49  ;;  %v662_v55 = vsel %vm275_vm0, %v409_v53, 0.0  ;;  %v795_v56 = vmul.f32 %v409_v53, %v409_v53  ;;  %v2837_v57 = vpack.c.bf16 %v409_v53, %v409_v53  ;;  %v858_v61 = vsel %vm275_vm0, %v794_v48, 0.0  ;;  %v3486_v51 = vpop.f32.mrb[1].mxu1 }
  0xea   :  { %1255 = vst.msk [vmem:[%s4589_s3 + $0xc] sm:$0xf] %vm1251_vm1, %v2839_v52  ;;  %v663_v59 = vadd.f32 %v662_v55, %v661_v54  ;;  %v863_v4 = vsel %vm275_vm0, %v797_v58, 0.0  ;;  %v3492_v54 = vpop.f32.mrb[2].mxu1  ;;  %v2916_v58 = vpack.c.bf16 %v3486_v51, %v3479_v46 }
  0xeb   :  { %v859_v62 = vsel %vm275_vm0, %v795_v56, 0.0  ;;  %1253 = vst.msk [vmem:[%s4589_s3 + $0x4] sm:$0xf] %vm1251_vm1, %v2837_v57 }
  0xec   :  { %v665_v63 = vadd.f32 %v664_v60, %v663_v59  ;;  %v860_v0 = vadd.f32 %v859_v62, %v858_v61  ;;  %v3502_v59 = vpop.f32.mrb[3].mxu1  ;;  %2535 = vst [vmem:[%s4590_s5 + $0x80] sm:$0xff] %v2916_v58 }
  0xed   :  { %v3014_v2 = vpop.f32.mrb[4].mxu0 }
  0xee   :  { %v862_v5 = vadd.f32 %v861_v1, %v860_v0  ;;  %v2842_v6 = vpack.c.bf16 %v3014_v2, %v3014_v2  ;;  %v422_v7 = vpop.f32.mrb[5].mxu0  ;;  %v667_v8 = vadd.f32 %v666_v3, %v665_v63  ;;  %v800_v19 = vmul.f32 %v3014_v2, %v3014_v2 }
  0xef   :  { %v668_v9 = vsel %vm275_vm0, %v422_v7, 0.0  ;;  %v798_v10 = vmul.f32 %v422_v7, %v422_v7  ;;  %v2840_v11 = vpack.c.bf16 %v422_v7, %v422_v7  ;;  %v3015_v12 = vpop.f32.mrb[6].mxu0  ;;  %v672_v24 = vsel %vm275_vm0, %v3014_v2, 0.0 }
  0xf0   :  { %1258 = vst.msk [vmem:[%s4589_s3 + $0x18] sm:$0xf] %vm1251_vm1, %v2842_v6  ;;  %v864_v13 = vadd.f32 %v863_v4, %v862_v5  ;;  %v425_v14 = vpop.f32.mrb[7].mxu0  ;;  %v669_v15 = vadd.f32 %v668_v9, %v667_v8  ;;  %v2843_v17 = vpack.c.bf16 %v3015_v12, %v3015_v12  ;;  %v801_v25 = vmul.f32 %v3015_v12, %v3015_v12 }
  0xf1   :  { %v865_v16 = vsel %vm275_vm0, %v798_v10, 0.0  ;;  %1256 = vst.msk [vmem:[%s4589_s3 + $0x10] sm:$0xf] %vm1251_vm1, %v2840_v11  ;;  %v670_v18 = vsel %vm275_vm0, %v425_v14, 0.0  ;;  %v799_v21 = vmul.f32 %v425_v14, %v425_v14  ;;  %v2841_v22 = vpack.c.bf16 %v425_v14, %v425_v14 }
  0xf2   :  { %v866_v20 = vadd.f32 %v865_v16, %v864_v13  ;;  %1259 = vst.msk [vmem:[%s4589_s3 + $0x1c] sm:$0xf] %vm1251_vm1, %v2843_v17  ;;  %v671_v23 = vadd.f32 %v670_v18, %v669_v15  ;;  %v869_v30 = vsel %vm275_vm0, %v800_v19, 0.0  ;;  %v674_v31 = vsel %vm275_vm0, %v3015_v12, 0.0  ;;  %v3521_v16 = vpop.f32.mrb[4].mxu1 }
  0xf3   :  { %v867_v26 = vsel %vm275_vm0, %v799_v21, 0.0  ;;  %1257 = vst.msk [vmem:[%s4589_s3 + $0x14] sm:$0xf] %vm1251_vm1, %v2841_v22  ;;  %v871_v39 = vsel %vm275_vm0, %v801_v25, 0.0  ;;  %v2917_v63 = vpack.c.bf16 %v3502_v59, %v3492_v54  ;;  %v3528_v21 = vpop.f32.mrb[5].mxu1 }
  0xf4   :  { %v673_v27 = vadd.f32 %v672_v24, %v671_v23  ;;  %v868_v28 = vadd.f32 %v867_v26, %v866_v20  ;;  %v3534_v24 = vpop.f32.mrb[6].mxu1 }
  0xf5   :  { %v3018_v29 = vpop.f32.mrb[8].mxu0  ;;  %2536 = vst [vmem:[%s4590_s5 + $0x88] sm:$0xff] %v2917_v63 }
  0xf6   :  { %v2846_v32 = vpack.c.bf16 %v3018_v29, %v3018_v29  ;;  %v438_v33 = vpop.f32.mrb[9].mxu0  ;;  %v870_v34 = vadd.f32 %v869_v30, %v868_v28  ;;  %v675_v35 = vadd.f32 %v674_v31, %v673_v27  ;;  %v804_v47 = vmul.f32 %v3018_v29, %v3018_v29 }
  0xf7   :  { %v676_v36 = vsel %vm275_vm0, %v438_v33, 0.0  ;;  %v802_v37 = vmul.f32 %v438_v33, %v438_v33  ;;  %v3019_v38 = vpop.f32.mrb[10].mxu0  ;;  %v2844_v40 = vpack.c.bf16 %v438_v33, %v438_v33  ;;  %v680_v55 = vsel %vm275_vm0, %v3018_v29, 0.0  ;;  %v3544_v29 = vpop.f32.mrb[7].mxu1 }
  0xf8   :  { %1262 = vst.msk [vmem:[%s4589_s3 + $0x28] sm:$0xf] %vm1251_vm1, %v2846_v32  ;;  %v441_v41 = vpop.f32.mrb[11].mxu0  ;;  %v677_v42 = vadd.f32 %v676_v36, %v675_v35  ;;  %v872_v43 = vadd.f32 %v871_v39, %v870_v34  ;;  %v2847_v45 = vpack.c.bf16 %v3019_v38, %v3019_v38  ;;  %v805_v56 = vmul.f32 %v3019_v38, %v3019_v38 }
  0xf9   :  { %v873_v44 = vsel %vm275_vm0, %v802_v37, 0.0  ;;  %1260 = vst.msk [vmem:[%s4589_s3 + $0x20] sm:$0xf] %vm1251_vm1, %v2844_v40  ;;  %v678_v48 = vsel %vm275_vm0, %v441_v41, 0.0  ;;  %v803_v49 = vmul.f32 %v441_v41, %v441_v41  ;;  %v2845_v50 = vpack.c.bf16 %v441_v41, %v441_v41 }
  0xfa   :  { %v874_v52 = vadd.f32 %v873_v44, %v872_v43  ;;  %1263 = vst.msk [vmem:[%s4589_s3 + $0x2c] sm:$0xf] %vm1251_vm1, %v2847_v45  ;;  %v679_v53 = vadd.f32 %v678_v48, %v677_v42  ;;  %v877_v0 = vsel %vm275_vm0, %v804_v47, 0.0  ;;  %v682_v1 = vsel %vm275_vm0, %v3019_v38, 0.0 }
  0xfb   :  { %v875_v57 = vsel %vm275_vm0, %v803_v49, 0.0  ;;  %1261 = vst.msk [vmem:[%s4589_s3 + $0x24] sm:$0xf] %vm1251_vm1, %v2845_v50  ;;  %v879_v9 = vsel %vm275_vm0, %v805_v56, 0.0  ;;  %v2918_v28 = vpack.c.bf16 %v3528_v21, %v3521_v16  ;;  %v2919_v33 = vpack.c.bf16 %v3544_v29, %v3534_v24 }
  0xfc   :  { %v681_v60 = vadd.f32 %v680_v55, %v679_v53  ;;  %v876_v61 = vadd.f32 %v875_v57, %v874_v52  ;;  %v3563_v52 = vpop.f32.mrb[8].mxu1 }
  0xfd   :  { %v3022_v62 = vpop.f32.mrb[12].mxu0  ;;  %2537 = vst [vmem:[%s4590_s5 + $0x90] sm:$0xff] %v2918_v28  ;;  %2538 = vst [vmem:[%s4590_s5 + $0x98] sm:$0xff] %v2919_v33  ;;  %v3570_v58 = vpop.f32.mrb[9].mxu1 }
  0xfe   :  { %v2850_v2 = vpack.c.bf16 %v3022_v62, %v3022_v62  ;;  %v454_v3 = vpop.f32.mrb[13].mxu0  ;;  %v878_v4 = vadd.f32 %v877_v0, %v876_v61  ;;  %v683_v5 = vadd.f32 %v682_v1, %v681_v60  ;;  %v808_v17 = vmul.f32 %v3022_v62, %v3022_v62 }
  0xff   :  { %v684_v6 = vsel %vm275_vm0, %v454_v3, 0.0  ;;  %v806_v7 = vmul.f32 %v454_v3, %v454_v3  ;;  %v3023_v8 = vpop.f32.mrb[14].mxu0  ;;  %v2848_v10 = vpack.c.bf16 %v454_v3, %v454_v3  ;;  %v688_v25 = vsel %vm275_vm0, %v3022_v62, 0.0  ;;  %v3576_v62 = vpop.f32.mrb[10].mxu1 }
 0x100   :  { %1266 = vst.msk [vmem:[%s4589_s3 + $0x38] sm:$0xf] %vm1251_vm1, %v2850_v2  ;;  %v457_v11 = vpop.f32.mrb[15].mxu0  ;;  %v685_v12 = vadd.f32 %v684_v6, %v683_v5  ;;  %v880_v13 = vadd.f32 %v879_v9, %v878_v4  ;;  %v2851_v15 = vpack.c.bf16 %v3023_v8, %v3023_v8  ;;  %v809_v26 = vmul.f32 %v3023_v8, %v3023_v8  ;;  %v3586_v3 = vpop.f32.mrb[11].mxu1 }
 0x101   :  { %v881_v14 = vsel %vm275_vm0, %v806_v7, 0.0  ;;  %1264 = vst.msk [vmem:[%s4589_s3 + $0x30] sm:$0xf] %vm1251_vm1, %v2848_v10  ;;  %v686_v18 = vsel %vm275_vm0, %v457_v11, 0.0  ;;  %v807_v19 = vmul.f32 %v457_v11, %v457_v11  ;;  %v2849_v20 = vpack.c.bf16 %v457_v11, %v457_v11 }
 0x102   :  { %v882_v22 = vadd.f32 %v881_v14, %v880_v13  ;;  %1267 = vst.msk [vmem:[%s4589_s3 + $0x3c] sm:$0xf] %vm1251_vm1, %v2851_v15  ;;  %v687_v23 = vadd.f32 %v686_v18, %v685_v12  ;;  %v885_v34 = vsel %vm275_vm0, %v808_v17, 0.0  ;;  %v690_v35 = vsel %vm275_vm0, %v3023_v8, 0.0 }
 0x103   :  { %v883_v27 = vsel %vm275_vm0, %v807_v19, 0.0  ;;  %1265 = vst.msk [vmem:[%s4589_s3 + $0x34] sm:$0xf] %vm1251_vm1, %v2849_v20  ;;  %v887_v43 = vsel %vm275_vm0, %v809_v26, 0.0  ;;  %v2920_v2 = vpack.c.bf16 %v3570_v58, %v3563_v52  ;;  %v2921_v7 = vpack.c.bf16 %v3586_v3, %v3576_v62 }
 0x104   :  { %v689_v30 = vadd.f32 %v688_v25, %v687_v23  ;;  %v884_v31 = vadd.f32 %v883_v27, %v882_v22  ;;  %v3605_v27 = vpop.f32.mrb[12].mxu1 }
 0x105   :  { %v3026_v32 = vpop.f32.mrb[16].mxu0  ;;  %2539 = vst [vmem:[%s4590_s5 + $0xa0] sm:$0xff] %v2920_v2  ;;  %2540 = vst [vmem:[%s4590_s5 + $0xa8] sm:$0xff] %v2921_v7  ;;  %v3612_v33 = vpop.f32.mrb[13].mxu1 }
 0x106   :  { %v2854_v36 = vpack.c.bf16 %v3026_v32, %v3026_v32  ;;  %v470_v37 = vpop.f32.mrb[17].mxu0  ;;  %v886_v38 = vadd.f32 %v885_v34, %v884_v31  ;;  %v691_v39 = vadd.f32 %v690_v35, %v689_v30  ;;  %v812_v53 = vmul.f32 %v3026_v32, %v3026_v32 }
 0x107   :  { %v692_v40 = vsel %vm275_vm0, %v470_v37, 0.0  ;;  %v810_v41 = vmul.f32 %v470_v37, %v470_v37  ;;  %v3027_v42 = vpop.f32.mrb[18].mxu0  ;;  %v2852_v44 = vpack.c.bf16 %v470_v37, %v470_v37  ;;  %v696_v63 = vsel %vm275_vm0, %v3026_v32, 0.0 }
 0x108   :  { %1270 = vst.msk [vmem:[%s4589_s3 + $0x48] sm:$0xf] %vm1251_vm1, %v2854_v36  ;;  %v473_v45 = vpop.f32.mrb[19].mxu0  ;;  %v693_v47 = vadd.f32 %v692_v40, %v691_v39  ;;  %v888_v48 = vadd.f32 %v887_v43, %v886_v38  ;;  %v2855_v50 = vpack.c.bf16 %v3027_v42, %v3027_v42  ;;  %v813_v0 = vmul.f32 %v3027_v42, %v3027_v42  ;;  %v3618_v36 = vpop.f32.mrb[14].mxu1 }
 0x109   :  { %v889_v49 = vsel %vm275_vm0, %v810_v41, 0.0  ;;  %1268 = vst.msk [vmem:[%s4589_s3 + $0x40] sm:$0xf] %vm1251_vm1, %v2852_v44  ;;  %v694_v55 = vsel %vm275_vm0, %v473_v45, 0.0  ;;  %v811_v56 = vmul.f32 %v473_v45, %v473_v45  ;;  %v2853_v57 = vpack.c.bf16 %v473_v45, %v473_v45  ;;  %v3628_v41 = vpop.f32.mrb[15].mxu1 }
 0x10a   :  { %v890_v60 = vadd.f32 %v889_v49, %v888_v48  ;;  %1271 = vst.msk [vmem:[%s4589_s3 + $0x4c] sm:$0xf] %vm1251_vm1, %v2855_v50  ;;  %v695_v61 = vadd.f32 %v694_v55, %v693_v47  ;;  %v893_v8 = vsel %vm275_vm0, %v812_v53, 0.0  ;;  %v698_v9 = vsel %vm275_vm0, %v3027_v42, 0.0 }
 0x10b   :  { %v891_v1 = vsel %vm275_vm0, %v811_v56, 0.0  ;;  %1269 = vst.msk [vmem:[%s4589_s3 + $0x44] sm:$0xf] %vm1251_vm1, %v2853_v57  ;;  %v895_v18 = vsel %vm275_vm0, %v813_v0, 0.0  ;;  %v2922_v40 = vpack.c.bf16 %v3612_v33, %v3605_v27  ;;  %v2923_v45 = vpack.c.bf16 %v3628_v41, %v3618_v36 }
 0x10c   :  { %v697_v4 = vadd.f32 %v696_v63, %v695_v61  ;;  %v892_v5 = vadd.f32 %v891_v1, %v890_v60 }
 0x10d   :  { %v3030_v6 = vpop.f32.mrb[20].mxu0  ;;  %2541 = vst [vmem:[%s4590_s5 + $0xb0] sm:$0xff] %v2922_v40  ;;  %2542 = vst [vmem:[%s4590_s5 + $0xb8] sm:$0xff] %v2923_v45 }
 0x10e   :  { %v2858_v10 = vpack.c.bf16 %v3030_v6, %v3030_v6  ;;  %v486_v11 = vpop.f32.mrb[21].mxu0  ;;  %v894_v12 = vadd.f32 %v893_v8, %v892_v5  ;;  %v699_v13 = vadd.f32 %v698_v9, %v697_v4  ;;  %v816_v28 = vmul.f32 %v3030_v6, %v3030_v6 }
 0x10f   :  { %v700_v14 = vsel %vm275_vm0, %v486_v11, 0.0  ;;  %v814_v15 = vmul.f32 %v486_v11, %v486_v11  ;;  %v3031_v17 = vpop.f32.mrb[22].mxu0  ;;  %v2856_v19 = vpack.c.bf16 %v486_v11, %v486_v11  ;;  %v704_v37 = vsel %vm275_vm0, %v3030_v6, 0.0  ;;  %v3647_v6 = vpop.f32.mrb[16].mxu1 }
 0x110   :  { %1274 = vst.msk [vmem:[%s4589_s3 + $0x58] sm:$0xf] %vm1251_vm1, %v2858_v10  ;;  %v489_v20 = vpop.f32.mrb[23].mxu0  ;;  %v701_v22 = vadd.f32 %v700_v14, %v699_v13  ;;  %v896_v23 = vadd.f32 %v895_v18, %v894_v12  ;;  %v2859_v26 = vpack.c.bf16 %v3031_v17, %v3031_v17  ;;  %v817_v38 = vmul.f32 %v3031_v17, %v3031_v17  ;;  %v3654_v11 = vpop.f32.mrb[17].mxu1 }
 0x111   :  { %v897_v25 = vsel %vm275_vm0, %v814_v15, 0.0  ;;  %1272 = vst.msk [vmem:[%s4589_s3 + $0x50] sm:$0xf] %vm1251_vm1, %v2856_v19  ;;  %v702_v30 = vsel %vm275_vm0, %v489_v20, 0.0  ;;  %v815_v31 = vmul.f32 %v489_v20, %v489_v20  ;;  %v2857_v32 = vpack.c.bf16 %v489_v20, %v489_v20  ;;  %v3660_v14 = vpop.f32.mrb[18].mxu1 }
 0x112   :  { %v898_v34 = vadd.f32 %v897_v25, %v896_v23  ;;  %1275 = vst.msk [vmem:[%s4589_s3 + $0x5c] sm:$0xf] %vm1251_vm1, %v2859_v26  ;;  %v703_v35 = vadd.f32 %v702_v30, %v701_v22  ;;  %v901_v47 = vsel %vm275_vm0, %v816_v28, 0.0  ;;  %v706_v48 = vsel %vm275_vm0, %v3031_v17, 0.0  ;;  %v3670_v20 = vpop.f32.mrb[19].mxu1 }
 0x113   :  { %v899_v39 = vsel %vm275_vm0, %v815_v31, 0.0  ;;  %1273 = vst.msk [vmem:[%s4589_s3 + $0x54] sm:$0xf] %vm1251_vm1, %v2857_v32  ;;  %v903_v61 = vsel %vm275_vm0, %v817_v38, 0.0  ;;  %v2924_v19 = vpack.c.bf16 %v3654_v11, %v3647_v6  ;;  %v2925_v26 = vpack.c.bf16 %v3670_v20, %v3660_v14 }
 0x114   :  { %v705_v42 = vadd.f32 %v704_v37, %v703_v35  ;;  %v900_v43 = vadd.f32 %v899_v39, %v898_v34 }
 0x115   :  { %v3034_v44 = vpop.f32.mrb[24].mxu0  ;;  %2543 = vst [vmem:[%s4590_s5 + $0xc0] sm:$0xff] %v2924_v19  ;;  %2544 = vst [vmem:[%s4590_s5 + $0xc8] sm:$0xff] %v2925_v26 }
 0x116   :  { %v2862_v49 = vpack.c.bf16 %v3034_v44, %v3034_v44  ;;  %v502_v50 = vpop.f32.mrb[25].mxu0  ;;  %v902_v53 = vadd.f32 %v901_v47, %v900_v43  ;;  %v707_v55 = vadd.f32 %v706_v48, %v705_v42  ;;  %v820_v7 = vmul.f32 %v3034_v44, %v3034_v44 }
 0x117   :  { %v708_v56 = vsel %vm275_vm0, %v502_v50, 0.0  ;;  %v818_v57 = vmul.f32 %v502_v50, %v502_v50  ;;  %v3035_v60 = vpop.f32.mrb[26].mxu0  ;;  %v2860_v63 = vpack.c.bf16 %v502_v50, %v502_v50  ;;  %v712_v15 = vsel %vm275_vm0, %v3034_v44, 0.0 }
 0x118   :  { %1278 = vst.msk [vmem:[%s4589_s3 + $0x68] sm:$0xf] %vm1251_vm1, %v2862_v49  ;;  %v505_v0 = vpop.f32.mrb[27].mxu0  ;;  %v709_v1 = vadd.f32 %v708_v56, %v707_v55  ;;  %v904_v2 = vadd.f32 %v903_v61, %v902_v53  ;;  %v2863_v5 = vpack.c.bf16 %v3035_v60, %v3035_v60  ;;  %v821_v17 = vmul.f32 %v3035_v60, %v3035_v60  ;;  %v3689_v49 = vpop.f32.mrb[20].mxu1 }
 0x119   :  { %v905_v4 = vsel %vm275_vm0, %v818_v57, 0.0  ;;  %1276 = vst.msk [vmem:[%s4589_s3 + $0x60] sm:$0xf] %vm1251_vm1, %v2860_v63  ;;  %v710_v8 = vsel %vm275_vm0, %v505_v0, 0.0  ;;  %v819_v9 = vmul.f32 %v505_v0, %v505_v0  ;;  %v2861_v10 = vpack.c.bf16 %v505_v0, %v505_v0  ;;  %v3696_v57 = vpop.f32.mrb[21].mxu1 }
 0x11a   :  { %v906_v12 = vadd.f32 %v905_v4, %v904_v2  ;;  %1279 = vst.msk [vmem:[%s4589_s3 + $0x6c] sm:$0xf] %vm1251_vm1, %v2863_v5  ;;  %v711_v13 = vadd.f32 %v710_v8, %v709_v1  ;;  %v909_v28 = vsel %vm275_vm0, %v820_v7, 0.0  ;;  %v714_v30 = vsel %vm275_vm0, %v3035_v60, 0.0  ;;  %v3702_v63 = vpop.f32.mrb[22].mxu1 }
 0x11b   :  { %v907_v18 = vsel %vm275_vm0, %v819_v9, 0.0  ;;  %1277 = vst.msk [vmem:[%s4589_s3 + $0x64] sm:$0xf] %vm1251_vm1, %v2861_v10  ;;  %v911_v40 = vsel %vm275_vm0, %v821_v17, 0.0  ;;  %v2926_v4 = vpack.c.bf16 %v3696_v57, %v3689_v49  ;;  %v3712_v5 = vpop.f32.mrb[23].mxu1 }
 0x11c   :  { %v713_v22 = vadd.f32 %v712_v15, %v711_v13  ;;  %v908_v23 = vadd.f32 %v907_v18, %v906_v12  ;;  %v2927_v10 = vpack.c.bf16 %v3712_v5, %v3702_v63 }
 0x11d   :  { %v3038_v25 = vpop.f32.mrb[28].mxu0  ;;  %2545 = vst [vmem:[%s4590_s5 + $0xd0] sm:$0xff] %v2926_v4 }
 0x11e   :  { %v2866_v31 = vpack.c.bf16 %v3038_v25, %v3038_v25  ;;  %v518_v32 = vpop.f32.mrb[29].mxu0  ;;  %v910_v34 = vadd.f32 %v909_v28, %v908_v23  ;;  %v715_v35 = vadd.f32 %v714_v30, %v713_v22  ;;  %v824_v50 = vmul.f32 %v3038_v25, %v3038_v25  ;;  %2546 = vst [vmem:[%s4590_s5 + $0xd8] sm:$0xff] %v2927_v10 }
 0x11f   :  { %v716_v37 = vsel %vm275_vm0, %v518_v32, 0.0  ;;  %v822_v38 = vmul.f32 %v518_v32, %v518_v32  ;;  %v3039_v39 = vpop.f32.mrb[30].mxu0  ;;  %v2864_v42 = vpack.c.bf16 %v518_v32, %v518_v32  ;;  %v720_v0 = vsel %vm275_vm0, %v3038_v25, 0.0 }
 0x120   :  { %1282 = vst.msk [vmem:[%s4589_s3 + $0x78] sm:$0xf] %vm1251_vm1, %v2866_v31  ;;  %v521_v43 = vpop.f32.mrb[31].mxu0  ;;  %v717_v44 = vadd.f32 %v716_v37, %v715_v35  ;;  %v912_v45 = vadd.f32 %v911_v40, %v910_v34  ;;  %v2867_v48 = vpack.c.bf16 %v3039_v39, %v3039_v39  ;;  %v825_v1 = vmul.f32 %v3039_v39, %v3039_v39  ;;  %v3731_v37 = vpop.f32.mrb[24].mxu1 }
 0x121   :  { %v913_v47 = vsel %vm275_vm0, %v822_v38, 0.0  ;;  %1280 = vst.msk [vmem:[%s4589_s3 + $0x70] sm:$0xf] %vm1251_vm1, %v2864_v42  ;;  %v718_v53 = vsel %vm275_vm0, %v521_v43, 0.0  ;;  %v823_v55 = vmul.f32 %v521_v43, %v521_v43  ;;  %v2865_v56 = vpack.c.bf16 %v521_v43, %v521_v43  ;;  %v3738_v43 = vpop.f32.mrb[25].mxu1 }
 0x122   :  { %v914_v60 = vadd.f32 %v913_v47, %v912_v45  ;;  %1283 = vst.msk [vmem:[%s4589_s3 + $0x7c] sm:$0xf] %vm1251_vm1, %v2867_v48  ;;  %v719_v61 = vadd.f32 %v718_v53, %v717_v44  ;;  %v917_v12 = vsel %vm275_vm0, %v824_v50, 0.0  ;;  %v722_v13 = vsel %vm275_vm0, %v3039_v39, 0.0  ;;  %v3744_v47 = vpop.f32.mrb[26].mxu1 }
 0x123   :  { %v915_v2 = vsel %vm275_vm0, %v823_v55, 0.0  ;;  %1281 = vst.msk [vmem:[%s4589_s3 + $0x74] sm:$0xf] %vm1251_vm1, %v2865_v56  ;;  %v919_v26 = vsel %vm275_vm0, %v825_v1, 0.0  ;;  %v2928_v55 = vpack.c.bf16 %v3738_v43, %v3731_v37  ;;  %v3754_v56 = vpop.f32.mrb[27].mxu1 }
 0x124   :  { %v721_v7 = vadd.f32 %v720_v0, %v719_v61  ;;  %v916_v8 = vadd.f32 %v915_v2, %v914_v60  ;;  %v2929_v1 = vpack.c.bf16 %v3754_v56, %v3744_v47 }
 0x125   :  { %v3042_v9 = vpop.f32.mrb[32].mxu0  ;;  %2547 = vst [vmem:[%s4590_s5 + $0xe0] sm:$0xff] %v2928_v55 }
 0x126   :  { %v2870_v15 = vpack.c.bf16 %v3042_v9, %v3042_v9  ;;  %v534_v17 = vpop.f32.mrb[33].mxu0  ;;  %v918_v18 = vadd.f32 %v917_v12, %v916_v8  ;;  %v723_v19 = vadd.f32 %v722_v13, %v721_v7  ;;  %v828_v38 = vmul.f32 %v3042_v9, %v3042_v9  ;;  %2548 = vst [vmem:[%s4590_s5 + $0xe8] sm:$0xff] %v2929_v1 }
 0x127   :  { %v724_v22 = vsel %vm275_vm0, %v534_v17, 0.0  ;;  %v826_v23 = vmul.f32 %v534_v17, %v534_v17  ;;  %v3043_v25 = vpop.f32.mrb[34].mxu0  ;;  %v2868_v28 = vpack.c.bf16 %v534_v17, %v534_v17  ;;  %v728_v48 = vsel %vm275_vm0, %v3042_v9, 0.0 }
 0x128   :  { %1286 = vst.msk [vmem:[%s4589_s3 + $0x88] sm:$0xf] %vm1251_vm1, %v2870_v15  ;;  %v537_v30 = vpop.f32.mrb[35].mxu0  ;;  %v725_v31 = vadd.f32 %v724_v22, %v723_v19  ;;  %v920_v32 = vadd.f32 %v919_v26, %v918_v18  ;;  %v2871_v35 = vpack.c.bf16 %v3043_v25, %v3043_v25  ;;  %v829_v50 = vmul.f32 %v3043_v25, %v3043_v25 }
 0x129   :  { %v921_v34 = vsel %vm275_vm0, %v826_v23, 0.0  ;;  %1284 = vst.msk [vmem:[%s4589_s3 + $0x80] sm:$0xf] %vm1251_vm1, %v2868_v28  ;;  %v726_v39 = vsel %vm275_vm0, %v537_v30, 0.0  ;;  %v827_v40 = vmul.f32 %v537_v30, %v537_v30  ;;  %v2869_v42 = vpack.c.bf16 %v537_v30, %v537_v30  ;;  %v3773_v28 = vpop.f32.mrb[28].mxu1 }
 0x12a   :  { %v922_v44 = vadd.f32 %v921_v34, %v920_v32  ;;  %1287 = vst.msk [vmem:[%s4589_s3 + $0x8c] sm:$0xf] %vm1251_vm1, %v2871_v35  ;;  %v727_v45 = vadd.f32 %v726_v39, %v725_v31  ;;  %v925_v2 = vsel %vm275_vm0, %v828_v38, 0.0  ;;  %v730_v4 = vsel %vm275_vm0, %v3043_v25, 0.0  ;;  %v3780_v35 = vpop.f32.mrb[29].mxu1 }
 0x12b   :  { %v923_v53 = vsel %vm275_vm0, %v827_v40, 0.0  ;;  %1285 = vst.msk [vmem:[%s4589_s3 + $0x84] sm:$0xf] %vm1251_vm1, %v2869_v42  ;;  %v927_v17 = vsel %vm275_vm0, %v829_v50, 0.0  ;;  %v3786_v40 = vpop.f32.mrb[30].mxu1 }
 0x12c   :  { %v729_v60 = vadd.f32 %v728_v48, %v727_v45  ;;  %v924_v61 = vadd.f32 %v923_v53, %v922_v44  ;;  %v2930_v48 = vpack.c.bf16 %v3780_v35, %v3773_v28  ;;  %v3796_v50 = vpop.f32.mrb[31].mxu1 }
 0x12d   :  { %v3046_v0 = vpop.f32.mrb[36].mxu0 }
 0x12e   :  { %v2874_v7 = vpack.c.bf16 %v3046_v0, %v3046_v0  ;;  %v550_v8 = vpop.f32.mrb[37].mxu0  ;;  %v926_v9 = vadd.f32 %v925_v2, %v924_v61  ;;  %v731_v10 = vadd.f32 %v730_v4, %v729_v60  ;;  %v832_v30 = vmul.f32 %v3046_v0, %v3046_v0  ;;  %2549 = vst [vmem:[%s4590_s5 + $0xf0] sm:$0xff] %v2930_v48 }
 0x12f   :  { %v732_v12 = vsel %vm275_vm0, %v550_v8, 0.0  ;;  %v830_v13 = vmul.f32 %v550_v8, %v550_v8  ;;  %v3047_v15 = vpop.f32.mrb[38].mxu0  ;;  %v2872_v18 = vpack.c.bf16 %v550_v8, %v550_v8  ;;  %v736_v42 = vsel %vm275_vm0, %v3046_v0, 0.0 }
 0x130   :  { %1290 = vst.msk [vmem:[%s4589_s3 + $0x98] sm:$0xf] %vm1251_vm1, %v2874_v7  ;;  %v553_v19 = vpop.f32.mrb[39].mxu0  ;;  %v733_v22 = vadd.f32 %v732_v12, %v731_v10  ;;  %v928_v23 = vadd.f32 %v927_v17, %v926_v9  ;;  %v2875_v26 = vpack.c.bf16 %v3047_v15, %v3047_v15  ;;  %v833_v44 = vmul.f32 %v3047_v15, %v3047_v15 }
 0x131   :  { %v929_v25 = vsel %vm275_vm0, %v830_v13, 0.0  ;;  %1288 = vst.msk [vmem:[%s4589_s3 + $0x90] sm:$0xf] %vm1251_vm1, %v2872_v18  ;;  %v734_v31 = vsel %vm275_vm0, %v553_v19, 0.0  ;;  %v831_v32 = vmul.f32 %v553_v19, %v553_v19  ;;  %v2873_v34 = vpack.c.bf16 %v553_v19, %v553_v19 }
 0x132   :  { %v930_v38 = vadd.f32 %v929_v25, %v928_v23  ;;  %1291 = vst.msk [vmem:[%s4589_s3 + $0x9c] sm:$0xf] %vm1251_vm1, %v2875_v26  ;;  %v735_v39 = vadd.f32 %v734_v31, %v733_v22  ;;  %v2931_v61 = vpack.c.bf16 %v3796_v50, %v3786_v40  ;;  %v933_v0 = vsel %vm275_vm0, %v832_v30, 0.0  ;;  %v3815_v25 = vpop.f32.mrb[32].mxu1 }
 0x133   :  { %v931_v45 = vsel %vm275_vm0, %v831_v32, 0.0  ;;  %1289 = vst.msk [vmem:[%s4589_s3 + $0x94] sm:$0xf] %vm1251_vm1, %v2873_v34  ;;  %v738_v1 = vsel %vm275_vm0, %v3047_v15, 0.0  ;;  %v935_v13 = vsel %vm275_vm0, %v833_v44, 0.0  ;;  %v3822_v34 = vpop.f32.mrb[33].mxu1 }
 0x134   :  { %v737_v53 = vadd.f32 %v736_v42, %v735_v39  ;;  %v932_v55 = vadd.f32 %v931_v45, %v930_v38  ;;  %2550 = vst [vmem:[%s4590_s5 + $0xf8] sm:$0xff] %v2931_v61  ;;  %v3828_v42 = vpop.f32.mrb[34].mxu1 }
 0x135   :  { %v3050_v60 = vpop.f32.mrb[40].mxu0 }
 0x136   :  { %v2878_v2 = vpack.c.bf16 %v3050_v60, %v3050_v60  ;;  %v566_v4 = vpop.f32.mrb[41].mxu0  ;;  %v934_v7 = vadd.f32 %v933_v0, %v932_v55  ;;  %v739_v8 = vadd.f32 %v738_v1, %v737_v53  ;;  %v836_v26 = vmul.f32 %v3050_v60, %v3050_v60  ;;  %v3838_v55 = vpop.f32.mrb[35].mxu1 }
 0x137   :  { %v740_v9 = vsel %vm275_vm0, %v566_v4, 0.0  ;;  %v834_v10 = vmul.f32 %v566_v4, %v566_v4  ;;  %v3051_v12 = vpop.f32.mrb[42].mxu0  ;;  %v2876_v15 = vpack.c.bf16 %v566_v4, %v566_v4  ;;  %v744_v44 = vsel %vm275_vm0, %v3050_v60, 0.0 }
 0x138   :  { %1294 = vst.msk [vmem:[%s4589_s3 + $0xa8] sm:$0xf] %vm1251_vm1, %v2878_v2  ;;  %v569_v17 = vpop.f32.mrb[43].mxu0  ;;  %v741_v18 = vadd.f32 %v740_v9, %v739_v8  ;;  %v936_v19 = vadd.f32 %v935_v13, %v934_v7  ;;  %v2879_v23 = vpack.c.bf16 %v3051_v12, %v3051_v12  ;;  %v837_v45 = vmul.f32 %v3051_v12, %v3051_v12 }
 0x139   :  { %v937_v22 = vsel %vm275_vm0, %v834_v10, 0.0  ;;  %1292 = vst.msk [vmem:[%s4589_s3 + $0xa0] sm:$0xf] %vm1251_vm1, %v2876_v15  ;;  %v742_v30 = vsel %vm275_vm0, %v569_v17, 0.0  ;;  %v835_v31 = vmul.f32 %v569_v17, %v569_v17  ;;  %v2877_v32 = vpack.c.bf16 %v569_v17, %v569_v17 }
 0x13a   :  { %v938_v38 = vadd.f32 %v937_v22, %v936_v19  ;;  %1295 = vst.msk [vmem:[%s4589_s3 + $0xac] sm:$0xf] %vm1251_vm1, %v2879_v23  ;;  %v743_v39 = vadd.f32 %v742_v30, %v741_v18  ;;  %v2932_v53 = vpack.c.bf16 %v3822_v34, %v3815_v25  ;;  %v2933_v2 = vpack.c.bf16 %v3838_v55, %v3828_v42 }
 0x13b   :  { %v939_v48 = vsel %vm275_vm0, %v835_v31, 0.0  ;;  %1293 = vst.msk [vmem:[%s4589_s3 + $0xa4] sm:$0xf] %vm1251_vm1, %v2877_v32  ;;  %v941_v60 = vsel %vm275_vm0, %v836_v26, 0.0  ;;  %v746_v4 = vsel %vm275_vm0, %v3051_v12, 0.0  ;;  %v943_v18 = vsel %vm275_vm0, %v837_v45, 0.0 }
 0x13c   :  { %v745_v61 = vadd.f32 %v744_v44, %v743_v39  ;;  %v940_v0 = vadd.f32 %v939_v48, %v938_v38  ;;  %2551 = vst [vmem:[%s4590_s5 + $0x100] sm:$0xff] %v2932_v53  ;;  %2552 = vst [vmem:[%s4590_s5 + $0x108] sm:$0xff] %v2933_v2  ;;  %v3857_v31 = vpop.f32.mrb[36].mxu1 }
 0x13d   :  { %v3054_v1 = vpop.f32.mrb[44].mxu0  ;;  %v3864_v45 = vpop.f32.mrb[37].mxu1 }
 0x13e   :  { %v2882_v7 = vpack.c.bf16 %v3054_v1, %v3054_v1  ;;  %v582_v8 = vpop.f32.mrb[45].mxu0  ;;  %v942_v9 = vadd.f32 %v941_v60, %v940_v0  ;;  %v747_v10 = vadd.f32 %v746_v4, %v745_v61  ;;  %v840_v32 = vmul.f32 %v3054_v1, %v3054_v1  ;;  %4673 = vst [vmem:[#allocation2_spill] sm:$0xff] %v3864_v45  ;;  %v3870_v61 = vpop.f32.mrb[38].mxu1 }
 0x13f   :  { %v748_v13 = vsel %vm275_vm0, %v582_v8, 0.0  ;;  %v838_v15 = vmul.f32 %v582_v8, %v582_v8  ;;  %v3055_v17 = vpop.f32.mrb[46].mxu0  ;;  %v2880_v12 = vpack.c.bf16 %v582_v8, %v582_v8  ;;  %4674 = vst [vmem:[#allocation3_spill] sm:$0xff] %v3870_v61  ;;  %v752_v0 = vsel %vm275_vm0, %v3054_v1, 0.0 }
 0x140   :  { %1298 = vst.msk [vmem:[%s4589_s3 + $0xb8] sm:$0xf] %vm1251_vm1, %v2882_v7  ;;  %v585_v19 = vpop.f32.mrb[47].mxu0  ;;  %v749_v22 = vadd.f32 %v748_v13, %v747_v10  ;;  %v944_v23 = vadd.f32 %v943_v18, %v942_v9  ;;  %v2883_v30 = vpack.c.bf16 %v3055_v17, %v3055_v17  ;;  %v841_v2 = vmul.f32 %v3055_v17, %v3055_v17  ;;  %v3880_v7 = vpop.f32.mrb[39].mxu1 }
 0x141   :  { %v945_v26 = vsel %vm275_vm0, %v838_v15, 0.0  ;;  %1296 = vst.msk [vmem:[%s4589_s3 + $0xb0] sm:$0xf] %vm1251_vm1, %v2880_v12  ;;  %v750_v38 = vsel %vm275_vm0, %v585_v19, 0.0  ;;  %v839_v39 = vmul.f32 %v585_v19, %v585_v19  ;;  %v2881_v44 = vpack.c.bf16 %v585_v19, %v585_v19  ;;  %4675 = vst [vmem:[#allocation4_spill] sm:$0xff] %v3880_v7 }
 0x142   :  { %v946_v48 = vadd.f32 %v945_v26, %v944_v23  ;;  %1299 = vst.msk [vmem:[%s4589_s3 + $0xbc] sm:$0xf] %vm1251_vm1, %v2883_v30  ;;  %v751_v53 = vadd.f32 %v750_v38, %v749_v22  ;;  %v2934_v4 = vpack.c.bf16 %v3864_v45, %v3857_v31  ;;  %v2935_v13 = vpack.c.bf16 %v3880_v7, %v3870_v61 }
 0x143   :  { %v947_v60 = vsel %vm275_vm0, %v839_v39, 0.0  ;;  %1297 = vst.msk [vmem:[%s4589_s3 + $0xb4] sm:$0xf] %vm1251_vm1, %v2881_v44  ;;  %v949_v1 = vsel %vm275_vm0, %v840_v32, 0.0  ;;  %v754_v15 = vsel %vm275_vm0, %v3055_v17, 0.0  ;;  %v951_v32 = vsel %vm275_vm0, %v841_v2, 0.0 }
 0x144   :  { %v753_v8 = vadd.f32 %v752_v0, %v751_v53  ;;  %v948_v9 = vadd.f32 %v947_v60, %v946_v48  ;;  %2553 = vst [vmem:[%s4590_s5 + $0x110] sm:$0xff] %v2934_v4  ;;  %2554 = vst [vmem:[%s4590_s5 + $0x118] sm:$0xff] %v2935_v13  ;;  %v3899_v0 = vpop.f32.mrb[40].mxu1 }
 0x145   :  { %v3058_v10 = vpop.f32.mrb[48].mxu0  ;;  %4676 = vst [vmem:[#allocation5_spill] sm:$0xff] %v3899_v0 }
 0x146   :  { %v2886_v18 = vpack.c.bf16 %v3058_v10, %v3058_v10  ;;  %v598_v12 = vpop.f32.mrb[49].mxu0  ;;  %v950_v19 = vadd.f32 %v949_v1, %v948_v9  ;;  %v755_v22 = vadd.f32 %v754_v15, %v753_v8  ;;  %v844_v60 = vmul.f32 %v3058_v10, %v3058_v10  ;;  %v3906_v9 = vpop.f32.mrb[41].mxu1 }
 0x147   :  { %v756_v23 = vsel %vm275_vm0, %v598_v12, 0.0  ;;  %v842_v26 = vmul.f32 %v598_v12, %v598_v12  ;;  %v3059_v30 = vpop.f32.mrb[50].mxu0  ;;  %v2884_v17 = vpack.c.bf16 %v598_v12, %v598_v12  ;;  %4677 = vst [vmem:[#allocation6_spill] sm:$0xff] %v3906_v9  ;;  %v3912_v15 = vpop.f32.mrb[42].mxu1 }
 0x148   :  { %1302 = vst.msk [vmem:[%s4589_s3 + $0xc8] sm:$0xf] %vm1251_vm1, %v2886_v18  ;;  %v601_v38 = vpop.f32.mrb[51].mxu0  ;;  %v757_v39 = vadd.f32 %v756_v23, %v755_v22  ;;  %v952_v44 = vadd.f32 %v951_v32, %v950_v19  ;;  %v2887_v53 = vpack.c.bf16 %v3059_v30, %v3059_v30  ;;  %4678 = vst [vmem:[#allocation7_spill] sm:$0xff] %v3912_v15  ;;  %v760_v18 = vsel %vm275_vm0, %v3058_v10, 0.0  ;;  %v3922_v23 = vpop.f32.mrb[43].mxu1 }
 0x149   :  { %v953_v48 = vsel %vm275_vm0, %v842_v26, 0.0  ;;  %1300 = vst.msk [vmem:[%s4589_s3 + $0xc0] sm:$0xf] %vm1251_vm1, %v2884_v17  ;;  %v758_v2 = vsel %vm275_vm0, %v601_v38, 0.0  ;;  %v843_v4 = vmul.f32 %v601_v38, %v601_v38  ;;  %v2885_v8 = vpack.c.bf16 %v601_v38, %v601_v38  ;;  %4679 = vst [vmem:[#allocation8_spill] sm:$0xff] %v3922_v23 }
 0x14a   :  { %v954_v13 = vadd.f32 %v953_v48, %v952_v44  ;;  %1303 = vst.msk [vmem:[%s4589_s3 + $0xcc] sm:$0xf] %vm1251_vm1, %v2887_v53  ;;  %v759_v1 = vadd.f32 %v758_v2, %v757_v39  ;;  %v845_v12 = vmul.f32 %v3059_v30, %v3059_v30  ;;  %v2936_v22 = vpack.c.bf16 %v3906_v9, %v3899_v0 }
 0x14b   :  { %v955_v19 = vsel %vm275_vm0, %v843_v4, 0.0  ;;  %1301 = vst.msk [vmem:[%s4589_s3 + $0xc4] sm:$0xf] %vm1251_vm1, %v2885_v8  ;;  %v2937_v38 = vpack.c.bf16 %v3922_v23, %v3912_v15  ;;  %v957_v10 = vsel %vm275_vm0, %v844_v60, 0.0  ;;  %v762_v39 = vsel %vm275_vm0, %v3059_v30, 0.0 }
 0x14c   :  { %v761_v26 = vadd.f32 %v760_v18, %v759_v1  ;;  %v956_v32 = vadd.f32 %v955_v19, %v954_v13  ;;  %2555 = vst [vmem:[%s4590_s5 + $0x120] sm:$0xff] %v2936_v22  ;;  %v959_v60 = vsel %vm275_vm0, %v845_v12, 0.0 }
 0x14d   :  { %v3062_v17 = vpop.f32.mrb[52].mxu0  ;;  %2556 = vst [vmem:[%s4590_s5 + $0x128] sm:$0xff] %v2937_v38 }
 0x14e   :  { %v2890_v44 = vpack.c.bf16 %v3062_v17, %v3062_v17  ;;  %v614_v48 = vpop.f32.mrb[53].mxu0  ;;  %v958_v53 = vadd.f32 %v957_v10, %v956_v32  ;;  %v763_v2 = vadd.f32 %v762_v39, %v761_v26  ;;  %v3941_v32 = vpop.f32.mrb[44].mxu1  ;;  %v848_v10 = vmul.f32 %v3062_v17, %v3062_v17 }
 0x14f   :  { %v764_v4 = vsel %vm275_vm0, %v614_v48, 0.0  ;;  %v846_v8 = vmul.f32 %v614_v48, %v614_v48  ;;  %v3063_v13 = vpop.f32.mrb[54].mxu0  ;;  %v2888_v30 = vpack.c.bf16 %v614_v48, %v614_v48  ;;  %4680 = vst [vmem:[#allocation9_spill] sm:$0xff] %v3941_v32 }
 0x150   :  { %1306 = vst.msk [vmem:[%s4589_s3 + $0xd8] sm:$0xf] %vm1251_vm1, %v2890_v44  ;;  %v617_v1 = vpop.f32.mrb[55].mxu0  ;;  %v765_v18 = vadd.f32 %v764_v4, %v763_v2  ;;  %v960_v19 = vadd.f32 %v959_v60, %v958_v53  ;;  %v2891_v26 = vpack.c.bf16 %v3063_v13, %v3063_v13  ;;  %v3948_v44 = vpop.f32.mrb[45].mxu1  ;;  %v768_v4 = vsel %vm275_vm0, %v3062_v17, 0.0 }
 0x151   :  { %v961_v22 = vsel %vm275_vm0, %v846_v8, 0.0  ;;  %1304 = vst.msk [vmem:[%s4589_s3 + $0xd0] sm:$0xf] %vm1251_vm1, %v2888_v30  ;;  %v766_v12 = vsel %vm275_vm0, %v617_v1, 0.0  ;;  %v847_v38 = vmul.f32 %v617_v1, %v617_v1  ;;  %v2889_v39 = vpack.c.bf16 %v617_v1, %v617_v1  ;;  %4681 = vst [vmem:[#allocation10_spill] sm:$0xff] %v3948_v44  ;;  %v3954_v2 = vpop.f32.mrb[46].mxu1 }
 0x152   :  { %v962_v48 = vadd.f32 %v961_v22, %v960_v19  ;;  %1307 = vst.msk [vmem:[%s4589_s3 + $0xdc] sm:$0xf] %vm1251_vm1, %v2891_v26  ;;  %v767_v53 = vadd.f32 %v766_v12, %v765_v18  ;;  %4682 = vst [vmem:[#allocation11_spill] sm:$0xff] %v3954_v2  ;;  %v849_v8 = vmul.f32 %v3063_v13, %v3063_v13  ;;  %v3964_v1 = vpop.f32.mrb[47].mxu1  ;;  %v965_v17 = vsel %vm275_vm0, %v848_v10, 0.0 }
 0x153   :  { %v963_v60 = vsel %vm275_vm0, %v847_v38, 0.0  ;;  %1305 = vst.msk [vmem:[%s4589_s3 + $0xd4] sm:$0xf] %vm1251_vm1, %v2889_v39  ;;  %v2938_v30 = vpack.c.bf16 %v3948_v44, %v3941_v32  ;;  %4683 = vst [vmem:[#allocation12_spill] sm:$0xff] %v3964_v1  ;;  %v2939_v26 = vpack.c.bf16 %v3964_v1, %v3954_v2  ;;  %v770_v12 = vsel %vm275_vm0, %v3063_v13, 0.0 }
 0x154   :  { %v769_v19 = vadd.f32 %v768_v4, %v767_v53  ;;  %v964_v22 = vadd.f32 %v963_v60, %v962_v48  ;;  %v967_v10 = vsel %vm275_vm0, %v849_v8, 0.0 }
 0x155   :  { %v3066_v18 = vpop.f32.mrb[56].mxu0  ;;  %2557 = vst [vmem:[%s4590_s5 + $0x130] sm:$0xff] %v2938_v30  ;;  %2558 = vst [vmem:[%s4590_s5 + $0x138] sm:$0xff] %v2939_v26 }
 0x156   :  { %v2894_v38 = vpack.c.bf16 %v3066_v18, %v3066_v18  ;;  %v630_v23 = vpop.f32.mrb[57].mxu0  ;;  %v966_v39 = vadd.f32 %v965_v17, %v964_v22  ;;  %v771_v44 = vadd.f32 %v770_v12, %v769_v19  ;;  %v3983_v17 = vpop.f32.mrb[48].mxu1  ;;  %v852_v12 = vmul.f32 %v3066_v18, %v3066_v18 }
 0x157   :  { %v772_v32 = vsel %vm275_vm0, %v630_v23, 0.0  ;;  %v850_v53 = vmul.f32 %v630_v23, %v630_v23  ;;  %v3067_v48 = vpop.f32.mrb[58].mxu0  ;;  %v2892_v13 = vpack.c.bf16 %v630_v23, %v630_v23  ;;  %4684 = vst [vmem:[#allocation13_spill] sm:$0xff] %v3983_v17 }
 0x158   :  { %1310 = vst.msk [vmem:[%s4589_s3 + $0xe8] sm:$0xf] %vm1251_vm1, %v2894_v38  ;;  %v633_v4 = vpop.f32.mrb[59].mxu0  ;;  %v773_v60 = vadd.f32 %v772_v32, %v771_v44  ;;  %v968_v30 = vadd.f32 %v967_v10, %v966_v39  ;;  %v2895_v22 = vpack.c.bf16 %v3067_v48, %v3067_v48  ;;  %v3990_v38 = vpop.f32.mrb[49].mxu1  ;;  %v776_v39 = vsel %vm275_vm0, %v3066_v18, 0.0 }
 0x159   :  { %v969_v19 = vsel %vm275_vm0, %v850_v53, 0.0  ;;  %1308 = vst.msk [vmem:[%s4589_s3 + $0xe0] sm:$0xf] %vm1251_vm1, %v2892_v13  ;;  %v774_v8 = vsel %vm275_vm0, %v633_v4, 0.0  ;;  %v851_v26 = vmul.f32 %v633_v4, %v633_v4  ;;  %v2893_v1 = vpack.c.bf16 %v633_v4, %v633_v4  ;;  %4685 = vst [vmem:[#allocation14_spill] sm:$0xff] %v3990_v38  ;;  %v3996_v44 = vpop.f32.mrb[50].mxu1 }
 0x15a   :  { %v970_v23 = vadd.f32 %v969_v19, %v968_v30  ;;  %1311 = vst.msk [vmem:[%s4589_s3 + $0xec] sm:$0xf] %vm1251_vm1, %v2895_v22  ;;  %v775_v32 = vadd.f32 %v774_v8, %v773_v60  ;;  %4686 = vst [vmem:[#allocation15_spill] sm:$0xff] %v3996_v44  ;;  %v853_v53 = vmul.f32 %v3067_v48, %v3067_v48  ;;  %v4006_v4 = vpop.f32.mrb[51].mxu1  ;;  %v973_v18 = vsel %vm275_vm0, %v852_v12, 0.0 }
 0x15b   :  { %v971_v10 = vsel %vm275_vm0, %v851_v26, 0.0  ;;  %1309 = vst.msk [vmem:[%s4589_s3 + $0xe4] sm:$0xf] %vm1251_vm1, %v2893_v1  ;;  %v2940_v13 = vpack.c.bf16 %v3990_v38, %v3983_v17  ;;  %4687 = vst [vmem:[#allocation16_spill] sm:$0xff] %v4006_v4  ;;  %v2941_v22 = vpack.c.bf16 %v4006_v4, %v3996_v44  ;;  %v778_v8 = vsel %vm275_vm0, %v3067_v48, 0.0 }
 0x15c   :  { %v777_v30 = vadd.f32 %v776_v39, %v775_v32  ;;  %v972_v19 = vadd.f32 %v971_v10, %v970_v23  ;;  %v975_v12 = vsel %vm275_vm0, %v853_v53, 0.0 }
 0x15d   :  { %v3070_v60 = vpop.f32.mrb[60].mxu0  ;;  %2559 = vst [vmem:[%s4590_s5 + $0x140] sm:$0xff] %v2940_v13  ;;  %2560 = vst [vmem:[%s4590_s5 + $0x148] sm:$0xff] %v2941_v22 }
 0x15e   :  { %v2898_v26 = vpack.c.bf16 %v3070_v60, %v3070_v60  ;;  %v646_v2 = vpop.f32.mrb[61].mxu0  ;;  %v974_v1 = vadd.f32 %v973_v18, %v972_v19  ;;  %v779_v38 = vadd.f32 %v778_v8, %v777_v30  ;;  %v4025_v18 = vpop.f32.mrb[52].mxu1  ;;  %v856_v8 = vmul.f32 %v3070_v60, %v3070_v60 }
 0x15f   :  { %v780_v17 = vsel %vm275_vm0, %v646_v2, 0.0  ;;  %v854_v32 = vmul.f32 %v646_v2, %v646_v2  ;;  %v3071_v23 = vpop.f32.mrb[62].mxu0  ;;  %v2896_v48 = vpack.c.bf16 %v646_v2, %v646_v2  ;;  %4688 = vst [vmem:[#allocation17_spill] sm:$0xff] %v4025_v18 }
 0x160   :  { %1314 = vst.msk [vmem:[%s4589_s3 + $0xf8] sm:$0xf] %vm1251_vm1, %v2898_v26  ;;  %v649_v39 = vpop.f32.mrb[63].mxu0  ;;  %v781_v10 = vadd.f32 %v780_v17, %v779_v38  ;;  %v976_v13 = vadd.f32 %v975_v12, %v974_v1  ;;  %v2899_v19 = vpack.c.bf16 %v3071_v23, %v3071_v23  ;;  %v4032_v26 = vpop.f32.mrb[53].mxu1  ;;  %v857_v17 = vmul.f32 %v3071_v23, %v3071_v23 }
 0x161   :  { %v977_v30 = vsel %vm275_vm0, %v854_v32, 0.0  ;;  %1312 = vst.msk [vmem:[%s4589_s3 + $0xf0] sm:$0xf] %vm1251_vm1, %v2896_v48  ;;  %v782_v53 = vsel %vm275_vm0, %v649_v39, 0.0  ;;  %v855_v22 = vmul.f32 %v649_v39, %v649_v39  ;;  %v2897_v4 = vpack.c.bf16 %v649_v39, %v649_v39  ;;  %4689 = vst [vmem:[#allocation18_spill] sm:$0xff] %v4032_v26  ;;  %v4038_v1 = vpop.f32.mrb[54].mxu1 }
 0x162   :  { %v978_v2 = vadd.f32 %v977_v30, %v976_v13  ;;  %1315 = vst.msk [vmem:[%s4589_s3 + $0xfc] sm:$0xf] %vm1251_vm1, %v2899_v19  ;;  %v783_v38 = vadd.f32 %v782_v53, %v781_v10  ;;  %4690 = vst [vmem:[#allocation19_spill] sm:$0xff] %v4038_v1  ;;  %v784_v32 = vsel %vm275_vm0, %v3070_v60, 0.0  ;;  %v2942_v48 = vpack.c.bf16 %v4032_v26, %v4025_v18  ;;  %v4048_v39 = vpop.f32.mrb[55].mxu1 }
 0x163   :  { %v979_v12 = vsel %vm275_vm0, %v855_v22, 0.0  ;;  %1313 = vst.msk [vmem:[%s4589_s3 + $0xf4] sm:$0xf] %vm1251_vm1, %v2897_v4  ;;  %4691 = vst [vmem:[#allocation20_spill] sm:$0xff] %v4048_v39  ;;  %v2943_v10 = vpack.c.bf16 %v4048_v39, %v4038_v1  ;;  %v981_v60 = vsel %vm275_vm0, %v856_v8, 0.0  ;;  %v786_v53 = vsel %vm275_vm0, %v3071_v23, 0.0 }
 0x164   :  { %v785_v13 = vadd.f32 %v784_v32, %v783_v38  ;;  %v980_v30 = vadd.f32 %v979_v12, %v978_v2  ;;  %2561 = vst [vmem:[%s4590_s5 + $0x150] sm:$0xff] %v2942_v48  ;;  %v983_v4 = vsel %vm275_vm0, %v857_v17, 0.0 }
 0x165   :  { %v1398_v19 = vpop.f32.mrb[64].mxu0  ;;  %2562 = vst [vmem:[%s4590_s5 + $0x158] sm:$0xff] %v2943_v10 }
 0x166   :  { %v1400_v22 = vpop.f32.mrb[65].mxu0  ;;  %v787_v26 = vadd.f32 %v786_v53, %v785_v13  ;;  %v982_v18 = vadd.f32 %v981_v60, %v980_v30  ;;  %v1855_v2 = vmul.f32 %v1398_v19, %v1398_v19  ;;  %v4064_v13 = vpop.f32.mrb[56].mxu1 }
 0x167   :  { %v2900_v44 = vpack.c.bf16 %v1400_v22, %v1398_v19  ;;  %v1402_v38 = vpop.f32.mrb[66].mxu0  ;;  %v1856_v32 = vmul.f32 %v1400_v22, %v1400_v22  ;;  %4692 = vst [vmem:[#allocation21_spill] sm:$0xff] %v4064_v13  ;;  %v4066_v53 = vpop.f32.mrb[57].mxu1 }
 0x168   :  { %v1717_v8 = vadd.f32 %v1402_v38, %v1398_v19  ;;  %v1857_v12 = vmul.f32 %v1402_v38, %v1402_v38  ;;  %v1404_v23 = vpop.f32.mrb[67].mxu0  ;;  %v788_v39 = vrot.slane %v787_v26, 4  ;;  %v984_v1 = vadd.f32 %v983_v4, %v982_v18  ;;  %4693 = vst [vmem:[#allocation22_spill] sm:$0xff] %v4066_v53  ;;  %v4068_v19 = vpop.f32.mrb[58].mxu1 }
 0x169   :  { %2519 = vst [vmem:[%s4590_s5] sm:$0xff] %v2900_v44  ;;  %v1786_v17 = vadd.f32 %v1404_v23, %v1400_v22  ;;  %v1858_v48 = vmul.f32 %v1404_v23, %v1404_v23  ;;  %v2901_v60 = vpack.c.bf16 %v1404_v23, %v1402_v38  ;;  %4694 = vst [vmem:[#allocation23_spill] sm:$0xff] %v4068_v19  ;;  %v4075_v18 = vpop.f32.mrb[59].mxu1 }
 0x16a   :  { %v1983_v30 = vadd.f32 %v1857_v12, %v1855_v2  ;;  %v789_v10 = vadd.f32 %v788_v39, %v787_v26  ;;  %v985_v15 = vrot.slane %v984_v1, 4  ;;  %v2944_v44 = vpack.c.bf16 %v4066_v53, %v4064_v13  ;;  %4695 = vst [vmem:[#allocation24_spill] sm:$0xff] %v4075_v18  ;;  %v4085_v45 = vpop.f32.mrb[60].mxu1 }
 0x16b   :  { %v2052_v9 = vadd.f32 %v1858_v48, %v1856_v32  ;;  %2520 = vst [vmem:[%s4590_s5 + $0x8] sm:$0xff] %v2901_v60  ;;  %v2945_v38 = vpack.c.bf16 %v4075_v18, %v4068_v19 }
 0x16c   :  { %v790_v22 = vrot.slane %v789_v10, 2  ;;  %v986_v4 = vadd.f32 %v985_v15, %v984_v1  ;;  %2563 = vst [vmem:[%s4590_s5 + $0x160] sm:$0xff] %v2944_v44 }
 0x16d   :  { %v1408_v2 = vpop.f32.mrb[68].mxu0  ;;  %2564 = vst [vmem:[%s4590_s5 + $0x168] sm:$0xff] %v2945_v38 }
 0x16e   :  { %v1718_v26 = vadd.f32 %v1717_v8, %v1408_v2  ;;  %v1859_v39 = vmul.f32 %v1408_v2, %v1408_v2  ;;  %v1410_v32 = vpop.f32.mrb[69].mxu0  ;;  %v791_v12 = vadd.f32 %v790_v22, %v789_v10  ;;  %v987_v23 = vrot.slane %v986_v4, 2  ;;  %v4090_v22 = vpop.f32.mrb[61].mxu1 }
 0x16f   :  { %v1787_v48 = vadd.f32 %v1786_v17, %v1410_v32  ;;  %v1860_v60 = vmul.f32 %v1410_v32, %v1410_v32  ;;  %v1412_v53 = vpop.f32.mrb[70].mxu0  ;;  %v2902_v1 = vpack.c.bf16 %v1410_v32, %v1408_v2  ;;  %v2946_v2 = vpack.c.bf16 %v4090_v22, %v4085_v45  ;;  %v4094_v38 = vpop.f32.mrb[62].mxu1 }
 0x170   :  { %v1984_v15 = vadd.f32 %v1983_v30, %v1859_v39  ;;  %v1719_v13 = vadd.f32 %v1718_v26, %v1412_v53  ;;  %v1861_v18 = vmul.f32 %v1412_v53, %v1412_v53  ;;  %v1414_v8 = vpop.f32.mrb[71].mxu0  ;;  %v792_v19 = vrot.slane %v791_v12, 1 }
 0x171   :  { %v988_v0 = vadd.f32 %v987_v23, %v986_v4  ;;  %v2053_v7 = vadd.f32 %v2052_v9, %v1860_v60  ;;  %v1788_v61 = vadd.f32 %v1787_v48, %v1414_v8  ;;  %2521 = vst [vmem:[%s4590_s5 + $0x10] sm:$0xff] %v2902_v1  ;;  %v1862_v10 = vmul.f32 %v1414_v8, %v1414_v8  ;;  %v4099_v9 = vpop.f32.mrb[63].mxu1 }
 0x172   :  { %v1985_v17 = vadd.f32 %v1984_v15, %v1861_v18  ;;  %v2903_v44 = vpack.c.bf16 %v1414_v8, %v1412_v53  ;;  %v793_v26 = vadd.f32 %v792_v19, %v791_v12  ;;  %2565 = vst [vmem:[%s4590_s5 + $0x170] sm:$0xff] %v2946_v2  ;;  %v2947_v53 = vpack.c.bf16 %v4099_v9, %v4094_v38  ;;  %v4116_v2 = vpop.f32.mrb[64].mxu1 }
 0x173   :  { %v989_v30 = vrot.slane %v988_v0, 1  ;;  %v2054_v4 = vadd.f32 %v2053_v7, %v1862_v10 }
 0x174   :  { %2522 = vst [vmem:[%s4590_s5 + $0x18] sm:$0xff] %v2903_v44  ;;  %2566 = vst [vmem:[%s4590_s5 + $0x178] sm:$0xff] %v2947_v53 }
 0x175   :  { %v990_v18 = vadd.f32 %v989_v30, %v988_v0  ;;  %v1418_v39 = vpop.f32.mrb[72].mxu0 }
 0x176   :  { %v1720_v32 = vadd.f32 %v1719_v13, %v1418_v39  ;;  %v1863_v7 = vmul.f32 %v1418_v39, %v1418_v39  ;;  %v1420_v23 = vpop.f32.mrb[73].mxu0 }
 0x177   :  { %v1789_v48 = vadd.f32 %v1788_v61, %v1420_v23  ;;  %v1864_v60 = vmul.f32 %v1420_v23, %v1420_v23  ;;  %v2904_v15 = vpack.c.bf16 %v1420_v23, %v1418_v39  ;;  %v1422_v1 = vpop.f32.mrb[74].mxu0  ;;  %v992_v0 = vsel %vm991_vm2, %v793_v26, %v990_v18  ;;  %v4118_v26 = vpop.f32.mrb[65].mxu1 }
 0x178   :  { %v1986_v19 = vadd.f32 %v1985_v17, %v1863_v7  ;;  %v1721_v12 = vadd.f32 %v1720_v32, %v1422_v1  ;;  %v1865_v8 = vmul.f32 %v1422_v1, %v1422_v1  ;;  %v1424_v10 = vpop.f32.mrb[75].mxu0  ;;  %994 = vst.msk [vmem:[%s4591_s4] sm:$0x3] %vm993_vm3, %v992_v0  ;;  %v4125_v18 = vpop.f32.mrb[66].mxu1 }
 0x179   :  { %v2055_v13 = vadd.f32 %v2054_v4, %v1864_v60  ;;  %2523 = vst [vmem:[%s4590_s5 + $0x20] sm:$0xff] %v2904_v15  ;;  %v1790_v61 = vadd.f32 %v1789_v48, %v1424_v10  ;;  %v1866_v44 = vmul.f32 %v1424_v10, %v1424_v10  ;;  %v2905_v30 = vpack.c.bf16 %v1424_v10, %v1422_v1  ;;  %v4127_v53 = vpop.f32.mrb[67].mxu1 }
 0x17a   :  { %v1987_v39 = vadd.f32 %v1986_v19, %v1865_v8  ;;  %v2948_v4 = vpack.c.bf16 %v4118_v26, %v4116_v2  ;;  %4696 = vst [vmem:[#allocation25_spill] sm:$0xff] %v4125_v18  ;;  %4697 = vst [vmem:[#allocation26_spill] sm:$0xff] %v4127_v53  ;;  %v2949_v7 = vpack.c.bf16 %v4127_v53, %v4125_v18 }
 0x17b   :  { %v2056_v17 = vadd.f32 %v2055_v13, %v1866_v44  ;;  %2524 = vst [vmem:[%s4590_s5 + $0x28] sm:$0xff] %v2905_v30 }
 0x17c   :  { %2567 = vst [vmem:[%s4590_s5 + $0x180] sm:$0xff] %v2948_v4  ;;  %2568 = vst [vmem:[%s4590_s5 + $0x188] sm:$0xff] %v2949_v7 }
 0x17d   :  { %v1428_v32 = vpop.f32.mrb[76].mxu0 }
 0x17e   :  { %v1722_v23 = vadd.f32 %v1721_v12, %v1428_v32  ;;  %v1867_v48 = vmul.f32 %v1428_v32, %v1428_v32  ;;  %v1430_v60 = vpop.f32.mrb[77].mxu0 }
 0x17f   :  { %v1791_v15 = vadd.f32 %v1790_v61, %v1430_v60  ;;  %v1868_v1 = vmul.f32 %v1430_v60, %v1430_v60  ;;  %v2906_v0 = vpack.c.bf16 %v1430_v60, %v1428_v32  ;;  %v1432_v19 = vpop.f32.mrb[78].mxu0  ;;  %v4140_v61 = vpop.f32.mrb[68].mxu1 }
 0x180   :  { %v1988_v8 = vadd.f32 %v1987_v39, %v1867_v48  ;;  %v1723_v10 = vadd.f32 %v1722_v23, %v1432_v19  ;;  %v1869_v13 = vmul.f32 %v1432_v19, %v1432_v19  ;;  %v1434_v44 = vpop.f32.mrb[79].mxu0  ;;  %4698 = vst [vmem:[#allocation27_spill] sm:$0xff] %v4140_v61  ;;  %v4142_v60 = vpop.f32.mrb[69].mxu1 }
 0x181   :  { %v2057_v30 = vadd.f32 %v2056_v17, %v1868_v1  ;;  %2525 = vst [vmem:[%s4590_s5 + $0x30] sm:$0xff] %v2906_v0  ;;  %v1792_v12 = vadd.f32 %v1791_v15, %v1434_v44  ;;  %v1870_v4 = vmul.f32 %v1434_v44, %v1434_v44  ;;  %v2907_v53 = vpack.c.bf16 %v1434_v44, %v1432_v19  ;;  %v4149_v17 = vpop.f32.mrb[70].mxu1 }
 0x182   :  { %v1989_v32 = vadd.f32 %v1988_v8, %v1869_v13  ;;  %4699 = vst [vmem:[#allocation28_spill] sm:$0xff] %v4142_v60  ;;  %v2950_v39 = vpack.c.bf16 %v4142_v60, %v4140_v61  ;;  %4700 = vst [vmem:[#allocation29_spill] sm:$0xff] %v4149_v17  ;;  %v4151_v7 = vpop.f32.mrb[71].mxu1 }
 0x183   :  { %v2058_v18 = vadd.f32 %v2057_v30, %v1870_v4  ;;  %2526 = vst [vmem:[%s4590_s5 + $0x38] sm:$0xff] %v2907_v53  ;;  %4701 = vst [vmem:[#allocation30_spill] sm:$0xff] %v4151_v7  ;;  %v2951_v48 = vpack.c.bf16 %v4151_v7, %v4149_v17 }
 0x184   :  { %2569 = vst [vmem:[%s4590_s5 + $0x190] sm:$0xff] %v2950_v39 }
 0x185   :  { %v1438_v23 = vpop.f32.mrb[80].mxu0  ;;  %2570 = vst [vmem:[%s4590_s5 + $0x198] sm:$0xff] %v2951_v48 }
 0x186   :  { %v1724_v15 = vadd.f32 %v1723_v10, %v1438_v23  ;;  %v1871_v1 = vmul.f32 %v1438_v23, %v1438_v23  ;;  %v1440_v0 = vpop.f32.mrb[81].mxu0 }
 0x187   :  { %v1793_v19 = vadd.f32 %v1792_v12, %v1440_v0  ;;  %v1872_v53 = vmul.f32 %v1440_v0, %v1440_v0  ;;  %v2908_v8 = vpack.c.bf16 %v1440_v0, %v1438_v23  ;;  %v1442_v13 = vpop.f32.mrb[82].mxu0  ;;  %v4164_v12 = vpop.f32.mrb[72].mxu1 }
 0x188   :  { %v1990_v44 = vadd.f32 %v1989_v32, %v1871_v1  ;;  %v1725_v30 = vadd.f32 %v1724_v15, %v1442_v13  ;;  %v1873_v4 = vmul.f32 %v1442_v13, %v1442_v13  ;;  %v1444_v60 = vpop.f32.mrb[83].mxu0  ;;  %4702 = vst [vmem:[#allocation31_spill] sm:$0xff] %v4164_v12  ;;  %v4166_v0 = vpop.f32.mrb[73].mxu1 }
 0x189   :  { %v2059_v61 = vadd.f32 %v2058_v18, %v1872_v53  ;;  %2527 = vst [vmem:[%s4590_s5 + $0x40] sm:$0xff] %v2908_v8  ;;  %v1794_v10 = vadd.f32 %v1793_v19, %v1444_v60  ;;  %v1874_v39 = vmul.f32 %v1444_v60, %v1444_v60  ;;  %v2909_v7 = vpack.c.bf16 %v1444_v60, %v1442_v13  ;;  %v4173_v32 = vpop.f32.mrb[74].mxu1 }
 0x18a   :  { %v1991_v23 = vadd.f32 %v1990_v44, %v1873_v4  ;;  %4703 = vst [vmem:[#allocation32_spill] sm:$0xff] %v4166_v0  ;;  %v2952_v18 = vpack.c.bf16 %v4166_v0, %v4164_v12  ;;  %4704 = vst [vmem:[#allocation33_spill] sm:$0xff] %v4173_v32  ;;  %v4175_v48 = vpop.f32.mrb[75].mxu1 }
 0x18b   :  { %v2060_v17 = vadd.f32 %v2059_v61, %v1874_v39  ;;  %2528 = vst [vmem:[%s4590_s5 + $0x48] sm:$0xff] %v2909_v7  ;;  %4705 = vst [vmem:[#allocation34_spill] sm:$0xff] %v4175_v48  ;;  %v2953_v60 = vpack.c.bf16 %v4175_v48, %v4173_v32 }
 0x18c   :  { %2571 = vst [vmem:[%s4590_s5 + $0x1a0] sm:$0xff] %v2952_v18 }
 0x18d   :  { %v1448_v15 = vpop.f32.mrb[84].mxu0  ;;  %2572 = vst [vmem:[%s4590_s5 + $0x1a8] sm:$0xff] %v2953_v60 }
 0x18e   :  { %v1726_v61 = vadd.f32 %v1725_v30, %v1448_v15  ;;  %v1875_v1 = vmul.f32 %v1448_v15, %v1448_v15  ;;  %v1450_v19 = vpop.f32.mrb[85].mxu0 }
 0x18f   :  { %v1795_v53 = vadd.f32 %v1794_v10, %v1450_v19  ;;  %v1876_v7 = vmul.f32 %v1450_v19, %v1450_v19  ;;  %v2910_v8 = vpack.c.bf16 %v1450_v19, %v1448_v15  ;;  %v1452_v13 = vpop.f32.mrb[86].mxu0  ;;  %v4188_v10 = vpop.f32.mrb[76].mxu1 }
 0x190   :  { %v1992_v44 = vadd.f32 %v1991_v23, %v1875_v1  ;;  %v1727_v4 = vadd.f32 %v1726_v61, %v1452_v13  ;;  %v1877_v39 = vmul.f32 %v1452_v13, %v1452_v13  ;;  %v1454_v0 = vpop.f32.mrb[87].mxu0  ;;  %4706 = vst [vmem:[#allocation35_spill] sm:$0xff] %v4188_v10  ;;  %v4190_v19 = vpop.f32.mrb[77].mxu1 }
 0x191   :  { %v2061_v12 = vadd.f32 %v2060_v17, %v1876_v7  ;;  %2529 = vst [vmem:[%s4590_s5 + $0x50] sm:$0xff] %v2910_v8  ;;  %v1796_v30 = vadd.f32 %v1795_v53, %v1454_v0  ;;  %v1878_v18 = vmul.f32 %v1454_v0, %v1454_v0  ;;  %v2911_v48 = vpack.c.bf16 %v1454_v0, %v1452_v13  ;;  %v4197_v23 = vpop.f32.mrb[78].mxu1 }
 0x192   :  { %v1993_v15 = vadd.f32 %v1992_v44, %v1877_v39  ;;  %4707 = vst [vmem:[#allocation36_spill] sm:$0xff] %v4190_v19  ;;  %v2954_v17 = vpack.c.bf16 %v4190_v19, %v4188_v10  ;;  %4708 = vst [vmem:[#allocation37_spill] sm:$0xff] %v4197_v23  ;;  %v4199_v60 = vpop.f32.mrb[79].mxu1 }
 0x193   :  { %v2062_v32 = vadd.f32 %v2061_v12, %v1878_v18  ;;  %2530 = vst [vmem:[%s4590_s5 + $0x58] sm:$0xff] %v2911_v48  ;;  %4709 = vst [vmem:[#allocation38_spill] sm:$0xff] %v4199_v60  ;;  %v2955_v0 = vpack.c.bf16 %v4199_v60, %v4197_v23 }
 0x194   :  { %2573 = vst [vmem:[%s4590_s5 + $0x1b0] sm:$0xff] %v2954_v17 }
 0x195   :  { %v1458_v61 = vpop.f32.mrb[88].mxu0  ;;  %2574 = vst [vmem:[%s4590_s5 + $0x1b8] sm:$0xff] %v2955_v0 }
 0x196   :  { %v1728_v12 = vadd.f32 %v1727_v4, %v1458_v61  ;;  %v1879_v1 = vmul.f32 %v1458_v61, %v1458_v61  ;;  %v1460_v53 = vpop.f32.mrb[89].mxu0 }
 0x197   :  { %v1797_v7 = vadd.f32 %v1796_v30, %v1460_v53  ;;  %v1880_v48 = vmul.f32 %v1460_v53, %v1460_v53  ;;  %v2912_v8 = vpack.c.bf16 %v1460_v53, %v1458_v61  ;;  %v1462_v13 = vpop.f32.mrb[90].mxu0  ;;  %v4212_v30 = vpop.f32.mrb[80].mxu1 }
 0x198   :  { %v1994_v44 = vadd.f32 %v1993_v15, %v1879_v1  ;;  %v1729_v39 = vadd.f32 %v1728_v12, %v1462_v13  ;;  %v1881_v18 = vmul.f32 %v1462_v13, %v1462_v13  ;;  %v1464_v19 = vpop.f32.mrb[91].mxu0  ;;  %4710 = vst [vmem:[#allocation39_spill] sm:$0xff] %v4212_v30  ;;  %v4214_v53 = vpop.f32.mrb[81].mxu1 }
 0x199   :  { %v2063_v10 = vadd.f32 %v2062_v32, %v1880_v48  ;;  %2531 = vst [vmem:[%s4590_s5 + $0x60] sm:$0xff] %v2912_v8  ;;  %v1798_v4 = vadd.f32 %v1797_v7, %v1464_v19  ;;  %v1882_v17 = vmul.f32 %v1464_v19, %v1464_v19  ;;  %v2913_v60 = vpack.c.bf16 %v1464_v19, %v1462_v13  ;;  %v4221_v15 = vpop.f32.mrb[82].mxu1 }
 0x19a   :  { %v1995_v61 = vadd.f32 %v1994_v44, %v1881_v18  ;;  %4711 = vst [vmem:[#allocation40_spill] sm:$0xff] %v4214_v53  ;;  %v2956_v32 = vpack.c.bf16 %v4214_v53, %v4212_v30  ;;  %v4223_v0 = vpop.f32.mrb[83].mxu1 }
 0x19b   :  { %v2064_v23 = vadd.f32 %v2063_v10, %v1882_v17  ;;  %2532 = vst [vmem:[%s4590_s5 + $0x68] sm:$0xff] %v2913_v60  ;;  %4712 = vst [vmem:[#allocation41_spill] sm:$0xff] %v4223_v0  ;;  %v2957_v19 = vpack.c.bf16 %v4223_v0, %v4221_v15 }
 0x19c   :  { %2575 = vst [vmem:[%s4590_s5 + $0x1c0] sm:$0xff] %v2956_v32 }
 0x19d   :  { %v1468_v12 = vpop.f32.mrb[92].mxu0  ;;  %2576 = vst [vmem:[%s4590_s5 + $0x1c8] sm:$0xff] %v2957_v19 }
 0x19e   :  { %v1730_v10 = vadd.f32 %v1729_v39, %v1468_v12  ;;  %v1883_v1 = vmul.f32 %v1468_v12, %v1468_v12  ;;  %v1470_v7 = vpop.f32.mrb[93].mxu0 }
 0x19f   :  { %v1799_v48 = vadd.f32 %v1798_v4, %v1470_v7  ;;  %v1884_v60 = vmul.f32 %v1470_v7, %v1470_v7  ;;  %v2914_v8 = vpack.c.bf16 %v1470_v7, %v1468_v12  ;;  %v1472_v13 = vpop.f32.mrb[94].mxu0  ;;  %v4236_v4 = vpop.f32.mrb[84].mxu1  ;;  %v1887_v12 = vmul.f32 %v3479_v46, %v3479_v46 }
 0x1a0   :  { %v1996_v44 = vadd.f32 %v1995_v61, %v1883_v1  ;;  %v1731_v18 = vadd.f32 %v1730_v10, %v1472_v13  ;;  %v1885_v17 = vmul.f32 %v1472_v13, %v1472_v13  ;;  %v1474_v53 = vpop.f32.mrb[95].mxu0  ;;  %v4241_v61 = vpop.f32.mrb[85].mxu1 }
 0x1a1   :  { %v2065_v30 = vadd.f32 %v2064_v23, %v1884_v60  ;;  %2533 = vst [vmem:[%s4590_s5 + $0x70] sm:$0xff] %v2914_v8  ;;  %v1800_v39 = vadd.f32 %v1799_v48, %v1474_v53  ;;  %v1886_v32 = vmul.f32 %v1474_v53, %v1474_v53  ;;  %v2915_v0 = vpack.c.bf16 %v1474_v53, %v1472_v13  ;;  %v4251_v48 = vpop.f32.mrb[86].mxu1 }
 0x1a2   :  { %v1732_v7 = vadd.f32 %v1731_v18, %v3479_v46  ;;  %v1997_v19 = vadd.f32 %v1996_v44, %v1885_v17  ;;  %v1888_v23 = vmul.f32 %v3486_v51, %v3486_v51  ;;  %v2958_v53 = vpack.c.bf16 %v4241_v61, %v4236_v4  ;;  %v4256_v13 = vpop.f32.mrb[87].mxu1 }
 0x1a3   :  { %v1801_v10 = vadd.f32 %v1800_v39, %v3486_v51  ;;  %v2066_v1 = vadd.f32 %v2065_v30, %v1886_v32  ;;  %2534 = vst [vmem:[%s4590_s5 + $0x78] sm:$0xff] %v2915_v0  ;;  %v1889_v46 = vmul.f32 %v3492_v54, %v3492_v54  ;;  %v1890_v51 = vmul.f32 %v3502_v59, %v3502_v59 }
 0x1a4   :  { %v1733_v60 = vadd.f32 %v1732_v7, %v3492_v54  ;;  %v1998_v8 = vadd.f32 %v1997_v19, %v1887_v12  ;;  %2577 = vst [vmem:[%s4590_s5 + $0x1d0] sm:$0xff] %v2958_v53  ;;  %v2959_v0 = vpack.c.bf16 %v4256_v13, %v4251_v48  ;;  %v1891_v18 = vmul.f32 %v3521_v16, %v3521_v16 }
 0x1a5   :  { %v1802_v30 = vadd.f32 %v1801_v10, %v3502_v59  ;;  %v2067_v44 = vadd.f32 %v2066_v1, %v1888_v23  ;;  %v1892_v39 = vmul.f32 %v3528_v21, %v3528_v21  ;;  %v1893_v12 = vmul.f32 %v3534_v24, %v3534_v24  ;;  %v4281_v1 = vpop.f32.mrb[88].mxu1 }
 0x1a6   :  { %v1734_v54 = vadd.f32 %v1733_v60, %v3521_v16  ;;  %v1999_v17 = vadd.f32 %v1998_v8, %v1889_v46  ;;  %2578 = vst [vmem:[%s4590_s5 + $0x1d8] sm:$0xff] %v2959_v0  ;;  %v1894_v16 = vmul.f32 %v3544_v29, %v3544_v29  ;;  %v4286_v60 = vpop.f32.mrb[89].mxu1 }
 0x1a7   :  { %v1803_v32 = vadd.f32 %v1802_v30, %v3528_v21  ;;  %v2068_v59 = vadd.f32 %v2067_v44, %v1890_v51  ;;  %v1895_v21 = vmul.f32 %v3563_v52, %v3563_v52  ;;  %v4293_v30 = vpop.f32.mrb[90].mxu1  ;;  %v1897_v44 = vmul.f32 %v3576_v62, %v3576_v62 }
 0x1a8   :  { %v1735_v7 = vadd.f32 %v1734_v54, %v3534_v24  ;;  %v2000_v19 = vadd.f32 %v1999_v17, %v1891_v18  ;;  %v1896_v24 = vmul.f32 %v3570_v58, %v3570_v58  ;;  %v4298_v18 = vpop.f32.mrb[91].mxu1  ;;  %v1898_v54 = vmul.f32 %v3586_v3, %v3586_v3 }
 0x1a9   :  { %v1804_v23 = vadd.f32 %v1803_v32, %v3544_v29  ;;  %v2069_v10 = vadd.f32 %v2068_v59, %v1892_v39  ;;  %v2960_v29 = vpack.c.bf16 %v4286_v60, %v4281_v1  ;;  %v2961_v39 = vpack.c.bf16 %v4298_v18, %v4293_v30 }
 0x1aa   :  { %v1736_v53 = vadd.f32 %v1735_v7, %v3563_v52  ;;  %v2001_v46 = vadd.f32 %v2000_v19, %v1893_v12  ;;  %v1899_v32 = vmul.f32 %v3605_v27, %v3605_v27  ;;  %v1900_v12 = vmul.f32 %v3612_v33, %v3612_v33 }
 0x1ab   :  { %v1805_v8 = vadd.f32 %v1804_v23, %v3570_v58  ;;  %v2070_v51 = vadd.f32 %v2069_v10, %v1894_v16  ;;  %2579 = vst [vmem:[%s4590_s5 + $0x1e0] sm:$0xff] %v2960_v29  ;;  %2580 = vst [vmem:[%s4590_s5 + $0x1e8] sm:$0xff] %v2961_v39  ;;  %v1901_v19 = vmul.f32 %v3618_v36, %v3618_v36 }
 0x1ac   :  { %v1737_v0 = vadd.f32 %v1736_v53, %v3576_v62  ;;  %v2002_v52 = vadd.f32 %v2001_v46, %v1895_v21  ;;  %v4323_v53 = vpop.f32.mrb[92].mxu1 }
 0x1ad   :  { %v1806_v17 = vadd.f32 %v1805_v8, %v3586_v3  ;;  %v2071_v58 = vadd.f32 %v2070_v51, %v1896_v24  ;;  %v4328_v8 = vpop.f32.mrb[93].mxu1 }
 0x1ae   :  { %v1738_v62 = vadd.f32 %v1737_v0, %v3605_v27  ;;  %v2003_v59 = vadd.f32 %v2002_v52, %v1897_v44  ;;  %v1902_v27 = vmul.f32 %v3628_v41, %v3628_v41  ;;  %v4335_v44 = vpop.f32.mrb[94].mxu1  ;;  %v1905_v0 = vmul.f32 %v3660_v14, %v3660_v14 }
 0x1af   :  { %v1807_v7 = vadd.f32 %v1806_v17, %v3612_v33  ;;  %v2072_v3 = vadd.f32 %v2071_v58, %v1898_v54  ;;  %v1903_v33 = vmul.f32 %v3647_v6, %v3647_v6  ;;  %v4340_v54 = vpop.f32.mrb[95].mxu1  ;;  %v1906_v17 = vmul.f32 %v3670_v20, %v3670_v20 }
 0x1b0   :  { %v1739_v16 = vadd.f32 %v1738_v62, %v3618_v36  ;;  %v2004_v23 = vadd.f32 %v2003_v59, %v1899_v32  ;;  %v1904_v36 = vmul.f32 %v3654_v11, %v3654_v11  ;;  %v2963_v39 = vpack.c.bf16 %v4340_v54, %v4335_v44 }
 0x1b1   :  { %v1808_v10 = vadd.f32 %v1807_v7, %v3628_v41  ;;  %v2073_v21 = vadd.f32 %v2072_v3, %v1900_v12  ;;  %v2962_v41 = vpack.c.bf16 %v4328_v8, %v4323_v53  ;;  %v1907_v32 = vmul.f32 %v3689_v49, %v3689_v49 }
 0x1b2   :  { %v1740_v46 = vadd.f32 %v1739_v16, %v3647_v6  ;;  %v2005_v24 = vadd.f32 %v2004_v23, %v1901_v19  ;;  %v1908_v59 = vmul.f32 %v3696_v57, %v3696_v57  ;;  %2582 = vst [vmem:[%s4590_s5 + $0x1f8] sm:$0xff] %v2963_v39  ;;  %v1909_v7 = vmul.f32 %v3702_v63, %v3702_v63 }
 0x1b3   :  { %v1809_v51 = vadd.f32 %v1808_v10, %v3654_v11  ;;  %v2074_v29 = vadd.f32 %v2073_v21, %v1902_v27  ;;  %2581 = vst [vmem:[%s4590_s5 + $0x1f0] sm:$0xff] %v2962_v41  ;;  %v1912_v21 = vmul.f32 %v3738_v43, %v3738_v43 }
 0x1b4   :  { %v1741_v52 = vadd.f32 %v1740_v46, %v3660_v14  ;;  %v2006_v6 = vadd.f32 %v2005_v24, %v1903_v33 }
 0x1b5   :  { %v1810_v58 = vadd.f32 %v1809_v51, %v3670_v20  ;;  %v2075_v11 = vadd.f32 %v2074_v29, %v1904_v36 }
 0x1b6   :  { %v1742_v14 = vadd.f32 %v1741_v52, %v3689_v49  ;;  %v2007_v62 = vadd.f32 %v2006_v6, %v1905_v0  ;;  %v1910_v49 = vmul.f32 %v3712_v5, %v3712_v5 }
 0x1b7   :  { %v1811_v12 = vadd.f32 %v1810_v58, %v3696_v57  ;;  %v2076_v20 = vadd.f32 %v2075_v11, %v1906_v17  ;;  %v1911_v57 = vmul.f32 %v3731_v37, %v3731_v37 }
 0x1b8   :  { %v1743_v3 = vadd.f32 %v1742_v14, %v3702_v63  ;;  %v2008_v19 = vadd.f32 %v2007_v62, %v1907_v32  ;;  %v1913_v63 = vmul.f32 %v3744_v47, %v3744_v47 }
 0x1b9   :  { %v1812_v16 = vadd.f32 %v1811_v12, %v3712_v5  ;;  %v2077_v23 = vadd.f32 %v2076_v20, %v1908_v59  ;;  %v1914_v5 = vmul.f32 %v3754_v56, %v3754_v56 }
 0x1ba   :  { %v2009_v27 = vadd.f32 %v2008_v19, %v1909_v7  ;;  %v1744_v10 = vadd.f32 %v1743_v3, %v3731_v37  ;;  %v1915_v37 = vmul.f32 %v3773_v28, %v3773_v28 }
 0x1bb   :  { %v2078_v33 = vadd.f32 %v2077_v23, %v1910_v49  ;;  %v1813_v46 = vadd.f32 %v1812_v16, %v3738_v43  ;;  %v1916_v43 = vmul.f32 %v3780_v35, %v3780_v35 }
 0x1bc   :  { %v1745_v24 = vadd.f32 %v1744_v10, %v3744_v47  ;;  %v2010_v36 = vadd.f32 %v2009_v27, %v1911_v57  ;;  %v1917_v47 = vmul.f32 %v3786_v40, %v3786_v40 }
 0x1bd   :  { %v1814_v51 = vadd.f32 %v1813_v46, %v3754_v56  ;;  %v2079_v29 = vadd.f32 %v2078_v33, %v1912_v21  ;;  %v1918_v56 = vmul.f32 %v3796_v50, %v3796_v50 }
 0x1be   :  { %v1746_v41 = vadd.f32 %v1745_v24, %v3773_v28  ;;  %v2011_v0 = vadd.f32 %v2010_v36, %v1913_v63  ;;  %v1919_v28 = vmul.f32 %v3815_v25, %v3815_v25 }
 0x1bf   :  { %v1815_v52 = vadd.f32 %v1814_v51, %v3780_v35  ;;  %v2080_v6 = vadd.f32 %v2079_v29, %v1914_v5  ;;  %v1920_v35 = vmul.f32 %v3822_v34, %v3822_v34  ;;  %v4717_v51 = vld [vmem:[#allocation6_spill] sm:$0xff] }
 0x1c0   :  { %v1747_v17 = vadd.f32 %v1746_v41, %v3786_v40  ;;  %v2012_v58 = vadd.f32 %v2011_v0, %v1915_v37  ;;  %v1921_v40 = vmul.f32 %v3828_v42, %v3828_v42  ;;  %v1928_v29 = vmul.f32 %v4717_v51, %v4717_v51  ;;  %v4718_v0 = vld [vmem:[#allocation7_spill] sm:$0xff] }
 0x1c1   :  { %v1816_v11 = vadd.f32 %v1815_v52, %v3796_v50  ;;  %v2081_v39 = vadd.f32 %v2080_v6, %v1916_v43  ;;  %v1922_v50 = vmul.f32 %v3838_v55, %v3838_v55  ;;  %v1929_v43 = vmul.f32 %v4718_v0, %v4718_v0 }
 0x1c2   :  { %v1748_v32 = vadd.f32 %v1747_v17, %v3815_v25  ;;  %v2013_v14 = vadd.f32 %v2012_v58, %v1917_v47  ;;  %v1923_v25 = vmul.f32 %v3857_v31, %v3857_v31  ;;  %v4719_v47 = vld [vmem:[#allocation8_spill] sm:$0xff] }
 0x1c3   :  { %v1817_v62 = vadd.f32 %v1816_v11, %v3822_v34  ;;  %v2082_v59 = vadd.f32 %v2081_v39, %v1918_v56  ;;  %v4713_v34 = vld [vmem:[#allocation2_spill] sm:$0xff]  ;;  %v1930_v17 = vmul.f32 %v4719_v47, %v4719_v47  ;;  %v4720_v11 = vld [vmem:[#allocation9_spill] sm:$0xff] }
 0x1c4   :  { %v1749_v12 = vadd.f32 %v1748_v32, %v3828_v42  ;;  %v2014_v20 = vadd.f32 %v2013_v14, %v1919_v28  ;;  %v1924_v16 = vmul.f32 %v4713_v34, %v4713_v34  ;;  %v4714_v42 = vld [vmem:[#allocation3_spill] sm:$0xff]  ;;  %v1931_v39 = vmul.f32 %v4720_v11, %v4720_v11  ;;  %v4721_v14 = vld [vmem:[#allocation10_spill] sm:$0xff] }
 0x1c5   :  { %v1818_v7 = vadd.f32 %v1817_v62, %v3838_v55  ;;  %v2083_v3 = vadd.f32 %v2082_v59, %v1920_v35  ;;  %v1925_v27 = vmul.f32 %v4714_v42, %v4714_v42  ;;  %v4715_v55 = vld [vmem:[#allocation4_spill] sm:$0xff]  ;;  %v1932_v35 = vmul.f32 %v4721_v14, %v4721_v14 }
 0x1c6   :  { %v1750_v19 = vadd.f32 %v1749_v12, %v3857_v31  ;;  %v2015_v49 = vadd.f32 %v2014_v20, %v1921_v40  ;;  %v1926_v33 = vmul.f32 %v4715_v55, %v4715_v55  ;;  %v4716_v31 = vld [vmem:[#allocation5_spill] sm:$0xff]  ;;  %v4722_v40 = vld [vmem:[#allocation11_spill] sm:$0xff] }
 0x1c7   :  { %v1819_v23 = vadd.f32 %v1818_v7, %v4713_v34  ;;  %v2084_v57 = vadd.f32 %v2083_v3, %v1922_v50  ;;  %v1927_v24 = vmul.f32 %v4716_v31, %v4716_v31  ;;  %v1933_v12 = vmul.f32 %v4722_v40, %v4722_v40  ;;  %v4723_v7 = vld [vmem:[#allocation12_spill] sm:$0xff] }
 0x1c8   :  { %v1751_v10 = vadd.f32 %v1750_v19, %v4714_v42  ;;  %v2016_v21 = vadd.f32 %v2015_v49, %v1923_v25  ;;  %v1934_v3 = vmul.f32 %v4723_v7, %v4723_v7  ;;  %v4724_v49 = vld [vmem:[#allocation13_spill] sm:$0xff] }
 0x1c9   :  { %v1820_v46 = vadd.f32 %v1819_v23, %v4715_v55  ;;  %v2085_v63 = vadd.f32 %v2084_v57, %v1924_v16  ;;  %v1935_v16 = vmul.f32 %v4724_v49, %v4724_v49  ;;  %v4725_v57 = vld [vmem:[#allocation14_spill] sm:$0xff]  ;;  %v4726_v55 = vld [vmem:[#allocation15_spill] sm:$0xff] }
 0x1ca   :  { %v1752_v36 = vadd.f32 %v1751_v10, %v4716_v31  ;;  %v2017_v5 = vadd.f32 %v2016_v21, %v1925_v27  ;;  %v1936_v27 = vmul.f32 %v4725_v57, %v4725_v57  ;;  %v4727_v31 = vld [vmem:[#allocation16_spill] sm:$0xff] }
 0x1cb   :  { %v1821_v37 = vadd.f32 %v1820_v46, %v4717_v51  ;;  %v2086_v41 = vadd.f32 %v2085_v63, %v1926_v33  ;;  %v1937_v46 = vmul.f32 %v4726_v55, %v4726_v55  ;;  %v4728_v51 = vld [vmem:[#allocation17_spill] sm:$0xff] }
 0x1cc   :  { %v1753_v52 = vadd.f32 %v1752_v36, %v4718_v0  ;;  %v2018_v6 = vadd.f32 %v2017_v5, %v1927_v24  ;;  %v1938_v36 = vmul.f32 %v4727_v31, %v4727_v31  ;;  %v4729_v0 = vld [vmem:[#allocation18_spill] sm:$0xff] }
 0x1cd   :  { %v1822_v58 = vadd.f32 %v1821_v37, %v4719_v47  ;;  %v2087_v56 = vadd.f32 %v2086_v41, %v1928_v29  ;;  %v1939_v37 = vmul.f32 %v4728_v51, %v4728_v51  ;;  %v4730_v47 = vld [vmem:[#allocation19_spill] sm:$0xff] }
 0x1ce   :  { %v1754_v28 = vadd.f32 %v1753_v52, %v4720_v11  ;;  %v2019_v32 = vadd.f32 %v2018_v6, %v1929_v43  ;;  %v1940_v52 = vmul.f32 %v4729_v0, %v4729_v0  ;;  %v4731_v11 = vld [vmem:[#allocation20_spill] sm:$0xff] }
 0x1cf   :  { %v1823_v62 = vadd.f32 %v1822_v58, %v4721_v14  ;;  %v2088_v59 = vadd.f32 %v2087_v56, %v1930_v17  ;;  %v1941_v58 = vmul.f32 %v4730_v47, %v4730_v47  ;;  %v4732_v14 = vld [vmem:[#allocation21_spill] sm:$0xff] }
 0x1d0   :  { %v1755_v20 = vadd.f32 %v1754_v28, %v4722_v40  ;;  %v2020_v50 = vadd.f32 %v2019_v32, %v1931_v39  ;;  %v1942_v28 = vmul.f32 %v4731_v11, %v4731_v11  ;;  %v4733_v40 = vld [vmem:[#allocation22_spill] sm:$0xff] }
 0x1d1   :  { %v1824_v25 = vadd.f32 %v1823_v62, %v4723_v7  ;;  %v2089_v19 = vadd.f32 %v2088_v59, %v1932_v35  ;;  %v1943_v62 = vmul.f32 %v4732_v14, %v4732_v14  ;;  %v4734_v7 = vld [vmem:[#allocation23_spill] sm:$0xff] }
 0x1d2   :  { %v1756_v34 = vadd.f32 %v1755_v20, %v4724_v49  ;;  %v2021_v23 = vadd.f32 %v2020_v50, %v1933_v12  ;;  %v1944_v20 = vmul.f32 %v4733_v40, %v4733_v40  ;;  %v4735_v49 = vld [vmem:[#allocation24_spill] sm:$0xff] }
 0x1d3   :  { %v1825_v42 = vadd.f32 %v1824_v25, %v4725_v57  ;;  %v2090_v10 = vadd.f32 %v2089_v19, %v1934_v3  ;;  %v1945_v25 = vmul.f32 %v4734_v7, %v4734_v7 }
 0x1d4   :  { %v2022_v21 = vadd.f32 %v2021_v23, %v1935_v16  ;;  %v1757_v33 = vadd.f32 %v1756_v34, %v4726_v55  ;;  %v1946_v16 = vmul.f32 %v4735_v49, %v4735_v49 }
 0x1d5   :  { %v2091_v63 = vadd.f32 %v2090_v10, %v1936_v27  ;;  %v1826_v24 = vadd.f32 %v1825_v42, %v4727_v31  ;;  %v1947_v42 = vmul.f32 %v4085_v45, %v4085_v45 }
 0x1d6   :  { %v2023_v5 = vadd.f32 %v2022_v21, %v1937_v46  ;;  %v1758_v29 = vadd.f32 %v1757_v33, %v4728_v51  ;;  %v1948_v21 = vmul.f32 %v4090_v22, %v4090_v22  ;;  %v1949_v46 = vmul.f32 %v4094_v38, %v4094_v38 }
 0x1d7   :  { %v2092_v41 = vadd.f32 %v2091_v63, %v1938_v36  ;;  %v1827_v43 = vadd.f32 %v1826_v24, %v4729_v0  ;;  %v1950_v24 = vmul.f32 %v4099_v9, %v4099_v9 }
 0x1d8   :  { %v2024_v6 = vadd.f32 %v2023_v5, %v1939_v37  ;;  %v1759_v17 = vadd.f32 %v1758_v29, %v4730_v47  ;;  %v1951_v5 = vmul.f32 %v4116_v2, %v4116_v2  ;;  %v1952_v29 = vmul.f32 %v4118_v26, %v4118_v26 }
 0x1d9   :  { %v2093_v56 = vadd.f32 %v2092_v41, %v1940_v52  ;;  %v1828_v39 = vadd.f32 %v1827_v43, %v4731_v11 }
 0x1da   :  { %v2025_v32 = vadd.f32 %v2024_v6, %v1941_v58  ;;  %v1760_v35 = vadd.f32 %v1759_v17, %v4732_v14 }
 0x1db   :  { %v2094_v59 = vadd.f32 %v2093_v56, %v1942_v28  ;;  %v1829_v12 = vadd.f32 %v1828_v39, %v4733_v40 }
 0x1dc   :  { %v2026_v50 = vadd.f32 %v2025_v32, %v1943_v62  ;;  %v1761_v3 = vadd.f32 %v1760_v35, %v4734_v7  ;;  %v4740_v32 = vld [vmem:[#allocation29_spill] sm:$0xff] }
 0x1dd   :  { %v2095_v19 = vadd.f32 %v2094_v59, %v1944_v20  ;;  %v1830_v34 = vadd.f32 %v1829_v12, %v4735_v49  ;;  %v1957_v35 = vmul.f32 %v4740_v32, %v4740_v32  ;;  %v4741_v59 = vld [vmem:[#allocation30_spill] sm:$0xff] }
 0x1de   :  { %v2027_v23 = vadd.f32 %v2026_v50, %v1945_v25  ;;  %v1762_v57 = vadd.f32 %v1761_v3, %v4085_v45  ;;  %v1958_v12 = vmul.f32 %v4741_v59, %v4741_v59  ;;  %v4742_v50 = vld [vmem:[#allocation31_spill] sm:$0xff] }
 0x1df   :  { %v2096_v27 = vadd.f32 %v2095_v19, %v1946_v16  ;;  %v1831_v10 = vadd.f32 %v1830_v34, %v4090_v22  ;;  %v1959_v3 = vmul.f32 %v4742_v50, %v4742_v50  ;;  %v4743_v19 = vld [vmem:[#allocation32_spill] sm:$0xff] }
 0x1e0   :  { %v2028_v55 = vadd.f32 %v2027_v23, %v1947_v42  ;;  %v1763_v33 = vadd.f32 %v1762_v57, %v4094_v38  ;;  %v4736_v38 = vld [vmem:[#allocation25_spill] sm:$0xff]  ;;  %v1960_v34 = vmul.f32 %v4743_v19, %v4743_v19 }
 0x1e1   :  { %v2097_v63 = vadd.f32 %v2096_v27, %v1948_v21  ;;  %v1832_v31 = vadd.f32 %v1831_v10, %v4099_v9  ;;  %v1953_v0 = vmul.f32 %v4736_v38, %v4736_v38  ;;  %v4737_v9 = vld [vmem:[#allocation26_spill] sm:$0xff]  ;;  %v4744_v23 = vld [vmem:[#allocation33_spill] sm:$0xff] }
 0x1e2   :  { %v2029_v36 = vadd.f32 %v2028_v55, %v1949_v46  ;;  %v1764_v45 = vadd.f32 %v1763_v33, %v4116_v2  ;;  %v1954_v6 = vmul.f32 %v4737_v9, %v4737_v9  ;;  %v4738_v2 = vld [vmem:[#allocation27_spill] sm:$0xff]  ;;  %v1961_v42 = vmul.f32 %v4744_v23, %v4744_v23  ;;  %v4745_v10 = vld [vmem:[#allocation34_spill] sm:$0xff] }
 0x1e3   :  { %v2098_v51 = vadd.f32 %v2097_v63, %v1950_v24  ;;  %v1833_v22 = vadd.f32 %v1832_v31, %v4118_v26  ;;  %v1955_v58 = vmul.f32 %v4738_v2, %v4738_v2  ;;  %v4739_v26 = vld [vmem:[#allocation28_spill] sm:$0xff]  ;;  %v1962_v55 = vmul.f32 %v4745_v10, %v4745_v10  ;;  %v4746_v46 = vld [vmem:[#allocation35_spill] sm:$0xff] }
 0x1e4   :  { %v2030_v37 = vadd.f32 %v2029_v36, %v1951_v5  ;;  %v1765_v41 = vadd.f32 %v1764_v45, %v4736_v38  ;;  %v1956_v39 = vmul.f32 %v4739_v26, %v4739_v26  ;;  %v1963_v31 = vmul.f32 %v4746_v46, %v4746_v46  ;;  %v4747_v36 = vld [vmem:[#allocation36_spill] sm:$0xff] }
 0x1e5   :  { %v2099_v43 = vadd.f32 %v2098_v51, %v1952_v29  ;;  %v1834_v52 = vadd.f32 %v1833_v22, %v4737_v9  ;;  %v1964_v5 = vmul.f32 %v4747_v36, %v4747_v36  ;;  %v4748_v22 = vld [vmem:[#allocation37_spill] sm:$0xff] }
 0x1e6   :  { %v2031_v47 = vadd.f32 %v2030_v37, %v1953_v0  ;;  %v1766_v17 = vadd.f32 %v1765_v41, %v4738_v2  ;;  %v1965_v37 = vmul.f32 %v4748_v22, %v4748_v22  ;;  %v4749_v41 = vld [vmem:[#allocation38_spill] sm:$0xff] }
 0x1e7   :  { %v2100_v56 = vadd.f32 %v2099_v43, %v1954_v6  ;;  %v1835_v11 = vadd.f32 %v1834_v52, %v4739_v26  ;;  %v1966_v43 = vmul.f32 %v4749_v41, %v4749_v41  ;;  %v4750_v52 = vld [vmem:[#allocation39_spill] sm:$0xff] }
 0x1e8   :  { %v2032_v28 = vadd.f32 %v2031_v47, %v1955_v58  ;;  %v1767_v14 = vadd.f32 %v1766_v17, %v4740_v32  ;;  %v1967_v47 = vmul.f32 %v4750_v52, %v4750_v52  ;;  %v4751_v17 = vld [vmem:[#allocation40_spill] sm:$0xff]  ;;  %v4752_v32 = vld [vmem:[#allocation41_spill] sm:$0xff] }
 0x1e9   :  { %v2101_v62 = vadd.f32 %v2100_v56, %v1956_v39  ;;  %v1836_v40 = vadd.f32 %v1835_v11, %v4741_v59  ;;  %v1968_v56 = vmul.f32 %v4751_v17, %v4751_v17  ;;  %v1969_v39 = vmul.f32 %v4221_v15, %v4221_v15 }
 0x1ea   :  { %v2033_v20 = vadd.f32 %v2032_v28, %v1957_v35  ;;  %v1768_v7 = vadd.f32 %v1767_v14, %v4742_v50  ;;  %v1970_v35 = vmul.f32 %v4752_v32, %v4752_v32  ;;  %v1972_v50 = vmul.f32 %v4241_v61, %v4241_v61 }
 0x1eb   :  { %v2102_v25 = vadd.f32 %v2101_v62, %v1958_v12  ;;  %v1837_v49 = vadd.f32 %v1836_v40, %v4743_v19  ;;  %v1971_v40 = vmul.f32 %v4236_v4, %v4236_v4 }
 0x1ec   :  { %v2034_v16 = vadd.f32 %v2033_v20, %v1959_v3  ;;  %v1769_v57 = vadd.f32 %v1768_v7, %v4744_v23  ;;  %v1973_v3 = vmul.f32 %v4251_v48, %v4251_v48 }
 0x1ed   :  { %v2103_v27 = vadd.f32 %v2102_v25, %v1960_v34  ;;  %v1838_v21 = vadd.f32 %v1837_v49, %v4745_v10  ;;  %v1974_v49 = vmul.f32 %v4256_v13, %v4256_v13 }
 0x1ee   :  { %v2035_v33 = vadd.f32 %v2034_v16, %v1961_v42  ;;  %v1770_v63 = vadd.f32 %v1769_v57, %v4746_v46  ;;  %v1975_v16 = vmul.f32 %v4281_v1, %v4281_v1  ;;  %v1976_v57 = vmul.f32 %v4286_v60, %v4286_v60 }
 0x1ef   :  { %v2104_v24 = vadd.f32 %v2103_v27, %v1962_v55  ;;  %v1839_v45 = vadd.f32 %v1838_v21, %v4747_v36  ;;  %v1977_v27 = vmul.f32 %v4293_v30, %v4293_v30  ;;  %v1980_v55 = vmul.f32 %v4328_v8, %v4328_v8 }
 0x1f0   :  { %v2036_v51 = vadd.f32 %v2035_v33, %v1963_v31  ;;  %v1771_v29 = vadd.f32 %v1770_v63, %v4748_v22 }
 0x1f1   :  { %v2105_v38 = vadd.f32 %v2104_v24, %v1964_v5  ;;  %v1840_v0 = vadd.f32 %v1839_v45, %v4749_v41  ;;  %v1981_v24 = vmul.f32 %v4335_v44, %v4335_v44 }
 0x1f2   :  { %v2037_v9 = vadd.f32 %v2036_v51, %v1965_v37  ;;  %v1772_v6 = vadd.f32 %v1771_v29, %v4750_v52 }
 0x1f3   :  { %v2106_v2 = vadd.f32 %v2105_v38, %v1966_v43  ;;  %v1841_v58 = vadd.f32 %v1840_v0, %v4751_v17 }
 0x1f4   :  { %v2038_v26 = vadd.f32 %v2037_v9, %v1967_v47  ;;  %v1773_v11 = vadd.f32 %v1772_v6, %v4221_v15 }
 0x1f5   :  { %v2107_v28 = vadd.f32 %v2106_v2, %v1968_v56  ;;  %v1842_v14 = vadd.f32 %v1841_v58, %v4752_v32 }
 0x1f6   :  { %v2039_v62 = vadd.f32 %v2038_v26, %v1969_v39  ;;  %v1774_v59 = vadd.f32 %v1773_v11, %v4236_v4 }
 0x1f7   :  { %v2108_v12 = vadd.f32 %v2107_v28, %v1970_v35  ;;  %v1843_v20 = vadd.f32 %v1842_v14, %v4241_v61 }
 0x1f8   :  { %v2040_v7 = vadd.f32 %v2039_v62, %v1971_v40  ;;  %v1775_v15 = vadd.f32 %v1774_v59, %v4251_v48 }
 0x1f9   :  { %v2109_v25 = vadd.f32 %v2108_v12, %v1972_v50  ;;  %v1844_v19 = vadd.f32 %v1843_v20, %v4256_v13  ;;  %v1979_v13 = vmul.f32 %v4323_v53, %v4323_v53 }
 0x1fa   :  { %v2041_v34 = vadd.f32 %v2040_v7, %v1973_v3  ;;  %v1776_v4 = vadd.f32 %v1775_v15, %v4281_v1  ;;  %v1978_v1 = vmul.f32 %v4298_v18, %v4298_v18 }
 0x1fb   :  { %v2110_v23 = vadd.f32 %v2109_v25, %v1974_v49  ;;  %v1845_v61 = vadd.f32 %v1844_v19, %v4286_v60 }
 0x1fc   :  { %v2042_v42 = vadd.f32 %v2041_v34, %v1975_v16  ;;  %v1777_v48 = vadd.f32 %v1776_v4, %v4293_v30 }
 0x1fd   :  { %v2111_v10 = vadd.f32 %v2110_v23, %v1976_v57  ;;  %v1846_v21 = vadd.f32 %v1845_v61, %v4298_v18  ;;  %v1982_v18 = vmul.f32 %v4340_v54, %v4340_v54 }
 0x1fe   :  { %v2043_v33 = vadd.f32 %v2042_v42, %v1977_v27  ;;  %v1778_v60 = vadd.f32 %v1777_v48, %v4323_v53 }
 0x1ff   :  { %v2112_v46 = vadd.f32 %v2111_v10, %v1978_v1  ;;  %v1847_v63 = vadd.f32 %v1846_v21, %v4328_v8 }
 0x200   :  { %v2044_v31 = vadd.f32 %v2043_v33, %v1979_v13  ;;  %v1779_v30 = vadd.f32 %v1778_v60, %v4335_v44 }
 0x201   :  { %v2113_v36 = vadd.f32 %v2112_v46, %v1980_v55  ;;  %v1848_v45 = vadd.f32 %v1847_v63, %v4340_v54 }
 0x202   :  { %v1780_v5 = vrot.slane %v1779_v30, 4  ;;  %v2045_v51 = vadd.f32 %v2044_v31, %v1981_v24 }
 0x203   :  { %v1849_v22 = vrot.slane %v1848_v45, 4  ;;  %v2114_v29 = vadd.f32 %v2113_v36, %v1982_v18 }
 0x204   :  { %v1781_v53 = vadd.f32 %v1780_v5, %v1779_v30  ;;  %v2046_v37 = vrot.slane %v2045_v51, 4 }
 0x205   :  { %v1850_v38 = vadd.f32 %v1849_v22, %v1848_v45  ;;  %v2115_v8 = vrot.slane %v2114_v29, 4 }
 0x206   :  { %v1782_v41 = vrot.slane %v1781_v53, 2  ;;  %v2047_v0 = vadd.f32 %v2046_v37, %v2045_v51 }
 0x207   :  { %v1851_v43 = vrot.slane %v1850_v38, 2  ;;  %v2116_v9 = vadd.f32 %v2115_v8, %v2114_v29 }
 0x208   :  { %v1783_v52 = vadd.f32 %v1782_v41, %v1781_v53  ;;  %v2048_v44 = vrot.slane %v2047_v0, 2 }
 0x209   :  { %v1852_v6 = vadd.f32 %v1851_v43, %v1850_v38  ;;  %v2117_v47 = vrot.slane %v2116_v9, 2 }
 0x20a   :  { %v1784_v2 = vrot.slane %v1783_v52, 1  ;;  %v2049_v17 = vadd.f32 %v2048_v44, %v2047_v0 }
 0x20b   :  { %v1853_v58 = vrot.slane %v1852_v6, 1  ;;  %v2118_v54 = vadd.f32 %v2117_v47, %v2116_v9 }
 0x20c   :  { %v2050_v56 = vrot.slane %v2049_v17, 1  ;;  %v1785_v11 = vadd.f32 %v1784_v2, %v1783_v52 }
 0x20d   :  { %v2119_v26 = vrot.slane %v2118_v54, 1  ;;  %v1854_v28 = vadd.f32 %v1853_v58, %v1852_v6 }
 0x20e   :  { %v2051_v39 = vadd.f32 %v2050_v56, %v2049_v17 }
 0x20f   :  { %v2120_v32 = vadd.f32 %v2119_v26, %v2118_v54 }
 0x210   :  { %v2121_v14 = vsel %vm991_vm2, %v1785_v11, %v2051_v39 }
 0x211   :  { %v2122_v35 = vsel %vm991_vm2, %v1854_v28, %v2120_v32 }
 0x212   :  { %v2125_v62 = vcombine.low %v2121_v14, %v2122_v35 }
 0x214   :  { %2771 = vst.sshfl [vmem:[%s4592_s6] sm:$0x33 pattern:$0x76325410] %v2125_v62 }

// kernel: bottleneck_forward.5
= control target key start
LH: loop header
LB: loop body
LE: loop exit
PB: predicated region body
PF: predicated region fallthrough
CT: control target
= control target key end

     0   :  { %s5874_s18 = smov 0   ;;  %s7498_s0 = inlined_call_operand.vmem [shape: bf16[512,64], index: 0, kind: input, shape index: {}]   ;;  %s7499_s1 = inlined_call_operand.vmem [shape: f32[1,64], index: 1, kind: input, shape index: {}]   ;;  %s7500_s2 = inlined_call_operand.vmem [shape: f32[1,64], index: 2, kind: input, shape index: {}]   ;;  %s7501_s3 = inlined_call_operand.vmem [shape: bf16[3,192,64], index: 3, kind: input, shape index: {}]   ;;  %s7502_s4 = inlined_call_operand.vmem [shape: bf16[512,64], index: 4, kind: output, shape index: {0}]   ;;  %s7503_s5 = inlined_call_operand.vmem [shape: f32[2,2,64], index: 5, kind: output, shape index: {1}]  }
   0x1 LB: > { %s5880_s19 = sadd.s32 4294967295, %s5839_s18   ;;  %p5045_p0 = scmp.ge.s32.totalorder %s5839_s18, 1  ;;  %s5839_s18 = sphi %s5874_s18, %s16_s18  }
   0x2   : > { %p191_p1 = scmp.lt.s32.totalorder %s5839_s18, 3 }
   0x4   : > { %p192_p2 = pnand %p5045_p0, %p191_p1 }
   0x5   : > { %s5046_s20 = sshll.u32 (!%p192_p2), %s5880_s19, 5  ;;  %vm791_vm0 = vcmask (!%p192_p2), 519168   ;;  %vm794_vm1 = vcmask (!%p192_p2), 516096   ;;  %v5841_v0 = vmov (!%p192_p2), 0.0|0.0   ;;  %v5891_v3 = vld [vmem:[%s7499_s1] ss:$0 sm:$0xff] (!%p192_p2) }
   0x6   : > { %195 = sbr.rel (%p192_p2) target bundleno = 712 (0x2c8), region = 36  ;;  %p224_p3 = scmp.lt.s32.totalorder (!%p192_p2), %s5046_s20, 63  ;;  %v5053_v1 = vcombine.low (!%p192_p2), %v5841_v0, %v5841_v0  ;;  %v5054_v2 = vcombine.high (!%p192_p2), %v5841_v0, %v5841_v0  ;;  %vm446_vm2 = vcmask (!%p192_p2), 1040384   ;;  %v5913_v12 = vld [vmem:[%s7500_s2] ss:$0 sm:$0xff] (!%p192_p2)  ;;  %vm1346_vm6 = vcmask (!%p192_p2), 1042432  }
   0x7   : > { %vm895_vm3 = vsmask.f32 (!%p192_p2), 3328  ;;  %vm896_vm4 = vsmask.f32 (!%p192_p2), 7440  ;;  %s5842_s29 = smov (!%p192_p2), 64   ;;  %vm1347_vm7 = vcmask (!%p192_p2), 1046532  }
   0x8   : > { %792 = vst.msk [vmem:[#allocation2] sm:$0xf] (!%p192_p2), %vm791_vm0, %v5053_v1  ;;  %793 = vst.msk [vmem:[#allocation2 + $0x4] sm:$0xf] (!%p192_p2), %vm791_vm0, %v5054_v2  ;;  %vm1653_vm9 = vcmask (!%p192_p2), 523264   ;;  %p235_p4 = scmp.lt.s32.totalorder (!%p192_p2), %s5880_s19, 1 }
   0x9   : > { %795 = vst.msk [vmem:[#allocation2 + $0x8] sm:$0x1] (!%p192_p2), %vm794_vm1, %v5053_v1  ;;  %846 = vst.msk [vmem:[#allocation2 + $0xd4] sm:$0x1] (!%p192_p2), %vm794_vm1, %v5053_v1  ;;  %vm4792_vm10 = vcmask (!%p192_p2), 517120  }
   0xa   : > { %844 = vst.msk [vmem:[#allocation2 + $0xcc] sm:$0xf] (!%p192_p2), %vm791_vm0, %v5053_v1  ;;  %845 = vst.msk [vmem:[#allocation2 + $0xd0] sm:$0xf] (!%p192_p2), %vm791_vm0, %v5054_v2 }
   0xb   : > { %vm5934_vm5 = vmor (!%p192_p2), %vm895_vm3, %vm896_vm4 }
   0xc   : > { %vm6347_vm8 = vmor (!%p192_p2), %vm1346_vm6, %vm1347_vm7 }
   0xd   : > { %s7510_s20 = smov (!%p224_p3, %s5046_s20), 63  ;;  %s7512_s19 = smov (!%p235_p4, %s5880_s19), 1 }
   0xe   : > { %s5047_s21 = sshll.u32 %s7510_s20, 2  ;;  %s5050_s20 = sshll.u32 %s7512_s19, 1 }
   0xf   : > { %s5904_s26 = scalar_lea.vmem %s7498_s0, %s5047_s21  ;;  %v847_v27 = vld [vmem:[#allocation2] sm:$0xf]  ;;  %v848_v28 = vld [vmem:[#allocation2 + $0x4] sm:$0xf]  ;;  %s7170_s9 = scalar_lea.vmem %s7502_s4, %s5047_s21 }
  0x10   : > { %v5611_v4 = vld [vmem:[%s5904_s26 + $0x38] sm:$0xff]   ;;  %v5612_v5 = vld [vmem:[%s5904_s26 + $0x40] sm:$0xff]   ;;  %v5613_v11 = vld [vmem:[%s5904_s26 + $0x48] sm:$0xff]   ;;  %v899_v32 = vshrl.u32 %v847_v27, 16  ;;  %v902_v33 = vshll.u32 %v847_v27, 16  ;;  %v908_v34 = vshll.u32 %v848_v28, 16  ;;  %s238_s11 = scalar_lea.vmem %s7503_s5, %s5050_s20 }
  0x11   : > { %v5542_v6 = vld [vmem:[%s5904_s26] sm:$0xff]   ;;  %v5571_v7 = vunpack.c.l.bf16 %v5611_v4  ;;  %v5572_v8 = vunpack.c.h.bf16 %v5611_v4  ;;  %v5575_v9 = vunpack.c.l.bf16 %v5612_v5  ;;  %v5576_v10 = vunpack.c.h.bf16 %v5612_v5  ;;  %v879_v29 = vld [vmem:[#allocation2 + $0x8] sm:$0x1]  ;;  %v5614_v2 = vld [vmem:[%s5904_s26 + $0x50] sm:$0xff]  }
  0x12   : > { %v5543_v13 = vunpack.c.l.bf16 %v5542_v6  ;;  %v5544_v14 = vunpack.c.h.bf16 %v5542_v6  ;;  %v5579_v15 = vunpack.c.l.bf16 %v5613_v11  ;;  %v5580_v16 = vunpack.c.h.bf16 %v5613_v11  ;;  %v5605_v60 = vld [vmem:[%s5904_s26 + $0x8] sm:$0xff]  }
  0x13   : > { %v325_v17 = vmul.f32 %v5571_v7, %v5891_v3  ;;  %v326_v18 = vmul.f32 %v5572_v8, %v5891_v3  ;;  %v327_v19 = vmul.f32 %v5575_v9, %v5891_v3  ;;  %v328_v20 = vmul.f32 %v5576_v10, %v5891_v3 }
  0x14   : > { %v311_v21 = vmul.f32 %v5543_v13, %v5891_v3  ;;  %v312_v22 = vmul.f32 %v5544_v14, %v5891_v3  ;;  %v329_v23 = vmul.f32 %v5579_v15, %v5891_v3  ;;  %v330_v24 = vmul.f32 %v5580_v16, %v5891_v3 }
  0x15   : > { %v364_v25 = vadd.f32 %v5913_v12, %v325_v17  ;;  %v365_v26 = vadd.f32 %v5913_v12, %v326_v18  ;;  %v366_v30 = vadd.f32 %v5913_v12, %v327_v19  ;;  %v367_v31 = vadd.f32 %v5913_v12, %v328_v20 }
  0x16   : > { %v912_v35 = vshrl.u32 %v848_v28, 16  ;;  %v918_v38 = vshll.u32 %v879_v29, 16  ;;  %v901_v40 = vrot.slane %v899_v32, 4  ;;  %v904_v41 = vrot.slane %v902_v33, 5  ;;  %v5961_v28 = vld [vmem:[%s5904_s26 + $0x10] sm:$0xff]  }
  0x17   : > { %v396_v36 = vmax.f32 %v364_v25, 0.0  ;;  %v397_v37 = vmax.f32 %v365_v26, 0.0  ;;  %v398_v39 = vmax.f32 %v366_v30, 0.0  ;;  %v910_v42 = vrot.slane %v908_v34, 5 }
  0x18   : > { %v914_v43 = vrot.slane %v912_v35, 4  ;;  %v920_v46 = vrot.slane %v918_v38, 5  ;;  %v399_v47 = vmax.f32 %v367_v31, 0.0  ;;  %v905_v48 = vor.u32 %v904_v41, %v901_v40 }
  0x19   : > { %v468_v44 = vrot.slane %v396_v36, 7  ;;  %v469_v45 = vrot.slane %v397_v37, 7  ;;  %v471_v50 = vrot.slane %v398_v39, 7  ;;  %v350_v51 = vadd.f32 %v5913_v12, %v311_v21 }
  0x1a   : > { %v915_v49 = vor.u32 %v914_v43, %v910_v42  ;;  %v472_v55 = vrot.slane %v399_v47, 7  ;;  %v906_v59 = vrot.slane %v905_v48, 4  ;;  %v351_v9 = vadd.f32 %v5913_v12, %v312_v22 }
  0x1b   : > { %v470_v52 = vsel %vm446_vm2, %v468_v44, %v469_v45  ;;  %v550_v53 = vsel %vm446_vm2, 0.0, %v468_v44  ;;  %v566_v54 = vsel %vm446_vm2, %v469_v45, 0.0  ;;  %v551_v0 = vsel %vm446_vm2, 0.0, %v471_v50 }
  0x1c   : > { %v5482_v56 = vpack.c.bf16 %v550_v53, %v550_v53  ;;  %v5483_v57 = vpack.c.bf16 %v470_v52, %v470_v52  ;;  %v5484_v58 = vpack.c.bf16 %v566_v54, %v566_v54  ;;  %v916_v62 = vrot.slane %v915_v49, 4 }
  0x1d   : > { %v473_v63 = vsel %vm446_vm2, %v471_v50, %v472_v55  ;;  %v567_v1 = vsel %vm446_vm2, %v472_v55, 0.0  ;;  %v911_v4 = vsel %vm5934_vm5, %v906_v59, %v910_v42  ;;  %v5485_v5 = vpack.c.bf16 %v551_v0, %v551_v0 }
  0x1e   : > { %817 = vst.msk [vmem:[#allocation2 + $0x60] sm:$0xf] %vm791_vm0, %v5482_v56  ;;  %818 = vst.msk [vmem:[#allocation2 + $0x64] sm:$0xf] %vm791_vm0, %v5483_v57  ;;  %v5486_v6 = vpack.c.bf16 %v473_v63, %v473_v63  ;;  %v5487_v7 = vpack.c.bf16 %v567_v1, %v567_v1  ;;  %v921_v8 = vsel %vm5934_vm5, %v916_v62, %v920_v46  ;;  %v382_v10 = vmax.f32 %v350_v51, 0.0 }
  0x1f   : > { %819 = vst.msk [vmem:[#allocation2 + $0x68] sm:$0x1] %vm794_vm1, %v5484_v58  ;;  %v368_v11 = vadd.f32 %v5913_v12, %v329_v23  ;;  %v5135_v13 = vcombine.low %v911_v4, %v921_v8  ;;  %v369_v14 = vadd.f32 %v5913_v12, %v330_v24  ;;  %v5547_v15 = vunpack.c.l.bf16 %v5605_v60 }
  0x20   : > { %820 = vst.msk [vmem:[#allocation2 + $0x6c] sm:$0xf] %vm791_vm0, %v5485_v5  ;;  %821 = vst.msk [vmem:[#allocation2 + $0x70] sm:$0xf] %vm791_vm0, %v5486_v6  ;;  %v5548_v16 = vunpack.c.h.bf16 %v5605_v60  ;;  %v383_v17 = vmax.f32 %v351_v9, 0.0  ;;  %v447_v18 = vrot.slane %v382_v10, 7  ;;  %v5583_v20 = vunpack.c.l.bf16 %v5614_v2 }
  0x21   : > { %822 = vst.msk [vmem:[#allocation2 + $0x74] sm:$0x1] %vm794_vm1, %v5487_v7  ;;  %v400_v19 = vmax.f32 %v368_v11, 0.0  ;;  %1573 = vrot.lane.b32.xlu1 %v5135_v13, %s5842_s29  ;;  %v401_v21 = vmax.f32 %v369_v14, 0.0  ;;  %v313_v22 = vmul.f32 %v5547_v15, %v5891_v3  ;;  %v5584_v25 = vunpack.c.h.bf16 %v5614_v2 }
  0x22   : > { %v314_v23 = vmul.f32 %v5548_v16, %v5891_v3  ;;  %v448_v26 = vrot.slane %v383_v17, 7  ;;  %v543_v27 = vsel %vm446_vm2, 0.0, %v447_v18  ;;  %v331_v24 = vmul.f32 %v5583_v20, %v5891_v3 }
  0x23   : > { %v5461_v29 = vpack.c.bf16 %v543_v27, %v543_v27  ;;  %v474_v30 = vrot.slane %v400_v19, 7  ;;  %v475_v31 = vrot.slane %v401_v21, 7  ;;  %v5964_v32 = vadd.f32 %v5913_v12, %v313_v22 }
  0x24   : > { %v449_v36 = vsel %vm446_vm2, %v447_v18, %v448_v26  ;;  %v5968_v37 = vadd.f32 %v5913_v12, %v314_v23  ;;  %v5971_v38 = vmul.f32 %v5584_v25, %v5891_v3  ;;  %v5974_v39 = vadd.f32 %v5913_v12, %v331_v24 }
  0x25   : > { %v863_v33 = vld [vmem:[#allocation2 + $0x60] sm:$0xf]  ;;  %v864_v34 = vld [vmem:[#allocation2 + $0x64] sm:$0xf]  ;;  %796 = vst.msk [vmem:[#allocation2 + $0xc] sm:$0xf] %vm791_vm0, %v5461_v29  ;;  %v5462_v48 = vpack.c.bf16 %v449_v36, %v449_v36  ;;  %v5551_v49 = vunpack.c.l.bf16 %v5961_v28  ;;  %v476_v4 = vsel %vm446_vm2, %v474_v30, %v475_v31 }
  0x26   : > { %v887_v35 = vld [vmem:[#allocation2 + $0x68] sm:$0x1]  ;;  %v1091_v40 = vshrl.u32 %v863_v33, 16  ;;  %v1094_v41 = vshll.u32 %v863_v33, 16  ;;  %v1100_v42 = vshll.u32 %v864_v34, 16  ;;  %v1104_v43 = vshrl.u32 %v864_v34, 16 }
  0x27   : > { %v1110_v44 = vshll.u32 %v887_v35, 16  ;;  %v865_v45 = vld [vmem:[#allocation2 + $0x6c] sm:$0xf]  ;;  %v866_v46 = vld [vmem:[#allocation2 + $0x70] sm:$0xf]  ;;  %v559_v47 = vsel %vm446_vm2, %v448_v26, 0.0  ;;  %v5489_v27 = vpack.c.bf16 %v476_v4, %v476_v4 }
  0x28   : > { %v1093_v50 = vrot.slane %v1091_v40, 4  ;;  %v1096_v51 = vrot.slane %v1094_v41, 5  ;;  %v1102_v52 = vrot.slane %v1100_v42, 5  ;;  %v1106_v53 = vrot.slane %v1104_v43, 4  ;;  %v888_v54 = vld [vmem:[#allocation2 + $0x74] sm:$0x1] }
  0x29   : > { %v1112_v55 = vrot.slane %v1110_v44, 5  ;;  %v1115_v56 = vshrl.u32 %v865_v45, 16  ;;  %v1118_v57 = vshll.u32 %v865_v45, 16  ;;  %v1124_v58 = vshll.u32 %v866_v46, 16  ;;  %797 = vst.msk [vmem:[#allocation2 + $0x10] sm:$0xf] %vm791_vm0, %v5462_v48 }
  0x2a   : > { %v1097_v59 = vor.u32 %v1096_v51, %v1093_v50  ;;  %v1107_v60 = vor.u32 %v1106_v53, %v1102_v52  ;;  %v1128_v62 = vshrl.u32 %v866_v46, 16  ;;  %v1134_v63 = vshll.u32 %v888_v54, 16  ;;  %824 = vst.msk [vmem:[#allocation2 + $0x7c] sm:$0xf] %vm791_vm0, %v5489_v27  ;;  %v6024_v27 = vld [vmem:[%s5904_s26 + $0x18] sm:$0xff]  }
  0x2b   : > { %v1117_v0 = vrot.slane %v1115_v56, 4  ;;  %v1120_v1 = vrot.slane %v1118_v57, 5  ;;  %v1126_v2 = vrot.slane %v1124_v58, 5  ;;  %v5463_v10 = vpack.c.bf16 %v559_v47, %v559_v47 }
  0x2c   : > { %v1098_v5 = vrot.slane %v1097_v59, 4  ;;  %v1108_v6 = vrot.slane %v1107_v60, 4  ;;  %v1130_v7 = vrot.slane %v1128_v62, 4  ;;  %v1136_v8 = vrot.slane %v1134_v63, 5  ;;  %v849_v11 = vld [vmem:[#allocation2 + $0xc] sm:$0xf] }
  0x2d   : > { %v1121_v9 = vor.u32 %v1120_v1, %v1117_v0  ;;  %v552_v13 = vsel %vm446_vm2, 0.0, %v474_v30  ;;  %v568_v14 = vsel %vm446_vm2, %v475_v31, 0.0  ;;  %v923_v18 = vshrl.u32 %v849_v11, 16  ;;  %798 = vst.msk [vmem:[#allocation2 + $0x14] sm:$0x1] %vm794_vm1, %v5463_v10 }
  0x2e   : > { %v1103_v15 = vsel %vm5934_vm5, %v1098_v5, %v1102_v52  ;;  %v1113_v16 = vsel %vm5934_vm5, %v1108_v6, %v1112_v55  ;;  %v1131_v17 = vor.u32 %v1130_v7, %v1126_v2  ;;  %v926_v21 = vshll.u32 %v849_v11, 16 }
  0x2f   : > { %v5143_v19 = vcombine.low %v1103_v15, %v1113_v16  ;;  %v1122_v20 = vrot.slane %v1121_v9, 4  ;;  %v5488_v22 = vpack.c.bf16 %v552_v13, %v552_v13  ;;  %v925_v26 = vrot.slane %v923_v18, 4 }
  0x30   : > { %v1132_v23 = vrot.slane %v1131_v17, 4  ;;  %v850_v25 = vld [vmem:[#allocation2 + $0x10] sm:$0xf]  ;;  %v5490_v24 = vpack.c.bf16 %v568_v14, %v568_v14  ;;  %v928_v30 = vrot.slane %v926_v21, 5  ;;  %v384_v35 = vmax.f32 %v5964_v32, 0.0  ;;  %v5615_v17 = vld [vmem:[%s5904_s26 + $0x58] sm:$0xff]  }
  0x31   : > { %1589 = vrot.lane.b32.xlu0 %v5143_v19, %s5842_s29  ;;  %v1127_v29 = vsel %vm5934_vm5, %v1122_v20, %v1126_v2  ;;  %v932_v31 = vshll.u32 %v850_v25, 16  ;;  %v936_v33 = vshrl.u32 %v850_v25, 16  ;;  %823 = vst.msk [vmem:[#allocation2 + $0x78] sm:$0xf] %vm791_vm0, %v5488_v22  ;;  %v385_v36 = vmax.f32 %v5968_v37, 0.0 }
  0x32   : > { %v1137_v34 = vsel %vm5934_vm5, %v1132_v23, %v1136_v8  ;;  %825 = vst.msk [vmem:[#allocation2 + $0x80] sm:$0x1] %vm794_vm1, %v5490_v24  ;;  %v371_v40 = vadd.f32 %v5913_v12, %v5971_v38  ;;  %v929_v42 = vor.u32 %v928_v30, %v925_v26  ;;  %v450_v45 = vrot.slane %v384_v35, 7  ;;  %v868_v1 = vld [vmem:[#allocation2 + $0x7c] sm:$0xf] }
  0x33   : > { %v5144_v41 = vcombine.low %v1127_v29, %v1137_v34  ;;  %v934_v43 = vrot.slane %v932_v31, 5  ;;  %v938_v44 = vrot.slane %v936_v33, 4  ;;  %v451_v46 = vrot.slane %v385_v36, 7  ;;  %v6028_v31 = vld [vmem:[%s5904_s26 + $0x60] sm:$0xff]  }
  0x34   : > { %v402_v47 = vmax.f32 %v5974_v39, 0.0  ;;  %v403_v48 = vmax.f32 %v371_v40, 0.0  ;;  %v930_v50 = vrot.slane %v929_v42, 4  ;;  %v5552_v32 = vunpack.c.h.bf16 %v5961_v28  ;;  %v880_v52 = vld [vmem:[#allocation2 + $0x14] sm:$0x1] }
  0x35   : > { %1591 = vrot.lane.b32.xlu0 %v5144_v41, %s5842_s29  ;;  %v939_v51 = vor.u32 %v938_v44, %v934_v43  ;;  %v452_v37 = vsel %vm446_vm2, %v450_v45, %v451_v46  ;;  %v544_v38 = vsel %vm446_vm2, 0.0, %v450_v45  ;;  %v560_v53 = vsel %vm446_vm2, %v451_v46, 0.0 }
  0x36   : > { %v942_v55 = vshll.u32 %v880_v52, 16  ;;  %v477_v56 = vrot.slane %v402_v47, 7  ;;  %v315_v39 = vmul.f32 %v5551_v49, %v5891_v3  ;;  %v5464_v58 = vpack.c.bf16 %v544_v38, %v544_v38 }
  0x37   : > { %v940_v54 = vrot.slane %v939_v51, 4  ;;  %v5465_v59 = vpack.c.bf16 %v452_v37, %v452_v37  ;;  %v5466_v60 = vpack.c.bf16 %v560_v53, %v560_v53  ;;  %v478_v62 = vrot.slane %v403_v48, 7 }
  0x38   : > { %v867_v57 = vld [vmem:[#allocation2 + $0x78] sm:$0xf]  ;;  %v935_v63 = vsel %vm5934_vm5, %v930_v50, %v934_v43  ;;  %v944_v0 = vrot.slane %v942_v55, 5  ;;  %v316_v5 = vmul.f32 %v5552_v32, %v5891_v3  ;;  %v1148_v7 = vshll.u32 %v868_v1, 16  ;;  %799 = vst.msk [vmem:[#allocation2 + $0x18] sm:$0xf] %vm791_vm0, %v5464_v58 }
  0x39   : > { %v889_v2 = vld [vmem:[#allocation2 + $0x80] sm:$0x1]  ;;  %v1139_v4 = vshrl.u32 %v867_v57, 16  ;;  %v1142_v6 = vshll.u32 %v867_v57, 16  ;;  %v1152_v8 = vshrl.u32 %v868_v1, 16  ;;  %v479_v10 = vsel %vm446_vm2, %v477_v56, %v478_v62 }
  0x3a   : > { %v1158_v28 = vshll.u32 %v889_v2, 16  ;;  %800 = vst.msk [vmem:[#allocation2 + $0x1c] sm:$0xf] %vm791_vm0, %v5465_v59  ;;  %v945_v49 = vsel %vm5934_vm5, %v940_v54, %v944_v0  ;;  %v354_v11 = vadd.f32 %v5913_v12, %v315_v39  ;;  %v1150_v15 = vrot.slane %v1148_v7, 5 }
  0x3b   : > { %801 = vst.msk [vmem:[#allocation2 + $0x20] sm:$0x1] %vm794_vm1, %v5466_v60  ;;  %v1141_v9 = vrot.slane %v1139_v4, 4  ;;  %v5136_v13 = vcombine.low %v935_v63, %v945_v49  ;;  %v1144_v14 = vrot.slane %v1142_v6, 5  ;;  %v1154_v16 = vrot.slane %v1152_v8, 4 }
  0x3c   : > { %v1160_v18 = vrot.slane %v1158_v28, 5  ;;  %v553_v19 = vsel %vm446_vm2, 0.0, %v477_v56  ;;  %v569_v20 = vsel %vm446_vm2, %v478_v62, 0.0  ;;  %v5492_v21 = vpack.c.bf16 %v479_v10, %v479_v10 }
  0x3d   : > { %1575 = vrot.lane.b32.xlu0 %v5136_v13, %s5842_s29  ;;  %v1145_v22 = vor.u32 %v1144_v14, %v1141_v9  ;;  %v1155_v23 = vor.u32 %v1154_v16, %v1150_v15  ;;  %v5491_v25 = vpack.c.bf16 %v553_v19, %v553_v19  ;;  %v5493_v26 = vpack.c.bf16 %v569_v20, %v569_v20 }
  0x3e   : > { %827 = vst.msk [vmem:[#allocation2 + $0x88] sm:$0xf] %vm791_vm0, %v5492_v21  ;;  %v386_v24 = vmax.f32 %v354_v11, 0.0  ;;  %v5587_v29 = vunpack.c.l.bf16 %v5615_v17  ;;  %v5588_v30 = vunpack.c.h.bf16 %v5615_v17  ;;  %v355_v35 = vadd.f32 %v5913_v12, %v316_v5 }
  0x3f   : > { %v1146_v33 = vrot.slane %v1145_v22, 4  ;;  %v1156_v34 = vrot.slane %v1155_v23, 4  ;;  %826 = vst.msk [vmem:[#allocation2 + $0x84] sm:$0xf] %vm791_vm0, %v5491_v25  ;;  %v851_v36 = vld [vmem:[#allocation2 + $0x18] sm:$0xf]  ;;  %v5555_v44 = vunpack.c.l.bf16 %v6024_v27  ;;  %v5556_v45 = vunpack.c.h.bf16 %v6024_v27 }
  0x40   : > { %828 = vst.msk [vmem:[#allocation2 + $0x8c] sm:$0x1] %vm794_vm1, %v5493_v26  ;;  %v333_v42 = vmul.f32 %v5587_v29, %v5891_v3  ;;  %v334_v43 = vmul.f32 %v5588_v30, %v5891_v3  ;;  %v947_v48 = vshrl.u32 %v851_v36, 16  ;;  %v950_v50 = vshll.u32 %v851_v36, 16 }
  0x41   : > { %v852_v40 = vld [vmem:[#allocation2 + $0x1c] sm:$0xf]  ;;  %v1151_v46 = vsel %vm5934_vm5, %v1146_v33, %v1150_v15  ;;  %v1161_v47 = vsel %vm5934_vm5, %v1156_v34, %v1160_v18  ;;  %v387_v54 = vmax.f32 %v355_v35, 0.0  ;;  %v5591_v55 = vunpack.c.l.bf16 %v6028_v31 }
  0x42   : > { %v881_v41 = vld [vmem:[#allocation2 + $0x20] sm:$0x1]  ;;  %v5145_v51 = vcombine.low %v1151_v46, %v1161_v47  ;;  %v956_v32 = vshll.u32 %v852_v40, 16  ;;  %v960_v52 = vshrl.u32 %v852_v40, 16  ;;  %v949_v38 = vrot.slane %v947_v48, 4 }
  0x43   : > { %v966_v37 = vshll.u32 %v881_v41, 16  ;;  %v952_v53 = vrot.slane %v950_v50, 5  ;;  %v5592_v58 = vunpack.c.h.bf16 %v6028_v31  ;;  %v453_v62 = vrot.slane %v386_v24, 7 }
  0x44   : > { %1593 = vrot.lane.b32.xlu1 %v5145_v51, %s5842_s29  ;;  %v958_v56 = vrot.slane %v956_v32, 5  ;;  %v962_v39 = vrot.slane %v960_v52, 4  ;;  %v454_v63 = vrot.slane %v387_v54, 7  ;;  %v372_v0 = vadd.f32 %v5913_v12, %v333_v42  ;;  %v5608_v54 = vld [vmem:[%s5904_s26 + $0x20] sm:$0xff]  }
  0x45   : > { %v968_v57 = vrot.slane %v966_v37, 5  ;;  %v953_v59 = vor.u32 %v952_v53, %v949_v38  ;;  %v870_v60 = vld [vmem:[#allocation2 + $0x88] sm:$0xf]  ;;  %v373_v7 = vadd.f32 %v5913_v12, %v334_v43  ;;  %v317_v14 = vmul.f32 %v5555_v44, %v5891_v3 }
  0x46   : > { %v963_v1 = vor.u32 %v962_v39, %v958_v56  ;;  %v869_v2 = vld [vmem:[#allocation2 + $0x84] sm:$0xf]  ;;  %v1172_v5 = vshll.u32 %v870_v60, 16  ;;  %v1176_v6 = vshrl.u32 %v870_v60, 16  ;;  %v455_v21 = vsel %vm446_vm2, %v453_v62, %v454_v63  ;;  %v6076_v60 = vld [vmem:[%s5904_s26 + $0x68] sm:$0xff]  }
  0x47   : > { %v890_v4 = vld [vmem:[#allocation2 + $0x8c] sm:$0x1]  ;;  %v954_v8 = vrot.slane %v953_v59, 4  ;;  %v1163_v28 = vshrl.u32 %v869_v2, 16  ;;  %v1166_v49 = vshll.u32 %v869_v2, 16  ;;  %v545_v22 = vsel %vm446_vm2, 0.0, %v453_v62 }
  0x48   : > { %v1182_v9 = vshll.u32 %v890_v4, 16  ;;  %v964_v10 = vrot.slane %v963_v1, 4  ;;  %v1174_v11 = vrot.slane %v1172_v5, 5  ;;  %v1178_v13 = vrot.slane %v1176_v6, 4 }
  0x49   : > { %v959_v15 = vsel %vm5934_vm5, %v954_v8, %v958_v56  ;;  %v1165_v16 = vrot.slane %v1163_v28, 4  ;;  %v1168_v17 = vrot.slane %v1166_v49, 5  ;;  %v561_v26 = vsel %vm446_vm2, %v454_v63, 0.0 }
  0x4a   : > { %v1184_v18 = vrot.slane %v1182_v9, 5  ;;  %v969_v19 = vsel %vm5934_vm5, %v964_v10, %v968_v57  ;;  %v1179_v20 = vor.u32 %v1178_v13, %v1174_v11  ;;  %v5467_v27 = vpack.c.bf16 %v545_v22, %v545_v22 }
  0x4b   : > { %v5137_v23 = vcombine.low %v959_v15, %v969_v19  ;;  %v1169_v25 = vor.u32 %v1168_v17, %v1165_v16  ;;  %v5468_v29 = vpack.c.bf16 %v455_v21, %v455_v21  ;;  %v5469_v30 = vpack.c.bf16 %v561_v26, %v561_v26 }
  0x4c   : > { %v1180_v24 = vrot.slane %v1179_v20, 4  ;;  %v404_v31 = vmax.f32 %v372_v0, 0.0  ;;  %802 = vst.msk [vmem:[#allocation2 + $0x24] sm:$0xf] %vm791_vm0, %v5467_v27  ;;  %v405_v34 = vmax.f32 %v373_v7, 0.0  ;;  %v318_v35 = vmul.f32 %v5556_v45, %v5891_v3 }
  0x4d   : > { %1577 = vrot.lane.b32.xlu0 %v5137_v23, %s5842_s29  ;;  %v1170_v33 = vrot.slane %v1169_v25, 4  ;;  %v356_v36 = vadd.f32 %v5913_v12, %v317_v14  ;;  %803 = vst.msk [vmem:[#allocation2 + $0x28] sm:$0xf] %vm791_vm0, %v5468_v29  ;;  %v335_v42 = vmul.f32 %v5591_v55, %v5891_v3  ;;  %v336_v43 = vmul.f32 %v5592_v58, %v5891_v3 }
  0x4e   : > { %v1185_v40 = vsel %vm5934_vm5, %v1180_v24, %v1184_v18  ;;  %804 = vst.msk [vmem:[#allocation2 + $0x2c] sm:$0x1] %vm794_vm1, %v5469_v30  ;;  %v480_v41 = vrot.slane %v404_v31, 7  ;;  %v481_v46 = vrot.slane %v405_v34, 7  ;;  %v357_v45 = vadd.f32 %v5913_v12, %v318_v35 }
  0x4f   : > { %v1175_v44 = vsel %vm5934_vm5, %v1170_v33, %v1174_v11  ;;  %v388_v47 = vmax.f32 %v356_v36, 0.0  ;;  %v374_v51 = vadd.f32 %v5913_v12, %v335_v42  ;;  %v375_v32 = vadd.f32 %v5913_v12, %v336_v43 }
  0x50   : > { %v5146_v48 = vcombine.low %v1175_v44, %v1185_v40  ;;  %v554_v50 = vsel %vm446_vm2, 0.0, %v480_v41  ;;  %v482_v52 = vsel %vm446_vm2, %v480_v41, %v481_v46  ;;  %v570_v37 = vsel %vm446_vm2, %v481_v46, 0.0 }
  0x51   : > { %v5494_v38 = vpack.c.bf16 %v554_v50, %v554_v50  ;;  %v389_v53 = vmax.f32 %v357_v45, 0.0  ;;  %v5495_v55 = vpack.c.bf16 %v482_v52, %v482_v52  ;;  %v5496_v56 = vpack.c.bf16 %v570_v37, %v570_v37 }
  0x52   : > { %1595 = vrot.lane.b32.xlu1 %v5146_v48, %s5842_s29  ;;  %v456_v39 = vrot.slane %v388_v47, 7  ;;  %v406_v57 = vmax.f32 %v374_v51, 0.0  ;;  %v407_v59 = vmax.f32 %v375_v32, 0.0  ;;  %v5559_v1 = vunpack.c.l.bf16 %v5608_v54 }
  0x53   : > { %829 = vst.msk [vmem:[#allocation2 + $0x90] sm:$0xf] %vm791_vm0, %v5494_v38  ;;  %v457_v58 = vrot.slane %v389_v53, 7  ;;  %v853_v62 = vld [vmem:[#allocation2 + $0x24] sm:$0xf]  ;;  %v5560_v2 = vunpack.c.h.bf16 %v5608_v54  ;;  %v5595_v11 = vunpack.c.l.bf16 %v6076_v60  ;;  %v5596_v23 = vunpack.c.h.bf16 %v6076_v60 }
  0x54   : > { %830 = vst.msk [vmem:[#allocation2 + $0x94] sm:$0xf] %vm791_vm0, %v5495_v55  ;;  %v546_v63 = vsel %vm446_vm2, 0.0, %v456_v39  ;;  %v483_v0 = vrot.slane %v406_v57, 7  ;;  %v854_v4 = vld [vmem:[#allocation2 + $0x28] sm:$0xf]  ;;  %v319_v29 = vmul.f32 %v5559_v1, %v5891_v3 }
  0x55   : > { %831 = vst.msk [vmem:[#allocation2 + $0x98] sm:$0x1] %vm794_vm1, %v5496_v56  ;;  %v882_v5 = vld [vmem:[#allocation2 + $0x2c] sm:$0x1]  ;;  %v971_v6 = vshrl.u32 %v853_v62, 16  ;;  %v974_v7 = vshll.u32 %v853_v62, 16  ;;  %v458_v8 = vsel %vm446_vm2, %v456_v39, %v457_v58  ;;  %v5470_v28 = vpack.c.bf16 %v546_v63, %v546_v63 }
  0x56   : > { %v980_v49 = vshll.u32 %v854_v4, 16  ;;  %v984_v9 = vshrl.u32 %v854_v4, 16  ;;  %v990_v10 = vshll.u32 %v882_v5, 16  ;;  %v562_v15 = vsel %vm446_vm2, %v457_v58, 0.0 }
  0x57   : > { %v973_v13 = vrot.slane %v971_v6, 4  ;;  %v976_v14 = vrot.slane %v974_v7, 5  ;;  %v5471_v16 = vpack.c.bf16 %v458_v8, %v458_v8  ;;  %805 = vst.msk [vmem:[#allocation2 + $0x30] sm:$0xf] %vm791_vm0, %v5470_v28  ;;  %v5472_v19 = vpack.c.bf16 %v562_v15, %v562_v15 }
  0x58   : > { %v982_v17 = vrot.slane %v980_v49, 5  ;;  %v986_v18 = vrot.slane %v984_v9, 4  ;;  %v484_v21 = vrot.slane %v407_v59, 7  ;;  %v555_v22 = vsel %vm446_vm2, 0.0, %v483_v0 }
  0x59   : > { %v977_v20 = vor.u32 %v976_v14, %v973_v13  ;;  %806 = vst.msk [vmem:[#allocation2 + $0x34] sm:$0xf] %vm791_vm0, %v5471_v16  ;;  %v992_v26 = vrot.slane %v990_v10, 5  ;;  %v5497_v24 = vpack.c.bf16 %v555_v22, %v555_v22  ;;  %v320_v35 = vmul.f32 %v5560_v2, %v5891_v3 }
  0x5a   : > { %v987_v25 = vor.u32 %v986_v18, %v982_v17  ;;  %v871_v27 = vld [vmem:[#allocation2 + $0x90] sm:$0xf]  ;;  %807 = vst.msk [vmem:[#allocation2 + $0x38] sm:$0x1] %vm794_vm1, %v5472_v19  ;;  %v337_v36 = vmul.f32 %v5595_v11, %v5891_v3  ;;  %v485_v47 = vsel %vm446_vm2, %v483_v0, %v484_v21  ;;  %v571_v57 = vsel %vm446_vm2, %v484_v21, 0.0  ;;  %v5609_v19 = vld [vmem:[%s5904_s26 + $0x28] sm:$0xff]  }
  0x5b   : > { %v978_v30 = vrot.slane %v977_v20, 4  ;;  %v872_v31 = vld [vmem:[#allocation2 + $0x94] sm:$0xf]  ;;  %v1187_v34 = vshrl.u32 %v871_v27, 16  ;;  %v1190_v41 = vshll.u32 %v871_v27, 16  ;;  %v5498_v58 = vpack.c.bf16 %v485_v47, %v485_v47 }
  0x5c   : > { %v891_v33 = vld [vmem:[#allocation2 + $0x98] sm:$0x1]  ;;  %v988_v40 = vrot.slane %v987_v25, 4  ;;  %v1196_v42 = vshll.u32 %v872_v31, 16  ;;  %v1200_v43 = vshrl.u32 %v872_v31, 16  ;;  %v358_v6 = vadd.f32 %v5913_v12, %v319_v29 }
  0x5d   : > { %832 = vst.msk [vmem:[#allocation2 + $0x9c] sm:$0xf] %vm791_vm0, %v5497_v24  ;;  %v983_v44 = vsel %vm5934_vm5, %v978_v30, %v982_v17  ;;  %v1189_v46 = vrot.slane %v1187_v34, 4  ;;  %v1206_v45 = vshll.u32 %v891_v33, 16  ;;  %v1192_v50 = vrot.slane %v1190_v41, 5 }
  0x5e   : > { %v993_v48 = vsel %vm5934_vm5, %v988_v40, %v992_v26  ;;  %v1198_v51 = vrot.slane %v1196_v42, 5  ;;  %v1202_v32 = vrot.slane %v1200_v43, 4  ;;  %v855_v52 = vld [vmem:[#allocation2 + $0x30] sm:$0xf]  ;;  %833 = vst.msk [vmem:[#allocation2 + $0xa0] sm:$0xf] %vm791_vm0, %v5498_v58  ;;  %v5499_v49 = vpack.c.bf16 %v571_v57, %v571_v57 }
  0x5f   : > { %v5138_v37 = vcombine.low %v983_v44, %v993_v48  ;;  %v1208_v38 = vrot.slane %v1206_v45, 5  ;;  %v995_v53 = vshrl.u32 %v855_v52, 16  ;;  %v998_v54 = vshll.u32 %v855_v52, 16  ;;  %v5696_v58 = vld [vmem:[%s7499_s1] ss:$0 sm:$0xff] }
  0x60   : > { %v1193_v55 = vor.u32 %v1192_v50, %v1189_v46  ;;  %v1203_v56 = vor.u32 %v1202_v32, %v1198_v51  ;;  %v856_v39 = vld [vmem:[#allocation2 + $0x34] sm:$0xf]  ;;  %834 = vst.msk [vmem:[#allocation2 + $0xa4] sm:$0x1] %vm794_vm1, %v5499_v49  ;;  %v359_v21 = vadd.f32 %v5913_v12, %v320_v35  ;;  %v390_v22 = vmax.f32 %v358_v6, 0.0 }
  0x61   : > { %1579 = vrot.lane.b32.xlu0 %v5138_v37, %s5842_s29  ;;  %v883_v59 = vld [vmem:[#allocation2 + $0x38] sm:$0x1]  ;;  %v997_v62 = vrot.slane %v995_v53, 4  ;;  %v1000_v63 = vrot.slane %v998_v54, 5  ;;  %v1004_v0 = vshll.u32 %v856_v39, 16  ;;  %v1008_v1 = vshrl.u32 %v856_v39, 16 }
  0x62   : > { %v1194_v2 = vrot.slane %v1193_v55, 4  ;;  %v1204_v4 = vrot.slane %v1203_v56, 4  ;;  %v1014_v5 = vshll.u32 %v883_v59, 16  ;;  %v338_v25 = vmul.f32 %v5596_v23, %v5891_v3 }
  0x63   : > { %v1001_v7 = vor.u32 %v1000_v63, %v997_v62  ;;  %v1006_v8 = vrot.slane %v1004_v0, 5  ;;  %v1010_v28 = vrot.slane %v1008_v1, 4  ;;  %v376_v29 = vadd.f32 %v5913_v12, %v337_v36  ;;  %v5618_v63 = vld [vmem:[%s5904_s26 + $0x70] sm:$0xff]  }
  0x64   : > { %v873_v9 = vld [vmem:[#allocation2 + $0x9c] sm:$0xf]  ;;  %v1199_v10 = vsel %vm5934_vm5, %v1194_v2, %v1198_v51  ;;  %v1209_v11 = vsel %vm5934_vm5, %v1204_v4, %v1208_v38  ;;  %v1016_v13 = vrot.slane %v1014_v5, 5  ;;  %v391_v30 = vmax.f32 %v359_v21, 0.0  ;;  %v5610_v0 = vld [vmem:[%s5904_s26 + $0x30] sm:$0xff]  }
  0x65   : > { %v1211_v14 = vshrl.u32 %v873_v9, 16  ;;  %v5147_v15 = vcombine.low %v1199_v10, %v1209_v11  ;;  %v1002_v16 = vrot.slane %v1001_v7, 4  ;;  %v1011_v17 = vor.u32 %v1010_v28, %v1006_v8  ;;  %v874_v40 = vld [vmem:[#allocation2 + $0xa0] sm:$0xf] }
  0x66   : > { %v1214_v18 = vshll.u32 %v873_v9, 16  ;;  %v459_v31 = vrot.slane %v390_v22, 7  ;;  %v377_v33 = vadd.f32 %v5913_v12, %v338_v25  ;;  %v5563_v34 = vunpack.c.l.bf16 %v5609_v19 }
  0x67   : > { %v1213_v20 = vrot.slane %v1211_v14, 4  ;;  %1597 = vrot.lane.b32.xlu1 %v5147_v15, %s5842_s29  ;;  %v1007_v26 = vsel %vm5934_vm5, %v1002_v16, %v1006_v8  ;;  %v1012_v27 = vrot.slane %v1011_v17, 4  ;;  %v408_v3 = vmax.f32 %v376_v29, 0.0  ;;  %v892_v12 = vld [vmem:[#allocation2 + $0xa4] sm:$0x1] }
  0x68   : > { %v1216_v24 = vrot.slane %v1214_v18, 5  ;;  %v5564_v23 = vunpack.c.h.bf16 %v5609_v19  ;;  %v1220_v42 = vshll.u32 %v874_v40, 16  ;;  %v1224_v43 = vshrl.u32 %v874_v40, 16  ;;  %v6139_v8 = vld [vmem:[%s7500_s2] ss:$0 sm:$0xff] }
  0x69   : > { %v1017_v35 = vsel %vm5934_vm5, %v1012_v27, %v1016_v13  ;;  %v460_v44 = vrot.slane %v391_v30, 7  ;;  %v547_v45 = vsel %vm446_vm2, 0.0, %v459_v31  ;;  %v409_v36 = vmax.f32 %v377_v33, 0.0  ;;  %v6148_v18 = vld [vmem:[#allocation2 + $0xc] sm:$0xf] }
  0x6a   : > { %v1217_v60 = vor.u32 %v1216_v24, %v1213_v20  ;;  %v5139_v41 = vcombine.low %v1007_v26, %v1017_v35  ;;  %v486_v47 = vrot.slane %v408_v3, 7  ;;  %v1222_v48 = vrot.slane %v1220_v42, 5 }
  0x6b   : > { %v1226_v50 = vrot.slane %v1224_v43, 4  ;;  %v461_v51 = vsel %vm446_vm2, %v459_v31, %v460_v44  ;;  %v563_v32 = vsel %vm446_vm2, %v460_v44, 0.0  ;;  %v1230_v52 = vshll.u32 %v892_v12, 16 }
  0x6c   : > { %v1218_v46 = vrot.slane %v1217_v60, 4  ;;  %1581 = vrot.lane.b32.xlu0 %v5139_v41, %s5842_s29  ;;  %v5473_v37 = vpack.c.bf16 %v547_v45, %v547_v45  ;;  %v5474_v38 = vpack.c.bf16 %v461_v51, %v461_v51  ;;  %v5475_v55 = vpack.c.bf16 %v563_v32, %v563_v32 }
  0x6d   : > { %v1227_v54 = vor.u32 %v1226_v50, %v1222_v48  ;;  %v487_v56 = vrot.slane %v409_v36, 7  ;;  %v1232_v39 = vrot.slane %v1230_v52, 5  ;;  %v556_v57 = vsel %vm446_vm2, 0.0, %v486_v47 }
  0x6e   : > { %v1223_v53 = vsel %vm5934_vm5, %v1218_v46, %v1222_v48  ;;  %808 = vst.msk [vmem:[#allocation2 + $0x3c] sm:$0xf] %vm791_vm0, %v5473_v37  ;;  %809 = vst.msk [vmem:[#allocation2 + $0x40] sm:$0xf] %vm791_vm0, %v5474_v38  ;;  %v321_v59 = vmul.f32 %v5696_v58, %v5563_v34  ;;  %v322_v62 = vmul.f32 %v5696_v58, %v5564_v23  ;;  %v5599_v10 = vunpack.c.l.bf16 %v5618_v63 }
  0x6f   : > { %v1228_v1 = vrot.slane %v1227_v54, 4  ;;  %810 = vst.msk [vmem:[#allocation2 + $0x44] sm:$0x1] %vm794_vm1, %v5475_v55  ;;  %v488_v2 = vsel %vm446_vm2, %v486_v47, %v487_v56  ;;  %v572_v4 = vsel %vm446_vm2, %v487_v56, 0.0  ;;  %v5500_v5 = vpack.c.bf16 %v556_v57, %v556_v57 }
  0x70   : > { %v5501_v6 = vpack.c.bf16 %v488_v2, %v488_v2  ;;  %v5502_v7 = vpack.c.bf16 %v572_v4, %v572_v4  ;;  %v360_v28 = vadd.f32 %v6139_v8, %v321_v59  ;;  %v361_v49 = vadd.f32 %v6139_v8, %v322_v62 }
  0x71   : > { %v1233_v9 = vsel %vm5934_vm5, %v1228_v1, %v1232_v39  ;;  %835 = vst.msk [vmem:[#allocation2 + $0xa8] sm:$0xf] %vm791_vm0, %v5500_v5  ;;  %v5600_v11 = vunpack.c.h.bf16 %v5618_v63  ;;  %v5567_v13 = vunpack.c.l.bf16 %v5610_v0  ;;  %v5568_v17 = vunpack.c.h.bf16 %v5610_v0 }
  0x72   : > { %v5148_v14 = vcombine.low %v1223_v53, %v1233_v9  ;;  %836 = vst.msk [vmem:[#allocation2 + $0xac] sm:$0xf] %vm791_vm0, %v5501_v6  ;;  %v392_v15 = vmax.f32 %v360_v28, 0.0  ;;  %v393_v16 = vmax.f32 %v361_v49, 0.0  ;;  %v339_v19 = vmul.f32 %v5696_v58, %v5599_v10 }
  0x73   : > { %837 = vst.msk [vmem:[#allocation2 + $0xb0] sm:$0x1] %vm794_vm1, %v5502_v7  ;;  %v340_v20 = vmul.f32 %v5696_v58, %v5600_v11  ;;  %v323_v24 = vmul.f32 %v5696_v58, %v5567_v13  ;;  %v324_v29 = vmul.f32 %v5696_v58, %v5568_v17  ;;  %v2105_v30 = vshrl.u32 %v6148_v18, 16  ;;  %v6164_v7 = vld [vmem:[#allocation2 + $0x10] sm:$0xf] }
  0x74   : > { %1599 = vrot.lane.b32.xlu1 %v5148_v14, %s5842_s29  ;;  %v462_v21 = vrot.slane %v392_v15, 7  ;;  %v463_v22 = vrot.slane %v393_v16, 7  ;;  %v378_v27 = vadd.f32 %v6139_v8, %v339_v19  ;;  %v2108_v15 = vshll.u32 %v6148_v18, 16 }
  0x75   : > { %v857_v25 = vld [vmem:[#allocation2 + $0x3c] sm:$0xf]  ;;  %v858_v26 = vld [vmem:[#allocation2 + $0x40] sm:$0xf]  ;;  %v379_v41 = vadd.f32 %v6139_v8, %v340_v20  ;;  %v362_v56 = vadd.f32 %v6139_v8, %v323_v24  ;;  %v363_v13 = vadd.f32 %v6139_v8, %v324_v29  ;;  %v2114_v20 = vshll.u32 %v6164_v7, 16 }
  0x76   : > { %v884_v31 = vld [vmem:[#allocation2 + $0x44] sm:$0x1]  ;;  %v1019_v33 = vshrl.u32 %v857_v25, 16  ;;  %v1022_v34 = vshll.u32 %v857_v25, 16  ;;  %v1028_v35 = vshll.u32 %v858_v26, 16  ;;  %v1032_v40 = vshrl.u32 %v858_v26, 16 }
  0x77   : > { %v1038_v60 = vshll.u32 %v884_v31, 16  ;;  %v464_v3 = vsel %vm446_vm2, %v462_v21, %v463_v22  ;;  %v548_v23 = vsel %vm446_vm2, 0.0, %v462_v21  ;;  %v564_v0 = vsel %vm446_vm2, %v463_v22, 0.0 }
  0x78   : > { %v1021_v42 = vrot.slane %v1019_v33, 4  ;;  %v1024_v43 = vrot.slane %v1022_v34, 5  ;;  %v1030_v44 = vrot.slane %v1028_v35, 5  ;;  %v1034_v46 = vrot.slane %v1032_v40, 4  ;;  %v875_v45 = vld [vmem:[#allocation2 + $0xa8] sm:$0xf] }
  0x79   : > { %v1040_v36 = vrot.slane %v1038_v60, 5  ;;  %v876_v47 = vld [vmem:[#allocation2 + $0xac] sm:$0xf]  ;;  %v1235_v48 = vshrl.u32 %v875_v45, 16  ;;  %v5476_v50 = vpack.c.bf16 %v548_v23, %v548_v23  ;;  %v5477_v51 = vpack.c.bf16 %v464_v3, %v464_v3 }
  0x7a   : > { %v893_v12 = vld [vmem:[#allocation2 + $0xb0] sm:$0x1]  ;;  %v1025_v32 = vor.u32 %v1024_v43, %v1021_v42  ;;  %v1035_v52 = vor.u32 %v1034_v46, %v1030_v44  ;;  %v1238_v37 = vshll.u32 %v875_v45, 16  ;;  %v1244_v38 = vshll.u32 %v876_v47, 16 }
  0x7b   : > { %v1237_v53 = vrot.slane %v1235_v48, 4  ;;  %v1248_v54 = vshrl.u32 %v876_v47, 16  ;;  %v1254_v55 = vshll.u32 %v893_v12, 16  ;;  %811 = vst.msk [vmem:[#allocation2 + $0x48] sm:$0xf] %vm791_vm0, %v5476_v50  ;;  %v410_v1 = vmax.f32 %v378_v27, 0.0 }
  0x7c   : > { %812 = vst.msk [vmem:[#allocation2 + $0x4c] sm:$0xf] %vm791_vm0, %v5477_v51  ;;  %v1026_v39 = vrot.slane %v1025_v32, 4  ;;  %v1036_v57 = vrot.slane %v1035_v52, 4  ;;  %v1240_v58 = vrot.slane %v1238_v37, 5  ;;  %v1246_v59 = vrot.slane %v1244_v38, 5 }
  0x7d   : > { %v1250_v62 = vrot.slane %v1248_v54, 4  ;;  %v1256_v63 = vrot.slane %v1254_v55, 5  ;;  %v5478_v6 = vpack.c.bf16 %v564_v0, %v564_v0  ;;  %v411_v9 = vmax.f32 %v379_v41, 0.0  ;;  %v2088_v37 = vld [vmem:[#allocation2 + $0x14] sm:$0x1]  ;;  %v5655_v0 = vld [vmem:[%s7501_s3] sm:$0xff]  }
  0x7e   : > { %v1031_v2 = vsel %vm5934_vm5, %v1026_v39, %v1030_v44  ;;  %v1041_v4 = vsel %vm5934_vm5, %v1036_v57, %v1040_v36  ;;  %v1241_v5 = vor.u32 %v1240_v58, %v1237_v53  ;;  %v489_v10 = vrot.slane %v410_v1, 7  ;;  %v3323_v57 = vld [vmem:[#allocation2 + $0x18] sm:$0xf] }
  0x7f   : > { %v5140_v28 = vcombine.low %v1031_v2, %v1041_v4  ;;  %v1251_v49 = vor.u32 %v1250_v62, %v1246_v59  ;;  %813 = vst.msk [vmem:[#allocation2 + $0x50] sm:$0x1] %vm794_vm1, %v5478_v6  ;;  %v394_v14 = vmax.f32 %v362_v56, 0.0  ;;  %v490_v17 = vrot.slane %v411_v9, 7 }
  0x80   : > { %v1242_v11 = vrot.slane %v1241_v5, 4  ;;  %v557_v19 = vsel %vm446_vm2, 0.0, %v489_v10  ;;  %v395_v27 = vmax.f32 %v363_v13, 0.0  ;;  %v2107_v48 = vrot.slane %v2105_v30, 4 }
  0x81   : > { %1583 = vrot.lane.b32.xlu0 %v5140_v28, %s5842_s29  ;;  %v1252_v16 = vrot.slane %v1251_v49, 4  ;;  %v5503_v26 = vpack.c.bf16 %v557_v19, %v557_v19  ;;  %v465_v24 = vrot.slane %v394_v14, 7  ;;  %v491_v40 = vsel %vm446_vm2, %v489_v10, %v490_v17 }
  0x82   : > { %v1247_v21 = vsel %vm5934_vm5, %v1242_v11, %v1246_v59  ;;  %v859_v22 = vld [vmem:[#allocation2 + $0x48] sm:$0xf]  ;;  %v573_v60 = vsel %vm446_vm2, %v490_v17, 0.0  ;;  %v5504_v42 = vpack.c.bf16 %v491_v40, %v491_v40  ;;  %v466_v46 = vrot.slane %v395_v27, 7 }
  0x83   : > { %v860_v25 = vld [vmem:[#allocation2 + $0x4c] sm:$0xf]  ;;  %v1257_v8 = vsel %vm5934_vm5, %v1252_v16, %v1256_v63  ;;  %v1043_v29 = vshrl.u32 %v859_v22, 16  ;;  %v1046_v31 = vshll.u32 %v859_v22, 16  ;;  %838 = vst.msk [vmem:[#allocation2 + $0xb4] sm:$0xf] %vm791_vm0, %v5503_v26  ;;  %v5505_v44 = vpack.c.bf16 %v573_v60, %v573_v60 }
  0x84   : > { %v1052_v33 = vshll.u32 %v860_v25, 16  ;;  %v5149_v34 = vcombine.low %v1247_v21, %v1257_v8  ;;  %v1056_v35 = vshrl.u32 %v860_v25, 16  ;;  %v549_v45 = vsel %vm446_vm2, 0.0, %v465_v24  ;;  %839 = vst.msk [vmem:[#allocation2 + $0xb8] sm:$0xf] %vm791_vm0, %v5504_v42 }
  0x85   : > { %v1045_v3 = vrot.slane %v1043_v29, 4  ;;  %v1048_v23 = vrot.slane %v1046_v31, 5  ;;  %v5479_v12 = vpack.c.bf16 %v549_v45, %v549_v45  ;;  %v2110_v50 = vrot.slane %v2108_v15, 5  ;;  %840 = vst.msk [vmem:[#allocation2 + $0xbc] sm:$0x1] %vm794_vm1, %v5505_v44  ;;  %v5656_v15 = vld [vmem:[%s7501_s3 + $0x8] sm:$0xff]  }
  0x86   : > { %v1054_v41 = vrot.slane %v1052_v33, 5  ;;  %1601 = vrot.lane.b32.xlu1 %v5149_v34, %s5842_s29  ;;  %v1058_v43 = vrot.slane %v1056_v35, 4  ;;  %v885_v36 = vld [vmem:[#allocation2 + $0x50] sm:$0x1]  ;;  %v467_v52 = vsel %vm446_vm2, %v465_v24, %v466_v46  ;;  %v565_v53 = vsel %vm446_vm2, %v466_v46, 0.0 }
  0x87   : > { %v1049_v47 = vor.u32 %v1048_v23, %v1045_v3  ;;  %v1062_v32 = vshll.u32 %v885_v36, 16  ;;  %v5480_v54 = vpack.c.bf16 %v467_v52, %v467_v52  ;;  %814 = vst.msk [vmem:[#allocation2 + $0x54] sm:$0xf] %vm791_vm0, %v5479_v12  ;;  %v6188_v55 = vrot.slane %v2114_v20, 5  ;;  %v5657_v46 = vld [vmem:[%s7501_s3 + $0x10] sm:$0xff]  }
  0x88   : > { %v1059_v51 = vor.u32 %v1058_v43, %v1054_v41  ;;  %v5481_v18 = vpack.c.bf16 %v565_v53, %v565_v53  ;;  %v2118_v30 = vshrl.u32 %v6164_v7, 16  ;;  %v2111_v62 = vor.u32 %v2110_v50, %v2107_v48  ;;  %v6200_v7 = vld [vmem:[#allocation2 + $0x1c] sm:$0xf]  ;;  %v3355_v12 = vld [vmem:[#allocation2 + $0x20] sm:$0x1] }
  0x89   : > { %v1050_v38 = vrot.slane %v1049_v47, 4  ;;  %v1064_v39 = vrot.slane %v1062_v32, 5  ;;  %815 = vst.msk [vmem:[#allocation2 + $0x58] sm:$0xf] %vm791_vm0, %v5480_v54  ;;  %v2124_v63 = vshll.u32 %v2088_v37, 16  ;;  %v3372_v28 = vshrl.u32 %v3323_v57, 16 }
  0x8a   : > { %v1060_v56 = vrot.slane %v1059_v51, 4  ;;  %v877_v59 = vld [vmem:[#allocation2 + $0xb4] sm:$0xf]  ;;  %816 = vst.msk [vmem:[#allocation2 + $0x5c] sm:$0x1] %vm794_vm1, %v5481_v18  ;;  %v2120_v5 = vrot.slane %v2118_v30, 4 }
  0x8b   : > { %v1055_v58 = vsel %vm5934_vm5, %v1050_v38, %v1054_v41  ;;  %v1259_v2 = vshrl.u32 %v877_v59, 16  ;;  %v1262_v4 = vshll.u32 %v877_v59, 16  ;;  %v878_v49 = vld [vmem:[#allocation2 + $0xb8] sm:$0xf]  ;;  %v5843_v13 = vmov 0  }
  0x8c   : > { %v1065_v1 = vsel %vm5934_vm5, %v1060_v56, %v1064_v39  ;;  %v2121_v11 = vor.u32 %v2120_v5, %v6188_v55  ;;  %5620 = vmatprep.subr.bf16.mxu1 %v5843_v13  ;;  %v3375_v14 = vshll.u32 %v3323_v57, 16  ;;  %1862 = vmatprep.subr.bf16.mxu0 %v5843_v13  ;;  %v894_v16 = vld [vmem:[#allocation2 + $0xbc] sm:$0x1]  ;;  %v1268_v17 = vshll.u32 %v878_v49, 16  ;;  %v2058_v54 = vld [vmem:[#allocation2 + $0x18] sm:$0xf] }
  0x8d   : > { %v5141_v6 = vcombine.low %v1055_v58, %v1065_v1  ;;  %v1261_v9 = vrot.slane %v1259_v2, 4  ;;  %v1264_v10 = vrot.slane %v1262_v4, 5  ;;  %v1272_v19 = vshrl.u32 %v878_v49, 16  ;;  %5632 = vmatpush1.bf16.msra.mxu1 %v5655_v0  ;;  %1863 = vmatpush1.bf16.msra.mxu0 %v5655_v0  ;;  %v2059_v30 = vld [vmem:[#allocation2 + $0x1c] sm:$0xf] }
  0x8e   : > { %v2112_v20 = vrot.slane %v2111_v62, 4  ;;  %v2126_v21 = vrot.slane %v2124_v63, 5  ;;  %v1278_v25 = vshll.u32 %v894_v16, 16  ;;  %v861_v26 = vld [vmem:[#allocation2 + $0x54] sm:$0xf]  ;;  %5621 = vmatprep.subr.bf16.mxu1 %v5843_v13  ;;  %v3374_v27 = vrot.slane %v3372_v28, 4  ;;  %1864 = vmatprep.subr.bf16.mxu0 %v5843_v13 }
  0x8f   : > { %1585 = vrot.lane.b32.xlu0 %v5141_v6, %s5842_s29  ;;  %v1265_v22 = vor.u32 %v1264_v10, %v1261_v9  ;;  %v3381_v24 = vshll.u32 %v6200_v7, 16  ;;  %v1270_v8 = vrot.slane %v1268_v17, 5  ;;  %v1274_v29 = vrot.slane %v1272_v19, 4  ;;  %v5658_v57 = vld [vmem:[%s7501_s3 + $0x18] sm:$0xff]   ;;  %v2089_v0 = vld [vmem:[#allocation2 + $0x20] sm:$0x1] }
  0x90   : > { %v1067_v31 = vshrl.u32 %v861_v26, 16  ;;  %v1070_v33 = vshll.u32 %v861_v26, 16  ;;  %v1280_v35 = vrot.slane %v1278_v25, 5  ;;  %v862_v40 = vld [vmem:[#allocation2 + $0x58] sm:$0xf]  ;;  %v2122_v60 = vrot.slane %v2121_v11, 4 }
  0x91   : > { %v1266_v34 = vrot.slane %v1265_v22, 4  ;;  %v3377_v3 = vrot.slane %v3375_v14, 5  ;;  %v1275_v23 = vor.u32 %v1274_v29, %v1270_v8  ;;  %v886_v41 = vld [vmem:[#allocation2 + $0x5c] sm:$0x1]  ;;  %v1076_v44 = vshll.u32 %v862_v40, 16  ;;  %5633 = vmatpush1.bf16.msra.mxu1 %v5656_v15  ;;  %1865 = vmatpush1.bf16.msra.mxu0 %v5656_v15  ;;  %v5659_v17 = vld [vmem:[%s7501_s3 + $0x20] sm:$0xff]  }
  0x92   : > { %v1069_v42 = vrot.slane %v1067_v31, 4  ;;  %v1072_v43 = vrot.slane %v1070_v33, 5  ;;  %v1080_v45 = vshrl.u32 %v862_v40, 16  ;;  %v1086_v36 = vshll.u32 %v886_v41, 16  ;;  %5622 = vmatprep.subr.bf16.mxu1 %v5843_v13  ;;  %1866 = vmatprep.subr.bf16.mxu0 %v5843_v13  ;;  %v3325_v9 = vld [vmem:[#allocation2 + $0x24] sm:$0xf] }
  0x93   : > { %v2117_v47 = vsel %vm5934_vm5, %v2112_v20, %v6188_v55  ;;  %v1271_v48 = vsel %vm5934_vm5, %v1266_v34, %v1270_v8  ;;  %v1276_v50 = vrot.slane %v1275_v23, 4  ;;  %v1078_v32 = vrot.slane %v1076_v44, 5  ;;  %v3326_v16 = vld [vmem:[#allocation2 + $0x28] sm:$0xf]  ;;  %v3356_v25 = vld [vmem:[#allocation2 + $0x2c] sm:$0x1] }
  0x94   : > { %v1073_v51 = vor.u32 %v1072_v43, %v1069_v42  ;;  %v1082_v52 = vrot.slane %v1080_v45, 4  ;;  %v2127_v37 = vsel %vm5934_vm5, %v2122_v60, %v2126_v21  ;;  %v3378_v38 = vor.u32 %v3377_v3, %v3374_v27  ;;  %v2060_v23 = vld [vmem:[#allocation2 + $0x24] sm:$0xf]  ;;  %v5660_v41 = vld [vmem:[%s7501_s3 + $0x28] sm:$0xff]  }
  0x95   : > { %v3383_v53 = vrot.slane %v3381_v24, 5  ;;  %v1281_v55 = vsel %vm5934_vm5, %v1276_v50, %v1280_v35  ;;  %v3385_v39 = vshrl.u32 %v6200_v7, 16  ;;  %v3391_v18 = vshll.u32 %v3355_v12, 16  ;;  %5634 = vmatpush1.bf16.msra.mxu1 %v5657_v46  ;;  %1867 = vmatpush1.bf16.msra.mxu0 %v5657_v46  ;;  %v2061_v45 = vld [vmem:[#allocation2 + $0x28] sm:$0xf] }
  0x96   : > { %v1074_v56 = vrot.slane %v1073_v51, 4  ;;  %v5150_v58 = vcombine.low %v1271_v48, %v1281_v55  ;;  %v1083_v59 = vor.u32 %v1082_v52, %v1078_v32  ;;  %v1088_v62 = vrot.slane %v1086_v36, 5  ;;  %5623 = vmatprep.subr.bf16.mxu1 %v5843_v13  ;;  %1868 = vmatprep.subr.bf16.mxu0 %v5843_v13  ;;  %v3327_v55 = vld [vmem:[#allocation2 + $0x30] sm:$0xf] }
  0x97   : > { %v3379_v63 = vrot.slane %v3378_v38, 4  ;;  %v5227_v2 = vcombine.low %v2117_v47, %v2127_v37  ;;  %v3387_v4 = vrot.slane %v3385_v39, 4  ;;  %v2129_v5 = vshrl.u32 %v2058_v54, 16 }
  0x98   : > { %v1079_v1 = vsel %vm5934_vm5, %v1074_v56, %v1078_v32  ;;  %1603 = vrot.lane.b32.xlu1 %v5150_v58, %s5842_s29  ;;  %v1084_v6 = vrot.slane %v1083_v59, 4  ;;  %v3393_v7 = vrot.slane %v3391_v18, 5  ;;  %v2132_v28 = vshll.u32 %v2058_v54, 16  ;;  %v2090_v32 = vld [vmem:[#allocation2 + $0x2c] sm:$0x1]  ;;  %v5661_v56 = vld [vmem:[%s7501_s3 + $0x30] sm:$0xff]  }
  0x99   : > { %v2138_v49 = vshll.u32 %v2059_v30, 16  ;;  %v3388_v10 = vor.u32 %v3387_v4, %v3383_v53  ;;  %v2131_v11 = vrot.slane %v2129_v5, 4  ;;  %v2142_v14 = vshrl.u32 %v2059_v30, 16  ;;  %5635 = vmatpush1.bf16.msra.mxu1 %v5658_v57  ;;  %1869 = vmatpush1.bf16.msra.mxu0 %v5658_v57  ;;  %v3357_v4 = vld [vmem:[#allocation2 + $0x38] sm:$0x1] }
  0x9a   : > { %v2148_v15 = vshll.u32 %v2089_v0, 16  ;;  %v1089_v19 = vsel %vm5934_vm5, %v1084_v6, %v1088_v62  ;;  %v3384_v20 = vsel %vm5934_vm5, %v3379_v63, %v3383_v53  ;;  %v2134_v21 = vrot.slane %v2132_v28, 5  ;;  %5624 = vmatprep.subr.bf16.mxu1 %v5843_v13  ;;  %1870 = vmatprep.subr.bf16.mxu0 %v5843_v13  ;;  %v3328_v0 = vld [vmem:[#allocation2 + $0x34] sm:$0xf] }
  0x9b   : > { %v2140_v22 = vrot.slane %v2138_v49, 5  ;;  %v5142_v26 = vcombine.low %v1079_v1, %v1089_v19  ;;  %v3389_v27 = vrot.slane %v3388_v10, 4  ;;  %v2144_v24 = vrot.slane %v2142_v14, 4  ;;  %v5662_v10 = vld [vmem:[%s7501_s3 + $0x38] sm:$0xff]  }
  0x9c   : > { %v2150_v8 = vrot.slane %v2148_v15, 5  ;;  %2776 = vrot.lane.b32.xlu1 %v5227_v2, %s5842_s29  ;;  %v2135_v29 = vor.u32 %v2134_v21, %v2131_v11  ;;  %v3396_v31 = vshrl.u32 %v3325_v9, 16  ;;  %v3399_v33 = vshll.u32 %v3325_v9, 16  ;;  %v2062_v9 = vld [vmem:[#allocation2 + $0x30] sm:$0xf] }
  0x9d   : > { %v3405_v34 = vshll.u32 %v3326_v16, 16  ;;  %1587 = vrot.lane.b32.xlu0 %v5142_v26, %s5842_s29  ;;  %v3394_v35 = vsel %vm5934_vm5, %v3389_v27, %v3393_v7  ;;  %v2145_v40 = vor.u32 %v2144_v24, %v2140_v22  ;;  %v3409_v60 = vshrl.u32 %v3326_v16, 16  ;;  %5636 = vmatpush1.bf16.msra.mxu1 %v5659_v17 }
  0x9e   : > { %v3415_v3 = vshll.u32 %v3356_v25, 16  ;;  %v5343_v42 = vcombine.low %v3384_v20, %v3394_v35  ;;  %v2136_v43 = vrot.slane %v2135_v29, 4  ;;  %v3398_v44 = vrot.slane %v3396_v31, 4  ;;  %5625 = vmatprep.subr.bf16.mxu1 %v5843_v13  ;;  %1871 = vmatpush1.bf16.msra.mxu0 %v5659_v17 }
  0x9f   : > { %v3401_v46 = vrot.slane %v3399_v33, 5  ;;  %v2146_v36 = vrot.slane %v2145_v40, 4  ;;  %v3407_v47 = vrot.slane %v3405_v34, 5  ;;  %v3411_v12 = vrot.slane %v3409_v60, 4  ;;  %1872 = vmatprep.subr.bf16.mxu0 %v5843_v13  ;;  %v2091_v33 = vld [vmem:[#allocation2 + $0x38] sm:$0x1] }
  0xa0   : > { %v2141_v48 = vsel %vm5934_vm5, %v2136_v43, %v2140_v22  ;;  %v3417_v51 = vrot.slane %v3415_v3, 5  ;;  %v2153_v52 = vshrl.u32 %v2060_v23, 16  ;;  %v2156_v53 = vshll.u32 %v2060_v23, 16  ;;  %v2063_v22 = vld [vmem:[#allocation2 + $0x34] sm:$0xf]  ;;  %v5663_v34 = vld [vmem:[%s7501_s3 + $0x40] sm:$0xff]  }
  0xa1   : > { %v3402_v50 = vor.u32 %v3401_v46, %v3398_v44  ;;  %4043 = vrot.lane.b32.xlu0 %v5343_v42, %s5842_s29  ;;  %v2151_v37 = vsel %vm5934_vm5, %v2146_v36, %v2150_v8  ;;  %v3412_v38 = vor.u32 %v3411_v12, %v3407_v47  ;;  %v2162_v54 = vshll.u32 %v2061_v45, 16  ;;  %5637 = vmatpush1.bf16.msra.mxu1 %v5660_v41  ;;  %v3329_v23 = vld [vmem:[#allocation2 + $0x3c] sm:$0xf]  ;;  %v3330_v46 = vld [vmem:[#allocation2 + $0x40] sm:$0xf] }
  0xa2   : > { %v5228_v39 = vcombine.low %v2141_v48, %v2151_v37  ;;  %v2155_v30 = vrot.slane %v2153_v52, 4  ;;  %v2166_v57 = vshrl.u32 %v2061_v45, 16  ;;  %5626 = vmatprep.subr.bf16.mxu1 %v5843_v13  ;;  %1873 = vmatpush1.bf16.msra.mxu0 %v5660_v41  ;;  %v2158_v59 = vrot.slane %v2156_v53, 5 }
  0xa3   : > { %v3403_v18 = vrot.slane %v3402_v50, 4  ;;  %v3413_v58 = vrot.slane %v3412_v38, 4  ;;  %v2164_v62 = vrot.slane %v2162_v54, 5  ;;  %v2172_v63 = vshll.u32 %v2090_v32, 16  ;;  %1874 = vmatprep.subr.bf16.mxu0 %v5843_v13  ;;  %v5664_v32 = vld [vmem:[%s7501_s3 + $0x48] sm:$0xff]  }
  0xa4   : > { %2778 = vrot.lane.b32.xlu1 %v5228_v39, %s5842_s29  ;;  %v2168_v2 = vrot.slane %v2166_v57, 4  ;;  %v3420_v5 = vshrl.u32 %v3327_v55, 16  ;;  %v2159_v7 = vor.u32 %v2158_v59, %v2155_v30  ;;  %v3423_v49 = vshll.u32 %v3327_v55, 16  ;;  %v3358_v38 = vld [vmem:[#allocation2 + $0x44] sm:$0x1] }
  0xa5   : > { %v3408_v1 = vsel %vm5934_vm5, %v3403_v18, %v3407_v47  ;;  %v3418_v6 = vsel %vm5934_vm5, %v3413_v58, %v3417_v51  ;;  %v2174_v28 = vrot.slane %v2172_v63, 5  ;;  %5638 = vmatpush1.bf16.msra.mxu1 %v5661_v56  ;;  %v3429_v16 = vshll.u32 %v3328_v0, 16  ;;  %v2064_v30 = vld [vmem:[#allocation2 + $0x3c] sm:$0xf]  ;;  %v2065_v63 = vld [vmem:[#allocation2 + $0x40] sm:$0xf] }
  0xa6   : > { %v5344_v11 = vcombine.low %v3408_v1, %v3418_v6  ;;  %v2169_v14 = vor.u32 %v2168_v2, %v2164_v62  ;;  %v3422_v15 = vrot.slane %v3420_v5, 4  ;;  %5627 = vmatprep.subr.bf16.mxu1 %v5843_v13  ;;  %1875 = vmatpush1.bf16.msra.mxu0 %v5661_v56  ;;  %v2160_v17 = vrot.slane %v2159_v7, 4  ;;  %v2092_v7 = vld [vmem:[#allocation2 + $0x44] sm:$0x1] }
  0xa7   : > { %v3425_v19 = vrot.slane %v3423_v49, 5  ;;  %v3433_v20 = vshrl.u32 %v3328_v0, 16  ;;  %v3439_v21 = vshll.u32 %v3357_v4, 16  ;;  %1876 = vmatprep.subr.bf16.mxu0 %v5843_v13  ;;  %v3431_v26 = vrot.slane %v3429_v16, 5  ;;  %v5665_v4 = vld [vmem:[%s7501_s3 + $0x50] sm:$0xff]  }
  0xa8   : > { %4045 = vrot.lane.b32.xlu0 %v5344_v11, %s5842_s29  ;;  %v2170_v25 = vrot.slane %v2169_v14, 4  ;;  %v2177_v27 = vshrl.u32 %v2062_v9, 16  ;;  %v2165_v24 = vsel %vm5934_vm5, %v2160_v17, %v2164_v62  ;;  %v2180_v60 = vshll.u32 %v2062_v9, 16 }
  0xa9   : > { %v3426_v8 = vor.u32 %v3425_v19, %v3422_v15  ;;  %v3435_v29 = vrot.slane %v3433_v20, 4  ;;  %v3441_v31 = vrot.slane %v3439_v21, 5  ;;  %5639 = vmatpush1.bf16.msra.mxu1 %v5662_v10  ;;  %v2186_v3 = vshll.u32 %v2063_v22, 16  ;;  %v3331_v15 = vld [vmem:[#allocation2 + $0x48] sm:$0xf]  ;;  %v5666_v21 = vld [vmem:[%s7501_s3 + $0x58] sm:$0xff]  }
  0xaa   : > { %v2175_v35 = vsel %vm5934_vm5, %v2170_v25, %v2174_v28  ;;  %v2179_v40 = vrot.slane %v2177_v27, 4  ;;  %5628 = vmatprep.subr.bf16.mxu1 %v5843_v13  ;;  %1877 = vmatpush1.bf16.msra.mxu0 %v5662_v10  ;;  %v2190_v44 = vshrl.u32 %v2063_v22, 16  ;;  %v2182_v45 = vrot.slane %v2180_v60, 5 }
  0xab   : > { %v5229_v41 = vcombine.low %v2165_v24, %v2175_v35  ;;  %v3427_v42 = vrot.slane %v3426_v8, 4  ;;  %v3436_v43 = vor.u32 %v3435_v29, %v3431_v26  ;;  %1878 = vmatprep.subr.bf16.mxu0 %v5843_v13  ;;  %v2188_v36 = vrot.slane %v2186_v3, 5  ;;  %v3332_v24 = vld [vmem:[#allocation2 + $0x4c] sm:$0xf]  ;;  %v2066_v3 = vld [vmem:[#allocation2 + $0x48] sm:$0xf] }
  0xac   : > { %v2196_v47 = vshll.u32 %v2091_v33, 16  ;;  %v2192_v50 = vrot.slane %v2190_v44, 4  ;;  %v3444_v51 = vshrl.u32 %v3329_v23, 16  ;;  %v2183_v52 = vor.u32 %v2182_v45, %v2179_v40 }
  0xad   : > { %2780 = vrot.lane.b32.xlu1 %v5229_v41, %s5842_s29  ;;  %v3432_v12 = vsel %vm5934_vm5, %v3427_v42, %v3431_v26  ;;  %v3437_v48 = vrot.slane %v3436_v43, 4  ;;  %5640 = vmatpush1.bf16.msra.mxu1 %v5663_v34  ;;  %v3447_v53 = vshll.u32 %v3329_v23, 16  ;;  %v3453_v54 = vshll.u32 %v3330_v46, 16 }
  0xae   : > { %v2198_v37 = vrot.slane %v2196_v47, 5  ;;  %5629 = vmatprep.subr.bf16.mxu1 %v5843_v13  ;;  %1879 = vmatpush1.bf16.msra.mxu0 %v5663_v34  ;;  %v2193_v56 = vor.u32 %v2192_v50, %v2188_v36  ;;  %v3446_v39 = vrot.slane %v3444_v51, 4  ;;  %v3457_v18 = vshrl.u32 %v3330_v46, 16  ;;  %v2067_v47 = vld [vmem:[#allocation2 + $0x4c] sm:$0xf] }
  0xaf   : > { %v3442_v55 = vsel %vm5934_vm5, %v3437_v48, %v3441_v31  ;;  %1880 = vmatprep.subr.bf16.mxu0 %v5843_v13  ;;  %v2184_v58 = vrot.slane %v2183_v52, 4  ;;  %v3449_v59 = vrot.slane %v3447_v53, 5  ;;  %v3455_v62 = vrot.slane %v3453_v54, 5  ;;  %v3359_v31 = vld [vmem:[#allocation2 + $0x50] sm:$0x1] }
  0xb0   : > { %v5345_v57 = vcombine.low %v3432_v12, %v3442_v55  ;;  %v2194_v0 = vrot.slane %v2193_v56, 4  ;;  %v3459_v1 = vrot.slane %v3457_v18, 4  ;;  %v3463_v2 = vshll.u32 %v3358_v38, 16  ;;  %v6313_v12 = vld [vmem:[#allocation2 + $0x74] sm:$0x1] }
  0xb1   : > { %5641 = vmatpush1.bf16.msra.mxu1 %v5664_v32  ;;  %v2189_v5 = vsel %vm5934_vm5, %v2184_v58, %v2188_v36  ;;  %v3450_v6 = vor.u32 %v3449_v59, %v3446_v39  ;;  %v2201_v28 = vshrl.u32 %v2064_v30, 16  ;;  %v2204_v49 = vshll.u32 %v2064_v30, 16 }
  0xb2   : > { %4047 = vrot.lane.b32.xlu0 %v5345_v57, %s5842_s29  ;;  %5630 = vmatprep.subr.bf16.mxu1 %v5843_v13  ;;  %v2199_v9 = vsel %vm5934_vm5, %v2194_v0, %v2198_v37  ;;  %v3460_v10 = vor.u32 %v3459_v1, %v3455_v62  ;;  %v3465_v11 = vrot.slane %v3463_v2, 5  ;;  %v2210_v14 = vshll.u32 %v2065_v63, 16 }
  0xb3   : > { %1881 = vmatpush1.bf16.msra.mxu0 %v5664_v32  ;;  %v5230_v16 = vcombine.low %v2189_v5, %v2199_v9  ;;  %v3451_v17 = vrot.slane %v3450_v6, 4  ;;  %v2203_v19 = vrot.slane %v2201_v28, 4  ;;  %v2206_v20 = vrot.slane %v2204_v49, 5  ;;  %v2093_v32 = vld [vmem:[#allocation2 + $0x50] sm:$0x1] }
  0xb4   : > { %1882 = vmatprep.subr.bf16.mxu0 %v5843_v13  ;;  %v3461_v22 = vrot.slane %v3460_v10, 4  ;;  %v2212_v25 = vrot.slane %v2210_v14, 5  ;;  %v2214_v26 = vshrl.u32 %v2065_v63, 16  ;;  %v2220_v27 = vshll.u32 %v2092_v7, 16  ;;  %v3334_v63 = vld [vmem:[#allocation2 + $0x58] sm:$0xf] }
  0xb5   : > { %5642 = vmatpush1.bf16.msra.mxu1 %v5665_v4  ;;  %2782 = vrot.lane.b32.xlu1 %v5230_v16, %s5842_s29  ;;  %v3456_v8 = vsel %vm5934_vm5, %v3451_v17, %v3455_v62  ;;  %v2207_v29 = vor.u32 %v2206_v20, %v2203_v19  ;;  %v3468_v33 = vshrl.u32 %v3331_v15, 16  ;;  %v3471_v60 = vshll.u32 %v3331_v15, 16  ;;  %v3333_v62 = vld [vmem:[#allocation2 + $0x54] sm:$0xf]  ;;  %v3360_v5 = vld [vmem:[#allocation2 + $0x5c] sm:$0x1] }
  0xb6   : > { %5631 = vmatprep.subr.bf16.mxu1 %v5843_v13  ;;  %v3466_v34 = vsel %vm5934_vm5, %v3461_v22, %v3465_v11  ;;  %v2216_v35 = vrot.slane %v2214_v26, 4  ;;  %v2222_v40 = vrot.slane %v2220_v27, 5  ;;  %v3477_v43 = vshll.u32 %v3332_v24, 16  ;;  %v6323_v6 = vld [vmem:[#allocation2 + $0x14] sm:$0x1] }
  0xb7   : > { %1883 = vmatpush1.bf16.msra.mxu0 %v5665_v4  ;;  %v5346_v23 = vcombine.low %v3456_v8, %v3466_v34  ;;  %v2208_v41 = vrot.slane %v2207_v29, 4  ;;  %v3470_v42 = vrot.slane %v3468_v33, 4  ;;  %v3473_v46 = vrot.slane %v3471_v60, 5  ;;  %v6331_v8 = vld [vmem:[#allocation2 + $0x80] sm:$0x1] }
  0xb8   : > { %1884 = vmatprep.subr.bf16.mxu0 %v5843_v13  ;;  %v2217_v44 = vor.u32 %v2216_v35, %v2212_v25  ;;  %v3481_v45 = vshrl.u32 %v3332_v24, 16  ;;  %v3487_v36 = vshll.u32 %v3359_v31, 16  ;;  %v1417_v48 = vrot.slane %v6313_v12, 5  ;;  %v2069_v24 = vld [vmem:[#allocation2 + $0x58] sm:$0xf] }
  0xb9   : > { %5643 = vmatpush1.bf16.msra.mxu1 %v5666_v21  ;;  %4049 = vrot.lane.b32.xlu0 %v5346_v23, %s5842_s29  ;;  %v2213_v50 = vsel %vm5934_vm5, %v2208_v41, %v2212_v25  ;;  %v3479_v51 = vrot.slane %v3477_v43, 5  ;;  %v2225_v52 = vshrl.u32 %v2066_v3, 16  ;;  %v3474_v38 = vor.u32 %v3473_v46, %v3470_v42  ;;  %v2094_v35 = vld [vmem:[#allocation2 + $0x5c] sm:$0x1] }
  0xba   : > { %3065 = vmatprep.subr.bf16.mxu1 %v5843_v13  ;;  %v2218_v37 = vrot.slane %v2217_v44, 4  ;;  %v3483_v53 = vrot.slane %v3481_v45, 4  ;;  %v3489_v54 = vrot.slane %v3487_v36, 5  ;;  %v2228_v56 = vshll.u32 %v2066_v3, 16  ;;  %v5671_v12 = vld [vmem:[%s7501_s3 + $0x78] sm:$0xff]  }
  0xbb   : > { %1885 = vmatpush1.bf16.msra.mxu0 %v5666_v21  ;;  %v2227_v55 = vrot.slane %v2225_v52, 4  ;;  %v2234_v39 = vshll.u32 %v2067_v47, 16  ;;  %v2238_v18 = vshrl.u32 %v2067_v47, 16  ;;  %v3475_v57 = vrot.slane %v3474_v38, 4  ;;  %v2068_v21 = vld [vmem:[#allocation2 + $0x54] sm:$0xf] }
  0xbc   : > { %4332 = vmatprep.subr.bf16.mxu0 %v5843_v13  ;;  %v2223_v30 = vsel %vm5934_vm5, %v2218_v37, %v2222_v40  ;;  %v3484_v58 = vor.u32 %v3483_v53, %v3479_v51  ;;  %v2244_v59 = vshll.u32 %v2093_v32, 16  ;;  %v2230_v1 = vrot.slane %v2228_v56, 5  ;;  %v1290_v38 = vld [vmem:[#allocation2 + $0x60] sm:$0xe] }
  0xbd   : > { %v5231_v0 = vcombine.low %v2213_v50, %v2223_v30  ;;  %v2236_v2 = vrot.slane %v2234_v39, 5  ;;  %v2240_v4 = vrot.slane %v2238_v18, 4  ;;  %v1361_v7 = vrot.slane %v6323_v6, 5  ;;  %v6339_v50 = vld [vmem:[#allocation2 + $0x20] sm:$0x1]  ;;  %v5675_v6 = vld [vmem:[%s7501_s3 + $0xd8] sm:$0xff]  }
  0xbe   : > { %v3480_v28 = vsel %vm5934_vm5, %v3475_v57, %v3479_v51  ;;  %v3485_v49 = vrot.slane %v3484_v58, 4  ;;  %v2246_v9 = vrot.slane %v2244_v59, 5  ;;  %v2231_v10 = vor.u32 %v2230_v1, %v2227_v55  ;;  %v3335_v30 = vld [vmem:[#allocation2 + $0x60] sm:$0xf]  ;;  %v1590_v59 = vpop.permute.xlu0 %1589 }
  0xbf   : > { %2784 = vrot.lane.b32.xlu1 %v5231_v0, %s5842_s29  ;;  %v2241_v11 = vor.u32 %v2240_v4, %v2236_v2  ;;  %v3492_v14 = vshrl.u32 %v3333_v62, 16  ;;  %v3495_v15 = vshll.u32 %v3333_v62, 16  ;;  %v3501_v17 = vshll.u32 %v3334_v63, 16  ;;  %v5702_v0 = vld [vmem:[#allocation2 + $0x64] sm:$0xf] }
  0xc0   : > { %v3490_v16 = vsel %vm5934_vm5, %v3485_v49, %v3489_v54  ;;  %v3505_v19 = vshrl.u32 %v3334_v63, 16  ;;  %v3511_v20 = vshll.u32 %v3360_v5, 16  ;;  %v2232_v25 = vrot.slane %v2231_v10, 4  ;;  %v5703_v5 = vld [vmem:[#allocation2 + $0x68] sm:$0x1] }
  0xc1   : > { %v5347_v22 = vcombine.low %v3480_v28, %v3490_v16  ;;  %v2242_v26 = vrot.slane %v2241_v11, 4  ;;  %v3494_v27 = vrot.slane %v3492_v14, 4  ;;  %v1424_v29 = vrot.slane %v6331_v8, 5  ;;  %v5704_v49 = vld [vmem:[#allocation2 + $0x60] sm:$0xf]  ;;  %v5677_v8 = vld [vmem:[%s7501_s3 + $0x90] sm:$0xff]  }
  0xc2   : > { %v3497_v31 = vrot.slane %v3495_v15, 5  ;;  %v3503_v33 = vrot.slane %v3501_v17, 5  ;;  %v3507_v34 = vrot.slane %v3505_v19, 4  ;;  %v2237_v40 = vsel %vm5934_vm5, %v2232_v25, %v2236_v2  ;;  %v3336_v2 = vld [vmem:[#allocation2 + $0x64] sm:$0xf] }
  0xc3   : > { %4051 = vrot.lane.b32.xlu0 %v5347_v22, %s5842_s29  ;;  %v2247_v60 = vsel %vm5934_vm5, %v2242_v26, %v2246_v9  ;;  %v3513_v3 = vrot.slane %v3511_v20, 5  ;;  %v2249_v23 = vshrl.u32 %v2068_v21, 16  ;;  %v2252_v44 = vshll.u32 %v2068_v21, 16  ;;  %v3361_v19 = vld [vmem:[#allocation2 + $0x68] sm:$0x1] }
  0xc4   : > { %v5232_v41 = vcombine.low %v2237_v40, %v2247_v60  ;;  %v3498_v42 = vor.u32 %v3497_v31, %v3494_v27  ;;  %v3508_v43 = vor.u32 %v3507_v34, %v3503_v33  ;;  %v2258_v45 = vshll.u32 %v2069_v24, 16  ;;  %v2070_v22 = vld [vmem:[#allocation2 + $0x60] sm:$0xf]  ;;  %v2071_v31 = vld [vmem:[#allocation2 + $0x64] sm:$0xf] }
  0xc5   : > { %v2251_v46 = vrot.slane %v2249_v23, 4  ;;  %v2262_v36 = vshrl.u32 %v2069_v24, 16  ;;  %v2268_v47 = vshll.u32 %v2094_v35, 16  ;;  %v1368_v51 = vrot.slane %v6339_v50, 5  ;;  %v5667_v35 = vld [vmem:[%s7501_s3 + $0x60] sm:$0xff]   ;;  %v5681_v50 = vld [vmem:[%s7501_s3 + $0xf0] sm:$0xff]  }
  0xc6   : > { %2786 = vrot.lane.b32.xlu1 %v5232_v41, %s5842_s29  ;;  %v3499_v32 = vrot.slane %v3498_v42, 4  ;;  %v3509_v52 = vrot.slane %v3508_v43, 4  ;;  %v2254_v37 = vrot.slane %v2252_v44, 5  ;;  %v2260_v53 = vrot.slane %v2258_v45, 5  ;;  %v6364_v23 = vld [vmem:[#allocation2 + $0x8c] sm:$0x1] }
  0xc7   : > { %v2264_v54 = vrot.slane %v2262_v36, 4  ;;  %v2270_v55 = vrot.slane %v2268_v47, 5  ;;  %v5111_v63 = vrot.slane %v1290_v38, 9  ;;  %v1407_v1 = vrot.slane %v5702_v0, 5 }
  0xc8   : > { %v3504_v56 = vsel %vm5934_vm5, %v3499_v32, %v3503_v33  ;;  %v3514_v39 = vsel %vm5934_vm5, %v3509_v52, %v3513_v3  ;;  %v2255_v18 = vor.u32 %v2254_v37, %v2251_v46  ;;  %v1410_v28 = vrot.slane %v5703_v5, 5  ;;  %v2095_v3 = vld [vmem:[#allocation2 + $0x68] sm:$0x1]  ;;  %v1282_v32 = vld [vmem:[#allocation2] sm:$0xe] }
  0xc9   : > { %v5348_v57 = vcombine.low %v3504_v56, %v3514_v39  ;;  %v2265_v58 = vor.u32 %v2264_v54, %v2260_v53  ;;  %v5127_v9 = vcombine.low %v5704_v49, %v5702_v0  ;;  %v1408_v11 = vsel %vm6347_vm8, %v5111_v63, %v1407_v1  ;;  %v1291_v54 = vld [vmem:[#allocation2 + $0x6c] sm:$0xe]  ;;  %v5707_v5 = vld [vmem:[#allocation2 + $0x4] sm:$0xf]  ;;  %v6378_v49 = vld [vmem:[#allocation2 + $0x98] sm:$0x1] }
  0xca   : > { %v2256_v4 = vrot.slane %v2255_v18, 4  ;;  %v1409_v14 = vrot.slane %v1407_v1, 4  ;;  %v3516_v15 = vshrl.u32 %v3335_v30, 16  ;;  %v3519_v20 = vshll.u32 %v3335_v30, 16  ;;  %v5668_v30 = vld [vmem:[%s7501_s3 + $0x68] sm:$0xff]  }
  0xcb   : > { %4053 = vrot.lane.b32.xlu0 %v5348_v57, %s5842_s29  ;;  %v2266_v10 = vrot.slane %v2265_v58, 4  ;;  %v1688_v17 = vsel %vm1653_vm9, %v5127_v9, %v1590_v59  ;;  %v3525_v21 = vshll.u32 %v3336_v2, 16  ;;  %v3529_v24 = vshrl.u32 %v3336_v2, 16  ;;  %v6372_v57 = vld [vmem:[#allocation2 + $0x2c] sm:$0x1] }
  0xcc   : > { %v2261_v16 = vsel %vm5934_vm5, %v2256_v4, %v2260_v53  ;;  %v1411_v26 = vsel %vm6347_vm8, %v1409_v14, %v1410_v28  ;;  %v3518_v27 = vrot.slane %v3516_v15, 4  ;;  %v3521_v40 = vrot.slane %v3519_v20, 5 }
  0xcd   : > { %v2271_v25 = vsel %vm5934_vm5, %v2266_v10, %v2270_v55  ;;  %v5159_v34 = vcombine.low %v1408_v11, %v1411_v26  ;;  %v3527_v60 = vrot.slane %v3525_v21, 5  ;;  %v1431_v41 = vrot.slane %v6364_v23, 5  ;;  %v5709_v11 = vld [vmem:[#allocation2 + $0x8] sm:$0x1]  ;;  %v5710_v21 = vld [vmem:[#allocation2] sm:$0xf]  ;;  %v1574_v26 = vpop.permute.xlu1 %1573 }
  0xce   : > { %v5233_v33 = vcombine.low %v2261_v16, %v2271_v25  ;;  %v3531_v42 = vrot.slane %v3529_v24, 4  ;;  %v3535_v43 = vshll.u32 %v3361_v19, 16  ;;  %v2273_v44 = vshrl.u32 %v2070_v22, 16  ;;  %v3337_v16 = vld [vmem:[#allocation2 + $0x6c] sm:$0xf]  ;;  %v5670_v25 = vld [vmem:[%s7501_s3 + $0x70] sm:$0xff]  }
  0xcf   : > { %5187 = vmatprep.mubr.msk.bf16.mxu1 %vm1653_vm9, %v5159_v34  ;;  %v3522_v46 = vor.u32 %v3521_v40, %v3518_v27  ;;  %v2276_v45 = vshll.u32 %v2070_v22, 16  ;;  %v2282_v36 = vshll.u32 %v2071_v31, 16  ;;  %v2286_v47 = vshrl.u32 %v2071_v31, 16  ;;  %v5711_v31 = vld [vmem:[#allocation2 + $0x70] sm:$0xf]  ;;  %v5683_v23 = vld [vmem:[%s7501_s3 + $0xa8] sm:$0xff]  }
  0xd0   : > { %2788 = vrot.lane.b32.xlu1 %v5233_v33, %s5842_s29  ;;  %1959 = vmatmul.mubr.bf16.vlgmr.msra.gmra.mrb[0].mxu1 %v1688_v17  ;;  %v3532_v52 = vor.u32 %v3531_v42, %v3527_v60  ;;  %v3537_v37 = vrot.slane %v3535_v43, 5  ;;  %v2275_v38 = vrot.slane %v2273_v44, 4  ;;  %v2292_v53 = vshll.u32 %v2095_v3, 16  ;;  %v5712_v34 = vld [vmem:[#allocation2 + $0x6c] sm:$0xf] }
  0xd1   : > { %3066 = vmatpush1.bf16.msra.mxu1 %v5667_v35  ;;  %v3523_v55 = vrot.slane %v3522_v46, 4  ;;  %v2278_v56 = vrot.slane %v2276_v45, 5  ;;  %v2284_v39 = vrot.slane %v2282_v36, 5  ;;  %v2288_v18 = vrot.slane %v2286_v47, 4  ;;  %v3338_v3 = vld [vmem:[#allocation2 + $0x70] sm:$0xf]  ;;  %v1592_v36 = vpop.permute.xlu0 %1591 }
  0xd2   : > { %v1375_v58 = vrot.slane %v6372_v57, 5  ;;  %v3533_v59 = vrot.slane %v3532_v52, 4  ;;  %v2294_v63 = vrot.slane %v2292_v53, 5  ;;  %3067 = vmatprep.subr.bf16.mxu1 %v5843_v13  ;;  %v5103_v0 = vrot.slane %v1282_v32, 9  ;;  %v3362_v42 = vld [vmem:[#allocation2 + $0x74] sm:$0x1] }
  0xd3   : > { %v3528_v1 = vsel %vm5934_vm5, %v3523_v55, %v3527_v60  ;;  %v2279_v2 = vor.u32 %v2278_v56, %v2275_v38  ;;  %v2289_v4 = vor.u32 %v2288_v18, %v2284_v39  ;;  %v1351_v28 = vrot.slane %v5707_v5, 5  ;;  %v2072_v52 = vld [vmem:[#allocation2 + $0x6c] sm:$0xf]  ;;  %v5669_v53 = vld [vmem:[%s7501_s3 + $0xc0] sm:$0xff]  }
  0xd4   : > { %v1438_v9 = vrot.slane %v6378_v49, 5  ;;  %v3538_v10 = vsel %vm5934_vm5, %v3533_v59, %v3537_v37  ;;  %v1354_v14 = vrot.slane %v5709_v11, 5  ;;  %v5112_v15 = vrot.slane %v1291_v54, 9  ;;  %v2073_v59 = vld [vmem:[#allocation2 + $0x70] sm:$0xf]  ;;  %v5687_v57 = vld [vmem:[%s7501_s3 + $0x108] sm:$0xff]  }
  0xd5   : > { %v5349_v17 = vcombine.low %v3528_v1, %v3538_v10  ;;  %v2280_v19 = vrot.slane %v2279_v2, 4  ;;  %v2290_v20 = vrot.slane %v2289_v4, 4  ;;  %3068 = vmatpush1.bf16.msra.mxu1 %v5668_v30  ;;  %v5119_v22 = vcombine.low %v5710_v21, %v5707_v5  ;;  %v2096_v2 = vld [vmem:[#allocation2 + $0x74] sm:$0x1]  ;;  %v6413_v5 = vld [vmem:[#allocation2 + $0x38] sm:$0x1] }
  0xd6   : > { %v1352_v27 = vsel %vm6347_vm8, %v5103_v0, %v1351_v28  ;;  %v1353_v24 = vrot.slane %v1351_v28, 4  ;;  %v1414_v33 = vrot.slane %v5711_v31, 5  ;;  %v5128_v35 = vcombine.low %v5712_v34, %v5711_v31  ;;  %3069 = vmatprep.subr.bf16.mxu1 %v5843_v13 }
  0xd7   : > { %4055 = vrot.lane.b32.xlu0 %v5349_v17, %s5842_s29  ;;  %v2285_v40 = vsel %vm5934_vm5, %v2280_v19, %v2284_v39  ;;  %v2295_v60 = vsel %vm5934_vm5, %v2290_v20, %v2294_v63  ;;  %v3540_v43 = vshrl.u32 %v3337_v16, 16  ;;  %v3543_v44 = vshll.u32 %v3337_v16, 16  ;;  %v5672_v20 = vld [vmem:[%s7501_s3 + $0xc8] sm:$0xff]  }
  0xd8   : > { %v5234_v46 = vcombine.low %v2285_v40, %v2295_v60  ;;  %v1355_v45 = vsel %vm6347_vm8, %v1353_v24, %v1354_v14  ;;  %v1415_v47 = vsel %vm6347_vm8, %v5112_v15, %v1414_v33  ;;  %v1416_v32 = vrot.slane %v1414_v33, 4  ;;  %v1283_v14 = vld [vmem:[#allocation2 + $0xc] sm:$0xe] }
  0xd9   : > { %v5151_v37 = vcombine.low %v1352_v27, %v1355_v45  ;;  %v1656_v38 = vsel %vm1653_vm9, %v5119_v22, %v1574_v26  ;;  %3070 = vmatpush1.bf16.msra.mxu1 %v5670_v25  ;;  %v3542_v54 = vrot.slane %v3540_v43, 4  ;;  %v3545_v55 = vrot.slane %v3543_v44, 5  ;;  %v1292_v27 = vld [vmem:[#allocation2 + $0x78] sm:$0xe]  ;;  %v5714_v43 = vld [vmem:[#allocation2 + $0x10] sm:$0xf] }
  0xda   : > { %2790 = vrot.lane.b32.xlu1 %v5234_v46, %s5842_s29  ;;  %v1418_v56 = vsel %vm6347_vm8, %v1416_v32, %v1417_v48  ;;  %v3549_v39 = vshll.u32 %v3338_v3, 16  ;;  %v3553_v18 = vshrl.u32 %v3338_v3, 16  ;;  %v3559_v30 = vshll.u32 %v3362_v42, 16  ;;  %3071 = vmatprep.subr.bf16.mxu1 %v5843_v13  ;;  %v1576_v42 = vpop.permute.xlu0 %1575  ;;  %v5715_v45 = vld [vmem:[#allocation2 + $0xc] sm:$0xf] }
  0xdb   : > { %5179 = vmatprep.mubr.msk.bf16.mxu0 %vm1653_vm9, %v5151_v37  ;;  %v5160_v63 = vcombine.low %v1415_v47, %v1418_v56  ;;  %v1692_v0 = vsel %vm1653_vm9, %v5128_v35, %v1592_v36  ;;  %v3546_v1 = vor.u32 %v3545_v55, %v3542_v54  ;;  %v2297_v4 = vshrl.u32 %v2072_v52, 16  ;;  %v5674_v35 = vld [vmem:[%s7501_s3 + $0x80] sm:$0xff]   ;;  %v5716_v32 = vld [vmem:[#allocation2 + $0x7c] sm:$0xf]  ;;  %v5673_v37 = vld [vmem:[%s7501_s3 + $0xd0] sm:$0xff]  }
  0xdc   : > { %v1382_v48 = vrot.slane %v6413_v5, 5  ;;  %1895 = vmatmul.mubr.bf16.vlgmr.msra.gmra.mrb[0].mxu0 %v1656_v38  ;;  %v3551_v28 = vrot.slane %v3549_v39, 5  ;;  %v3555_v10 = vrot.slane %v3553_v18, 4  ;;  %v2300_v11 = vshll.u32 %v2072_v52, 16  ;;  %v3339_v56 = vld [vmem:[#allocation2 + $0x78] sm:$0xf] }
  0xdd   : > { %5188 = vmatprep.mubr.msk.bf16.mxu1 %vm1653_vm9, %v5160_v63  ;;  %4333 = vmatpush1.bf16.msra.mxu0 %v5669_v53  ;;  %v3547_v15 = vrot.slane %v3546_v1, 4  ;;  %v2299_v16 = vrot.slane %v2297_v4, 4  ;;  %v2306_v17 = vshll.u32 %v2073_v59, 16  ;;  %v2310_v19 = vshrl.u32 %v2073_v59, 16  ;;  %v5676_v1 = vld [vmem:[%s7501_s3 + $0x88] sm:$0xff]  }
  0xde   : > { %1967 = vmatmul.mubr.bf16.gmra.mrb[4].mxu1 %v1692_v0  ;;  %v3556_v21 = vor.u32 %v3555_v10, %v3551_v28  ;;  %v3561_v22 = vrot.slane %v3559_v30, 5  ;;  %v2302_v25 = vrot.slane %v2300_v11, 5  ;;  %v2316_v26 = vshll.u32 %v2096_v2, 16  ;;  %4334 = vmatprep.subr.bf16.mxu0 %v5843_v13  ;;  %v1594_v30 = vpop.permute.xlu1 %1593  ;;  %v3340_v0 = vld [vmem:[#allocation2 + $0x7c] sm:$0xf] }
  0xdf   : > { %v3552_v24 = vsel %vm5934_vm5, %v3547_v15, %v3551_v28  ;;  %v2308_v31 = vrot.slane %v2306_v17, 5  ;;  %v2312_v33 = vrot.slane %v2310_v19, 4  ;;  %v5104_v34 = vrot.slane %v1283_v14, 9  ;;  %3072 = vmatpush1.bf16.msra.mxu1 %v5671_v12  ;;  %v5717_v28 = vld [vmem:[#allocation2 + $0x78] sm:$0xf] }
  0xe0   : > { %v3557_v40 = vrot.slane %v3556_v21, 4  ;;  %v2303_v60 = vor.u32 %v2302_v25, %v2299_v16  ;;  %v2318_v3 = vrot.slane %v2316_v26, 5  ;;  %v1358_v44 = vrot.slane %v5714_v43, 5  ;;  %3073 = vmatprep.subr.bf16.mxu1 %v5843_v13  ;;  %v3363_v11 = vld [vmem:[#allocation2 + $0x80] sm:$0x1] }
  0xe1   : > { %v2313_v46 = vor.u32 %v2312_v33, %v2308_v31  ;;  %v5120_v36 = vcombine.low %v5715_v45, %v5714_v43  ;;  %v5113_v47 = vrot.slane %v1292_v27, 9  ;;  %v1421_v52 = vrot.slane %v5716_v32, 5  ;;  %4335 = vmatpush1.bf16.msra.mxu0 %v5672_v20  ;;  %v2074_v19 = vld [vmem:[#allocation2 + $0x78] sm:$0xf]  ;;  %v2075_v25 = vld [vmem:[#allocation2 + $0x7c] sm:$0xf] }
  0xe2   : > { %v3562_v38 = vsel %vm5934_vm5, %v3557_v40, %v3561_v22  ;;  %v2304_v53 = vrot.slane %v2303_v60, 4  ;;  %v1359_v54 = vsel %vm6347_vm8, %v5104_v34, %v1358_v44  ;;  %v1360_v55 = vrot.slane %v1358_v44, 4  ;;  %4336 = vmatprep.subr.bf16.mxu0 %v5843_v13  ;;  %v2097_v33 = vld [vmem:[#allocation2 + $0x80] sm:$0x1]  ;;  %v6464_v34 = vld [vmem:[#allocation2 + $0xa4] sm:$0x1] }
  0xe3   : > { %v5350_v39 = vcombine.low %v3552_v24, %v3562_v38  ;;  %v2314_v18 = vrot.slane %v2313_v46, 4  ;;  %v1660_v59 = vsel %vm1653_vm9, %v5120_v36, %v1576_v42  ;;  %v1422_v63 = vsel %vm6347_vm8, %v5113_v47, %v1421_v52  ;;  %3074 = vmatpush1.bf16.msra.mxu1 %v5674_v35  ;;  %v1284_v46 = vld [vmem:[#allocation2 + $0x18] sm:$0xe]  ;;  %v5678_v45 = vld [vmem:[%s7501_s3 + $0xe0] sm:$0xff]  }
  0xe4   : > { %v2309_v2 = vsel %vm5934_vm5, %v2304_v53, %v2308_v31  ;;  %v1362_v4 = vsel %vm6347_vm8, %v1360_v55, %v1361_v7  ;;  %v1423_v12 = vrot.slane %v1421_v52, 4  ;;  %v5129_v10 = vcombine.low %v5717_v28, %v5716_v32  ;;  %3075 = vmatprep.subr.bf16.mxu1 %v5843_v13  ;;  %v1293_v55 = vld [vmem:[#allocation2 + $0x84] sm:$0xe] }
  0xe5   : > { %4057 = vrot.lane.b32.xlu0 %v5350_v39, %s5842_s29  ;;  %v2319_v14 = vsel %vm5934_vm5, %v2314_v18, %v2318_v3  ;;  %v5152_v15 = vcombine.low %v1359_v54, %v1362_v4  ;;  %v3564_v16 = vshrl.u32 %v3339_v56, 16  ;;  %v3567_v17 = vshll.u32 %v3339_v56, 16  ;;  %4337 = vmatpush1.bf16.msra.mxu0 %v5673_v37  ;;  %v5680_v56 = vld [vmem:[%s7501_s3 + $0x98] sm:$0xff]   ;;  %v6477_v39 = vld [vmem:[#allocation2 + $0x44] sm:$0x1]  ;;  %v1578_v4 = vpop.permute.xlu0 %1577 }
  0xe6   : > { %v5235_v7 = vcombine.low %v2309_v2, %v2319_v14  ;;  %v1425_v20 = vsel %vm6347_vm8, %v1423_v12, %v1424_v29  ;;  %v1696_v21 = vsel %vm1653_vm9, %v5129_v10, %v1594_v30  ;;  %v3573_v22 = vshll.u32 %v3340_v0, 16  ;;  %4338 = vmatprep.subr.bf16.mxu0 %v5843_v13  ;;  %v5720_v12 = vld [vmem:[#allocation2 + $0x1c] sm:$0xf]  ;;  %v5679_v10 = vld [vmem:[%s7501_s3 + $0xe8] sm:$0xff]   ;;  %v5721_v14 = vld [vmem:[#allocation2 + $0x18] sm:$0xf] }
  0xe7   : > { %5180 = vmatprep.mubr.msk.bf16.mxu0 %vm1653_vm9, %v5152_v15  ;;  %v5161_v26 = vcombine.low %v1422_v63, %v1425_v20  ;;  %v3566_v27 = vrot.slane %v3564_v16, 4  ;;  %v3569_v24 = vrot.slane %v3567_v17, 5  ;;  %v3577_v31 = vshrl.u32 %v3340_v0, 16  ;;  %3076 = vmatpush1.bf16.msra.mxu1 %v5676_v1  ;;  %v5722_v17 = vld [vmem:[#allocation2 + $0x88] sm:$0xf] }
  0xe8   : > { %v1445_v29 = vrot.slane %v6464_v34, 5  ;;  %2792 = vrot.lane.b32.xlu1 %v5235_v7, %s5842_s29  ;;  %1903 = vmatmul.mubr.bf16.gmra.mrb[4].mxu0 %v1660_v59  ;;  %v3575_v35 = vrot.slane %v3573_v22, 5  ;;  %v3583_v40 = vshll.u32 %v3363_v11, 16  ;;  %v2321_v60 = vshrl.u32 %v2074_v19, 16  ;;  %v3341_v22 = vld [vmem:[#allocation2 + $0x84] sm:$0xf] }
  0xe9   : > { %5189 = vmatprep.mubr.msk.bf16.mxu1 %vm1653_vm9, %v5161_v26  ;;  %v3570_v3 = vor.u32 %v3569_v24, %v3566_v27  ;;  %v3579_v42 = vrot.slane %v3577_v31, 4  ;;  %v2324_v43 = vshll.u32 %v2074_v19, 16  ;;  %v2330_v44 = vshll.u32 %v2075_v25, 16  ;;  %4339 = vmatpush1.bf16.msra.mxu0 %v5675_v6  ;;  %v1596_v24 = vpop.permute.xlu1 %1595 }
  0xea   : > { %1975 = vmatmul.mubr.bf16.gmra.mrb[8].mxu1 %v1696_v21  ;;  %v3585_v36 = vrot.slane %v3583_v40, 5  ;;  %v2323_v47 = vrot.slane %v2321_v60, 4  ;;  %v2334_v32 = vshrl.u32 %v2075_v25, 16  ;;  %v2340_v52 = vshll.u32 %v2097_v33, 16  ;;  %3077 = vmatprep.subr.bf16.mxu1 %v5843_v13  ;;  %v5682_v25 = vld [vmem:[%s7501_s3 + $0xa0] sm:$0xff]  }
  0xeb   : > { %v3571_v37 = vrot.slane %v3570_v3, 4  ;;  %v3580_v38 = vor.u32 %v3579_v42, %v3575_v35  ;;  %v2326_v53 = vrot.slane %v2324_v43, 5  ;;  %v2332_v54 = vrot.slane %v2330_v44, 5  ;;  %4340 = vmatprep.subr.bf16.mxu0 %v5843_v13  ;;  %3078 = vmatpush1.bf16.msra.mxu1 %v5677_v8  ;;  %v3342_v8 = vld [vmem:[#allocation2 + $0x88] sm:$0xf] }
  0xec   : > { %v1389_v18 = vrot.slane %v6477_v39, 5  ;;  %v2336_v30 = vrot.slane %v2334_v32, 4  ;;  %v2342_v59 = vrot.slane %v2340_v52, 5  ;;  %v5105_v63 = vrot.slane %v1284_v46, 9  ;;  %3079 = vmatprep.subr.bf16.mxu1 %v5843_v13  ;;  %v5723_v3 = vld [vmem:[#allocation2 + $0x84] sm:$0xf] }
  0xed   : > { %v3576_v0 = vsel %vm5934_vm5, %v3571_v37, %v3575_v35  ;;  %v3581_v1 = vrot.slane %v3580_v38, 4  ;;  %v2327_v2 = vor.u32 %v2326_v53, %v2323_v47  ;;  %v1365_v28 = vrot.slane %v5720_v12, 5  ;;  %4341 = vmatpush1.bf16.msra.mxu0 %v5678_v45  ;;  %v3364_v43 = vld [vmem:[#allocation2 + $0x8c] sm:$0x1]  ;;  %v2076_v47 = vld [vmem:[#allocation2 + $0x84] sm:$0xf] }
  0xee   : > { %v2337_v11 = vor.u32 %v2336_v30, %v2332_v54  ;;  %v5121_v15 = vcombine.low %v5721_v14, %v5720_v12  ;;  %v5114_v16 = vrot.slane %v1293_v55, 9  ;;  %v1428_v19 = vrot.slane %v5722_v17, 5  ;;  %4342 = vmatprep.subr.bf16.mxu0 %v5843_v13  ;;  %v2077_v38 = vld [vmem:[#allocation2 + $0x88] sm:$0xf]  ;;  %v2098_v30 = vld [vmem:[#allocation2 + $0x8c] sm:$0x1] }
  0xef   : > { %v3586_v6 = vsel %vm5934_vm5, %v3581_v1, %v3585_v36  ;;  %v2328_v7 = vrot.slane %v2327_v2, 4  ;;  %v1366_v20 = vsel %vm6347_vm8, %v5105_v63, %v1365_v28  ;;  %v1367_v21 = vrot.slane %v1365_v28, 4  ;;  %3080 = vmatpush1.bf16.msra.mxu1 %v5680_v56 }
  0xf0   : > { %v5351_v26 = vcombine.low %v3576_v0, %v3586_v6  ;;  %v2338_v27 = vrot.slane %v2337_v11, 4  ;;  %v1664_v31 = vsel %vm1653_vm9, %v5121_v15, %v1578_v4  ;;  %v1429_v33 = vsel %vm6347_vm8, %v5114_v16, %v1428_v19  ;;  %3081 = vmatprep.subr.bf16.mxu1 %v5843_v13  ;;  %v5684_v11 = vld [vmem:[%s7501_s3 + $0xf8] sm:$0xff]  }
  0xf1   : > { %v2333_v35 = vsel %vm5934_vm5, %v2328_v7, %v2332_v54  ;;  %v1369_v40 = vsel %vm6347_vm8, %v1367_v21, %v1368_v51  ;;  %v1430_v60 = vrot.slane %v1428_v19, 4  ;;  %v5130_v42 = vcombine.low %v5723_v3, %v5722_v17  ;;  %4343 = vmatpush1.bf16.msra.mxu0 %v5679_v10  ;;  %v1285_v10 = vld [vmem:[#allocation2 + $0x24] sm:$0xe]  ;;  %v1294_v21 = vld [vmem:[#allocation2 + $0x90] sm:$0xe] }
  0xf2   : > { %4059 = vrot.lane.b32.xlu0 %v5351_v26, %s5842_s29  ;;  %v2343_v44 = vsel %vm5934_vm5, %v2338_v27, %v2342_v59  ;;  %v5153_v46 = vcombine.low %v1366_v20, %v1369_v40  ;;  %v3588_v45 = vshrl.u32 %v3341_v22, 16  ;;  %v3591_v36 = vshll.u32 %v3341_v22, 16  ;;  %4344 = vmatprep.subr.bf16.mxu0 %v5843_v13  ;;  %v6521_v59 = vld [vmem:[#allocation2 + $0xb0] sm:$0x1]  ;;  %v1580_v40 = vpop.permute.xlu0 %1579 }
  0xf3   : > { %v5236_v51 = vcombine.low %v2333_v35, %v2343_v44  ;;  %v1432_v32 = vsel %vm6347_vm8, %v1430_v60, %v1431_v41  ;;  %v1700_v52 = vsel %vm1653_vm9, %v5130_v42, %v1596_v24  ;;  %v3597_v37 = vshll.u32 %v3342_v8, 16  ;;  %3082 = vmatpush1.bf16.msra.mxu1 %v5682_v25  ;;  %v5686_v22 = vld [vmem:[%s7501_s3 + $0xb0] sm:$0xff]   ;;  %v5726_v60 = vld [vmem:[#allocation2 + $0x28] sm:$0xf]  ;;  %v5685_v42 = vld [vmem:[%s7501_s3 + $0x100] sm:$0xff]  }
  0xf4   : > { %5181 = vmatprep.mubr.msk.bf16.mxu0 %vm1653_vm9, %v5153_v46  ;;  %v5162_v53 = vcombine.low %v1429_v33, %v1432_v32  ;;  %v3590_v54 = vrot.slane %v3588_v45, 4  ;;  %v3593_v55 = vrot.slane %v3591_v36, 5  ;;  %v3601_v56 = vshrl.u32 %v3342_v8, 16  ;;  %3083 = vmatprep.subr.bf16.mxu1 %v5843_v13  ;;  %v6533_v25 = vld [vmem:[#allocation2 + $0x50] sm:$0x1] }
  0xf5   : > { %v1452_v41 = vrot.slane %v6521_v59, 5  ;;  %2794 = vrot.lane.b32.xlu1 %v5236_v51, %s5842_s29  ;;  %1911 = vmatmul.mubr.bf16.gmra.mrb[8].mxu0 %v1664_v31  ;;  %v3599_v63 = vrot.slane %v3597_v37, 5  ;;  %v3607_v0 = vshll.u32 %v3364_v43, 16  ;;  %v2345_v1 = vshrl.u32 %v2076_v47, 16  ;;  %v5727_v44 = vld [vmem:[#allocation2 + $0x24] sm:$0xf] }
  0xf6   : > { %5190 = vmatprep.mubr.msk.bf16.mxu1 %vm1653_vm9, %v5162_v53  ;;  %v3594_v2 = vor.u32 %v3593_v55, %v3590_v54  ;;  %v3603_v4 = vrot.slane %v3601_v56, 4  ;;  %v2348_v12 = vshll.u32 %v2076_v47, 16  ;;  %v2354_v28 = vshll.u32 %v2077_v38, 16  ;;  %4345 = vmatpush1.bf16.msra.mxu0 %v5681_v50  ;;  %v5728_v36 = vld [vmem:[#allocation2 + $0x94] sm:$0xf]  ;;  %v1598_v55 = vpop.permute.xlu1 %1597 }
  0xf7   : > { %1983 = vmatmul.mubr.bf16.gmra.mrb[12].mxu1 %v1700_v52  ;;  %v3609_v14 = vrot.slane %v3607_v0, 5  ;;  %v2347_v15 = vrot.slane %v2345_v1, 4  ;;  %v2358_v16 = vshrl.u32 %v2077_v38, 16  ;;  %v2364_v17 = vshll.u32 %v2098_v30, 16  ;;  %4346 = vmatprep.subr.bf16.mxu0 %v5843_v13  ;;  %v3343_v37 = vld [vmem:[#allocation2 + $0x90] sm:$0xf] }
  0xf8   : > { %v3595_v19 = vrot.slane %v3594_v2, 4  ;;  %v3604_v6 = vor.u32 %v3603_v4, %v3599_v63  ;;  %v2350_v7 = vrot.slane %v2348_v12, 5  ;;  %v2356_v20 = vrot.slane %v2354_v28, 5  ;;  %3084 = vmatpush1.bf16.msra.mxu1 %v5683_v23  ;;  %v5688_v38 = vld [vmem:[%s7501_s3 + $0xb8] sm:$0xff]   ;;  %v3344_v23 = vld [vmem:[#allocation2 + $0x94] sm:$0xf] }
  0xf9   : > { %v1396_v26 = vrot.slane %v6533_v25, 5  ;;  %v2360_v27 = vrot.slane %v2358_v16, 4  ;;  %v2366_v24 = vrot.slane %v2364_v17, 5  ;;  %v5106_v31 = vrot.slane %v1285_v10, 9  ;;  %3085 = vmatprep.subr.bf16.mxu1 %v5843_v13  ;;  %v5729_v2 = vld [vmem:[#allocation2 + $0x90] sm:$0xf] }
  0xfa   : > { %v3600_v33 = vsel %vm5934_vm5, %v3595_v19, %v3599_v63  ;;  %v3605_v8 = vrot.slane %v3604_v6, 4  ;;  %v2351_v35 = vor.u32 %v2350_v7, %v2347_v15  ;;  %v1372_v3 = vrot.slane %v5726_v60, 5  ;;  %4347 = vmatpush1.bf16.msra.mxu0 %v5684_v11  ;;  %v3365_v12 = vld [vmem:[#allocation2 + $0x98] sm:$0x1]  ;;  %v2078_v15 = vld [vmem:[#allocation2 + $0x90] sm:$0xf] }
  0xfb   : > { %v2361_v43 = vor.u32 %v2360_v27, %v2356_v20  ;;  %v5122_v46 = vcombine.low %v5727_v44, %v5726_v60  ;;  %v5115_v45 = vrot.slane %v1294_v21, 9  ;;  %v1435_v47 = vrot.slane %v5728_v36, 5  ;;  %4348 = vmatprep.subr.bf16.mxu0 %v5843_v13  ;;  %v2079_v6 = vld [vmem:[#allocation2 + $0x94] sm:$0xf]  ;;  %v2099_v27 = vld [vmem:[#allocation2 + $0x98] sm:$0x1] }
  0xfc   : > { %v3610_v50 = vsel %vm5934_vm5, %v3605_v8, %v3609_v14  ;;  %v2352_v51 = vrot.slane %v2351_v35, 4  ;;  %v1373_v32 = vsel %vm6347_vm8, %v5106_v31, %v1372_v3  ;;  %v1374_v52 = vrot.slane %v1372_v3, 4  ;;  %3086 = vmatpush1.bf16.msra.mxu1 %v5686_v22  ;;  %v1286_v3 = vld [vmem:[#allocation2 + $0x30] sm:$0xe] }
  0xfd   : > { %v5352_v53 = vcombine.low %v3600_v33, %v3610_v50  ;;  %v2362_v54 = vrot.slane %v2361_v43, 4  ;;  %v1668_v56 = vsel %vm1653_vm9, %v5122_v46, %v1580_v40  ;;  %v1436_v30 = vsel %vm6347_vm8, %v5115_v45, %v1435_v47  ;;  %3087 = vmatprep.subr.bf16.mxu1 %v5843_v13 }
  0xfe   : > { %v2357_v63 = vsel %vm5934_vm5, %v2352_v51, %v2356_v20  ;;  %v1376_v0 = vsel %vm6347_vm8, %v1374_v52, %v1375_v58  ;;  %v1437_v1 = vrot.slane %v1435_v47, 4  ;;  %v5131_v4 = vcombine.low %v5729_v2, %v5728_v36  ;;  %4349 = vmatpush1.bf16.msra.mxu0 %v5685_v42  ;;  %v5691_v42 = vld [vmem:[%s7501_s3 + $0x110] sm:$0xff]   ;;  %v6582_v52 = vld [vmem:[#allocation2 + $0xbc] sm:$0x1] }
  0xff   : > { %4061 = vrot.lane.b32.xlu0 %v5352_v53, %s5842_s29  ;;  %v2367_v28 = vsel %vm5934_vm5, %v2362_v54, %v2366_v24  ;;  %v5154_v10 = vcombine.low %v1373_v32, %v1376_v0  ;;  %v3612_v11 = vshrl.u32 %v3343_v37, 16  ;;  %v3615_v14 = vshll.u32 %v3343_v37, 16  ;;  %4350 = vmatprep.subr.bf16.mxu0 %v5843_v13  ;;  %v6573_v24 = vld [vmem:[#allocation2 + $0x14] sm:$0x1]  ;;  %v1295_v32 = vld [vmem:[#allocation2 + $0x9c] sm:$0xe] }
 0x100   : > { %v5237_v58 = vcombine.low %v2357_v63, %v2367_v28  ;;  %v1439_v16 = vsel %vm6347_vm8, %v1437_v1, %v1438_v9  ;;  %v1704_v17 = vsel %vm1653_vm9, %v5131_v4, %v1598_v55  ;;  %v3621_v19 = vshll.u32 %v3344_v23, 16  ;;  %3088 = vmatpush1.bf16.msra.mxu1 %v5688_v38  ;;  %v5732_v63 = vld [vmem:[#allocation2 + $0x34] sm:$0xf]  ;;  %v5692_v1 = vld [vmem:[%s7501_s3 + $0x118] sm:$0xff]   ;;  %v5733_v4 = vld [vmem:[#allocation2 + $0x30] sm:$0xf] }
 0x101   : > { %5182 = vmatprep.mubr.msk.bf16.mxu0 %vm1653_vm9, %v5154_v10  ;;  %v5163_v7 = vcombine.low %v1436_v30, %v1439_v16  ;;  %v3614_v20 = vrot.slane %v3612_v11, 4  ;;  %v3617_v21 = vrot.slane %v3615_v14, 5  ;;  %v3625_v22 = vshrl.u32 %v3344_v23, 16  ;;  %v1582_v23 = vpop.permute.xlu0 %1581  ;;  %v5734_v10 = vld [vmem:[#allocation2 + $0xa0] sm:$0xf] }
 0x102   : > { %v2557_v31 = vrot.slane %v6573_v24, 5  ;;  %2796 = vrot.lane.b32.xlu1 %v5237_v58, %s5842_s29  ;;  %1919 = vmatmul.mubr.bf16.gmra.mrb[12].mxu0 %v1668_v56  ;;  %v3623_v49 = vrot.slane %v3621_v19, 5  ;;  %v3631_v9 = vshll.u32 %v3365_v12, 16  ;;  %v2369_v33 = vshrl.u32 %v2078_v15, 16  ;;  %v3345_v16 = vld [vmem:[#allocation2 + $0x9c] sm:$0xf] }
 0x103   : > { %5191 = vmatprep.mubr.msk.bf16.mxu1 %vm1653_vm9, %v5163_v7  ;;  %v3618_v8 = vor.u32 %v3617_v21, %v3614_v20  ;;  %v3627_v35 = vrot.slane %v3625_v22, 4  ;;  %v2372_v40 = vshll.u32 %v2078_v15, 16  ;;  %v2378_v60 = vshll.u32 %v2079_v6, 16  ;;  %4351 = vmatpush1.bf16.msra.mxu0 %v5687_v57  ;;  %v3346_v21 = vld [vmem:[#allocation2 + $0xa0] sm:$0xf] }
 0x104   : > { %1991 = vmatmul.mubr.bf16.gmra.mrb[16].mxu1 %v1704_v17  ;;  %v3633_v43 = vrot.slane %v3631_v9, 5  ;;  %v2371_v44 = vrot.slane %v2369_v33, 4  ;;  %v2382_v46 = vshrl.u32 %v2079_v6, 16  ;;  %v2388_v45 = vshll.u32 %v2099_v27, 16  ;;  %4352 = vmatprep.subr.bf16.mxu0 %v5843_v13  ;;  %v1600_v6 = vpop.permute.xlu1 %1599  ;;  %v5757_v24 = vld [vmem:[#allocation2 + $0x1c] sm:$0xf] }
 0x105   : > { %v3619_v36 = vrot.slane %v3618_v8, 4  ;;  %v3628_v47 = vor.u32 %v3627_v35, %v3623_v49  ;;  %v2374_v50 = vrot.slane %v2372_v40, 5  ;;  %v2380_v51 = vrot.slane %v2378_v60, 5  ;;  %v3366_v35 = vld [vmem:[#allocation2 + $0xa4] sm:$0x1] }
 0x106   : > { %v1459_v37 = vrot.slane %v6582_v52, 5  ;;  %v2384_v38 = vrot.slane %v2382_v46, 4  ;;  %v2390_v53 = vrot.slane %v2388_v45, 5  ;;  %v5107_v54 = vrot.slane %v1286_v3, 9  ;;  %v2080_v3 = vld [vmem:[#allocation2 + $0x9c] sm:$0xf] }
 0x107   : > { %v3624_v55 = vsel %vm5934_vm5, %v3619_v36, %v3623_v49  ;;  %v3629_v56 = vrot.slane %v3628_v47, 4  ;;  %v2375_v30 = vor.u32 %v2374_v50, %v2371_v44  ;;  %v1379_v0 = vrot.slane %v5732_v63, 5  ;;  %4353 = vmatpush1.bf16.msra.mxu0 %v5691_v42  ;;  %v5735_v49 = vld [vmem:[#allocation2 + $0x9c] sm:$0xf]  ;;  %v2081_v44 = vld [vmem:[#allocation2 + $0xa0] sm:$0xf] }
 0x108   : > { %v2385_v2 = vor.u32 %v2384_v38, %v2380_v51  ;;  %v5123_v12 = vcombine.low %v5733_v4, %v5732_v63  ;;  %v5116_v28 = vrot.slane %v1295_v32, 9  ;;  %v1442_v11 = vrot.slane %v5734_v10, 5  ;;  %4354 = vmatprep.subr.bf16.mxu0 %v5843_v13  ;;  %v2100_v50 = vld [vmem:[#allocation2 + $0xa4] sm:$0x1] }
 0x109   : > { %v3634_v14 = vsel %vm5934_vm5, %v3629_v56, %v3633_v43  ;;  %v2376_v15 = vrot.slane %v2375_v30, 4  ;;  %v1380_v57 = vsel %vm6347_vm8, %v5107_v54, %v1379_v0  ;;  %v1381_v58 = vrot.slane %v1379_v0, 4  ;;  %v1287_v30 = vld [vmem:[#allocation2 + $0x3c] sm:$0xe] }
 0x10a   : > { %v5353_v17 = vcombine.low %v3624_v55, %v3634_v14  ;;  %v2386_v19 = vrot.slane %v2385_v2, 4  ;;  %v1672_v7 = vsel %vm1653_vm9, %v5123_v12, %v1582_v23  ;;  %v1443_v20 = vsel %vm6347_vm8, %v5116_v28, %v1442_v11 }
 0x10b   : > { %v2381_v13 = vsel %vm5934_vm5, %v2376_v15, %v2380_v51  ;;  %v1383_v22 = vsel %vm6347_vm8, %v1381_v58, %v1382_v48  ;;  %v1444_v27 = vrot.slane %v1442_v11, 4  ;;  %v5132_v9 = vcombine.low %v5735_v49, %v5734_v10  ;;  %4355 = vmatpush1.bf16.msra.mxu0 %v5692_v1  ;;  %v6613_v51 = vld [vmem:[#allocation2 + $0x5c] sm:$0x1]  ;;  %v1296_v10 = vld [vmem:[#allocation2 + $0xa8] sm:$0xe] }
 0x10c   : > { %4063 = vrot.lane.b32.xlu0 %v5353_v17, %s5842_s29  ;;  %v2391_v33 = vsel %vm5934_vm5, %v2386_v19, %v2390_v53  ;;  %v5155_v8 = vcombine.low %v1380_v57, %v1383_v22  ;;  %v3636_v40 = vshrl.u32 %v3345_v16, 16  ;;  %v3639_v60 = vshll.u32 %v3345_v16, 16  ;;  %v6618_v11 = vld [vmem:[#allocation2 + $0x20] sm:$0x1]  ;;  %v5740_v49 = vld [vmem:[#allocation2 + $0xac] sm:$0xf] }
 0x10d   : > { %v5238_v42 = vcombine.low %v2381_v13, %v2391_v33  ;;  %v1446_v5 = vsel %vm6347_vm8, %v1444_v27, %v1445_v29  ;;  %v1708_v48 = vsel %vm1653_vm9, %v5132_v9, %v1600_v6  ;;  %v3645_v43 = vshll.u32 %v3346_v21, 16  ;;  %v1584_v6 = vpop.permute.xlu0 %1583  ;;  %v5739_v13 = vld [vmem:[#allocation2 + $0x3c] sm:$0xf] }
 0x10e   : > { %5183 = vmatprep.mubr.msk.bf16.mxu0 %vm1653_vm9, %v5155_v8  ;;  %v5164_v46 = vcombine.low %v1443_v20, %v1446_v5  ;;  %v3638_v45 = vrot.slane %v3636_v40, 4  ;;  %v3641_v36 = vrot.slane %v3639_v60, 5  ;;  %v3649_v47 = vshrl.u32 %v3346_v21, 16  ;;  %v3347_v60 = vld [vmem:[#allocation2 + $0xa8] sm:$0xf]  ;;  %v1602_v5 = vpop.permute.xlu1 %1601 }
 0x10f   : > { %v1403_v32 = vrot.slane %v6613_v51, 5  ;;  %2798 = vrot.lane.b32.xlu1 %v5238_v42, %s5842_s29  ;;  %1927 = vmatmul.mubr.bf16.gmra.mrb[16].mxu0 %v1672_v7  ;;  %v3647_v34 = vrot.slane %v3645_v43, 5  ;;  %v3655_v29 = vshll.u32 %v3366_v35, 16  ;;  %v2393_v38 = vshrl.u32 %v2080_v3, 16  ;;  %v5738_v7 = vld [vmem:[#allocation2 + $0x40] sm:$0xf] }
 0x110   : > { %5192 = vmatprep.mubr.msk.bf16.mxu1 %vm1653_vm9, %v5164_v46  ;;  %v3642_v53 = vor.u32 %v3641_v36, %v3638_v45  ;;  %v3651_v54 = vrot.slane %v3649_v47, 4  ;;  %v2396_v55 = vshll.u32 %v2080_v3, 16  ;;  %v2402_v56 = vshll.u32 %v2081_v44, 16  ;;  %v5741_v47 = vld [vmem:[#allocation2 + $0xa8] sm:$0xf] }
 0x111   : > { %1999 = vmatmul.mubr.bf16.gmra.mrb[20].mxu1 %v1708_v48  ;;  %v3657_v23 = vrot.slane %v3655_v29, 5  ;;  %v2395_v63 = vrot.slane %v2393_v38, 4  ;;  %v2406_v0 = vshrl.u32 %v2081_v44, 16  ;;  %v2412_v1 = vshll.u32 %v2100_v50, 16  ;;  %v3348_v44 = vld [vmem:[#allocation2 + $0xac] sm:$0xf] }
 0x112   : > { %v3643_v2 = vrot.slane %v3642_v53, 4  ;;  %v3652_v4 = vor.u32 %v3651_v54, %v3647_v34  ;;  %v2398_v12 = vrot.slane %v2396_v55, 5  ;;  %v2404_v28 = vrot.slane %v2402_v56, 5  ;;  %v3367_v38 = vld [vmem:[#allocation2 + $0xb0] sm:$0x1] }
 0x113   : > { %v3824_v14 = vrot.slane %v6618_v11, 5  ;;  %v2408_v15 = vrot.slane %v2406_v0, 4  ;;  %v2414_v57 = vrot.slane %v2412_v1, 5  ;;  %v5108_v58 = vrot.slane %v1287_v30, 9  ;;  %v2082_v55 = vld [vmem:[#allocation2 + $0xa8] sm:$0xf] }
 0x114   : > { %v3648_v16 = vsel %vm5934_vm5, %v3643_v2, %v3647_v34  ;;  %v3653_v17 = vrot.slane %v3652_v4, 4  ;;  %v2399_v19 = vor.u32 %v2398_v12, %v2395_v63  ;;  %v1386_v20 = vrot.slane %v5738_v7, 5  ;;  %v2101_v4 = vld [vmem:[#allocation2 + $0xb0] sm:$0x1]  ;;  %v6645_v12 = vld [vmem:[#allocation2 + $0x20] sm:$0x1] }
 0x115   : > { %v2409_v21 = vor.u32 %v2408_v15, %v2404_v28  ;;  %v5124_v22 = vcombine.low %v5739_v13, %v5738_v7  ;;  %v5117_v27 = vrot.slane %v1296_v10, 9  ;;  %v1449_v9 = vrot.slane %v5740_v49, 5  ;;  %v5755_v51 = vld [vmem:[%s7499_s1] ss:$0 sm:$0xff] }
 0x116   : > { %v3658_v33 = vsel %vm5934_vm5, %v3653_v17, %v3657_v23  ;;  %v2400_v8 = vrot.slane %v2399_v19, 4  ;;  %v1387_v35 = vsel %vm6347_vm8, %v5108_v58, %v1386_v20  ;;  %v1388_v40 = vrot.slane %v1386_v20, 4  ;;  %v2083_v23 = vld [vmem:[#allocation2 + $0xac] sm:$0xf]  ;;  %v1288_v17 = vld [vmem:[#allocation2 + $0x48] sm:$0xe] }
 0x117   : > { %v5354_v3 = vcombine.low %v3648_v16, %v3658_v33  ;;  %v2410_v42 = vrot.slane %v2409_v21, 4  ;;  %v1676_v48 = vsel %vm1653_vm9, %v5124_v22, %v1584_v6  ;;  %v1450_v43 = vsel %vm6347_vm8, %v5117_v27, %v1449_v9 }
 0x118   : > { %v2405_v46 = vsel %vm5934_vm5, %v2400_v8, %v2404_v28  ;;  %v1390_v45 = vsel %vm6347_vm8, %v1388_v40, %v1389_v18  ;;  %v1451_v36 = vrot.slane %v1449_v9, 4  ;;  %v5133_v50 = vcombine.low %v5741_v47, %v5740_v49  ;;  %v1297_v49 = vld [vmem:[#allocation2 + $0xb4] sm:$0xe]  ;;  %v6650_v9 = vld [vmem:[#allocation2 + $0x2c] sm:$0x1] }
 0x119   : > { %4065 = vrot.lane.b32.xlu0 %v5354_v3, %s5842_s29  ;;  %v2415_v34 = vsel %vm5934_vm5, %v2410_v42, %v2414_v57  ;;  %v5156_v29 = vcombine.low %v1387_v35, %v1390_v45  ;;  %v3660_v53 = vshrl.u32 %v3347_v60, 16  ;;  %v3663_v54 = vshll.u32 %v3347_v60, 16  ;;  %v5746_v47 = vld [vmem:[#allocation2 + $0xb8] sm:$0xf] }
 0x11a   : > { %v5239_v56 = vcombine.low %v2405_v46, %v2415_v34  ;;  %v1453_v39 = vsel %vm6347_vm8, %v1451_v36, %v1452_v41  ;;  %v1712_v18 = vsel %vm1653_vm9, %v5133_v50, %v1602_v5  ;;  %v3669_v30 = vshll.u32 %v3348_v44, 16  ;;  %v1586_v5 = vpop.permute.xlu0 %1585  ;;  %v5745_v46 = vld [vmem:[#allocation2 + $0x48] sm:$0xf] }
 0x11b   : > { %5184 = vmatprep.mubr.msk.bf16.mxu0 %vm1653_vm9, %v5156_v29  ;;  %v5165_v63 = vcombine.low %v1450_v43, %v1453_v39  ;;  %v3662_v0 = vrot.slane %v3660_v53, 4  ;;  %v3665_v1 = vrot.slane %v3663_v54, 5  ;;  %v3673_v2 = vshrl.u32 %v3348_v44, 16  ;;  %v3349_v54 = vld [vmem:[#allocation2 + $0xb4] sm:$0xf]  ;;  %v1604_v39 = vpop.permute.xlu1 %1603 }
 0x11c   : > { %v2564_v28 = vrot.slane %v6645_v12, 5  ;;  %2800 = vrot.lane.b32.xlu1 %v5239_v56, %s5842_s29  ;;  %1935 = vmatmul.mubr.bf16.gmra.mrb[20].mxu0 %v1676_v48  ;;  %v3671_v59 = vrot.slane %v3669_v30, 5  ;;  %v3679_v41 = vshll.u32 %v3367_v38, 16  ;;  %v2417_v10 = vshrl.u32 %v2082_v55, 16  ;;  %v5744_v48 = vld [vmem:[#allocation2 + $0x4c] sm:$0xf] }
 0x11d   : > { %5193 = vmatprep.mubr.msk.bf16.mxu1 %vm1653_vm9, %v5165_v63  ;;  %v3666_v15 = vor.u32 %v3665_v1, %v3662_v0  ;;  %v3675_v57 = vrot.slane %v3673_v2, 4  ;;  %v2420_v58 = vshll.u32 %v2082_v55, 16  ;;  %v2426_v16 = vshll.u32 %v2083_v23, 16  ;;  %v5747_v2 = vld [vmem:[#allocation2 + $0xb4] sm:$0xf] }
 0x11e   : > { %2007 = vmatmul.mubr.bf16.gmra.mrb[24].mxu1 %v1712_v18  ;;  %v3681_v19 = vrot.slane %v3679_v41, 5  ;;  %v2419_v6 = vrot.slane %v2417_v10, 4  ;;  %v2430_v7 = vshrl.u32 %v2083_v23, 16  ;;  %v2436_v20 = vshll.u32 %v2101_v4, 16  ;;  %v6662_v23 = vld [vmem:[#allocation2 + $0xb8] sm:$0xf] }
 0x11f   : > { %v3667_v21 = vrot.slane %v3666_v15, 4  ;;  %v3676_v13 = vor.u32 %v3675_v57, %v3671_v59  ;;  %v2422_v22 = vrot.slane %v2420_v58, 5  ;;  %v2428_v27 = vrot.slane %v2426_v16, 5  ;;  %v6673_v10 = vld [vmem:[#allocation2 + $0xbc] sm:$0x1] }
 0x120   : > { %v3831_v33 = vrot.slane %v6650_v9, 5  ;;  %v2432_v8 = vrot.slane %v2430_v7, 4  ;;  %v2438_v35 = vrot.slane %v2436_v20, 5  ;;  %v5109_v40 = vrot.slane %v1288_v17, 9  ;;  %v2084_v58 = vld [vmem:[#allocation2 + $0xb4] sm:$0xf] }
 0x121   : > { %v3672_v60 = vsel %vm5934_vm5, %v3667_v21, %v3671_v59  ;;  %v3677_v3 = vrot.slane %v3676_v13, 4  ;;  %v2423_v42 = vor.u32 %v2422_v22, %v2419_v6  ;;  %v1393_v43 = vrot.slane %v5744_v48, 5  ;;  %v6685_v13 = vld [vmem:[#allocation2 + $0xbc] sm:$0x1]  ;;  %v6687_v22 = vld [vmem:[#allocation2 + $0x2c] sm:$0x1] }
 0x122   : > { %v2433_v44 = vor.u32 %v2432_v8, %v2428_v27  ;;  %v5125_v45 = vcombine.low %v5745_v46, %v5744_v48  ;;  %v5118_v36 = vrot.slane %v1297_v49, 9  ;;  %v1456_v50 = vrot.slane %v5746_v47, 5 }
 0x123   : > { %v3682_v34 = vsel %vm5934_vm5, %v3677_v3, %v3681_v19  ;;  %v2424_v29 = vrot.slane %v2423_v42, 4  ;;  %v1394_v38 = vsel %vm6347_vm8, %v5109_v40, %v1393_v43  ;;  %v1395_v53 = vrot.slane %v1393_v43, 4  ;;  %v6681_v19 = vld [vmem:[#allocation2 + $0xb8] sm:$0xf]  ;;  %v1289_v43 = vld [vmem:[#allocation2 + $0x54] sm:$0xe] }
 0x124   : > { %v5355_v55 = vcombine.low %v3672_v60, %v3682_v34  ;;  %v2434_v56 = vrot.slane %v2433_v44, 4  ;;  %v1680_v18 = vsel %vm1653_vm9, %v5125_v45, %v1586_v5  ;;  %v1457_v30 = vsel %vm6347_vm8, %v5118_v36, %v1456_v50  ;;  %v6699_v34 = vld [vmem:[#allocation2 + $0x38] sm:$0x1] }
 0x125   : > { %v2429_v63 = vsel %vm5934_vm5, %v2424_v29, %v2428_v27  ;;  %v1397_v0 = vsel %vm6347_vm8, %v1395_v53, %v1396_v26  ;;  %v1458_v1 = vrot.slane %v1456_v50, 4  ;;  %v5134_v4 = vcombine.low %v5747_v2, %v5746_v47  ;;  %v6696_v47 = vld [vmem:[#allocation2 + $0x38] sm:$0x1]  ;;  %v5751_v53 = vld [vmem:[#allocation2 + $0xc] sm:$0xf]  ;;  %v2777_v2 = vpop.permute.xlu1 %2776 }
 0x126   : > { %4067 = vrot.lane.b32.xlu0 %v5355_v55, %s5842_s29  ;;  %v2439_v59 = vsel %vm5934_vm5, %v2434_v56, %v2438_v35  ;;  %v5157_v41 = vcombine.low %v1394_v38, %v1397_v0  ;;  %v3684_v15 = vshrl.u32 %v3349_v54, 16  ;;  %v3687_v57 = vshll.u32 %v3349_v54, 16  ;;  %v5752_v54 = vld [vmem:[#allocation2 + $0x10] sm:$0xf]  ;;  %v2488_v56 = vld [vmem:[#allocation2 + $0xc] sm:$0xe] }
 0x127   : > { %v5240_v16 = vcombine.low %v2429_v63, %v2439_v59  ;;  %v1460_v25 = vsel %vm6347_vm8, %v1458_v1, %v1459_v37  ;;  %v1716_v26 = vsel %vm1653_vm9, %v5134_v4, %v1604_v39  ;;  %v3693_v17 = vshll.u32 %v6662_v23, 16  ;;  %v5753_v4 = vld [vmem:[#allocation2 + $0x58] sm:$0xf] }
 0x128   : > { %5185 = vmatprep.mubr.msk.bf16.mxu0 %vm1653_vm9, %v5157_v41  ;;  %v5166_v6 = vcombine.low %v1457_v30, %v1460_v25  ;;  %v3686_v7 = vrot.slane %v3684_v15, 4  ;;  %v3689_v20 = vrot.slane %v3687_v57, 5  ;;  %v3697_v21 = vshrl.u32 %v6662_v23, 16  ;;  %v5754_v41 = vld [vmem:[#allocation2 + $0x54] sm:$0xf] }
 0x129   : > { %v2571_v52 = vrot.slane %v6687_v22, 5  ;;  %2802 = vrot.lane.b32.xlu1 %v5240_v16, %s5842_s29  ;;  %1943 = vmatmul.mubr.bf16.gmra.mrb[24].mxu0 %v1680_v18  ;;  %v3695_v37 = vrot.slane %v3693_v17, 5  ;;  %v3703_v27 = vshll.u32 %v6673_v10, 16  ;;  %v2441_v49 = vshrl.u32 %v2084_v58, 16 }
 0x12a   : > { %5194 = vmatprep.mubr.msk.bf16.mxu1 %vm1653_vm9, %v5166_v6  ;;  %v3690_v8 = vor.u32 %v3689_v20, %v3686_v7  ;;  %v3699_v35 = vrot.slane %v3697_v21, 4  ;;  %v2444_v40 = vshll.u32 %v2084_v58, 16  ;;  %v2450_v60 = vshll.u32 %v6681_v19, 16  ;;  %v1588_v7 = vpop.permute.xlu0 %1587 }
 0x12b   : > { %2015 = vmatmul.mubr.bf16.gmra.mrb[28].mxu1 %v1716_v26  ;;  %v3705_v3 = vrot.slane %v3703_v27, 5  ;;  %v2443_v42 = vrot.slane %v2441_v49, 4  ;;  %v2454_v5 = vshrl.u32 %v6681_v19, 16  ;;  %v2460_v48 = vshll.u32 %v6685_v13, 16  ;;  %v5619_v26 = vld [vmem:[%s5904_s26 + $0x78] sm:$0xff]  }
 0x12c   : > { %v3691_v44 = vrot.slane %v3690_v8, 4  ;;  %v3700_v46 = vor.u32 %v3699_v35, %v3695_v37  ;;  %v2446_v45 = vrot.slane %v2444_v40, 5  ;;  %v2452_v36 = vrot.slane %v2450_v60, 5  ;;  %v3755_v35 = vld [vmem:[#allocation2 + $0x18] sm:$0xe] }
 0x12d   : > { %v3838_v50 = vrot.slane %v6696_v47, 5  ;;  %v2578_v29 = vrot.slane %v6699_v34, 5  ;;  %v2456_v38 = vrot.slane %v2454_v5, 4  ;;  %v5211_v55 = vcombine.low %v5751_v53, %v5752_v54  ;;  %v2489_v5 = vld [vmem:[#allocation2 + $0x18] sm:$0xe] }
 0x12e   : > { %v3696_v39 = vsel %vm5934_vm5, %v3691_v44, %v3695_v37  ;;  %v3701_v18 = vrot.slane %v3700_v46, 4  ;;  %v2447_v30 = vor.u32 %v2446_v45, %v2443_v42  ;;  %v5110_v63 = vrot.slane %v1289_v43, 9  ;;  %v6726_v45 = vld [vmem:[#allocation2 + $0xcc] sm:$0xf] }
 0x12f   : > { %v2457_v0 = vor.u32 %v2456_v38, %v2452_v36  ;;  %v2462_v1 = vrot.slane %v2460_v48, 5  ;;  %v1400_v59 = vrot.slane %v5753_v4, 5  ;;  %v5126_v15 = vcombine.low %v5754_v41, %v5753_v4  ;;  %v6740_v4 = vld [vmem:[#allocation2 + $0xd0] sm:$0xf] }
 0x130   : > { %v3706_v57 = vsel %vm5934_vm5, %v3701_v18, %v3705_v3  ;;  %v2448_v58 = vrot.slane %v2447_v30, 4  ;;  %v5195_v16 = vrot.slane %v2488_v56, 9  ;;  %v2554_v25 = vrot.slane %v5752_v54, 5  ;;  %v6731_v54 = vld [vmem:[#allocation2 + $0x44] sm:$0x1] }
 0x131   : > { %v5356_v17 = vcombine.low %v3696_v39, %v3706_v57  ;;  %v2458_v6 = vrot.slane %v2457_v0, 4  ;;  %v1401_v20 = vsel %vm6347_vm8, %v5110_v63, %v1400_v59  ;;  %v1402_v21 = vrot.slane %v1400_v59, 4  ;;  %v5758_v39 = vld [vmem:[#allocation2 + $0x1c] sm:$0xf]  ;;  %v5759_v30 = vld [vmem:[%s7500_s2] ss:$0 sm:$0xff] }
 0x132   : > { %v2453_v37 = vsel %vm5934_vm5, %v2448_v58, %v2452_v36  ;;  %v2858_v27 = vsel %vm1653_vm9, %v5211_v55, %v2777_v2  ;;  %v2555_v49 = vsel %vm6347_vm8, %v5195_v16, %v2554_v25  ;;  %v2556_v8 = vrot.slane %v2554_v25, 4 }
 0x133   : > { %4069 = vrot.lane.b32.xlu0 %v5356_v17, %s5842_s29  ;;  %v2463_v40 = vsel %vm5934_vm5, %v2458_v6, %v2462_v1  ;;  %v1404_v60 = vsel %vm6347_vm8, %v1402_v21, %v1403_v32  ;;  %v5603_v3 = vunpack.c.l.bf16 %v5619_v26  ;;  %v5604_v42 = vunpack.c.h.bf16 %v5619_v26  ;;  %v5760_v1 = vld [vmem:[#allocation2 + $0x18] sm:$0xf]  ;;  %v4044_v26 = vpop.permute.xlu0 %4043 }
 0x134   : > { %v5241_v48 = vcombine.low %v2453_v37, %v2463_v40  ;;  %v5158_v43 = vcombine.low %v1401_v20, %v1404_v60  ;;  %v1684_v44 = vsel %vm1653_vm9, %v5126_v15, %v1588_v7  ;;  %v2558_v46 = vsel %vm6347_vm8, %v2556_v8, %v2557_v31  ;;  %v5761_v17 = vld [vmem:[#allocation2 + $0x18] sm:$0xf]  ;;  %v2779_v20 = vpop.permute.xlu1 %2778 }
 0x135   : > { %v5243_v36 = vcombine.low %v2555_v49, %v2558_v46  ;;  %v341_v32 = vmul.f32 %v5755_v51, %v5603_v3  ;;  %v342_v38 = vmul.f32 %v5755_v51, %v5604_v42  ;;  %v5311_v53 = vrot.slane %v3755_v35, 9  ;;  %v6757_v3 = vld [vmem:[#allocation2 + $0x44] sm:$0x1]  ;;  %v2490_v46 = vld [vmem:[#allocation2 + $0x24] sm:$0xe] }
 0x136   : > { %v3845_v55 = vrot.slane %v6731_v54, 5  ;;  %2804 = vrot.lane.b32.xlu1 %v5241_v48, %s5842_s29  ;;  %5186 = vmatprep.mubr.msk.bf16.mxu0 %vm1653_vm9, %v5158_v43  ;;  %v3821_v31 = vrot.slane %v5757_v24, 5  ;;  %v5196_v56 = vrot.slane %v2489_v5, 9  ;;  %v2561_v18 = vrot.slane %v5758_v39, 5  ;;  %v3756_v5 = vld [vmem:[#allocation2 + $0x24] sm:$0xe] }
 0x137   : > { %1951 = vmatmul.mubr.bf16.gmra.mrb[28].mxu0 %v1684_v44  ;;  %5295 = vmatprep.mubr.msk.bf16.mxu1 %vm1653_vm9, %v5243_v36  ;;  %v380_v63 = vadd.f32 %v5759_v30, %v341_v32  ;;  %v381_v0 = vadd.f32 %v5759_v30, %v342_v38  ;;  %v5327_v2 = vcombine.low %v5760_v1, %v5757_v24  ;;  %v3732_v59 = vshrl.u32 %v6726_v45, 16  ;;  %v6772_v30 = vld [vmem:[#allocation2 + $0x50] sm:$0x1]  ;;  %v5765_v1 = vld [vmem:[#allocation2 + $0x28] sm:$0xf] }
 0x138   : > { %3098 = vmatmul.mubr.bf16.vlgmr.msra.gmra.mrb[32].mxu1 %v2858_v27  ;;  %v3822_v41 = vsel %vm6347_vm8, %v5311_v53, %v3821_v31  ;;  %v3823_v15 = vrot.slane %v3821_v31, 4  ;;  %v2562_v57 = vsel %vm6347_vm8, %v5196_v56, %v2561_v18  ;;  %v2563_v58 = vrot.slane %v2561_v18, 4  ;;  %v6770_v53 = vld [vmem:[#allocation2 + $0xd4] sm:$0x1] }
 0x139   : > { %v412_v16 = vmax.f32 %v380_v63, 0.0  ;;  %v413_v25 = vmax.f32 %v381_v0, 0.0  ;;  %v5212_v6 = vcombine.low %v5761_v17, %v5758_v39  ;;  %v3734_v7 = vrot.slane %v3732_v59, 4  ;;  %v5763_v39 = vld [vmem:[#allocation2 + $0x28] sm:$0xf] }
 0x13a   : > { %v3825_v21 = vsel %vm6347_vm8, %v3823_v15, %v3824_v14  ;;  %v2565_v37 = vsel %vm6347_vm8, %v2563_v58, %v2564_v28  ;;  %v3735_v27 = vshll.u32 %v6726_v45, 16  ;;  %v3741_v49 = vshll.u32 %v6740_v4, 16  ;;  %v5766_v59 = vld [vmem:[#allocation2 + $0x24] sm:$0xf]  ;;  %v3757_v15 = vld [vmem:[#allocation2 + $0x30] sm:$0xe] }
 0x13b   : > { %v492_v8 = vrot.slane %v412_v16, 7  ;;  %v493_v35 = vrot.slane %v413_v25, 7  ;;  %v5359_v40 = vcombine.low %v3822_v41, %v3825_v21  ;;  %v5244_v60 = vcombine.low %v2562_v57, %v2565_v37  ;;  %v6778_v57 = vld [vmem:[#allocation2 + $0x50] sm:$0x1]  ;;  %v4046_v16 = vpop.permute.xlu0 %4045  ;;  %v5768_v17 = vld [vmem:[#allocation2 + $0x24] sm:$0xf]  ;;  %v2781_v21 = vpop.permute.xlu1 %2780 }
 0x13c   : > { %v2585_v11 = vrot.slane %v6757_v3, 5  ;;  %v4125_v42 = vsel %vm1653_vm9, %v5327_v2, %v4044_v26  ;;  %v3737_v14 = vrot.slane %v3735_v27, 5  ;;  %v3745_v12 = vshrl.u32 %v6740_v4, 16 }
 0x13d   : > { %v494_v28 = vsel %vm446_vm2, %v492_v8, %v493_v35  ;;  %v558_v48 = vsel %vm446_vm2, 0.0, %v492_v8  ;;  %v574_v43 = vsel %vm446_vm2, %v493_v35, 0.0  ;;  %5411 = vmatprep.mubr.msk.bf16.mxu0 %vm1653_vm9, %v5359_v40  ;;  %5296 = vmatprep.mubr.msk.bf16.mxu1 %vm1653_vm9, %v5244_v60  ;;  %v2862_v44 = vsel %vm1653_vm9, %v5212_v6, %v2779_v20  ;;  %v6787_v8 = vld [vmem:[#allocation2 + $0x5c] sm:$0x1] }
 0x13e   : > { %v5506_v36 = vpack.c.bf16 %v558_v48, %v558_v48  ;;  %v5507_v51 = vpack.c.bf16 %v494_v28, %v494_v28  ;;  %v5508_v32 = vpack.c.bf16 %v574_v43, %v574_v43  ;;  %v6768_v38 = vrot.slane %v3741_v49, 5  ;;  %v2491_v49 = vld [vmem:[#allocation2 + $0x30] sm:$0xe]  ;;  %v5770_v28 = vld [vmem:[#allocation2 + $0x34] sm:$0xf] }
 0x13f   : > { %4365 = vmatmul.mubr.bf16.vlgmr.msra.gmra.mrb[32].mxu0 %v4125_v42  ;;  %v3738_v24 = vor.u32 %v3737_v14, %v3734_v7  ;;  %v3747_v31 = vrot.slane %v3745_v12, 4  ;;  %v5312_v56 = vrot.slane %v3756_v5, 9  ;;  %v3828_v18 = vrot.slane %v5763_v39, 5  ;;  %v4048_v22 = vpop.permute.xlu0 %4047 }
 0x140   : > { %v3852_v63 = vrot.slane %v6772_v30, 5  ;;  %841 = vst.msk [vmem:[#allocation2 + $0xc0] sm:$0xf] %vm791_vm0, %v5506_v36  ;;  %842 = vst.msk [vmem:[#allocation2 + $0xc4] sm:$0xf] %vm791_vm0, %v5507_v51  ;;  %3106 = vmatmul.mubr.bf16.gmra.mrb[36].mxu1 %v2862_v44  ;;  %v5197_v0 = vrot.slane %v2490_v46, 9  ;;  %v5328_v41 = vcombine.low %v5766_v59, %v5763_v39  ;;  %v5213_v6 = vcombine.low %v5768_v17, %v5765_v1 }
 0x141   : > { %843 = vst.msk [vmem:[#allocation2 + $0xc8] sm:$0x1] %vm794_vm1, %v5508_v32  ;;  %v2568_v2 = vrot.slane %v5765_v1, 5  ;;  %v2592_v58 = vrot.slane %v6778_v57, 5  ;;  %v3829_v25 = vsel %vm6347_vm8, %v5312_v56, %v3828_v18  ;;  %v3830_v26 = vrot.slane %v3828_v18, 4 }
 0x142   : > { %v3748_v7 = vor.u32 %v3747_v31, %v6768_v38  ;;  %v3751_v20 = vshll.u32 %v6770_v53, 16  ;;  %v6790_v40 = vrot.slane %v3738_v24, 4  ;;  %v5313_v42 = vrot.slane %v3757_v15, 9  ;;  %v5771_v36 = vld [vmem:[#allocation2 + $0x30] sm:$0xf] }
 0x143   : > { %v2569_v37 = vsel %vm6347_vm8, %v5197_v0, %v2568_v2  ;;  %v2570_v27 = vrot.slane %v2568_v2, 4  ;;  %v3832_v60 = vsel %vm6347_vm8, %v3830_v26, %v3831_v33  ;;  %v4129_v5 = vsel %vm1653_vm9, %v5328_v41, %v4046_v16  ;;  %v5772_v24 = vld [vmem:[#allocation2 + $0x34] sm:$0xf]  ;;  %v5773_v1 = vld [vmem:[#allocation2 + $0x30] sm:$0xf] }
 0x144   : > { %v5360_v14 = vcombine.low %v3829_v25, %v3832_v60  ;;  %v3835_v48 = vrot.slane %v5770_v28, 5  ;;  %v2866_v44 = vsel %vm1653_vm9, %v5213_v6, %v2781_v21  ;;  %v5198_v46 = vrot.slane %v2491_v49, 9  ;;  %v5781_v30 = vld [vmem:[#allocation2 + $0x48] sm:$0xf] }
 0x145   : > { %v2572_v12 = vsel %vm6347_vm8, %v2570_v27, %v2571_v52  ;;  %v5329_v9 = vcombine.low %v5771_v36, %v5770_v28  ;;  %v6802_v51 = vrot.slane %v3748_v7, 4  ;;  %v6804_v33 = vrot.slane %v3751_v20, 5 }
 0x146   : > { %v5245_v43 = vcombine.low %v2569_v37, %v2572_v12  ;;  %5412 = vmatprep.mubr.msk.bf16.mxu0 %vm1653_vm9, %v5360_v14  ;;  %v3837_v32 = vrot.slane %v3835_v48, 4  ;;  %v2575_v52 = vrot.slane %v5772_v24, 5  ;;  %v3744_v18 = vsel %vm5934_vm5, %v6790_v40, %v6768_v38  ;;  %v6889_v40 = vld [vmem:[#allocation2 + $0x58] sm:$0xf] }
 0x147   : > { %v6807_v31 = vld [vmem:[#allocation2 + $0xc0] sm:$0xf]  ;;  %v6809_v56 = vld [vmem:[#allocation2 + $0xc4] sm:$0xf]  ;;  %4373 = vmatmul.mubr.bf16.gmra.mrb[36].mxu0 %v4129_v5  ;;  %v3836_v0 = vsel %vm6347_vm8, %v5313_v42, %v3835_v48  ;;  %v5214_v2 = vcombine.low %v5773_v1, %v5772_v24  ;;  %v4133_v21 = vsel %vm1653_vm9, %v5329_v9, %v4048_v22  ;;  %v2783_v42 = vpop.permute.xlu1 %2782  ;;  %v3754_v34 = vsel %vm5934_vm5, %v6802_v51, %v6804_v33 }
 0x148   : > { %v6811_v39 = vld [vmem:[#allocation2 + $0xc8] sm:$0x1]  ;;  %5297 = vmatprep.mubr.msk.bf16.mxu1 %vm1653_vm9, %v5245_v43  ;;  %v3708_v59 = vshrl.u32 %v6807_v31, 16  ;;  %v3711_v41 = vshll.u32 %v6807_v31, 16  ;;  %v3717_v15 = vshll.u32 %v6809_v56, 16  ;;  %v3721_v16 = vshrl.u32 %v6809_v56, 16 }
 0x149   : > { %v6824_v25 = vld [vmem:[#allocation2 + $0xc0] sm:$0xf]  ;;  %3114 = vmatmul.mubr.bf16.gmra.mrb[40].mxu1 %v2866_v44  ;;  %v3727_v26 = vshll.u32 %v6811_v39, 16  ;;  %v6827_v17 = vld [vmem:[#allocation2 + $0xc4] sm:$0xf]  ;;  %v3839_v7 = vsel %vm6347_vm8, %v3837_v32, %v3838_v50  ;;  %v2576_v20 = vsel %vm6347_vm8, %v5198_v46, %v2575_v52  ;;  %v2870_v22 = vsel %vm1653_vm9, %v5214_v2, %v2783_v42 }
 0x14a   : > { %v6829_v6 = vld [vmem:[#allocation2 + $0xc8] sm:$0x1]  ;;  %v3710_v37 = vrot.slane %v3708_v59, 4  ;;  %v3713_v27 = vrot.slane %v3711_v41, 5  ;;  %v3719_v49 = vrot.slane %v3717_v15, 5  ;;  %v3723_v60 = vrot.slane %v3721_v16, 4 }
 0x14b   : > { %v3729_v14 = vrot.slane %v3727_v26, 5  ;;  %v2465_v12 = vshrl.u32 %v6824_v25, 16  ;;  %v2468_v5 = vshll.u32 %v6824_v25, 16  ;;  %v2474_v47 = vshll.u32 %v6827_v17, 16  ;;  %v3758_v44 = vld [vmem:[#allocation2 + $0x3c] sm:$0xe] }
 0x14c   : > { %v3714_v28 = vor.u32 %v3713_v27, %v3710_v37  ;;  %v3724_v48 = vor.u32 %v3723_v60, %v3719_v49  ;;  %v2478_v50 = vshrl.u32 %v6827_v17, 16  ;;  %v2484_v43 = vshll.u32 %v6829_v6, 16  ;;  %v2492_v41 = vld [vmem:[#allocation2 + $0x3c] sm:$0xe] }
 0x14d   : > { %v2467_v46 = vrot.slane %v2465_v12, 4  ;;  %v2470_v36 = vrot.slane %v2468_v5, 5  ;;  %v2476_v9 = vrot.slane %v2474_v47, 5  ;;  %v5361_v16 = vcombine.low %v3836_v0, %v3839_v7  ;;  %v5774_v5 = vld [vmem:[#allocation2 + $0x40] sm:$0xf] }
 0x14e   : > { %v3715_v32 = vrot.slane %v3714_v28, 4  ;;  %v3725_v24 = vrot.slane %v3724_v48, 4  ;;  %v2480_v1 = vrot.slane %v2478_v50, 4  ;;  %v2486_v59 = vrot.slane %v2484_v43, 5  ;;  %v3759_v7 = vld [vmem:[#allocation2 + $0x48] sm:$0xe] }
 0x14f   : > { %v2471_v15 = vor.u32 %v2470_v36, %v2467_v46  ;;  %v2577_v26 = vrot.slane %v2575_v52, 4  ;;  %v5314_v37 = vrot.slane %v3758_v44, 9  ;;  %v3842_v47 = vrot.slane %v5774_v5, 5  ;;  %5413 = vmatprep.mubr.msk.bf16.mxu0 %vm1653_vm9, %v5361_v16  ;;  %v5776_v43 = vld [vmem:[#allocation2 + $0x3c] sm:$0xf]  ;;  %v4050_v46 = vpop.permute.xlu0 %4049 }
 0x150   : > { %v3720_v27 = vsel %vm5934_vm5, %v3715_v32, %v3719_v49  ;;  %v3730_v60 = vsel %vm5934_vm5, %v3725_v24, %v3729_v14  ;;  %v2481_v12 = vor.u32 %v2480_v1, %v2476_v9  ;;  %v5199_v52 = vrot.slane %v2492_v41, 9  ;;  %4381 = vmatmul.mubr.bf16.gmra.mrb[40].mxu0 %v4133_v21  ;;  %v3760_v41 = vld [vmem:[#allocation2 + $0x54] sm:$0xe] }
 0x151   : > { %v5357_v35 = vcombine.low %v3720_v27, %v3730_v60  ;;  %v2472_v2 = vrot.slane %v2471_v15, 4  ;;  %v2579_v0 = vsel %vm6347_vm8, %v2577_v26, %v2578_v29  ;;  %v3843_v49 = vsel %vm6347_vm8, %v5314_v37, %v3842_v47  ;;  %v5775_v29 = vld [vmem:[#allocation2 + $0x40] sm:$0xf]  ;;  %v5779_v60 = vld [vmem:[#allocation2 + $0x4c] sm:$0xf] }
 0x152   : > { %v2482_v42 = vrot.slane %v2481_v12, 4  ;;  %v5246_v28 = vcombine.low %v2576_v20, %v2579_v0  ;;  %v3844_v14 = vrot.slane %v3842_v47, 4  ;;  %v2582_v50 = vrot.slane %v5775_v29, 5  ;;  %v2493_v20 = vld [vmem:[#allocation2 + $0x48] sm:$0xe] }
 0x153   : > { %4071 = vrot.lane.b32.xlu0 %v5357_v35, %s5842_s29  ;;  %v2477_v48 = vsel %vm5934_vm5, %v2472_v2, %v2476_v9  ;;  %v5330_v44 = vcombine.low %v5776_v43, %v5774_v5  ;;  %v5315_v36 = vrot.slane %v3759_v7, 9  ;;  %v5777_v9 = vld [vmem:[#allocation2 + $0x4c] sm:$0xf]  ;;  %v5200_v26 = vrot.slane %v2493_v20, 9  ;;  %v2494_v47 = vld [vmem:[#allocation2 + $0x54] sm:$0xe] }
 0x154   : > { %v2487_v21 = vsel %vm5934_vm5, %v2482_v42, %v2486_v59  ;;  %5298 = vmatprep.mubr.msk.bf16.mxu1 %vm1653_vm9, %v5246_v28  ;;  %v3846_v35 = vsel %vm6347_vm8, %v3844_v14, %v3845_v55  ;;  %v3849_v32 = vrot.slane %v5777_v9, 5  ;;  %v2583_v24 = vsel %vm6347_vm8, %v5199_v52, %v2582_v50  ;;  %v5778_v59 = vld [vmem:[#allocation2 + $0x3c] sm:$0xf]  ;;  %v4052_v28 = vpop.permute.xlu0 %4051  ;;  %v6908_v20 = vld [vmem:[#allocation2 + $0x64] sm:$0xf] }
 0x155   : > { %v5242_v51 = vcombine.low %v2477_v48, %v2487_v21  ;;  %3122 = vmatmul.mubr.bf16.gmra.mrb[44].mxu1 %v2870_v22  ;;  %v5362_v33 = vcombine.low %v3843_v49, %v3846_v35  ;;  %v2584_v1 = vrot.slane %v2582_v50, 4  ;;  %v5215_v15 = vcombine.low %v5778_v59, %v5775_v29  ;;  %v2785_v22 = vpop.permute.xlu1 %2784  ;;  %v5783_v48 = vld [vmem:[#allocation2 + $0x58] sm:$0xf]  ;;  %v5785_v35 = vld [vmem:[#allocation2 + $0x48] sm:$0xf] }
 0x156   : > { %v3850_v16 = vsel %vm6347_vm8, %v5315_v36, %v3849_v32  ;;  %v3851_v54 = vrot.slane %v3849_v32, 4  ;;  %v5358_v55 = vcombine.low %v3744_v18, %v3754_v34  ;;  %v4137_v27 = vsel %vm1653_vm9, %v5330_v44, %v4050_v46  ;;  %v3761_v46 = vld [vmem:[#allocation2 + $0x60] sm:$0xe] }
 0x157   : > { %2806 = vrot.lane.b32.xlu1 %v5242_v51, %s5842_s29  ;;  %5414 = vmatprep.mubr.msk.bf16.mxu0 %vm1653_vm9, %v5362_v33  ;;  %v2586_v37 = vsel %vm6347_vm8, %v2584_v1, %v2585_v11  ;;  %v2589_v12 = vrot.slane %v5779_v60, 5  ;;  %v5316_v38 = vrot.slane %v3760_v41, 9  ;;  %v3856_v18 = vrot.slane %v6889_v40, 5  ;;  %v6917_v33 = vld [vmem:[#allocation2 + $0x64] sm:$0xf] }
 0x158   : > { %v5247_v5 = vcombine.low %v2583_v24, %v2586_v37  ;;  %v3853_v61 = vsel %vm6347_vm8, %v3851_v54, %v3852_v63  ;;  %4389 = vmatmul.mubr.bf16.gmra.mrb[44].mxu0 %v4137_v27  ;;  %v2874_v0 = vsel %vm1653_vm9, %v5215_v15, %v2785_v22  ;;  %v5331_v52 = vcombine.low %v5781_v30, %v5777_v9  ;;  %v5782_v63 = vld [vmem:[#allocation2 + $0x5c] sm:$0x1]  ;;  %v5787_v1 = vld [vmem:[#allocation2 + $0x68] sm:$0x1] }
 0x159   : > { %v5363_v3 = vcombine.low %v3850_v16, %v3853_v61  ;;  %v2590_v11 = vsel %vm6347_vm8, %v5200_v26, %v2589_v12  ;;  %v2591_v2 = vrot.slane %v2589_v12, 4  ;;  %v3858_v7 = vrot.slane %v3856_v18, 4  ;;  %v2787_v9 = vpop.permute.xlu1 %2786  ;;  %v2495_v16 = vld [vmem:[#allocation2 + $0x60] sm:$0xe]  ;;  %v5789_v37 = vld [vmem:[#allocation2 + $0x68] sm:$0x1] }
 0x15a   : > { %5299 = vmatprep.mubr.msk.bf16.mxu1 %vm1653_vm9, %v5247_v5  ;;  %v2599_v42 = vrot.slane %v5782_v63, 5  ;;  %v5201_v14 = vrot.slane %v2494_v47, 9  ;;  %v2596_v34 = vrot.slane %v5783_v48, 5  ;;  %v3857_v50 = vsel %vm6347_vm8, %v5316_v38, %v3856_v18  ;;  %v6927_v18 = vld [vmem:[#allocation2 + $0x70] sm:$0xf] }
 0x15b   : > { %4073 = vrot.lane.b32.xlu1 %v5358_v55, %s5842_s29  ;;  %5415 = vmatprep.mubr.msk.bf16.mxu0 %vm1653_vm9, %v5363_v3  ;;  %v2593_v49 = vsel %vm6347_vm8, %v2591_v2, %v2592_v58  ;;  %v7508_v43 = vrot.slane %v6787_v8, 5  ;;  %v3863_v21 = vrot.slane %v6908_v20, 5  ;;  %v4141_v58 = vsel %vm1653_vm9, %v5331_v52, %v4052_v28  ;;  %v5788_v55 = vld [vmem:[#allocation2 + $0x54] sm:$0xf]  ;;  %v3762_v3 = vld [vmem:[#allocation2 + $0x6c] sm:$0xe] }
 0x15c   : > { %v5248_v29 = vcombine.low %v2590_v11, %v2593_v49  ;;  %v2598_v57 = vrot.slane %v2596_v34, 4  ;;  %v5216_v36 = vcombine.low %v5785_v35, %v5779_v60  ;;  %v2597_v8 = vsel %vm6347_vm8, %v5201_v14, %v2596_v34  ;;  %v4054_v60 = vpop.permute.xlu0 %4053  ;;  %v5791_v11 = vld [vmem:[#allocation2 + $0x54] sm:$0xf]  ;;  %v6936_v63 = vld [vmem:[#allocation2 + $0x70] sm:$0xf] }
 0x15d   : > { %v3860_v44 = vsel %vm6347_vm8, %v3858_v7, %v7508_v43  ;;  %3130 = vmatmul.mubr.bf16.gmra.mrb[48].mxu1 %v2874_v0  ;;  %v2603_v24 = vrot.slane %v6917_v33, 5  ;;  %v3866_v41 = vrot.slane %v5787_v1, 5  ;;  %v5317_v59 = vrot.slane %v3761_v46, 9  ;;  %v2789_v0 = vpop.permute.xlu1 %2788  ;;  %v5793_v28 = vld [vmem:[#allocation2 + $0x74] sm:$0x1] }
 0x15e   : > { %5300 = vmatprep.mubr.msk.bf16.mxu1 %vm1653_vm9, %v5248_v29  ;;  %v5364_v32 = vcombine.low %v3857_v50, %v3860_v44  ;;  %v2600_v51 = vsel %vm6347_vm8, %v2598_v57, %v2599_v42  ;;  %v3865_v15 = vrot.slane %v3863_v21, 4  ;;  %v2878_v54 = vsel %vm1653_vm9, %v5216_v36, %v2787_v9  ;;  %v2496_v29 = vld [vmem:[#allocation2 + $0x6c] sm:$0xe]  ;;  %v5794_v43 = vld [vmem:[#allocation2 + $0x60] sm:$0xf] }
 0x15f   : > { %v5249_v26 = vcombine.low %v2597_v8, %v2600_v51  ;;  %v5332_v22 = vcombine.low %v5788_v55, %v6889_v40  ;;  %v2606_v27 = vrot.slane %v5789_v37, 5  ;;  %v5202_v12 = vrot.slane %v2495_v16, 9  ;;  %v3763_v51 = vld [vmem:[#allocation2 + $0x78] sm:$0xe]  ;;  %v5799_v55 = vld [vmem:[#allocation2 + $0x80] sm:$0x1] }
 0x160   : > { %4397 = vmatmul.mubr.bf16.gmra.mrb[48].mxu0 %v4141_v58  ;;  %v2605_v5 = vrot.slane %v2603_v24, 4  ;;  %v3864_v61 = vsel %vm6347_vm8, %v5317_v59, %v3863_v21  ;;  %v3867_v38 = vsel %vm6347_vm8, %v3865_v15, %v3866_v41  ;;  %v3870_v47 = vrot.slane %v6927_v18, 5  ;;  %v5795_v21 = vld [vmem:[#allocation2 + $0x74] sm:$0x1]  ;;  %v4056_v46 = vpop.permute.xlu0 %4055 }
 0x161   : > { %5416 = vmatprep.mubr.msk.bf16.mxu0 %vm1653_vm9, %v5364_v32  ;;  %v4145_v40 = vsel %vm1653_vm9, %v5332_v22, %v4054_v60  ;;  %v5217_v2 = vcombine.low %v5791_v11, %v5783_v48  ;;  %v5365_v30 = vcombine.low %v3864_v61, %v3867_v38  ;;  %v2604_v52 = vsel %vm6347_vm8, %v5202_v12, %v2603_v24  ;;  %v6946_v32 = vld [vmem:[#allocation2 + $0x7c] sm:$0xf]  ;;  %v5797_v24 = vld [vmem:[#allocation2 + $0x60] sm:$0xf]  ;;  %v2791_v41 = vpop.permute.xlu1 %2790  ;;  %v2497_v60 = vld [vmem:[#allocation2 + $0x78] sm:$0xe] }
 0x162   : > { %v2607_v7 = vsel %vm6347_vm8, %v2605_v5, %v2606_v27  ;;  %v2610_v42 = vrot.slane %v6936_v63, 5  ;;  %v3873_v49 = vrot.slane %v5793_v28, 5  ;;  %v5318_v14 = vrot.slane %v3762_v3, 9  ;;  %v5800_v5 = vld [vmem:[#allocation2 + $0x6c] sm:$0xf] }
 0x163   : > { %v3872_v34 = vrot.slane %v3870_v47, 4  ;;  %v2882_v48 = vsel %vm1653_vm9, %v5217_v2, %v2789_v0  ;;  %v5250_v50 = vcombine.low %v2604_v52, %v2607_v7  ;;  %v5333_v44 = vcombine.low %v5794_v43, %v6908_v20  ;;  %v3764_v38 = vld [vmem:[#allocation2 + $0x84] sm:$0xe] }
 0x164   : > { %v2613_v57 = vrot.slane %v5795_v21, 5  ;;  %v5203_v58 = vrot.slane %v2496_v29, 9  ;;  %v2612_v35 = vrot.slane %v2610_v42, 4  ;;  %v3871_v36 = vsel %vm6347_vm8, %v5318_v14, %v3870_v47  ;;  %v6961_v47 = vld [vmem:[#allocation2 + $0x88] sm:$0xf]  ;;  %v4058_v2 = vpop.permute.xlu0 %4057 }
 0x165   : > { %3138 = vmatmul.mubr.bf16.gmra.mrb[52].mxu1 %v2878_v54  ;;  %v3874_v9 = vsel %vm6347_vm8, %v3872_v34, %v3873_v49  ;;  %v3877_v8 = vrot.slane %v6946_v32, 5  ;;  %v4149_v20 = vsel %vm1653_vm9, %v5333_v44, %v4056_v46  ;;  %v5218_v1 = vcombine.low %v5797_v24, %v6917_v33  ;;  %v6956_v54 = vld [vmem:[#allocation2 + $0x7c] sm:$0xf]  ;;  %v5804_v49 = vld [vmem:[#allocation2 + $0x8c] sm:$0x1] }
 0x166   : > { %5301 = vmatprep.mubr.msk.bf16.mxu1 %vm1653_vm9, %v5249_v26  ;;  %v5366_v59 = vcombine.low %v3871_v36, %v3874_v9  ;;  %v2611_v15 = vsel %vm6347_vm8, %v5203_v58, %v2610_v42  ;;  %v2614_v16 = vsel %vm6347_vm8, %v2612_v35, %v2613_v57  ;;  %v2617_v26 = vrot.slane %v6956_v54, 5  ;;  %v5805_v34 = vld [vmem:[#allocation2 + $0x8c] sm:$0x1]  ;;  %v2498_v46 = vld [vmem:[#allocation2 + $0x84] sm:$0xe] }
 0x167   : > { %v3880_v22 = vrot.slane %v5799_v55, 5  ;;  %v5319_v37 = vrot.slane %v3763_v51, 9  ;;  %v3879_v27 = vrot.slane %v3877_v8, 4  ;;  %v2886_v33 = vsel %vm1653_vm9, %v5218_v1, %v2791_v41  ;;  %v5807_v35 = vld [vmem:[#allocation2 + $0x98] sm:$0x1] }
 0x168   : > { %4405 = vmatmul.mubr.bf16.gmra.mrb[52].mxu0 %v4145_v40  ;;  %v5251_v12 = vcombine.low %v2611_v15, %v2614_v16  ;;  %v5334_v61 = vcombine.low %v5800_v5, %v6927_v18  ;;  %v3884_v3 = vrot.slane %v6961_v47, 5  ;;  %v5802_v40 = vld [vmem:[#allocation2 + $0x80] sm:$0x1]  ;;  %v5204_v0 = vrot.slane %v2497_v60, 9  ;;  %v5803_v18 = vld [vmem:[#allocation2 + $0x6c] sm:$0xf]  ;;  %v4060_v15 = vpop.permute.xlu0 %4059 }
 0x169   : > { %5417 = vmatprep.mubr.msk.bf16.mxu0 %vm1653_vm9, %v5365_v30  ;;  %v2620_v11 = vrot.slane %v5802_v40, 5  ;;  %v2619_v30 = vrot.slane %v2617_v26, 4  ;;  %v3878_v52 = vsel %vm6347_vm8, %v5319_v37, %v3877_v8  ;;  %v3881_v7 = vsel %vm6347_vm8, %v3879_v27, %v3880_v22  ;;  %v3769_v8 = vld [vmem:[#allocation2 + $0xc0] sm:$0xe]  ;;  %v5808_v1 = vld [vmem:[#allocation2 + $0x78] sm:$0xf] }
 0x16a   : > { %v5219_v42 = vcombine.low %v5803_v18, %v6936_v63  ;;  %v5320_v28 = vrot.slane %v3764_v38, 9  ;;  %v3887_v14 = vrot.slane %v5804_v49, 5  ;;  %v2627_v29 = vrot.slane %v5805_v34, 5  ;;  %v6976_v63 = vld [vmem:[#allocation2 + $0x88] sm:$0xf] }
 0x16b   : > { %v3886_v43 = vrot.slane %v3884_v3, 4  ;;  %v5367_v44 = vcombine.low %v3878_v52, %v3881_v7  ;;  %v2618_v21 = vsel %vm6347_vm8, %v5204_v0, %v2617_v26  ;;  %v2621_v57 = vsel %vm6347_vm8, %v2619_v30, %v2620_v11  ;;  %v2503_v51 = vld [vmem:[#allocation2 + $0xc0] sm:$0xe]  ;;  %v6987_v22 = vld [vmem:[#allocation2 + $0x94] sm:$0xf] }
 0x16c   : > { %v2624_v58 = vrot.slane %v6976_v63, 5  ;;  %v3894_v36 = vrot.slane %v5807_v35, 5  ;;  %v3922_v9 = vrot.slane %v6811_v39, 5  ;;  %v5335_v41 = vcombine.low %v5808_v1, %v6946_v32  ;;  %v3765_v39 = vld [vmem:[#allocation2 + $0x90] sm:$0xe] }
 0x16d   : > { %3146 = vmatmul.mubr.bf16.gmra.mrb[56].mxu1 %v2882_v48  ;;  %v2793_v48 = vpop.permute.xlu1 %2792  ;;  %v5252_v16 = vcombine.low %v2618_v21, %v2621_v57  ;;  %v3888_v26 = vsel %vm6347_vm8, %v3886_v43, %v3887_v14  ;;  %v5205_v55 = vrot.slane %v2498_v46, 9  ;;  %v5325_v27 = vrot.slane %v3769_v8, 9  ;;  %v7012_v49 = vld [vmem:[#allocation2 + $0x94] sm:$0xf]  ;;  %v5812_v43 = vld [vmem:[#allocation2 + $0x98] sm:$0x1] }
 0x16e   : > { %5302 = vmatprep.mubr.msk.bf16.mxu1 %vm1653_vm9, %v5250_v50  ;;  %v4153_v50 = vsel %vm1653_vm9, %v5334_v61, %v4058_v2  ;;  %v2890_v24 = vsel %vm1653_vm9, %v5219_v42, %v2793_v48  ;;  %v2626_v37 = vrot.slane %v2624_v58, 4  ;;  %v3919_v32 = vrot.slane %v6809_v56, 5  ;;  %v5813_v46 = vld [vmem:[#allocation2 + $0x84] sm:$0xf] }
 0x16f   : > { %v5210_v60 = vrot.slane %v2503_v51, 9  ;;  %v2659_v5 = vrot.slane %v6827_v17, 5  ;;  %v5341_v61 = vcombine.low %v6807_v31, %v6809_v56  ;;  %v5226_v38 = vcombine.low %v6824_v25, %v6827_v17 }
 0x170   : > { %4413 = vmatmul.mubr.bf16.gmra.mrb[56].mxu0 %v4149_v20  ;;  %v2662_v20 = vrot.slane %v6829_v6, 5  ;;  %v3891_v6 = vrot.slane %v6987_v22, 5  ;;  %v5321_v40 = vrot.slane %v3765_v39, 9  ;;  %v7001_v11 = vsel %vm6347_vm8, %v5325_v27, %v3919_v32 }
 0x171   : > { %5418 = vmatprep.mubr.msk.bf16.mxu0 %vm1653_vm9, %v5366_v59  ;;  %v3885_v59 = vsel %vm6347_vm8, %v5320_v28, %v3884_v3  ;;  %v4157_v3 = vsel %vm1653_vm9, %v5335_v41, %v4060_v15  ;;  %v3921_v2 = vrot.slane %v3919_v32, 4  ;;  %v2625_v0 = vsel %vm6347_vm8, %v5205_v55, %v2624_v58  ;;  %v2795_v7 = vpop.permute.xlu1 %2794  ;;  %v2499_v28 = vld [vmem:[#allocation2 + $0x90] sm:$0xe]  ;;  %v4062_v41 = vpop.permute.xlu0 %4061  ;;  %v7044_v32 = vld [vmem:[#allocation2 + $0xa0] sm:$0xf] }
 0x172   : > { %v7008_v30 = vsel %vm6347_vm8, %v5210_v60, %v2659_v5  ;;  %v2661_v52 = vrot.slane %v2659_v5, 4  ;;  %v2628_v18 = vsel %vm6347_vm8, %v2626_v37, %v2627_v29  ;;  %v3893_v42 = vrot.slane %v3891_v6, 4 }
 0x173   : > { %v2631_v14 = vrot.slane %v7012_v49, 5  ;;  %v7017_v34 = vsel %vm6347_vm8, %v3921_v2, %v3922_v9  ;;  %v5253_v57 = vcombine.low %v2625_v0, %v2628_v18  ;;  %v5336_v58 = vcombine.low %v5813_v46, %v6961_v47  ;;  %v5816_v47 = vld [vmem:[#allocation2 + $0x84] sm:$0xf] }
 0x174   : > { %v5373_v48 = vcombine.low %v7001_v11, %v7017_v34  ;;  %v5206_v35 = vrot.slane %v2499_v28, 9  ;;  %v3892_v9 = vsel %vm6347_vm8, %v5321_v40, %v3891_v6  ;;  %v3895_v8 = vsel %vm6347_vm8, %v3893_v42, %v3894_v36  ;;  %v5819_v40 = vld [vmem:[#allocation2 + $0x90] sm:$0xf]  ;;  %v7054_v42 = vld [vmem:[#allocation2 + $0xac] sm:$0xf] }
 0x175   : > { %3154 = vmatmul.mubr.bf16.gmra.mrb[60].mxu1 %v2886_v33  ;;  %v5810_v33 = vld [vmem:[#allocation2 + $0x78] sm:$0xf]  ;;  %v2633_v51 = vrot.slane %v2631_v14, 4  ;;  %v2797_v39 = vpop.permute.xlu1 %2796  ;;  %v4161_v6 = vsel %vm1653_vm9, %v5336_v58, %v4062_v41  ;;  %v2638_v60 = vrot.slane %v7044_v32, 5  ;;  %v5337_v2 = vcombine.low %v5819_v40, %v6987_v22  ;;  %v5821_v22 = vld [vmem:[#allocation2 + $0x90] sm:$0xf] }
 0x176   : > { %5303 = vmatprep.mubr.msk.bf16.mxu1 %vm1653_vm9, %v5251_v12  ;;  %v5220_v12 = vcombine.low %v5810_v33, %v6956_v54  ;;  %v5368_v54 = vcombine.low %v3885_v59, %v3888_v26  ;;  %v5815_v59 = vld [vmem:[#allocation2 + $0xa4] sm:$0x1]  ;;  %v5369_v26 = vcombine.low %v3892_v9, %v3895_v8  ;;  %v2632_v55 = vsel %vm6347_vm8, %v5206_v35, %v2631_v14  ;;  %v2500_v33 = vld [vmem:[#allocation2 + $0x9c] sm:$0xe]  ;;  %v3767_v14 = vld [vmem:[#allocation2 + $0xa8] sm:$0xe] }
 0x177   : > { %v3901_v15 = vrot.slane %v5815_v59, 5  ;;  %v3905_v28 = vrot.slane %v7054_v42, 5  ;;  %v2501_v35 = vld [vmem:[#allocation2 + $0xa8] sm:$0xe]  ;;  %v5822_v9 = vld [vmem:[#allocation2 + $0xac] sm:$0xf] }
 0x178   : > { %4421 = vmatmul.mubr.bf16.gmra.mrb[60].mxu0 %v4153_v50  ;;  %v7023_v50 = vsel %vm6347_vm8, %v2661_v52, %v2662_v20  ;;  %v2894_v21 = vsel %vm1653_vm9, %v5220_v12, %v2795_v7  ;;  %v3766_v20 = vld [vmem:[#allocation2 + $0x9c] sm:$0xe]  ;;  %v5818_v12 = vld [vmem:[#allocation2 + $0xa4] sm:$0x1]  ;;  %v5207_v52 = vrot.slane %v2500_v33, 9  ;;  %v2640_v7 = vrot.slane %v2638_v60, 4 }
 0x179   : > { %5419 = vmatprep.mubr.msk.bf16.mxu0 %vm1653_vm9, %v5367_v44  ;;  %v2634_v44 = vrot.slane %v5812_v43, 5  ;;  %v5258_v29 = vcombine.low %v7008_v30, %v7023_v50  ;;  %v5322_v36 = vrot.slane %v3766_v20, 9  ;;  %v2641_v5 = vrot.slane %v5818_v12, 5  ;;  %v5826_v33 = vld [vmem:[#allocation2 + $0x9c] sm:$0xf] }
 0x17a   : > { %v5222_v43 = vcombine.low %v5821_v22, %v7012_v49  ;;  %v2639_v46 = vsel %vm6347_vm8, %v5207_v52, %v2638_v60  ;;  %v2645_v8 = vrot.slane %v5822_v9, 5  ;;  %v3907_v41 = vrot.slane %v3905_v28, 4  ;;  %v3768_v60 = vld [vmem:[#allocation2 + $0xb4] sm:$0xe]  ;;  %v3770_v50 = vld [vmem:[#allocation2 + $0xcc] sm:$0xe] }
 0x17b   : > { %v2635_v37 = vsel %vm6347_vm8, %v2633_v51, %v2634_v44  ;;  %v2642_v58 = vsel %vm6347_vm8, %v2640_v7, %v2641_v5  ;;  %v5823_v51 = vld [vmem:[#allocation2 + $0xb0] sm:$0x1]  ;;  %v5223_v12 = vcombine.low %v5826_v33, %v7044_v32  ;;  %v2502_v52 = vld [vmem:[#allocation2 + $0xb4] sm:$0xe]  ;;  %v3926_v30 = vrot.slane %v6740_v4, 5 }
 0x17c   : > { %v3908_v20 = vrot.slane %v5823_v51, 5  ;;  %v5255_v59 = vcombine.low %v2639_v46, %v2642_v58  ;;  %v5209_v22 = vrot.slane %v2502_v52, 9 }
 0x17d   : > { %3162 = vmatmul.mubr.bf16.gmra.mrb[64].mxu1 %v2890_v24  ;;  %v7034_v24 = vld [vmem:[#allocation2 + $0xa0] sm:$0xf] }
 0x17e   : > { %5304 = vmatprep.mubr.msk.bf16.mxu1 %vm1653_vm9, %v5252_v16  ;;  %v3898_v1 = vrot.slane %v7034_v24, 5  ;;  %v5221_v16 = vcombine.low %v5816_v47, %v6976_v63  ;;  %v4064_v18 = vpop.permute.xlu0 %4063  ;;  %v5824_v47 = vld [vmem:[#allocation2 + $0xb0] sm:$0x1] }
 0x180   : > { %4429 = vmatmul.mubr.bf16.gmra.mrb[64].mxu0 %v4157_v3  ;;  %v3900_v27 = vrot.slane %v3898_v1, 4  ;;  %v2898_v63 = vsel %vm1653_vm9, %v5221_v16, %v2797_v39  ;;  %v5254_v3 = vcombine.low %v2632_v55, %v2635_v37  ;;  %v2648_v16 = vrot.slane %v5824_v47, 5  ;;  %v5831_v47 = vld [vmem:[#allocation2 + $0xb4] sm:$0xf] }
 0x181   : > { %5420 = vmatprep.mubr.msk.bf16.mxu0 %vm1653_vm9, %v5368_v54  ;;  %v3899_v54 = vsel %vm6347_vm8, %v5322_v36, %v3898_v1  ;;  %v5323_v1 = vrot.slane %v3767_v14, 9  ;;  %v2647_v36 = vrot.slane %v2645_v8, 4  ;;  %v3909_v37 = vsel %vm6347_vm8, %v3907_v41, %v3908_v20  ;;  %v5829_v20 = vld [vmem:[#allocation2 + $0xb4] sm:$0xf] }
 0x182   : > { %v3902_v0 = vsel %vm6347_vm8, %v3900_v27, %v3901_v15  ;;  %v5208_v15 = vrot.slane %v2501_v35, 9  ;;  %v3912_v27 = vrot.slane %v6662_v23, 5  ;;  %v3915_v23 = vrot.slane %v6673_v10, 5 }
 0x183   : > { %v5370_v44 = vcombine.low %v3899_v54, %v3902_v0  ;;  %v2649_v40 = vsel %vm6347_vm8, %v2647_v36, %v2648_v16  ;;  %v5324_v54 = vrot.slane %v3768_v60, 9  ;;  %v5832_v16 = vld [vmem:[#allocation2 + $0xb8] sm:$0xf] }
 0x184   : > { %v3914_v0 = vrot.slane %v3912_v27, 4 }
 0x185   : > { %3170 = vmatmul.mubr.bf16.gmra.mrb[68].mxu1 %v2894_v21  ;;  %v2799_v21 = vpop.permute.xlu1 %2798  ;;  %v3913_v10 = vsel %vm6347_vm8, %v5324_v54, %v3912_v27 }
 0x186   : > { %5305 = vmatprep.mubr.msk.bf16.mxu1 %vm1653_vm9, %v5253_v57  ;;  %v4165_v57 = vsel %vm1653_vm9, %v5337_v2, %v4064_v18  ;;  %v2902_v49 = vsel %vm1653_vm9, %v5222_v43, %v2799_v21  ;;  %v2652_v2 = vrot.slane %v6681_v19, 5  ;;  %v2655_v18 = vrot.slane %v6685_v13, 5  ;;  %v5828_v21 = vld [vmem:[#allocation2 + $0xa8] sm:$0xf] }
 0x187   : > { %v3916_v19 = vsel %vm6347_vm8, %v3914_v0, %v3915_v23 }
 0x188   : > { %4437 = vmatmul.mubr.bf16.gmra.mrb[68].mxu0 %v4161_v6  ;;  %v3906_v6 = vsel %vm6347_vm8, %v5323_v1, %v3905_v28  ;;  %v5827_v28 = vld [vmem:[#allocation2 + $0xa8] sm:$0xf]  ;;  %v2654_v43 = vrot.slane %v2652_v2, 4  ;;  %v5372_v58 = vcombine.low %v3913_v10, %v3916_v19  ;;  %v5830_v1 = vld [vmem:[#allocation2 + $0xb8] sm:$0xf] }
 0x189   : > { %5421 = vmatprep.mubr.msk.bf16.mxu0 %vm1653_vm9, %v5369_v26  ;;  %v5825_v26 = vld [vmem:[#allocation2 + $0x9c] sm:$0xf]  ;;  %v5339_v14 = vcombine.low %v5827_v28, %v7054_v42  ;;  %v2653_v42 = vsel %vm6347_vm8, %v5209_v22, %v2652_v2  ;;  %v5340_v41 = vcombine.low %v5829_v20, %v5830_v1 }
 0x18a   : > { %v5338_v55 = vcombine.low %v5825_v26, %v7034_v24  ;;  %v2646_v24 = vsel %vm6347_vm8, %v5208_v15, %v2645_v8  ;;  %v2656_v35 = vsel %vm6347_vm8, %v2654_v43, %v2655_v18  ;;  %v5225_v26 = vcombine.low %v5831_v47, %v5832_v16 }
 0x18b   : > { %v4066_v39 = vpop.permute.xlu0 %4065  ;;  %v5256_v7 = vcombine.low %v2646_v24, %v2649_v40  ;;  %v5257_v51 = vcombine.low %v2653_v42, %v2656_v35 }
 0x18d   : > { %3178 = vmatmul.mubr.bf16.gmra.mrb[72].mxu1 %v2898_v63  ;;  %v4169_v63 = vsel %vm1653_vm9, %v5338_v55, %v4066_v39 }
 0x18e   : > { %5306 = vmatprep.mubr.msk.bf16.mxu1 %vm1653_vm9, %v5254_v3  ;;  %v2801_v5 = vpop.permute.xlu1 %2800  ;;  %v5371_v3 = vcombine.low %v3906_v6, %v3909_v37 }
 0x18f   : > { %v2906_v32 = vsel %vm1653_vm9, %v5223_v12, %v2801_v5  ;;  %v3929_v5 = vrot.slane %v6770_v53, 5 }
 0x190   : > { %4445 = vmatmul.mubr.bf16.gmra.mrb[72].mxu0 %v4165_v57  ;;  %v5224_v57 = vcombine.low %v5828_v21, %v5822_v9 }
 0x191   : > { %5422 = vmatprep.mubr.msk.bf16.mxu0 %vm1653_vm9, %v5370_v44 }
 0x195   : > { %3186 = vmatmul.mubr.bf16.gmra.mrb[76].mxu1 %v2902_v49 }
 0x196   : > { %5307 = vmatprep.mubr.msk.bf16.mxu1 %vm1653_vm9, %v5255_v59 }
 0x198   : > { %4453 = vmatmul.mubr.bf16.gmra.mrb[76].mxu0 %v4169_v63  ;;  %v4068_v44 = vpop.permute.xlu0 %4067  ;;  %v5326_v63 = vrot.slane %v3770_v50, 9 }
 0x199   : > { %5423 = vmatprep.mubr.msk.bf16.mxu0 %vm1653_vm9, %v5371_v3  ;;  %v4173_v46 = vsel %vm1653_vm9, %v5339_v14, %v4068_v44  ;;  %v3928_v3 = vrot.slane %v3926_v30, 4  ;;  %v5342_v44 = vcombine.low %v6726_v45, %v6740_v4 }
 0x19b   : > { %v2803_v13 = vpop.permute.xlu1 %2802  ;;  %v3930_v53 = vsel %vm6347_vm8, %v3928_v3, %v3929_v5 }
 0x19c   : > { %v2910_v8 = vsel %vm1653_vm9, %v5224_v57, %v2803_v13 }
 0x19d   : > { %3194 = vmatmul.mubr.bf16.gmra.mrb[80].mxu1 %v2906_v32  ;;  %v3927_v32 = vsel %vm6347_vm8, %v5326_v63, %v3926_v30 }
 0x19e   : > { %5308 = vmatprep.mubr.msk.bf16.mxu1 %vm1653_vm9, %v5256_v7  ;;  %v5374_v7 = vcombine.low %v3927_v32, %v3930_v53 }
 0x1a0   : > { %4461 = vmatmul.mubr.bf16.gmra.mrb[80].mxu0 %v4173_v46 }
 0x1a1   : > { %5424 = vmatprep.mubr.msk.bf16.mxu0 %vm1653_vm9, %v5372_v58 }
 0x1a3   : > { %v1960_v9 = vpop.f32.mrb[0].mxu1 }
 0x1a4   : > { %2039 = vst.msk [vmem:[#allocation3 + $0x80] sm:$0xff] %vm1653_vm9, %v1960_v9  ;;  %v1962_v49 = vpop.f32.mrb[1].mxu1 }
 0x1a5   : > { %3202 = vmatmul.mubr.bf16.gmra.mrb[84].mxu1 %v2910_v8  ;;  %v4070_v59 = vpop.permute.xlu0 %4069  ;;  %v1963_v15 = vpop.f32.mrb[2].mxu1 }
 0x1a6   : > { %5309 = vmatprep.mubr.msk.bf16.mxu1 %vm1653_vm9, %v5257_v51  ;;  %2040 = vst.msk [vmem:[#allocation3 + $0x88] sm:$0xff] %vm1653_vm9, %v1963_v15  ;;  %v1965_v55 = vpop.f32.mrb[3].mxu1  ;;  %v4177_v36 = vsel %vm1653_vm9, %v5340_v41, %v4070_v59 }
 0x1a8   : > { %v2805_v39 = vpop.permute.xlu1 %2804  ;;  %4469 = vmatmul.mubr.bf16.gmra.mrb[84].mxu0 %v4177_v36 }
 0x1a9   : > { %v2914_v6 = vsel %vm1653_vm9, %v5225_v26, %v2805_v39  ;;  %5425 = vmatprep.mubr.msk.bf16.mxu0 %vm1653_vm9, %v5373_v48 }
 0x1ad   : > { %3210 = vmatmul.mubr.bf16.gmra.mrb[88].mxu1 %v2914_v6 }
 0x1ae   : > { %5310 = vmatprep.mubr.msk.bf16.mxu1 %vm1653_vm9, %v5258_v29 }
 0x1af   : > { %v1896_v37 = vpop.f32.mrb[0].mxu0 }
 0x1b0   : > { %2023 = vst.msk [vmem:[#allocation3] sm:$0xff] %vm1653_vm9, %v1896_v37  ;;  %v1898_v27 = vpop.f32.mrb[1].mxu0 }
 0x1b1   : > { %v1968_v60 = vpop.f32.mrb[4].mxu1  ;;  %v1899_v33 = vpop.f32.mrb[2].mxu0 }
 0x1b2   : > { %2041 = vst.msk [vmem:[#allocation3 + $0x90] sm:$0xff] %vm1653_vm9, %v1968_v60  ;;  %2024 = vst.msk [vmem:[#allocation3 + $0x8] sm:$0xff] %vm1653_vm9, %v1899_v33  ;;  %v1970_v12 = vpop.f32.mrb[5].mxu1  ;;  %v1901_v11 = vpop.f32.mrb[3].mxu0 }
 0x1b3   : > { %v1971_v34 = vpop.f32.mrb[6].mxu1 }
 0x1b4   : > { %2042 = vst.msk [vmem:[#allocation3 + $0x98] sm:$0xff] %vm1653_vm9, %v1971_v34  ;;  %v1973_v48 = vpop.f32.mrb[7].mxu1 }
 0x1bb   : > { %v1904_v29 = vpop.f32.mrb[4].mxu0 }
 0x1bc   : > { %2025 = vst.msk [vmem:[#allocation3 + $0x10] sm:$0xff] %vm1653_vm9, %v1904_v29  ;;  %v1906_v24 = vpop.f32.mrb[5].mxu0  ;;  %v3226_v29 = vld [vmem:[#allocation3] sm:$0xff] }
 0x1bd   : > { %v1976_v40 = vpop.f32.mrb[8].mxu1  ;;  %v1907_v2 = vpop.f32.mrb[6].mxu0 }
 0x1be   : > { %2043 = vst.msk [vmem:[#allocation3 + $0xa0] sm:$0xff] %vm1653_vm9, %v1976_v40  ;;  %2026 = vst.msk [vmem:[#allocation3 + $0x18] sm:$0xff] %vm1653_vm9, %v1907_v2  ;;  %v1978_v23 = vpop.f32.mrb[9].mxu1  ;;  %v1909_v54 = vpop.f32.mrb[7].mxu0  ;;  %v3227_v2 = vld [vmem:[#allocation3 + $0x8] sm:$0xff] }
 0x1bf   : > { %v1979_v0 = vpop.f32.mrb[10].mxu1 }
 0x1c0   : > { %2044 = vst.msk [vmem:[#allocation3 + $0xa8] sm:$0xff] %vm1653_vm9, %v1979_v0  ;;  %v1981_v52 = vpop.f32.mrb[11].mxu1 }
 0x1c3   : > { %v3228_v32 = vld [vmem:[#allocation3 + $0x10] sm:$0xff] }
 0x1c5   : > { %v4072_v18 = vpop.permute.xlu0 %4071 }
 0x1c6   : > { %v4181_v28 = vsel %vm1653_vm9, %v5341_v61, %v4072_v18 }
 0x1c7   : > { %4477 = vmatmul.mubr.bf16.gmra.mrb[88].mxu0 %v4181_v28 }
 0x1c8   : > { %5426 = vmatprep.mubr.msk.bf16.mxu0 %vm1653_vm9, %v5374_v7  ;;  %v1912_v14 = vpop.f32.mrb[8].mxu0 }
 0x1c9   : > { %v2807_v22 = vpop.permute.xlu1 %2806  ;;  %2027 = vst.msk [vmem:[#allocation3 + $0x20] sm:$0xff] %vm1653_vm9, %v1912_v14  ;;  %v1914_v43 = vpop.f32.mrb[9].mxu0 }
 0x1ca   : > { %v2918_v62 = vsel %vm1653_vm9, %v5226_v38, %v2807_v22  ;;  %v1984_v10 = vpop.f32.mrb[12].mxu1  ;;  %v1915_v31 = vpop.f32.mrb[10].mxu0  ;;  %v3229_v43 = vld [vmem:[#allocation3 + $0x18] sm:$0xff] }
 0x1cb   : > { %3218 = vmatmul.mubr.bf16.gmra.mrb[92].mxu1 %v2918_v62  ;;  %2045 = vst.msk [vmem:[#allocation3 + $0xb0] sm:$0xff] %vm1653_vm9, %v1984_v10  ;;  %2028 = vst.msk [vmem:[#allocation3 + $0x28] sm:$0xff] %vm1653_vm9, %v1915_v31  ;;  %v1986_v56 = vpop.f32.mrb[13].mxu1  ;;  %v1917_v61 = vpop.f32.mrb[11].mxu0 }
 0x1cc   : > { %v1987_v19 = vpop.f32.mrb[14].mxu1 }
 0x1cd   : > { %v4074_v21 = vpop.permute.xlu1 %4073  ;;  %2046 = vst.msk [vmem:[#allocation3 + $0xb8] sm:$0xff] %vm1653_vm9, %v1987_v19  ;;  %v1989_v57 = vpop.f32.mrb[15].mxu1 }
 0x1ce   : > { %v4185_v25 = vsel %vm1653_vm9, %v5342_v44, %v4074_v21 }
 0x1cf   : > { %4485 = vmatmul.mubr.bf16.gmra.mrb[92].mxu0 %v4185_v25 }
 0x1d0   : > { %v3230_v57 = vld [vmem:[#allocation3 + $0x20] sm:$0xff] }
 0x1d5   : > { %v1920_v17 = vpop.f32.mrb[12].mxu0 }
 0x1d6   : > { %2029 = vst.msk [vmem:[#allocation3 + $0x30] sm:$0xff] %vm1653_vm9, %v1920_v17  ;;  %v1922_v45 = vpop.f32.mrb[13].mxu0 }
 0x1d7   : > { %v1992_v4 = vpop.f32.mrb[16].mxu1  ;;  %v1923_v38 = vpop.f32.mrb[14].mxu0 }
 0x1d8   : > { %2047 = vst.msk [vmem:[#allocation3 + $0xc0] sm:$0xff] %vm1653_vm9, %v1992_v4  ;;  %2030 = vst.msk [vmem:[#allocation3 + $0x38] sm:$0xff] %vm1653_vm9, %v1923_v38  ;;  %v1994_v13 = vpop.f32.mrb[17].mxu1  ;;  %v1925_v46 = vpop.f32.mrb[15].mxu0 }
 0x1d9   : > { %v1995_v58 = vpop.f32.mrb[18].mxu1  ;;  %v3231_v46 = vld [vmem:[#allocation3 + $0x28] sm:$0xff] }
 0x1da   : > { %2048 = vst.msk [vmem:[#allocation3 + $0xc8] sm:$0xff] %vm1653_vm9, %v1995_v58  ;;  %v1997_v42 = vpop.f32.mrb[19].mxu1 }
 0x1e2   : > { %v1928_v35 = vpop.f32.mrb[16].mxu0 }
 0x1e3   : > { %2031 = vst.msk [vmem:[#allocation3 + $0x40] sm:$0xff] %vm1653_vm9, %v1928_v35  ;;  %v1930_v8 = vpop.f32.mrb[17].mxu0 }
 0x1e4   : > { %v2000_v51 = vpop.f32.mrb[20].mxu1  ;;  %v1931_v20 = vpop.f32.mrb[18].mxu0 }
 0x1e5   : > { %2049 = vst.msk [vmem:[#allocation3 + $0xd0] sm:$0xff] %vm1653_vm9, %v2000_v51  ;;  %2032 = vst.msk [vmem:[#allocation3 + $0x48] sm:$0xff] %vm1653_vm9, %v1931_v20  ;;  %v2002_v1 = vpop.f32.mrb[21].mxu1  ;;  %v1933_v41 = vpop.f32.mrb[19].mxu0 }
 0x1e6   : > { %v2003_v9 = vpop.f32.mrb[22].mxu1 }
 0x1e7   : > { %2050 = vst.msk [vmem:[#allocation3 + $0xd8] sm:$0xff] %vm1653_vm9, %v2003_v9  ;;  %v2005_v49 = vpop.f32.mrb[23].mxu1 }
 0x1ef   : > { %v1936_v59 = vpop.f32.mrb[20].mxu0 }
 0x1f0   : > { %2033 = vst.msk [vmem:[#allocation3 + $0x50] sm:$0xff] %vm1653_vm9, %v1936_v59  ;;  %v1938_v15 = vpop.f32.mrb[21].mxu0 }
 0x1f1   : > { %v2008_v47 = vpop.f32.mrb[24].mxu1  ;;  %v1939_v16 = vpop.f32.mrb[22].mxu0 }
 0x1f2   : > { %2051 = vst.msk [vmem:[#allocation3 + $0xe0] sm:$0xff] %vm1653_vm9, %v2008_v47  ;;  %2034 = vst.msk [vmem:[#allocation3 + $0x58] sm:$0xff] %vm1653_vm9, %v1939_v16  ;;  %v2010_v26 = vpop.f32.mrb[25].mxu1  ;;  %v1941_v55 = vpop.f32.mrb[23].mxu0 }
 0x1f3   : > { %v2011_v36 = vpop.f32.mrb[26].mxu1 }
 0x1f4   : > { %2052 = vst.msk [vmem:[#allocation3 + $0xe8] sm:$0xff] %vm1653_vm9, %v2011_v36  ;;  %v2013_v39 = vpop.f32.mrb[27].mxu1 }
 0x1fc   : > { %v1944_v6 = vpop.f32.mrb[24].mxu0 }
 0x1fd   : > { %2035 = vst.msk [vmem:[#allocation3 + $0x60] sm:$0xff] %vm1653_vm9, %v1944_v6  ;;  %v1946_v37 = vpop.f32.mrb[25].mxu0 }
 0x1fe   : > { %v2016_v27 = vpop.f32.mrb[28].mxu1  ;;  %v1947_v60 = vpop.f32.mrb[26].mxu0 }
 0x1ff   : > { %2053 = vst.msk [vmem:[#allocation3 + $0xf0] sm:$0xff] %vm1653_vm9, %v2016_v27  ;;  %2036 = vst.msk [vmem:[#allocation3 + $0x68] sm:$0xff] %vm1653_vm9, %v1947_v60  ;;  %v2018_v33 = vpop.f32.mrb[29].mxu1  ;;  %v1949_v12 = vpop.f32.mrb[27].mxu0 }
 0x200   : > { %v2019_v11 = vpop.f32.mrb[30].mxu1 }
 0x201   : > { %2054 = vst.msk [vmem:[#allocation3 + $0xf8] sm:$0xff] %vm1653_vm9, %v2019_v11  ;;  %v2021_v34 = vpop.f32.mrb[31].mxu1 }
 0x20a   : > { %v1952_v48 = vpop.f32.mrb[28].mxu0 }
 0x20b   : > { %2037 = vst.msk [vmem:[#allocation3 + $0x70] sm:$0xff] %vm1653_vm9, %v1952_v48  ;;  %v1954_v30 = vpop.f32.mrb[29].mxu0  ;;  %v3099_v50 = vpop.f32.mrb[32].mxu1 }
 0x20c   : > { %v3258_v24 = vadd.f32 %v3226_v29, %v3099_v50  ;;  %v1955_v5 = vpop.f32.mrb[30].mxu0  ;;  %v3101_v63 = vpop.f32.mrb[33].mxu1  ;;  %v3232_v29 = vld [vmem:[#allocation3 + $0x30] sm:$0xff] }
 0x20d   : > { %2038 = vst.msk [vmem:[#allocation3 + $0x78] sm:$0xff] %vm1653_vm9, %v1955_v5  ;;  %v1957_v3 = vpop.f32.mrb[31].mxu0  ;;  %v3102_v40 = vpop.f32.mrb[34].mxu1 }
 0x20e   : > { %3290 = vst.msk [vmem:[#allocation3] sm:$0xff] %vm1653_vm9, %v3258_v24  ;;  %v3259_v23 = vadd.f32 %v3227_v2, %v3102_v40  ;;  %v3104_v54 = vpop.f32.mrb[35].mxu1 }
 0x210   : > { %3291 = vst.msk [vmem:[#allocation3 + $0x8] sm:$0xff] %vm1653_vm9, %v3259_v23 }
 0x212   : > { %v4366_v0 = vpop.f32.mrb[32].mxu0 }
 0x213   : > { %v3107_v52 = vpop.f32.mrb[36].mxu1  ;;  %v4368_v53 = vpop.f32.mrb[33].mxu0 }
 0x214   : > { %v3260_v7 = vadd.f32 %v3228_v32, %v3107_v52  ;;  %v3109_v18 = vpop.f32.mrb[37].mxu1  ;;  %v4369_v28 = vpop.f32.mrb[34].mxu0  ;;  %v3233_v53 = vld [vmem:[#allocation3 + $0x38] sm:$0xff] }
 0x215   : > { %v4493_v14 = vld [vmem:[#allocation3] sm:$0xff]  ;;  %v3110_v22 = vpop.f32.mrb[38].mxu1  ;;  %v4371_v62 = vpop.f32.mrb[35].mxu0 }
 0x216   : > { %v4525_v44 = vadd.f32 %v4493_v14, %v4366_v0  ;;  %3292 = vst.msk [vmem:[#allocation3 + $0x10] sm:$0xff] %vm1653_vm9, %v3260_v7  ;;  %v3261_v10 = vadd.f32 %v3229_v43, %v3110_v22  ;;  %v3112_v31 = vpop.f32.mrb[39].mxu1 }
 0x217   : > { %v4494_v56 = vld [vmem:[#allocation3 + $0x8] sm:$0xff] }
 0x218   : > { %4557 = vst.msk [vmem:[#allocation3] sm:$0xff] %vm1653_vm9, %v4525_v44  ;;  %v4526_v61 = vadd.f32 %v4494_v56, %v4369_v28  ;;  %3293 = vst.msk [vmem:[#allocation3 + $0x18] sm:$0xff] %vm1653_vm9, %v3261_v10 }
 0x21a   : > { %4558 = vst.msk [vmem:[#allocation3 + $0x8] sm:$0xff] %vm1653_vm9, %v4526_v61  ;;  %v4374_v19 = vpop.f32.mrb[36].mxu0 }
 0x21b   : > { %v4376_v25 = vpop.f32.mrb[37].mxu0 }
 0x21c   : > { %v3115_v21 = vpop.f32.mrb[40].mxu1  ;;  %v4377_v4 = vpop.f32.mrb[38].mxu0 }
 0x21d   : > { %v3262_v17 = vadd.f32 %v3230_v57, %v3115_v21  ;;  %v3117_v45 = vpop.f32.mrb[41].mxu1  ;;  %v4495_v38 = vld [vmem:[#allocation3 + $0x10] sm:$0xff]  ;;  %v4379_v58 = vpop.f32.mrb[39].mxu0  ;;  %v3234_v57 = vld [vmem:[#allocation3 + $0x40] sm:$0xff] }
 0x21e   : > { %v3118_v13 = vpop.f32.mrb[42].mxu1  ;;  %v4527_v42 = vadd.f32 %v4495_v38, %v4374_v19 }
 0x21f   : > { %3294 = vst.msk [vmem:[#allocation3 + $0x20] sm:$0xff] %vm1653_vm9, %v3262_v17  ;;  %v3263_v35 = vadd.f32 %v3231_v46, %v3118_v13  ;;  %v3120_v8 = vpop.f32.mrb[43].mxu1  ;;  %v4589_v51 = vld [vmem:[#allocation3] sm:$0xff]  ;;  %v4496_v20 = vld [vmem:[#allocation3 + $0x18] sm:$0xff] }
 0x220   : > { %v4690_v1 = vmul.f32 %v4589_v51, %v4589_v51  ;;  %v5509_v41 = vpack.c.bf16 %v4589_v51, %v4589_v51  ;;  %4559 = vst.msk [vmem:[#allocation3 + $0x10] sm:$0xff] %vm1653_vm9, %v4527_v42  ;;  %v4528_v9 = vadd.f32 %v4496_v20, %v4377_v4  ;;  %v4621_v59 = vsel %vm1653_vm9, %v4589_v51, 0.0  ;;  %v3235_v51 = vld [vmem:[#allocation3 + $0x48] sm:$0xff] }
 0x221   : > { %3295 = vst.msk [vmem:[#allocation3 + $0x28] sm:$0xff] %vm1653_vm9, %v3263_v35  ;;  %v4590_v49 = vld [vmem:[#allocation3 + $0x8] sm:$0xff] }
 0x222   : > { %4922 = vst.msk [vmem:[%s7170_s9] sm:$0xf] %vm791_vm0, %v5509_v41  ;;  %v4622_v15 = vsel %vm1653_vm9, %v4590_v49, 0.0  ;;  %v4691_v47 = vmul.f32 %v4590_v49, %v4590_v49  ;;  %v5510_v16 = vpack.c.bf16 %v4590_v49, %v4590_v49  ;;  %v4722_v55 = vsel %vm1653_vm9, %v4690_v1, 0.0 }
 0x223   : > { %4560 = vst.msk [vmem:[#allocation3 + $0x18] sm:$0xff] %vm1653_vm9, %v4528_v9  ;;  %v4623_v26 = vadd.f32 %v4622_v15, %v4621_v59  ;;  %v4382_v6 = vpop.f32.mrb[40].mxu0 }
 0x224   : > { %v4723_v36 = vsel %vm1653_vm9, %v4691_v47, 0.0  ;;  %4923 = vst.msk [vmem:[%s7170_s9 + $0x4] sm:$0xf] %vm791_vm0, %v5510_v16  ;;  %v4384_v60 = vpop.f32.mrb[41].mxu0 }
 0x225   : > { %v4724_v39 = vadd.f32 %v4723_v36, %v4722_v55  ;;  %v4385_v12 = vpop.f32.mrb[42].mxu0 }
 0x226   : > { %v4497_v37 = vld [vmem:[#allocation3 + $0x20] sm:$0xff]  ;;  %v4387_v5 = vpop.f32.mrb[43].mxu0 }
 0x227   : > { %v4529_v27 = vadd.f32 %v4497_v37, %v4382_v6  ;;  %v4591_v33 = vld [vmem:[#allocation3 + $0x10] sm:$0xff] }
 0x228   : > { %v4498_v11 = vld [vmem:[#allocation3 + $0x28] sm:$0xff]  ;;  %v4624_v34 = vsel %vm1653_vm9, %v4591_v33, 0.0  ;;  %v4692_v48 = vmul.f32 %v4591_v33, %v4591_v33  ;;  %v5511_v30 = vpack.c.bf16 %v4591_v33, %v4591_v33  ;;  %v3123_v50 = vpop.f32.mrb[44].mxu1  ;;  %v3236_v6 = vld [vmem:[#allocation3 + $0x50] sm:$0xff] }
 0x229   : > { %4561 = vst.msk [vmem:[#allocation3 + $0x20] sm:$0xff] %vm1653_vm9, %v4529_v27  ;;  %v4530_v24 = vadd.f32 %v4498_v11, %v4385_v12  ;;  %v4625_v63 = vadd.f32 %v4624_v34, %v4623_v26  ;;  %v3264_v40 = vadd.f32 %v3232_v29, %v3123_v50  ;;  %v3125_v2 = vpop.f32.mrb[45].mxu1  ;;  %v3237_v11 = vld [vmem:[#allocation3 + $0x58] sm:$0xff] }
 0x22a   : > { %v4592_v3 = vld [vmem:[#allocation3 + $0x18] sm:$0xff]  ;;  %v4725_v23 = vsel %vm1653_vm9, %v4692_v48, 0.0  ;;  %4924 = vst.msk [vmem:[%s7170_s9 + $0x8] sm:$0xf] %vm791_vm0, %v5511_v30  ;;  %v3126_v32 = vpop.f32.mrb[46].mxu1 }
 0x22b   : > { %v4626_v54 = vsel %vm1653_vm9, %v4592_v3, 0.0  ;;  %v4693_v0 = vmul.f32 %v4592_v3, %v4592_v3  ;;  %v5512_v52 = vpack.c.bf16 %v4592_v3, %v4592_v3  ;;  %4562 = vst.msk [vmem:[#allocation3 + $0x28] sm:$0xff] %vm1653_vm9, %v4530_v24  ;;  %v4726_v7 = vadd.f32 %v4725_v23, %v4724_v39  ;;  %3296 = vst.msk [vmem:[#allocation3 + $0x30] sm:$0xff] %vm1653_vm9, %v3264_v40  ;;  %v3128_v14 = vpop.f32.mrb[47].mxu1  ;;  %v4390_v62 = vpop.f32.mrb[44].mxu0 }
 0x22c   : > { %v4627_v18 = vadd.f32 %v4626_v54, %v4625_v63  ;;  %v3265_v28 = vadd.f32 %v3233_v53, %v3126_v32  ;;  %v4392_v44 = vpop.f32.mrb[45].mxu0 }
 0x22d   : > { %v4727_v22 = vsel %vm1653_vm9, %v4693_v0, 0.0  ;;  %4925 = vst.msk [vmem:[%s7170_s9 + $0xc] sm:$0xf] %vm791_vm0, %v5512_v52  ;;  %v4393_v31 = vpop.f32.mrb[46].mxu0 }
 0x22e   : > { %v4728_v43 = vadd.f32 %v4727_v22, %v4726_v7  ;;  %3297 = vst.msk [vmem:[#allocation3 + $0x38] sm:$0xff] %vm1653_vm9, %v3265_v28  ;;  %v4395_v25 = vpop.f32.mrb[47].mxu0  ;;  %v3238_v22 = vld [vmem:[#allocation3 + $0x60] sm:$0xff] }
 0x230   : > { %v4593_v10 = vld [vmem:[#allocation3 + $0x20] sm:$0xff]  ;;  %v3131_v21 = vpop.f32.mrb[48].mxu1 }
 0x231   : > { %v4628_v56 = vsel %vm1653_vm9, %v4593_v10, 0.0  ;;  %v4694_v61 = vmul.f32 %v4593_v10, %v4593_v10  ;;  %v5513_v19 = vpack.c.bf16 %v4593_v10, %v4593_v10  ;;  %v3266_v4 = vadd.f32 %v3234_v57, %v3131_v21  ;;  %v3133_v38 = vpop.f32.mrb[49].mxu1 }
 0x232   : > { %v4629_v17 = vadd.f32 %v4628_v56, %v4627_v18  ;;  %v4594_v45 = vld [vmem:[#allocation3 + $0x28] sm:$0xff]  ;;  %v4499_v35 = vld [vmem:[#allocation3 + $0x30] sm:$0xff]  ;;  %v3134_v8 = vpop.f32.mrb[50].mxu1 }
 0x233   : > { %v4729_v13 = vsel %vm1653_vm9, %v4694_v61, 0.0  ;;  %4926 = vst.msk [vmem:[%s7170_s9 + $0x10] sm:$0xf] %vm791_vm0, %v5513_v19  ;;  %v4630_v46 = vsel %vm1653_vm9, %v4594_v45, 0.0  ;;  %v4695_v58 = vmul.f32 %v4594_v45, %v4594_v45  ;;  %v5514_v42 = vpack.c.bf16 %v4594_v45, %v4594_v45  ;;  %v3136_v49 = vpop.f32.mrb[51].mxu1  ;;  %v4398_v26 = vpop.f32.mrb[48].mxu0 }
 0x234   : > { %v4730_v20 = vadd.f32 %v4729_v13, %v4728_v43  ;;  %v4631_v1 = vadd.f32 %v4630_v46, %v4629_v17  ;;  %v4531_v41 = vadd.f32 %v4499_v35, %v4390_v62  ;;  %3298 = vst.msk [vmem:[#allocation3 + $0x40] sm:$0xff] %vm1653_vm9, %v3266_v4  ;;  %v3267_v9 = vadd.f32 %v3235_v51, %v3134_v8  ;;  %v4400_v55 = vpop.f32.mrb[49].mxu0  ;;  %v3239_v19 = vld [vmem:[#allocation3 + $0x68] sm:$0xff] }
 0x235   : > { %v4731_v59 = vsel %vm1653_vm9, %v4695_v58, 0.0  ;;  %4927 = vst.msk [vmem:[%s7170_s9 + $0x14] sm:$0xf] %vm791_vm0, %v5514_v42  ;;  %v4500_v15 = vld [vmem:[#allocation3 + $0x38] sm:$0xff]  ;;  %v4401_v36 = vpop.f32.mrb[50].mxu0 }
 0x236   : > { %v4732_v47 = vadd.f32 %v4731_v59, %v4730_v20  ;;  %4563 = vst.msk [vmem:[#allocation3 + $0x30] sm:$0xff] %vm1653_vm9, %v4531_v41  ;;  %v4532_v16 = vadd.f32 %v4500_v15, %v4393_v31  ;;  %3299 = vst.msk [vmem:[#allocation3 + $0x48] sm:$0xff] %vm1653_vm9, %v3267_v9  ;;  %v4403_v37 = vpop.f32.mrb[51].mxu0 }
 0x238   : > { %4564 = vst.msk [vmem:[#allocation3 + $0x38] sm:$0xff] %vm1653_vm9, %v4532_v16  ;;  %v3139_v39 = vpop.f32.mrb[52].mxu1 }
 0x239   : > { %v3268_v27 = vadd.f32 %v3236_v6, %v3139_v39  ;;  %v3141_v60 = vpop.f32.mrb[53].mxu1 }
 0x23a   : > { %v3142_v12 = vpop.f32.mrb[54].mxu1 }
 0x23b   : > { %v4501_v33 = vld [vmem:[#allocation3 + $0x40] sm:$0xff]  ;;  %3300 = vst.msk [vmem:[#allocation3 + $0x50] sm:$0xff] %vm1653_vm9, %v3268_v27  ;;  %v3269_v48 = vadd.f32 %v3237_v11, %v3142_v12  ;;  %v3144_v30 = vpop.f32.mrb[55].mxu1  ;;  %v4406_v40 = vpop.f32.mrb[52].mxu0  ;;  %v3241_v27 = vld [vmem:[#allocation3 + $0x78] sm:$0xff] }
 0x23c   : > { %v4533_v34 = vadd.f32 %v4501_v33, %v4398_v26  ;;  %v4408_v54 = vpop.f32.mrb[53].mxu0 }
 0x23d   : > { %v4595_v50 = vld [vmem:[#allocation3 + $0x30] sm:$0xff]  ;;  %v4502_v29 = vld [vmem:[#allocation3 + $0x48] sm:$0xff]  ;;  %3301 = vst.msk [vmem:[#allocation3 + $0x58] sm:$0xff] %vm1653_vm9, %v3269_v48  ;;  %v4409_v7 = vpop.f32.mrb[54].mxu0 }
 0x23e   : > { %v4632_v24 = vsel %vm1653_vm9, %v4595_v50, 0.0  ;;  %v4696_v5 = vmul.f32 %v4595_v50, %v4595_v50  ;;  %v5515_v63 = vpack.c.bf16 %v4595_v50, %v4595_v50  ;;  %4565 = vst.msk [vmem:[#allocation3 + $0x40] sm:$0xff] %vm1653_vm9, %v4533_v34  ;;  %v4534_v3 = vadd.f32 %v4502_v29, %v4401_v36  ;;  %v4411_v43 = vpop.f32.mrb[55].mxu0 }
 0x23f   : > { %v4633_v2 = vadd.f32 %v4632_v24, %v4631_v1  ;;  %v4596_v23 = vld [vmem:[#allocation3 + $0x38] sm:$0xff] }
 0x240   : > { %v4733_v0 = vsel %vm1653_vm9, %v4696_v5, 0.0  ;;  %4928 = vst.msk [vmem:[%s7170_s9 + $0x18] sm:$0xf] %vm791_vm0, %v5515_v63  ;;  %v4634_v52 = vsel %vm1653_vm9, %v4596_v23, 0.0  ;;  %v4697_v32 = vmul.f32 %v4596_v23, %v4596_v23  ;;  %v5516_v53 = vpack.c.bf16 %v4596_v23, %v4596_v23  ;;  %v3147_v14 = vpop.f32.mrb[56].mxu1 }
 0x241   : > { %4566 = vst.msk [vmem:[#allocation3 + $0x48] sm:$0xff] %vm1653_vm9, %v4534_v3  ;;  %v4734_v18 = vadd.f32 %v4733_v0, %v4732_v47  ;;  %v4635_v28 = vadd.f32 %v4634_v52, %v4633_v2  ;;  %v3270_v44 = vadd.f32 %v3238_v22, %v3147_v14  ;;  %v3149_v10 = vpop.f32.mrb[57].mxu1  ;;  %v3240_v47 = vld [vmem:[#allocation3 + $0x70] sm:$0xff]  ;;  %v3242_v0 = vld [vmem:[#allocation3 + $0x80] sm:$0xff] }
 0x242   : > { %v4735_v62 = vsel %vm1653_vm9, %v4697_v32, 0.0  ;;  %4929 = vst.msk [vmem:[%s7170_s9 + $0x1c] sm:$0xf] %vm791_vm0, %v5516_v53  ;;  %v4503_v56 = vld [vmem:[#allocation3 + $0x50] sm:$0xff]  ;;  %v3150_v61 = vpop.f32.mrb[58].mxu1 }
 0x243   : > { %v4736_v31 = vadd.f32 %v4735_v62, %v4734_v18  ;;  %v4535_v21 = vadd.f32 %v4503_v56, %v4406_v40  ;;  %3302 = vst.msk [vmem:[#allocation3 + $0x60] sm:$0xff] %vm1653_vm9, %v3270_v44  ;;  %v3271_v57 = vadd.f32 %v3239_v19, %v3150_v61  ;;  %v3152_v25 = vpop.f32.mrb[59].mxu1  ;;  %v4414_v58 = vpop.f32.mrb[56].mxu0 }
 0x244   : > { %v4504_v45 = vld [vmem:[#allocation3 + $0x58] sm:$0xff]  ;;  %v4416_v8 = vpop.f32.mrb[57].mxu0 }
 0x245   : > { %v4597_v17 = vld [vmem:[#allocation3 + $0x40] sm:$0xff]  ;;  %4567 = vst.msk [vmem:[#allocation3 + $0x50] sm:$0xff] %vm1653_vm9, %v4535_v21  ;;  %v4536_v46 = vadd.f32 %v4504_v45, %v4409_v7  ;;  %3303 = vst.msk [vmem:[#allocation3 + $0x68] sm:$0xff] %vm1653_vm9, %v3271_v57  ;;  %v4417_v9 = vpop.f32.mrb[58].mxu0 }
 0x246   : > { %v4636_v4 = vsel %vm1653_vm9, %v4597_v17, 0.0  ;;  %v4698_v38 = vmul.f32 %v4597_v17, %v4597_v17  ;;  %v5517_v13 = vpack.c.bf16 %v4597_v17, %v4597_v17  ;;  %v4419_v16 = vpop.f32.mrb[59].mxu0  ;;  %v3244_v17 = vld [vmem:[#allocation3 + $0x90] sm:$0xff] }
 0x247   : > { %v4637_v42 = vadd.f32 %v4636_v4, %v4635_v28  ;;  %4568 = vst.msk [vmem:[#allocation3 + $0x58] sm:$0xff] %vm1653_vm9, %v4536_v46  ;;  %v3243_v28 = vld [vmem:[#allocation3 + $0x88] sm:$0xff] }
 0x248   : > { %v4598_v35 = vld [vmem:[#allocation3 + $0x48] sm:$0xff]  ;;  %v4737_v51 = vsel %vm1653_vm9, %v4698_v38, 0.0  ;;  %4930 = vst.msk [vmem:[%s7170_s9 + $0x20] sm:$0xf] %vm791_vm0, %v5517_v13  ;;  %v3155_v15 = vpop.f32.mrb[60].mxu1 }
 0x249   : > { %v4638_v20 = vsel %vm1653_vm9, %v4598_v35, 0.0  ;;  %v4699_v1 = vmul.f32 %v4598_v35, %v4598_v35  ;;  %v5518_v41 = vpack.c.bf16 %v4598_v35, %v4598_v35  ;;  %v4738_v49 = vadd.f32 %v4737_v51, %v4736_v31  ;;  %v3157_v36 = vpop.f32.mrb[61].mxu1 }
 0x24a   : > { %v4639_v59 = vadd.f32 %v4638_v20, %v4637_v42  ;;  %v3272_v55 = vadd.f32 %v3240_v47, %v3155_v15  ;;  %v4505_v6 = vld [vmem:[#allocation3 + $0x60] sm:$0xff]  ;;  %v3158_v37 = vpop.f32.mrb[62].mxu1 }
 0x24b   : > { %v4739_v26 = vsel %vm1653_vm9, %v4699_v1, 0.0  ;;  %4931 = vst.msk [vmem:[%s7170_s9 + $0x24] sm:$0xf] %vm791_vm0, %v5518_v41  ;;  %v4537_v60 = vadd.f32 %v4505_v6, %v4414_v58  ;;  %v3273_v33 = vadd.f32 %v3241_v27, %v3158_v37  ;;  %v3160_v12 = vpop.f32.mrb[63].mxu1  ;;  %v4422_v29 = vpop.f32.mrb[60].mxu0  ;;  %v3245_v58 = vld [vmem:[#allocation3 + $0x98] sm:$0xff] }
 0x24c   : > { %v7231_v39 = vadd.f32 %v4739_v26, %v4738_v49  ;;  %3304 = vst.msk [vmem:[#allocation3 + $0x70] sm:$0xff] %vm1653_vm9, %v3272_v55  ;;  %v7234_v11 = vld [vmem:[#allocation3 + $0x50] sm:$0xff]  ;;  %v4506_v34 = vld [vmem:[#allocation3 + $0x68] sm:$0xff]  ;;  %v4424_v63 = vpop.f32.mrb[61].mxu0  ;;  %v3246_v26 = vld [vmem:[#allocation3 + $0xa0] sm:$0xff] }
 0x24d   : > { %v4640_v48 = vsel %vm1653_vm9, %v7234_v11, 0.0  ;;  %v5519_v30 = vpack.c.bf16 %v7234_v11, %v7234_v11  ;;  %4569 = vst.msk [vmem:[#allocation3 + $0x60] sm:$0xff] %vm1653_vm9, %v4537_v60  ;;  %v4538_v50 = vadd.f32 %v4506_v34, %v4417_v9  ;;  %3305 = vst.msk [vmem:[#allocation3 + $0x78] sm:$0xff] %vm1653_vm9, %v3273_v33  ;;  %v4425_v2 = vpop.f32.mrb[62].mxu0  ;;  %v3247_v60 = vld [vmem:[#allocation3 + $0xa8] sm:$0xff] }
 0x24e   : > { %v4641_v24 = vadd.f32 %v4640_v48, %v4639_v59  ;;  %v7242_v5 = vld [vmem:[#allocation3 + $0x58] sm:$0xff]  ;;  %v4427_v52 = vpop.f32.mrb[63].mxu0 }
 0x24f   : > { %4932 = vst.msk [vmem:[%s7170_s9 + $0x28] sm:$0xf] %vm791_vm0, %v5519_v30  ;;  %v4642_v3 = vsel %vm1653_vm9, %v7242_v5, 0.0  ;;  %v5520_v40 = vpack.c.bf16 %v7242_v5, %v7242_v5 }
 0x250   : > { %4570 = vst.msk [vmem:[#allocation3 + $0x68] sm:$0xff] %vm1653_vm9, %v4538_v50  ;;  %v7251_v23 = vadd.f32 %v4642_v3, %v4641_v24  ;;  %v3163_v54 = vpop.f32.mrb[64].mxu1 }
 0x251   : > { %4933 = vst.msk [vmem:[%s7170_s9 + $0x2c] sm:$0xf] %vm791_vm0, %v5520_v40  ;;  %v3274_v32 = vadd.f32 %v3242_v0, %v3163_v54  ;;  %v3165_v53 = vpop.f32.mrb[65].mxu1  ;;  %v3248_v0 = vld [vmem:[#allocation3 + $0xb0] sm:$0xff] }
 0x252   : > { %v3166_v18 = vpop.f32.mrb[66].mxu1 }
 0x253   : > { %v4507_v7 = vld [vmem:[#allocation3 + $0x70] sm:$0xff]  ;;  %3306 = vst.msk [vmem:[#allocation3 + $0x80] sm:$0xff] %vm1653_vm9, %v3274_v32  ;;  %v3275_v22 = vadd.f32 %v3243_v28, %v3166_v18  ;;  %v3168_v43 = vpop.f32.mrb[67].mxu1  ;;  %v4430_v56 = vpop.f32.mrb[64].mxu0  ;;  %v3249_v28 = vld [vmem:[#allocation3 + $0xb8] sm:$0xff] }
 0x254   : > { %v4539_v14 = vadd.f32 %v4507_v7, %v4422_v29  ;;  %v7256_v62 = vld [vmem:[#allocation3 + $0x60] sm:$0xff]  ;;  %v4508_v44 = vld [vmem:[#allocation3 + $0x78] sm:$0xff]  ;;  %v4432_v19 = vpop.f32.mrb[65].mxu0 }
 0x255   : > { %v5521_v10 = vpack.c.bf16 %v7256_v62, %v7256_v62  ;;  %v4540_v31 = vadd.f32 %v4508_v44, %v4425_v2  ;;  %3307 = vst.msk [vmem:[#allocation3 + $0x88] sm:$0xff] %vm1653_vm9, %v3275_v22  ;;  %v4433_v57 = vpop.f32.mrb[66].mxu0 }
 0x256   : > { %4571 = vst.msk [vmem:[#allocation3 + $0x70] sm:$0xff] %vm1653_vm9, %v4539_v14  ;;  %v4435_v45 = vpop.f32.mrb[67].mxu0 }
 0x257   : > { %v7262_v61 = vld [vmem:[#allocation3 + $0x68] sm:$0xff]  ;;  %4934 = vst.msk [vmem:[%s7170_s9 + $0x30] sm:$0xf] %vm791_vm0, %v5521_v10 }
 0x258   : > { %v5522_v21 = vpack.c.bf16 %v7262_v61, %v7262_v61  ;;  %4572 = vst.msk [vmem:[#allocation3 + $0x78] sm:$0xff] %vm1653_vm9, %v4540_v31  ;;  %v3171_v25 = vpop.f32.mrb[68].mxu1 }
 0x259   : > { %v3276_v4 = vadd.f32 %v3244_v17, %v3171_v25  ;;  %v3173_v38 = vpop.f32.mrb[69].mxu1 }
 0x25a   : > { %4935 = vst.msk [vmem:[%s7170_s9 + $0x34] sm:$0xf] %vm791_vm0, %v5522_v21  ;;  %v4509_v13 = vld [vmem:[#allocation3 + $0x80] sm:$0xff]  ;;  %v3174_v46 = vpop.f32.mrb[70].mxu1 }
 0x25b   : > { %v4541_v42 = vadd.f32 %v4509_v13, %v4430_v56  ;;  %3308 = vst.msk [vmem:[#allocation3 + $0x90] sm:$0xff] %vm1653_vm9, %v3276_v4  ;;  %v3277_v35 = vadd.f32 %v3245_v58, %v3174_v46  ;;  %v3176_v8 = vpop.f32.mrb[71].mxu1  ;;  %v4438_v9 = vpop.f32.mrb[68].mxu0  ;;  %v3250_v4 = vld [vmem:[#allocation3 + $0xc0] sm:$0xff] }
 0x25c   : > { %v4510_v20 = vld [vmem:[#allocation3 + $0x88] sm:$0xff]  ;;  %v4440_v59 = vpop.f32.mrb[69].mxu0  ;;  %v4700_v8 = vmul.f32 %v7234_v11, %v7234_v11 }
 0x25d   : > { %v7272_v51 = vld [vmem:[#allocation3 + $0x70] sm:$0xff]  ;;  %4573 = vst.msk [vmem:[#allocation3 + $0x80] sm:$0xff] %vm1653_vm9, %v4541_v42  ;;  %v4542_v41 = vadd.f32 %v4510_v20, %v4433_v57  ;;  %3309 = vst.msk [vmem:[#allocation3 + $0x98] sm:$0xff] %vm1653_vm9, %v3277_v35  ;;  %v4441_v47 = vpop.f32.mrb[70].mxu0  ;;  %v3251_v35 = vld [vmem:[#allocation3 + $0xc8] sm:$0xff] }
 0x25e   : > { %v5523_v1 = vpack.c.bf16 %v7272_v51, %v7272_v51  ;;  %v4443_v55 = vpop.f32.mrb[71].mxu0 }
 0x25f   : > { %v7278_v49 = vld [vmem:[#allocation3 + $0x78] sm:$0xff]  ;;  %4574 = vst.msk [vmem:[#allocation3 + $0x88] sm:$0xff] %vm1653_vm9, %v4542_v41  ;;  %v4741_v55 = vsel %vm1653_vm9, %v4700_v8, 0.0 }
 0x260   : > { %4936 = vst.msk [vmem:[%s7170_s9 + $0x38] sm:$0xf] %vm791_vm0, %v5523_v1  ;;  %v5524_v15 = vpack.c.bf16 %v7278_v49, %v7278_v49  ;;  %v3179_v16 = vpop.f32.mrb[72].mxu1  ;;  %v4705_v8 = vmul.f32 %v7278_v49, %v7278_v49 }
 0x261   : > { %v3278_v36 = vadd.f32 %v3246_v26, %v3179_v16  ;;  %v3181_v6 = vpop.f32.mrb[73].mxu1 }
 0x262   : > { %4937 = vst.msk [vmem:[%s7170_s9 + $0x3c] sm:$0xf] %vm791_vm0, %v5524_v15  ;;  %v4511_v37 = vld [vmem:[#allocation3 + $0x90] sm:$0xff]  ;;  %v3182_v27 = vpop.f32.mrb[74].mxu1 }
 0x263   : > { %v4543_v33 = vadd.f32 %v4511_v37, %v4438_v9  ;;  %3310 = vst.msk [vmem:[#allocation3 + $0xa0] sm:$0xff] %vm1653_vm9, %v3278_v36  ;;  %v3279_v12 = vadd.f32 %v3247_v60, %v3182_v27  ;;  %v3184_v34 = vpop.f32.mrb[75].mxu1  ;;  %v4446_v24 = vpop.f32.mrb[72].mxu0  ;;  %v4701_v36 = vmul.f32 %v7242_v5, %v7242_v5  ;;  %v3252_v60 = vld [vmem:[#allocation3 + $0xd0] sm:$0xff]  ;;  %v4742_v5 = vadd.f32 %v4741_v55, %v7231_v39 }
 0x264   : > { %v7288_v48 = vld [vmem:[#allocation3 + $0x80] sm:$0xff]  ;;  %v4512_v30 = vld [vmem:[#allocation3 + $0x98] sm:$0xff]  ;;  %v4448_v3 = vpop.f32.mrb[73].mxu0  ;;  %v4703_v39 = vmul.f32 %v7262_v61, %v7262_v61 }
 0x265   : > { %v5525_v50 = vpack.c.bf16 %v7288_v48, %v7288_v48  ;;  %4575 = vst.msk [vmem:[#allocation3 + $0x90] sm:$0xff] %vm1653_vm9, %v4543_v33  ;;  %v4544_v29 = vadd.f32 %v4512_v30, %v4441_v47  ;;  %3311 = vst.msk [vmem:[#allocation3 + $0xa8] sm:$0xff] %vm1653_vm9, %v3279_v12  ;;  %v4449_v2 = vpop.f32.mrb[74].mxu0  ;;  %v4702_v12 = vmul.f32 %v7256_v62, %v7256_v62  ;;  %v4743_v3 = vsel %vm1653_vm9, %v4701_v36, 0.0 }
 0x266   : > { %v7294_v63 = vld [vmem:[#allocation3 + $0x88] sm:$0xff]  ;;  %v4451_v52 = vpop.f32.mrb[75].mxu0 }
 0x267   : > { %4938 = vst.msk [vmem:[%s7170_s9 + $0x40] sm:$0xf] %vm791_vm0, %v5525_v50  ;;  %v5526_v40 = vpack.c.bf16 %v7294_v63, %v7294_v63 }
 0x268   : > { %4576 = vst.msk [vmem:[#allocation3 + $0x98] sm:$0xff] %vm1653_vm9, %v4544_v29  ;;  %v3187_v54 = vpop.f32.mrb[76].mxu1 }
 0x269   : > { %4939 = vst.msk [vmem:[%s7170_s9 + $0x44] sm:$0xf] %vm791_vm0, %v5526_v40  ;;  %v3280_v32 = vadd.f32 %v3248_v0, %v3187_v54  ;;  %v3189_v53 = vpop.f32.mrb[77].mxu1  ;;  %v4644_v40 = vsel %vm1653_vm9, %v7256_v62, 0.0 }
 0x26a   : > { %v4513_v7 = vld [vmem:[#allocation3 + $0xa0] sm:$0xff]  ;;  %v3190_v18 = vpop.f32.mrb[78].mxu1  ;;  %v4745_v53 = vsel %vm1653_vm9, %v4702_v12, 0.0 }
 0x26b   : > { %v4545_v14 = vadd.f32 %v4513_v7, %v4446_v24  ;;  %3312 = vst.msk [vmem:[#allocation3 + $0xb0] sm:$0xff] %vm1653_vm9, %v3280_v32  ;;  %v3281_v22 = vadd.f32 %v3249_v28, %v3190_v18  ;;  %v3192_v43 = vpop.f32.mrb[79].mxu1  ;;  %v4454_v19 = vpop.f32.mrb[76].mxu0  ;;  %v3253_v24 = vld [vmem:[#allocation3 + $0xd8] sm:$0xff]  ;;  %v4744_v28 = vadd.f32 %v4743_v3, %v4742_v5 }
 0x26c   : > { %v7304_v44 = vld [vmem:[#allocation3 + $0x90] sm:$0xff]  ;;  %v4514_v10 = vld [vmem:[#allocation3 + $0xa8] sm:$0xff]  ;;  %v4456_v57 = vpop.f32.mrb[77].mxu0 }
 0x26d   : > { %v5527_v31 = vpack.c.bf16 %v7304_v44, %v7304_v44  ;;  %4577 = vst.msk [vmem:[#allocation3 + $0xa0] sm:$0xff] %vm1653_vm9, %v4545_v14  ;;  %v4546_v56 = vadd.f32 %v4514_v10, %v4449_v2  ;;  %3313 = vst.msk [vmem:[#allocation3 + $0xb8] sm:$0xff] %vm1653_vm9, %v3281_v22  ;;  %v4457_v17 = vpop.f32.mrb[78].mxu0  ;;  %v4645_v14 = vadd.f32 %v4644_v40, %v7251_v23  ;;  %v4646_v10 = vsel %vm1653_vm9, %v7262_v61, 0.0  ;;  %v3254_v23 = vld [vmem:[#allocation3 + $0xe0] sm:$0xff] }
 0x26e   : > { %v4459_v38 = vpop.f32.mrb[79].mxu0  ;;  %v4746_v57 = vadd.f32 %v4745_v53, %v4744_v28  ;;  %v4648_v61 = vsel %vm1653_vm9, %v7272_v51, 0.0  ;;  %v4656_v40 = vsel %vm1653_vm9, %v7304_v44, 0.0 }
 0x26f   : > { %v7310_v21 = vld [vmem:[#allocation3 + $0x98] sm:$0xff]  ;;  %4940 = vst.msk [vmem:[%s7170_s9 + $0x48] sm:$0xf] %vm791_vm0, %v5527_v31  ;;  %v4704_v31 = vmul.f32 %v7272_v51, %v7272_v51 }
 0x270   : > { %v5528_v25 = vpack.c.bf16 %v7310_v21, %v7310_v21  ;;  %4578 = vst.msk [vmem:[#allocation3 + $0xa8] sm:$0xff] %vm1653_vm9, %v4546_v56  ;;  %v3195_v45 = vpop.f32.mrb[80].mxu1 }
 0x271   : > { %v3282_v13 = vadd.f32 %v3250_v4, %v3195_v45  ;;  %v3197_v46 = vpop.f32.mrb[81].mxu1  ;;  %v4747_v45 = vsel %vm1653_vm9, %v4703_v39, 0.0 }
 0x272   : > { %4941 = vst.msk [vmem:[%s7170_s9 + $0x4c] sm:$0xf] %vm791_vm0, %v5528_v25  ;;  %v4515_v58 = vld [vmem:[#allocation3 + $0xb0] sm:$0xff]  ;;  %v3198_v42 = vpop.f32.mrb[82].mxu1  ;;  %v4748_v51 = vadd.f32 %v4747_v45, %v4746_v57 }
 0x273   : > { %v4547_v20 = vadd.f32 %v4515_v58, %v4454_v19  ;;  %3314 = vst.msk [vmem:[#allocation3 + $0xc0] sm:$0xff] %vm1653_vm9, %v3282_v13  ;;  %v3283_v1 = vadd.f32 %v3251_v35, %v3198_v42  ;;  %v3200_v41 = vpop.f32.mrb[83].mxu1  ;;  %v4462_v16 = vpop.f32.mrb[80].mxu0  ;;  %v4647_v13 = vadd.f32 %v4646_v10, %v4645_v14  ;;  %v3255_v42 = vld [vmem:[#allocation3 + $0xe8] sm:$0xff]  ;;  %v4749_v35 = vsel %vm1653_vm9, %v4704_v31, 0.0 }
 0x274   : > { %v7322_v9 = vld [vmem:[#allocation3 + $0xa0] sm:$0xff]  ;;  %v4516_v59 = vld [vmem:[#allocation3 + $0xb8] sm:$0xff]  ;;  %v4464_v26 = vpop.f32.mrb[81].mxu0 }
 0x275   : > { %v5529_v15 = vpack.c.bf16 %v7322_v9, %v7322_v9  ;;  %4579 = vst.msk [vmem:[#allocation3 + $0xb0] sm:$0xff] %vm1653_vm9, %v4547_v20  ;;  %v4548_v47 = vadd.f32 %v4516_v59, %v4457_v17  ;;  %3315 = vst.msk [vmem:[#allocation3 + $0xc8] sm:$0xff] %vm1653_vm9, %v3283_v1  ;;  %v4465_v37 = vpop.f32.mrb[82].mxu0  ;;  %v4649_v59 = vadd.f32 %v4648_v61, %v4647_v13  ;;  %v4660_v14 = vsel %vm1653_vm9, %v7322_v9, 0.0 }
 0x276   : > { %v4467_v33 = vpop.f32.mrb[83].mxu0  ;;  %v4706_v26 = vmul.f32 %v7288_v48, %v7288_v48 }
 0x277   : > { %v7328_v11 = vld [vmem:[#allocation3 + $0xa8] sm:$0xff]  ;;  %4942 = vst.msk [vmem:[%s7170_s9 + $0x50] sm:$0xf] %vm791_vm0, %v5529_v15 }
 0x278   : > { %v5530_v6 = vpack.c.bf16 %v7328_v11, %v7328_v11  ;;  %4580 = vst.msk [vmem:[#allocation3 + $0xb8] sm:$0xff] %vm1653_vm9, %v4548_v47  ;;  %v3203_v27 = vpop.f32.mrb[84].mxu1  ;;  %v4753_v12 = vsel %vm1653_vm9, %v4706_v26, 0.0  ;;  %v4711_v31 = vmul.f32 %v7328_v11, %v7328_v11 }
 0x279   : > { %v3284_v34 = vadd.f32 %v3252_v60, %v3203_v27  ;;  %v3205_v30 = vpop.f32.mrb[85].mxu1  ;;  %v4751_v27 = vsel %vm1653_vm9, %v4705_v8, 0.0 }
 0x27a   : > { %4943 = vst.msk [vmem:[%s7170_s9 + $0x54] sm:$0xf] %vm791_vm0, %v5530_v6  ;;  %v4517_v50 = vld [vmem:[#allocation3 + $0xc0] sm:$0xff]  ;;  %v3206_v29 = vpop.f32.mrb[86].mxu1  ;;  %v4750_v6 = vadd.f32 %v4749_v35, %v4748_v51 }
 0x27b   : > { %v4549_v2 = vadd.f32 %v4517_v50, %v4462_v16  ;;  %3316 = vst.msk [vmem:[#allocation3 + $0xd0] sm:$0xff] %vm1653_vm9, %v3284_v34  ;;  %v3285_v54 = vadd.f32 %v3253_v24, %v3206_v29  ;;  %v3208_v0 = vpop.f32.mrb[87].mxu1  ;;  %v4470_v18 = vpop.f32.mrb[84].mxu0  ;;  %v4650_v16 = vsel %vm1653_vm9, %v7278_v49, 0.0  ;;  %v4652_v49 = vsel %vm1653_vm9, %v7288_v48, 0.0 }
 0x27c   : > { %v7347_v52 = vld [vmem:[#allocation3 + $0xb0] sm:$0xff]  ;;  %v4518_v32 = vld [vmem:[#allocation3 + $0xc8] sm:$0xff]  ;;  %v4472_v43 = vpop.f32.mrb[85].mxu0  ;;  %v4651_v33 = vadd.f32 %v4650_v16, %v4649_v59  ;;  %v4707_v34 = vmul.f32 %v7294_v63, %v7294_v63  ;;  %v4752_v30 = vadd.f32 %v4751_v27, %v4750_v6  ;;  %v4654_v48 = vsel %vm1653_vm9, %v7294_v63, 0.0  ;;  %v3257_v6 = vld [vmem:[#allocation3 + $0xf8] sm:$0xff] }
 0x27d   : > { %v5531_v7 = vpack.c.bf16 %v7347_v52, %v7347_v52  ;;  %4581 = vst.msk [vmem:[#allocation3 + $0xc0] sm:$0xff] %vm1653_vm9, %v4549_v2  ;;  %v4550_v62 = vadd.f32 %v4518_v32, %v4465_v37  ;;  %3317 = vst.msk [vmem:[#allocation3 + $0xd8] sm:$0xff] %vm1653_vm9, %v3285_v54  ;;  %v4473_v19 = vpop.f32.mrb[86].mxu0  ;;  %v4708_v50 = vmul.f32 %v7304_v44, %v7304_v44  ;;  %v4658_v44 = vsel %vm1653_vm9, %v7310_v21, 0.0  ;;  %v3256_v59 = vld [vmem:[#allocation3 + $0xf0] sm:$0xff] }
 0x27e   : > { %v4475_v17 = vpop.f32.mrb[87].mxu0  ;;  %v4653_v5 = vadd.f32 %v4652_v49, %v4651_v33  ;;  %v4754_v29 = vadd.f32 %v4753_v12, %v4752_v30  ;;  %v4755_v3 = vsel %vm1653_vm9, %v4707_v34, 0.0  ;;  %v4709_v32 = vmul.f32 %v7310_v21, %v7310_v21 }
 0x27f   : > { %v7357_v22 = vld [vmem:[#allocation3 + $0xb8] sm:$0xff]  ;;  %4944 = vst.msk [vmem:[%s7170_s9 + $0x58] sm:$0xf] %vm791_vm0, %v5531_v7  ;;  %v4757_v63 = vsel %vm1653_vm9, %v4708_v50, 0.0  ;;  %v4662_v21 = vsel %vm1653_vm9, %v7328_v11, 0.0  ;;  %v4712_v57 = vmul.f32 %v7347_v52, %v7347_v52  ;;  %v4763_v17 = vsel %vm1653_vm9, %v4711_v31, 0.0 }
 0x280   : > { %v5532_v56 = vpack.c.bf16 %v7357_v22, %v7357_v22  ;;  %4582 = vst.msk [vmem:[#allocation3 + $0xc8] sm:$0xff] %vm1653_vm9, %v4550_v62  ;;  %v3211_v25 = vpop.f32.mrb[88].mxu1  ;;  %v4655_v54 = vadd.f32 %v4654_v48, %v4653_v5  ;;  %v4756_v39 = vadd.f32 %v4755_v3, %v4754_v29  ;;  %v4710_v62 = vmul.f32 %v7322_v9, %v7322_v9 }
 0x281   : > { %v3286_v4 = vadd.f32 %v3254_v23, %v3211_v25  ;;  %v3213_v38 = vpop.f32.mrb[89].mxu1  ;;  %v4759_v28 = vsel %vm1653_vm9, %v4709_v32, 0.0  ;;  %v4664_v9 = vsel %vm1653_vm9, %v7347_v52, 0.0  ;;  %v4713_v13 = vmul.f32 %v7357_v22, %v7357_v22 }
 0x282   : > { %4945 = vst.msk [vmem:[%s7170_s9 + $0x5c] sm:$0xf] %vm791_vm0, %v5532_v56  ;;  %v4519_v46 = vld [vmem:[#allocation3 + $0xd0] sm:$0xff]  ;;  %v3214_v58 = vpop.f32.mrb[90].mxu1  ;;  %v4657_v7 = vadd.f32 %v4656_v40, %v4655_v54  ;;  %v4761_v10 = vsel %vm1653_vm9, %v4710_v62, 0.0  ;;  %v4765_v38 = vsel %vm1653_vm9, %v4712_v57, 0.0 }
 0x283   : > { %v4551_v20 = vadd.f32 %v4519_v46, %v4470_v18  ;;  %3318 = vst.msk [vmem:[#allocation3 + $0xe0] sm:$0xff] %vm1653_vm9, %v3286_v4  ;;  %v3287_v1 = vadd.f32 %v3255_v42, %v3214_v58  ;;  %v3216_v41 = vpop.f32.mrb[91].mxu1  ;;  %v4758_v18 = vadd.f32 %v4757_v63, %v4756_v39  ;;  %v4666_v8 = vsel %vm1653_vm9, %v7357_v22, 0.0 }
 0x284   : > { %v7377_v15 = vld [vmem:[#allocation3 + $0xc0] sm:$0xff]  ;;  %v4520_v47 = vld [vmem:[#allocation3 + $0xd8] sm:$0xff]  ;;  %v4659_v43 = vadd.f32 %v4658_v44, %v4657_v7 }
 0x285   : > { %v5533_v55 = vpack.c.bf16 %v7377_v15, %v7377_v15  ;;  %4583 = vst.msk [vmem:[#allocation3 + $0xd0] sm:$0xff] %vm1653_vm9, %v4551_v20  ;;  %v4552_v36 = vadd.f32 %v4520_v47, %v4473_v19  ;;  %3319 = vst.msk [vmem:[#allocation3 + $0xe8] sm:$0xff] %vm1653_vm9, %v3287_v1  ;;  %v4760_v56 = vadd.f32 %v4759_v28, %v4758_v18  ;;  %v4767_v47 = vsel %vm1653_vm9, %v4713_v13, 0.0 }
 0x286   : > { %v4661_v19 = vadd.f32 %v4660_v14, %v4659_v43  ;;  %v4714_v20 = vmul.f32 %v7377_v15, %v7377_v15  ;;  %v4668_v16 = vsel %vm1653_vm9, %v7377_v15, 0.0 }
 0x287   : > { %v7387_v37 = vld [vmem:[#allocation3 + $0xc8] sm:$0xff]  ;;  %4946 = vst.msk [vmem:[%s7170_s9 + $0x60] sm:$0xf] %vm791_vm0, %v5533_v55  ;;  %v4762_v25 = vadd.f32 %v4761_v10, %v4760_v56 }
 0x288   : > { %v5534_v60 = vpack.c.bf16 %v7387_v37, %v7387_v37  ;;  %4584 = vst.msk [vmem:[#allocation3 + $0xd8] sm:$0xff] %vm1653_vm9, %v4552_v36  ;;  %v4663_v45 = vadd.f32 %v4662_v21, %v4661_v19  ;;  %v4769_v27 = vsel %vm1653_vm9, %v4714_v20, 0.0  ;;  %v4715_v49 = vmul.f32 %v7387_v37, %v7387_v37 }
 0x289   : > { %v4764_v58 = vadd.f32 %v4763_v17, %v4762_v25  ;;  %v4670_v15 = vsel %vm1653_vm9, %v7387_v37, 0.0 }
 0x28a   : > { %4947 = vst.msk [vmem:[%s7170_s9 + $0x64] sm:$0xf] %vm791_vm0, %v5534_v60  ;;  %v4521_v23 = vld [vmem:[#allocation3 + $0xe0] sm:$0xff]  ;;  %v4665_v42 = vadd.f32 %v4664_v9, %v4663_v45  ;;  %v4771_v40 = vsel %vm1653_vm9, %v4715_v49, 0.0 }
 0x28b   : > { %v4766_v41 = vadd.f32 %v4765_v38, %v4764_v58 }
 0x28c   : > { %v7406_v24 = vld [vmem:[#allocation3 + $0xd0] sm:$0xff]  ;;  %v4522_v4 = vld [vmem:[#allocation3 + $0xe8] sm:$0xff]  ;;  %v4667_v22 = vadd.f32 %v4666_v8, %v4665_v42 }
 0x28d   : > { %v5535_v2 = vpack.c.bf16 %v7406_v24, %v7406_v24  ;;  %v4768_v12 = vadd.f32 %v4767_v47, %v4766_v41  ;;  %v4716_v5 = vmul.f32 %v7406_v24, %v7406_v24 }
 0x28e   : > { %v4669_v34 = vadd.f32 %v4668_v16, %v4667_v22 }
 0x28f   : > { %v7413_v0 = vld [vmem:[#allocation3 + $0xd8] sm:$0xff]  ;;  %4948 = vst.msk [vmem:[%s7170_s9 + $0x68] sm:$0xf] %vm791_vm0, %v5535_v2  ;;  %v4770_v50 = vadd.f32 %v4769_v27, %v4768_v12  ;;  %v4672_v2 = vsel %vm1653_vm9, %v7406_v24, 0.0  ;;  %v4773_v37 = vsel %vm1653_vm9, %v4716_v5, 0.0 }
 0x290   : > { %v5536_v53 = vpack.c.bf16 %v7413_v0, %v7413_v0  ;;  %v4671_v32 = vadd.f32 %v4670_v15, %v4669_v34  ;;  %v4717_v39 = vmul.f32 %v7413_v0, %v7413_v0  ;;  %v4674_v28 = vsel %vm1653_vm9, %v7413_v0, 0.0 }
 0x291   : > { %v4772_v44 = vadd.f32 %v4771_v40, %v4770_v50 }
 0x292   : > { %4949 = vst.msk [vmem:[%s7170_s9 + $0x6c] sm:$0xf] %vm791_vm0, %v5536_v53  ;;  %v4673_v62 = vadd.f32 %v4672_v2, %v4671_v32  ;;  %v4775_v31 = vsel %vm1653_vm9, %v4717_v39, 0.0 }
 0x293   : > { %v4774_v43 = vadd.f32 %v4773_v37, %v4772_v44 }
 0x294   : > { %v4675_v21 = vadd.f32 %v4674_v28, %v4673_v62 }
 0x295   : > { %v4776_v0 = vadd.f32 %v4775_v31, %v4774_v43 }
 0x29a   : > { %v4478_v61 = vpop.f32.mrb[88].mxu0 }
 0x29b   : > { %v4553_v46 = vadd.f32 %v4521_v23, %v4478_v61  ;;  %v4480_v11 = vpop.f32.mrb[89].mxu0 }
 0x29c   : > { %v4481_v35 = vpop.f32.mrb[90].mxu0 }
 0x29d   : > { %4585 = vst.msk [vmem:[#allocation3 + $0xe0] sm:$0xff] %vm1653_vm9, %v4553_v46  ;;  %v4554_v52 = vadd.f32 %v4522_v4, %v4481_v35  ;;  %v4483_v1 = vpop.f32.mrb[91].mxu0 }
 0x29e   : > { %v3219_v51 = vpop.f32.mrb[92].mxu1 }
 0x29f   : > { %v3288_v26 = vadd.f32 %v3256_v59, %v3219_v51  ;;  %v3221_v55 = vpop.f32.mrb[93].mxu1  ;;  %4586 = vst.msk [vmem:[#allocation3 + $0xe8] sm:$0xff] %vm1653_vm9, %v4554_v52 }
 0x2a0   : > { %v3222_v36 = vpop.f32.mrb[94].mxu1 }
 0x2a1   : > { %3320 = vst.msk [vmem:[#allocation3 + $0xf0] sm:$0xff] %vm1653_vm9, %v3288_v26  ;;  %v3289_v60 = vadd.f32 %v3257_v6, %v3222_v36  ;;  %v3224_v33 = vpop.f32.mrb[95].mxu1 }
 0x2a2   : > { %v4486_v30 = vpop.f32.mrb[92].mxu0 }
 0x2a3   : > { %3321 = vst.msk [vmem:[#allocation3 + $0xf8] sm:$0xff] %vm1653_vm9, %v3289_v60  ;;  %v4488_v48 = vpop.f32.mrb[93].mxu0 }
 0x2a4   : > { %v4617_v29 = vld [vmem:[#allocation3 + $0xe0] sm:$0xff]  ;;  %v4489_v3 = vpop.f32.mrb[94].mxu0 }
 0x2a5   : > { %v5537_v54 = vpack.c.bf16 %v4617_v29, %v4617_v29  ;;  %v4491_v63 = vpop.f32.mrb[95].mxu0  ;;  %v4718_v14 = vmul.f32 %v4617_v29, %v4617_v29  ;;  %v4676_v56 = vsel %vm1653_vm9, %v4617_v29, 0.0 }
 0x2a6   : > { %v4618_v53 = vld [vmem:[#allocation3 + $0xe8] sm:$0xff]  ;;  %v4677_v23 = vadd.f32 %v4676_v56, %v4675_v21 }
 0x2a7   : > { %4950 = vst.msk [vmem:[%s7170_s9 + $0x70] sm:$0xf] %vm791_vm0, %v5537_v54  ;;  %v5538_v7 = vpack.c.bf16 %v4618_v53, %v4618_v53  ;;  %v4777_v57 = vsel %vm1653_vm9, %v4718_v14, 0.0  ;;  %v4719_v25 = vmul.f32 %v4618_v53, %v4618_v53  ;;  %v4678_v17 = vsel %vm1653_vm9, %v4618_v53, 0.0 }
 0x2a8   : > { %v4523_v18 = vld [vmem:[#allocation3 + $0xf0] sm:$0xff]  ;;  %v4778_v9 = vadd.f32 %v4777_v57, %v4776_v0  ;;  %v4679_v61 = vadd.f32 %v4678_v17, %v4677_v23 }
 0x2a9   : > { %4951 = vst.msk [vmem:[%s7170_s9 + $0x74] sm:$0xf] %vm791_vm0, %v5538_v7  ;;  %v4555_v24 = vadd.f32 %v4523_v18, %v4486_v30  ;;  %v4779_v45 = vsel %vm1653_vm9, %v4719_v25, 0.0 }
 0x2aa   : > { %v4524_v10 = vld [vmem:[#allocation3 + $0xf8] sm:$0xff]  ;;  %v4780_v11 = vadd.f32 %v4779_v45, %v4778_v9 }
 0x2ab   : > { %4587 = vst.msk [vmem:[#allocation3 + $0xf0] sm:$0xff] %vm1653_vm9, %v4555_v24  ;;  %v4556_v19 = vadd.f32 %v4524_v10, %v4489_v3 }
 0x2ad   : > { %4588 = vst.msk [vmem:[#allocation3 + $0xf8] sm:$0xff] %vm1653_vm9, %v4556_v19 }
 0x2b2   : > { %v4619_v4 = vld [vmem:[#allocation3 + $0xf0] sm:$0xff] }
 0x2b3   : > { %v4680_v38 = vsel %vm1653_vm9, %v4619_v4, 0.0  ;;  %v4720_v13 = vmul.f32 %v4619_v4, %v4619_v4  ;;  %v5539_v46 = vpack.c.bf16 %v4619_v4, %v4619_v4 }
 0x2b4   : > { %v4681_v58 = vadd.f32 %v4680_v38, %v4679_v61  ;;  %v4620_v42 = vld [vmem:[#allocation3 + $0xf8] sm:$0xff] }
 0x2b5   : > { %v4781_v35 = vsel %vm1653_vm9, %v4720_v13, 0.0  ;;  %4952 = vst.msk [vmem:[%s7170_s9 + $0x78] sm:$0xf] %vm791_vm0, %v5539_v46  ;;  %v4682_v8 = vsel %vm1653_vm9, %v4620_v42, 0.0  ;;  %v4721_v20 = vmul.f32 %v4620_v42, %v4620_v42  ;;  %v5540_v52 = vpack.c.bf16 %v4620_v42, %v4620_v42 }
 0x2b6   : > { %v4782_v1 = vadd.f32 %v4781_v35, %v4780_v11  ;;  %v4683_v41 = vadd.f32 %v4682_v8, %v4681_v58 }
 0x2b7   : > { %v4783_v51 = vsel %vm1653_vm9, %v4721_v20, 0.0  ;;  %4953 = vst.msk [vmem:[%s7170_s9 + $0x7c] sm:$0xf] %vm791_vm0, %v5540_v52 }
 0x2b8   : > { %v4684_v59 = vrot.slane %v4683_v41, 4  ;;  %v4784_v47 = vadd.f32 %v4783_v51, %v4782_v1 }
 0x2ba   : > { %v4685_v16 = vadd.f32 %v4684_v59, %v4683_v41  ;;  %v4785_v26 = vrot.slane %v4784_v47, 4 }
 0x2bc   : > { %v4686_v55 = vrot.slane %v4685_v16, 2  ;;  %v4786_v22 = vadd.f32 %v4785_v26, %v4784_v47 }
 0x2be   : > { %v4687_v36 = vadd.f32 %v4686_v55, %v4685_v16  ;;  %v4787_v6 = vrot.slane %v4786_v22, 2 }
 0x2c0   : > { %v4688_v27 = vrot.slane %v4687_v36, 1  ;;  %v4788_v49 = vadd.f32 %v4787_v6, %v4786_v22 }
 0x2c2   : > { %v4789_v60 = vrot.slane %v4788_v49, 1  ;;  %v4689_v33 = vadd.f32 %v4688_v27, %v4687_v36 }
 0x2c4   : > { %v4790_v12 = vadd.f32 %v4789_v60, %v4788_v49 }
 0x2c6   : > { %v4791_v34 = vsel %vm446_vm2, %v4689_v33, %v4790_v12 }
 0x2c7   : > { %4793 = vst.msk [vmem:[%s238_s11] sm:$0x3] %vm4792_vm10, %v4791_v34 }
 0x2c8 PF: > { %s16_s18 = sadd.s32 1, %s5839_s18  }
 0x2c9   : > { %p13_p5 = scmp.ge.s32.totalorder %s16_s18, 4  }
 0x2cb   :  { %15 = sbr.rel (!%p13_p5) target bundleno = 1 (0x1), region = 82 }

</bundles_post_ra>
